<compile_context>
chip_gen: v7x
topology: tpu7x:2x2x1
jax: 0.10.0
libtpu: 0.0.40
codegen_flags: <defaults>
</compile_context>

<pallas_src>
import jax
import jax.numpy as jnp
from jax.experimental import pallas as pl
from jax.experimental.pallas import tpu as pltpu


# --------------------------------- small helpers ---------------------------------

def _round_up(n, m):
    return ((n + m - 1) // m) * m


def _pad_gate_cols(w, H, HP):
    """w: (..., 4H) with PyTorch gate order i,f,g,o -> (..., 4HP); gate k at [k*HP, k*HP+H)."""
    if HP == H:
        return w
    out = jnp.zeros(w.shape[:-1] + (4 * HP,), w.dtype)
    for k in range(4):
        out = out.at[..., k * HP:k * HP + H].set(w[..., k * H:(k + 1) * H])
    return out


def _pad_rows_per_dir(w, H, HP, ndir):
    """w: (ndir*H, cols) -> (ndir*HP, cols); direction block dd at rows [dd*HP, dd*HP+H)."""
    if HP == H:
        return w
    out = jnp.zeros((ndir * HP, w.shape[1]), w.dtype)
    for dd in range(ndir):
        out = out.at[dd * HP:dd * HP + H, :].set(w[dd * H:(dd + 1) * H, :])
    return out


def _full_spec(shape):
    nd = len(shape)
    return pl.BlockSpec(shape, lambda i, _nd=nd: (0,) * _nd)


# ------------------------------ fused whole-model kernel ------------------------------

def _make_fused_kernel(num_layers, ndir, T, BP, HP):
    """Kernel closure over static sizes.

    Refs (in order):
      x_ref:                (T*BP, Din0)
      per layer l:          w_ih_ref (Din_l, ndir*4*HP)  wide input->gates (both dirs)
                            w_hh_ref (ndir, HP, 4*HP)    hidden->gates
                            b_ref    (1, ndir*4*HP)      combined bias (b_ih + b_hh)
      w_out_ref:            (ndir*HP, CP)                head weights (lane-padded)
      b_out_ref:            (1, CP)
      out_ref:              (T*BP, CP)                   sigmoid(linear) output
      gx_scr:               (T*BP, ndir*4*HP) f32        hoisted projection (reused per layer)
      act_scr:              (T*BP, ndir*HP)   f32        layer activation slab (reused per layer)
    Gate order follows PyTorch: i, f, g, o.  Padded hidden columns stay exactly 0.
    """
    G = 4 * HP

    def kernel(*refs):
        w_out_ref = refs[1 + 3 * num_layers]
        b_out_ref = refs[2 + 3 * num_layers]
        out_ref = refs[3 + 3 * num_layers]
        gx_scr = refs[4 + 3 * num_layers]
        act_scr = refs[5 + 3 * num_layers]

        for l in range(num_layers):                       # static unroll over layers
            w_ih_ref = refs[1 + 3 * l]
            w_hh_ref = refs[2 + 3 * l]
            b_ref = refs[3 + 3 * l]

            # ---- Phase 1: wide hoisted input projection (one MXU matmul, both dirs) ----
            xin = refs[0][...] if l == 0 else act_scr[...]
            gx_scr[...] = (jnp.dot(xin, w_ih_ref[...],
                                   preferred_element_type=jnp.float32)
                           + b_ref[...])

            # ---- Phase 2: interleaved fwd/rev recurrence (states live in vregs) ----
            def step(s, carry, w_hh_ref=w_hh_ref):
                new = []
                for d in range(ndir):                      # static unroll: 2 indep chains
                    h = carry[2 * d]
                    c = carry[2 * d + 1]
                    t = s if d == 0 else (T - 1) - s       # reverse dir walks time backwards
                    row = pl.multiple_of(t * BP, BP)       # sublane-aligned (BP % 8 == 0)
                    gates = (gx_scr[pl.ds(row, BP), pl.ds(d * G, G)]
                             + jnp.dot(h, w_hh_ref[d],
                                       preferred_element_type=jnp.float32))
                    # HP is a multiple of 128 -> each gate slice is a full-lane slab.
                    i = jax.nn.sigmoid(gates[:, 0 * HP:1 * HP])
                    f = jax.nn.sigmoid(gates[:, 1 * HP:2 * HP])
                    g = jnp.tanh(gates[:, 2 * HP:3 * HP])
                    o = jax.nn.sigmoid(gates[:, 3 * HP:4 * HP])
                    c_new = f * c + i * g
                    h_new = o * jnp.tanh(c_new)
                    # Write this timestep's hidden state straight into the slab.
                    act_scr[pl.ds(row, BP), pl.ds(d * HP, HP)] = h_new
                    new += [h_new, c_new]
                return tuple(new)

            zero = jnp.zeros((BP, HP), jnp.float32)
            jax.lax.fori_loop(0, T, step, (zero,) * (2 * ndir),
                              unroll=min(T, 8))            # bounded unroll

        # ---- Head: Linear + Sigmoid, lane-dense (CP = multiple of 128) output ----
        y = (jnp.dot(act_scr[...], w_out_ref[...],
                     preferred_element_type=jnp.float32) + b_out_ref[...])
        out_ref[...] = jax.nn.sigmoid(y).astype(out_ref.dtype)

    return kernel


def _fused_bilstm_call(x2, layer_ws, w_out_p, b_out_p, T, BP):
    """x2: (T*BP, Din0); layer_ws: list of (w_ih_wide, w_hh_stacked, b_wide)."""
    num_layers = len(layer_ws)
    ndir, HP, G = layer_ws[0][1].shape
    CP = w_out_p.shape[1]

    inputs = [x2]
    in_specs = [_full_spec(x2.shape)]
    for (w_ih, w_hh, b) in layer_ws:
        inputs += [w_ih, w_hh, b]
        in_specs += [_full_spec(w_ih.shape), _full_spec(w_hh.shape), _full_spec(b.shape)]
    inputs += [w_out_p, b_out_p]
    in_specs += [_full_spec(w_out_p.shape), _full_spec(b_out_p.shape)]

    # Explicit VMEM budget: double-buffered inputs/outputs + scratch + margin.
    in_bytes = sum(int(a.size) * a.dtype.itemsize for a in inputs)
    scr_bytes = (T * BP) * (ndir * G + ndir * HP) * 4
    out_bytes = (T * BP) * CP * 4
    vmem_est = 2 * in_bytes + 2 * out_bytes + scr_bytes + (4 << 20)
    vmem_limit = int(min(max(vmem_est, 32 << 20), 64 << 20))

    kernel = _make_fused_kernel(num_layers, ndir, T, BP, HP)

    return pl.pallas_call(
        kernel,
        out_shape=jax.ShapeDtypeStruct((T * BP, CP), jnp.float32),
        grid_spec=pltpu.PrefetchScalarGridSpec(
            num_scalar_prefetch=0,
            grid=(1,),
            in_specs=in_specs,
            out_specs=pl.BlockSpec((T * BP, CP), lambda i: (0, 0)),
            scratch_shapes=[
                pltpu.VMEM((T * BP, ndir * G), jnp.float32),    # hoisted projection
                pltpu.VMEM((T * BP, ndir * HP), jnp.float32),   # activation slab
            ],
        ),
        compiler_params=pltpu.CompilerParams(
            dimension_semantics=("arbitrary",),
            vmem_limit_bytes=vmem_limit,
        ),
    )(*inputs)


# ----------------------------------- parameters -----------------------------------

def init_bilstm_params(key, input_size, hidden_size, num_layers, bidirectional,
                       num_classes=3):
    """PyTorch-style U(-1/sqrt(H), 1/sqrt(H)) init.

    Returns a pytree containing only arrays:
      "lstm"/"out": unpadded (transposed) weights, used by the pure-JAX reference.
      "fused":      lane/gate-padded weights consumed by the fused Pallas kernel.
    """
    ndir = 2 if bidirectional else 1
    H = hidden_size
    HP = _round_up(H, 128)          # lane-aligned hidden size
    C = num_classes
    CP = _round_up(C, 128)          # lane-dense head output
    bound = 1.0 / (H ** 0.5)

    lstm_raw = []
    for layer in range(num_layers):
        layer_in = input_size if layer == 0 else ndir * H
        w_ih_l, w_hh_l, b_l = [], [], []
        for _ in range(ndir):
            key, k1, k2, k3, k4 = jax.random.split(key, 5)
            w_ih = jax.random.uniform(k1, (4 * H, layer_in), jnp.float32, -bound, bound)
            w_hh = jax.random.uniform(k2, (4 * H, H), jnp.float32, -bound, bound)
            b_ih = jax.random.uniform(k3, (4 * H,), jnp.float32, -bound, bound)
            b_hh = jax.random.uniform(k4, (4 * H,), jnp.float32, -bound, bound)
            w_ih_l.append(w_ih.T)                   # (layer_in, 4H)
            w_hh_l.append(w_hh.T)                   # (H, 4H)
            b_l.append((b_ih + b_hh)[None, :])      # (1, 4H)
        lstm_raw.append((jnp.stack(w_ih_l, 0), jnp.stack(w_hh_l, 0), jnp.stack(b_l, 0)))

    key, k1, k2 = jax.random.split(key, 3)
    d_out = ndir * H
    bound_o = 1.0 / (d_out ** 0.5)
    w_out = jax.random.uniform(k1, (C, d_out), jnp.float32, -bound_o, bound_o)
    b_out = jax.random.uniform(k2, (C,), jnp.float32, -bound_o, bound_o)

    # ---- padded / fused weights (done once at init) ----
    fused_layers = []
    for layer, (w_ih_st, w_hh_st, b_st) in enumerate(lstm_raw):
        wide_cols, hh_stack, b_cols = [], [], []
        for d in range(ndir):
            wih = _pad_gate_cols(w_ih_st[d], H, HP)             # (layer_in, 4HP)
            if layer > 0:
                wih = _pad_rows_per_dir(wih, H, HP, ndir)       # (ndir*HP, 4HP)
            wide_cols.append(wih)
            whh = _pad_gate_cols(w_hh_st[d], H, HP)             # (H, 4HP)
            whh = jnp.zeros((HP, 4 * HP), jnp.float32).at[:H].set(whh)
            hh_stack.append(whh)
            b_cols.append(_pad_gate_cols(b_st[d], H, HP))       # (1, 4HP)
        fused_layers.append((jnp.concatenate(wide_cols, axis=1),   # (rows, ndir*4HP)
                             jnp.stack(hh_stack, 0),               # (ndir, HP, 4HP)
                             jnp.concatenate(b_cols, axis=1)))     # (1, ndir*4HP)

    w_out_t = w_out.T                                            # (ndir*H, C)
    w_out_p = _pad_rows_per_dir(w_out_t, H, HP, ndir)            # (ndir*HP, C)
    w_out_p = jnp.zeros((ndir * HP, CP), jnp.float32).at[:, :C].set(w_out_p)
    b_out_p = jnp.zeros((1, CP), jnp.float32).at[0, :C].set(b_out)

    return {"lstm": lstm_raw, "out": (w_out_t, b_out[None, :]),
            "fused": {"layers": fused_layers, "head": (w_out_p, b_out_p)}}


# ----------------------------------- full model -----------------------------------

@jax.jit
def bilstm_forward(x, params):
    """x: (T, B, input_size) -> (T, B, num_classes)."""
    T, B, Din0 = x.shape
    layer_ws = params["fused"]["layers"]
    w_out_p, b_out_p = params["fused"]["head"]
    CP = w_out_p.shape[1]
    C = params["out"][0].shape[1]
    BP = _round_up(B, 8)                              # sublane-aligned batch

    xp = x.astype(jnp.float32)
    if BP != B:
        xp = jnp.pad(xp, ((0, 0), (0, BP - B), (0, 0)))
    x2 = xp.reshape(T * BP, Din0)

    y2 = _fused_bilstm_call(x2, layer_ws, w_out_p, b_out_p, T, BP)
    return y2.reshape(T, BP, CP)[:, :B, :C]


# -------------------------------- pure-JAX reference --------------------------------

def _lstm_dir_ref(x, w_ih_t, w_hh_t, b):
    T, B, _ = x.shape
    H = w_hh_t.shape[0]

    def step(carry, x_t):
        h, c = carry
        gates = x_t @ w_ih_t + h @ w_hh_t + b
        i = jax.nn.sigmoid(gates[:, 0 * H:1 * H])
        f = jax.nn.sigmoid(gates[:, 1 * H:2 * H])
        g = jnp.tanh(gates[:, 2 * H:3 * H])
        o = jax.nn.sigmoid(gates[:, 3 * H:4 * H])
        c = f * c + i * g
        h = o * jnp.tanh(c)
        return (h, c), h

    init = (jnp.zeros((B, H), jnp.float32), jnp.zeros((B, H), jnp.float32))
    _, hs = jax.lax.scan(step, init, x)
    return hs


def bilstm_forward_ref(x, params):
    h_in = x
    for (w_ih_st, w_hh_st, b_st) in params["lstm"]:
        ndir = w_ih_st.shape[0]
        outs = []
        for d in range(ndir):
            xin = h_in if d == 0 else jnp.flip(h_in, axis=0)
            o = _lstm_dir_ref(xin, w_ih_st[d], w_hh_st[d], b_st[d])
            if d == 1:
                o = jnp.flip(o, axis=0)
            outs.append(o)
        h_in = jnp.concatenate(outs, axis=-1)
    T, B, D2 = h_in.shape
    w_out_t, b_out = params["out"]
    y = jax.nn.sigmoid(h_in.reshape(T * B, D2) @ w_out_t + b_out)
    return y.reshape(T, B, w_out_t.shape[1])


# ------------------------------------- main -------------------------------------

if __name__ == "__main__":
    # Small, LSTM-appropriate shapes: seq=8, batch=2, input_size=16, hidden=32,
    # num_layers=2, bidirectional=True, num_classes=3.
    T, B, INPUT_SIZE = 8, 2, 16
    HIDDEN, NUM_LAYERS, NUM_CLASSES = 32, 2, 3

    key = jax.random.PRNGKey(0)
    kx, kp = jax.random.split(key)
    x = jax.random.normal(kx, (T, B, INPUT_SIZE), dtype=jnp.float32)
    params = init_bilstm_params(kp, INPUT_SIZE, HIDDEN, NUM_LAYERS,
                                bidirectional=True, num_classes=NUM_CLASSES)

    out = bilstm_forward(x, params)
    jax.block_until_ready(out)
    assert out.shape == (T, B, NUM_CLASSES), out.shape

    ref = bilstm_forward_ref(x, params)
    assert jnp.allclose(out, ref, rtol=1e-4, atol=1e-4), (
        float(jnp.max(jnp.abs(out - ref))))

    print("KERNEL_OK")
</pallas_src>

<mosaic_0001>
module attributes {stable_mosaic.version = 11 : i64} {
  func.func @kernel(%arg0: i32, %arg1: memref<64x16xf32, #tpu.memory_space<vmem>>, %arg2: memref<16x1024xf32, #tpu.memory_space<vmem>>, %arg3: memref<2x128x512xf32, #tpu.memory_space<vmem>>, %arg4: memref<1x1024xf32, #tpu.memory_space<vmem>>, %arg5: memref<256x1024xf32, #tpu.memory_space<vmem>>, %arg6: memref<2x128x512xf32, #tpu.memory_space<vmem>>, %arg7: memref<1x1024xf32, #tpu.memory_space<vmem>>, %arg8: memref<256x128xf32, #tpu.memory_space<vmem>>, %arg9: memref<1x128xf32, #tpu.memory_space<vmem>>, %arg10: memref<64x128xf32, #tpu.memory_space<vmem>>, %arg11: memref<64x1024xf32, #tpu.memory_space<vmem>>, %arg12: memref<64x256xf32, #tpu.memory_space<vmem>>) attributes {dimension_semantics = [#tpu.dimension_semantics<arbitrary>], iteration_bounds = array<i64: 1>, scalar_prefetch = 0 : i64, scratch_operands = 2 : i64, tpu.core_type = #tpu.core_type<tc>, window_params = [{pipeline_mode = #tpu.pipeline_mode<synchronous>, transform_indices = @transform_0, window_bounds = array<i64: 64, 16>}, {pipeline_mode = #tpu.pipeline_mode<synchronous>, transform_indices = @transform_1, window_bounds = array<i64: 16, 1024>}, {pipeline_mode = #tpu.pipeline_mode<synchronous>, transform_indices = @transform_2, window_bounds = array<i64: 2, 128, 512>}, {pipeline_mode = #tpu.pipeline_mode<synchronous>, transform_indices = @transform_3, window_bounds = array<i64: 1, 1024>}, {pipeline_mode = #tpu.pipeline_mode<synchronous>, transform_indices = @transform_4, window_bounds = array<i64: 256, 1024>}, {pipeline_mode = #tpu.pipeline_mode<synchronous>, transform_indices = @transform_5, window_bounds = array<i64: 2, 128, 512>}, {pipeline_mode = #tpu.pipeline_mode<synchronous>, transform_indices = @transform_6, window_bounds = array<i64: 1, 1024>}, {pipeline_mode = #tpu.pipeline_mode<synchronous>, transform_indices = @transform_7, window_bounds = array<i64: 256, 128>}, {pipeline_mode = #tpu.pipeline_mode<synchronous>, transform_indices = @transform_8, window_bounds = array<i64: 1, 128>}, {pipeline_mode = #tpu.pipeline_mode<synchronous>, transform_indices = @transform_9, window_bounds = array<i64: 64, 128>}]} {
    %c0 = arith.constant 0 : index
    %c0_0 = arith.constant 0 : index
    %0 = vector.load %arg1[%c0, %c0_0] : memref<64x16xf32, #tpu.memory_space<vmem>>, vector<64x16xf32>
    %c0_1 = arith.constant 0 : index
    %c0_2 = arith.constant 0 : index
    %1 = vector.load %arg2[%c0_1, %c0_2] : memref<16x1024xf32, #tpu.memory_space<vmem>>, vector<16x1024xf32>
    %cst = arith.constant dense<0.000000e+00> : vector<64x1024xf32>
    %2 = tpu.matmul %0, %1, %cst {dimension_numbers = #tpu.dot_dimension_numbers<[1], [0], [0], [1], [0, 0, 1, 1], [], []>} : vector<64x16xf32>, vector<16x1024xf32>, vector<64x1024xf32> -> vector<64x1024xf32>
    %c0_3 = arith.constant 0 : index
    %c0_4 = arith.constant 0 : index
    %3 = vector.load %arg4[%c0_3, %c0_4] : memref<1x1024xf32, #tpu.memory_space<vmem>>, vector<1x1024xf32>
    %4 = vector.broadcast %3 : vector<1x1024xf32> to vector<64x1024xf32>
    %5 = arith.addf %2, %4 : vector<64x1024xf32>
    %c0_5 = arith.constant 0 : index
    %c0_6 = arith.constant 0 : index
    %6 = vector.load %arg11[%c0_5, %c0_6] : memref<64x1024xf32, #tpu.memory_space<vmem>>, vector<64x1024xf32>
    tpu.vector_store %arg11[%c0_5, %c0_6], %5 {strides = array<i32>} : memref<64x1024xf32, #tpu.memory_space<vmem>>, vector<64x1024xf32>,
    %cst_7 = arith.constant 0.000000e+00 : f32
    %7 = vector.broadcast %cst_7 : f32 to vector<8x128xf32>
    %c0_i32 = arith.constant 0 : i32
    %c8_i32 = arith.constant 8 : i32
    %8 = arith.muli %c0_i32, %c8_i32 : i32
    %9 = tpu.assume_multiple %8, 8 : i32
    %10 = arith.index_cast %9 : i32 to index
    %c0_8 = arith.constant 0 : index
    %11 = vector.load %arg11[%10, %c0_8] : memref<64x1024xf32, #tpu.memory_space<vmem>>, vector<8x512xf32>
    %c0_9 = arith.constant 0 : index
    %c0_10 = arith.constant 0 : index
    %c0_11 = arith.constant 0 : index
    %12 = vector.load %arg3[%c0_9, %c0_10, %c0_11] : memref<2x128x512xf32, #tpu.memory_space<vmem>>, vector<1x128x512xf32>
    %13 = vector.shape_cast %12 : vector<1x128x512xf32> to vector<128x512xf32>
    %cst_12 = arith.constant dense<0.000000e+00> : vector<8x512xf32>
    %14 = tpu.matmul %7, %13, %cst_12 {dimension_numbers = #tpu.dot_dimension_numbers<[1], [0], [0], [1], [0, 0, 1, 1], [], []>} : vector<8x128xf32>, vector<128x512xf32>, vector<8x512xf32> -> vector<8x512xf32>
    %15 = arith.addf %11, %14 : vector<8x512xf32>
    %16 = vector.extract_strided_slice %15 {offsets = [0, 0], sizes = [8, 128], strides = [1, 1]} : vector<8x512xf32> to vector<8x128xf32>
    %17 = arith.negf %16 : vector<8x128xf32>
    %18 = math.exp %17 : vector<8x128xf32>
    %cst_13 = arith.constant 1.000000e+00 : f32
    %19 = vector.broadcast %cst_13 : f32 to vector<8x128xf32>
    %20 = arith.addf %19, %18 : vector<8x128xf32>
    %21 = arith.divf %19, %20 : vector<8x128xf32>
    %22 = vector.extract_strided_slice %15 {offsets = [0, 128], sizes = [8, 128], strides = [1, 1]} : vector<8x512xf32> to vector<8x128xf32>
    %23 = arith.negf %22 : vector<8x128xf32>
    %24 = math.exp %23 : vector<8x128xf32>
    %cst_14 = arith.constant 1.000000e+00 : f32
    %25 = vector.broadcast %cst_14 : f32 to vector<8x128xf32>
    %26 = arith.addf %25, %24 : vector<8x128xf32>
    %27 = arith.divf %25, %26 : vector<8x128xf32>
    %28 = vector.extract_strided_slice %15 {offsets = [0, 256], sizes = [8, 128], strides = [1, 1]} : vector<8x512xf32> to vector<8x128xf32>
    %29 = math.tanh %28 : vector<8x128xf32>
    %30 = vector.extract_strided_slice %15 {offsets = [0, 384], sizes = [8, 128], strides = [1, 1]} : vector<8x512xf32> to vector<8x128xf32>
    %31 = arith.negf %30 : vector<8x128xf32>
    %32 = math.exp %31 : vector<8x128xf32>
    %cst_15 = arith.constant 1.000000e+00 : f32
    %33 = vector.broadcast %cst_15 : f32 to vector<8x128xf32>
    %34 = arith.addf %33, %32 : vector<8x128xf32>
    %35 = arith.divf %33, %34 : vector<8x128xf32>
    %36 = arith.mulf %27, %7 : vector<8x128xf32>
    %37 = arith.mulf %21, %29 : vector<8x128xf32>
    %38 = arith.addf %36, %37 : vector<8x128xf32>
    %39 = math.tanh %38 : vector<8x128xf32>
    %40 = arith.mulf %35, %39 : vector<8x128xf32>
    %41 = arith.index_cast %9 : i32 to index
    %c0_16 = arith.constant 0 : index
    %42 = vector.load %arg12[%41, %c0_16] : memref<64x256xf32, #tpu.memory_space<vmem>>, vector<8x128xf32>
    tpu.vector_store %arg12[%41, %c0_16], %40 {strides = array<i32>} : memref<64x256xf32, #tpu.memory_space<vmem>>, vector<8x128xf32>,
    %c7_i32 = arith.constant 7 : i32
    %43 = arith.subi %c7_i32, %c0_i32 : i32
    %c8_i32_17 = arith.constant 8 : i32
    %44 = arith.muli %43, %c8_i32_17 : i32
    %45 = tpu.assume_multiple %44, 8 : i32
    %46 = arith.index_cast %45 : i32 to index
    %c512 = arith.constant 512 : index
    %47 = vector.load %arg11[%46, %c512] : memref<64x1024xf32, #tpu.memory_space<vmem>>, vector<8x512xf32>
    %c1 = arith.constant 1 : index
    %c0_18 = arith.constant 0 : index
    %c0_19 = arith.constant 0 : index
    %48 = vector.load %arg3[%c1, %c0_18, %c0_19] : memref<2x128x512xf32, #tpu.memory_space<vmem>>, vector<1x128x512xf32>
    %49 = vector.shape_cast %48 : vector<1x128x512xf32> to vector<128x512xf32>
    %cst_20 = arith.constant dense<0.000000e+00> : vector<8x512xf32>
    %50 = tpu.matmul %7, %49, %cst_20 {dimension_numbers = #tpu.dot_dimension_numbers<[1], [0], [0], [1], [0, 0, 1, 1], [], []>} : vector<8x128xf32>, vector<128x512xf32>, vector<8x512xf32> -> vector<8x512xf32>
    %51 = arith.addf %47, %50 : vector<8x512xf32>
    %52 = vector.extract_strided_slice %51 {offsets = [0, 0], sizes = [8, 128], strides = [1, 1]} : vector<8x512xf32> to vector<8x128xf32>
    %53 = arith.negf %52 : vector<8x128xf32>
    %54 = math.exp %53 : vector<8x128xf32>
    %cst_21 = arith.constant 1.000000e+00 : f32
    %55 = vector.broadcast %cst_21 : f32 to vector<8x128xf32>
    %56 = arith.addf %55, %54 : vector<8x128xf32>
    %57 = arith.divf %55, %56 : vector<8x128xf32>
    %58 = vector.extract_strided_slice %51 {offsets = [0, 128], sizes = [8, 128], strides = [1, 1]} : vector<8x512xf32> to vector<8x128xf32>
    %59 = arith.negf %58 : vector<8x128xf32>
    %60 = math.exp %59 : vector<8x128xf32>
    %cst_22 = arith.constant 1.000000e+00 : f32
    %61 = vector.broadcast %cst_22 : f32 to vector<8x128xf32>
    %62 = arith.addf %61, %60 : vector<8x128xf32>
    %63 = arith.divf %61, %62 : vector<8x128xf32>
    %64 = vector.extract_strided_slice %51 {offsets = [0, 256], sizes = [8, 128], strides = [1, 1]} : vector<8x512xf32> to vector<8x128xf32>
    %65 = math.tanh %64 : vector<8x128xf32>
    %66 = vector.extract_strided_slice %51 {offsets = [0, 384], sizes = [8, 128], strides = [1, 1]} : vector<8x512xf32> to vector<8x128xf32>
    %67 = arith.negf %66 : vector<8x128xf32>
    %68 = math.exp %67 : vector<8x128xf32>
    %cst_23 = arith.constant 1.000000e+00 : f32
    %69 = vector.broadcast %cst_23 : f32 to vector<8x128xf32>
    %70 = arith.addf %69, %68 : vector<8x128xf32>
    %71 = arith.divf %69, %70 : vector<8x128xf32>
    %72 = arith.mulf %63, %7 : vector<8x128xf32>
    %73 = arith.mulf %57, %65 : vector<8x128xf32>
    %74 = arith.addf %72, %73 : vector<8x128xf32>
    %75 = math.tanh %74 : vector<8x128xf32>
    %76 = arith.mulf %71, %75 : vector<8x128xf32>
    %77 = arith.index_cast %45 : i32 to index
    %c128 = arith.constant 128 : index
    %78 = vector.load %arg12[%77, %c128] : memref<64x256xf32, #tpu.memory_space<vmem>>, vector<8x128xf32>
    tpu.vector_store %arg12[%77, %c128], %76 {strides = array<i32>} : memref<64x256xf32, #tpu.memory_space<vmem>>, vector<8x128xf32>,
    %c1_i32 = arith.constant 1 : i32
    %c8_i32_24 = arith.constant 8 : i32
    %79 = arith.muli %c1_i32, %c8_i32_24 : i32
    %80 = tpu.assume_multiple %79, 8 : i32
    %81 = arith.index_cast %80 : i32 to index
    %c0_25 = arith.constant 0 : index
    %82 = vector.load %arg11[%81, %c0_25] : memref<64x1024xf32, #tpu.memory_space<vmem>>, vector<8x512xf32>
    %c0_26 = arith.constant 0 : index
    %c0_27 = arith.constant 0 : index
    %c0_28 = arith.constant 0 : index
    %83 = vector.load %arg3[%c0_26, %c0_27, %c0_28] : memref<2x128x512xf32, #tpu.memory_space<vmem>>, vector<1x128x512xf32>
    %84 = vector.shape_cast %83 : vector<1x128x512xf32> to vector<128x512xf32>
    %cst_29 = arith.constant dense<0.000000e+00> : vector<8x512xf32>
    %85 = tpu.matmul %40, %84, %cst_29 {dimension_numbers = #tpu.dot_dimension_numbers<[1], [0], [0], [1], [0, 0, 1, 1], [], []>} : vector<8x128xf32>, vector<128x512xf32>, vector<8x512xf32> -> vector<8x512xf32>
    %86 = arith.addf %82, %85 : vector<8x512xf32>
    %87 = vector.extract_strided_slice %86 {offsets = [0, 0], sizes = [8, 128], strides = [1, 1]} : vector<8x512xf32> to vector<8x128xf32>
    %88 = arith.negf %87 : vector<8x128xf32>
    %89 = math.exp %88 : vector<8x128xf32>
    %cst_30 = arith.constant 1.000000e+00 : f32
    %90 = vector.broadcast %cst_30 : f32 to vector<8x128xf32>
    %91 = arith.addf %90, %89 : vector<8x128xf32>
    %92 = arith.divf %90, %91 : vector<8x128xf32>
    %93 = vector.extract_strided_slice %86 {offsets = [0, 128], sizes = [8, 128], strides = [1, 1]} : vector<8x512xf32> to vector<8x128xf32>
    %94 = arith.negf %93 : vector<8x128xf32>
    %95 = math.exp %94 : vector<8x128xf32>
    %cst_31 = arith.constant 1.000000e+00 : f32
    %96 = vector.broadcast %cst_31 : f32 to vector<8x128xf32>
    %97 = arith.addf %96, %95 : vector<8x128xf32>
    %98 = arith.divf %96, %97 : vector<8x128xf32>
    %99 = vector.extract_strided_slice %86 {offsets = [0, 256], sizes = [8, 128], strides = [1, 1]} : vector<8x512xf32> to vector<8x128xf32>
    %100 = math.tanh %99 : vector<8x128xf32>
    %101 = vector.extract_strided_slice %86 {offsets = [0, 384], sizes = [8, 128], strides = [1, 1]} : vector<8x512xf32> to vector<8x128xf32>
    %102 = arith.negf %101 : vector<8x128xf32>
    %103 = math.exp %102 : vector<8x128xf32>
    %cst_32 = arith.constant 1.000000e+00 : f32
    %104 = vector.broadcast %cst_32 : f32 to vector<8x128xf32>
    %105 = arith.addf %104, %103 : vector<8x128xf32>
    %106 = arith.divf %104, %105 : vector<8x128xf32>
    %107 = arith.mulf %98, %38 : vector<8x128xf32>
    %108 = arith.mulf %92, %100 : vector<8x128xf32>
    %109 = arith.addf %107, %108 : vector<8x128xf32>
    %110 = math.tanh %109 : vector<8x128xf32>
    %111 = arith.mulf %106, %110 : vector<8x128xf32>
    %112 = arith.index_cast %80 : i32 to index
    %c0_33 = arith.constant 0 : index
    %113 = vector.load %arg12[%112, %c0_33] : memref<64x256xf32, #tpu.memory_space<vmem>>, vector<8x128xf32>
    tpu.vector_store %arg12[%112, %c0_33], %111 {strides = array<i32>} : memref<64x256xf32, #tpu.memory_space<vmem>>, vector<8x128xf32>,
    %c7_i32_34 = arith.constant 7 : i32
    %114 = arith.subi %c7_i32_34, %c1_i32 : i32
    %c8_i32_35 = arith.constant 8 : i32
    %115 = arith.muli %114, %c8_i32_35 : i32
    %116 = tpu.assume_multiple %115, 8 : i32
    %117 = arith.index_cast %116 : i32 to index
    %c512_36 = arith.constant 512 : index
    %118 = vector.load %arg11[%117, %c512_36] : memref<64x1024xf32, #tpu.memory_space<vmem>>, vector<8x512xf32>
    %c1_37 = arith.constant 1 : index
    %c0_38 = arith.constant 0 : index
    %c0_39 = arith.constant 0 : index
    %119 = vector.load %arg3[%c1_37, %c0_38, %c0_39] : memref<2x128x512xf32, #tpu.memory_space<vmem>>, vector<1x128x512xf32>
    %120 = vector.shape_cast %119 : vector<1x128x512xf32> to vector<128x512xf32>
    %cst_40 = arith.constant dense<0.000000e+00> : vector<8x512xf32>
    %121 = tpu.matmul %76, %120, %cst_40 {dimension_numbers = #tpu.dot_dimension_numbers<[1], [0], [0], [1], [0, 0, 1, 1], [], []>} : vector<8x128xf32>, vector<128x512xf32>, vector<8x512xf32> -> vector<8x512xf32>
    %122 = arith.addf %118, %121 : vector<8x512xf32>
    %123 = vector.extract_strided_slice %122 {offsets = [0, 0], sizes = [8, 128], strides = [1, 1]} : vector<8x512xf32> to vector<8x128xf32>
    %124 = arith.negf %123 : vector<8x128xf32>
    %125 = math.exp %124 : vector<8x128xf32>
    %cst_41 = arith.constant 1.000000e+00 : f32
    %126 = vector.broadcast %cst_41 : f32 to vector<8x128xf32>
    %127 = arith.addf %126, %125 : vector<8x128xf32>
    %128 = arith.divf %126, %127 : vector<8x128xf32>
    %129 = vector.extract_strided_slice %122 {offsets = [0, 128], sizes = [8, 128], strides = [1, 1]} : vector<8x512xf32> to vector<8x128xf32>
    %130 = arith.negf %129 : vector<8x128xf32>
    %131 = math.exp %130 : vector<8x128xf32>
    %cst_42 = arith.constant 1.000000e+00 : f32
    %132 = vector.broadcast %cst_42 : f32 to vector<8x128xf32>
    %133 = arith.addf %132, %131 : vector<8x128xf32>
    %134 = arith.divf %132, %133 : vector<8x128xf32>
    %135 = vector.extract_strided_slice %122 {offsets = [0, 256], sizes = [8, 128], strides = [1, 1]} : vector<8x512xf32> to vector<8x128xf32>
    %136 = math.tanh %135 : vector<8x128xf32>
    %137 = vector.extract_strided_slice %122 {offsets = [0, 384], sizes = [8, 128], strides = [1, 1]} : vector<8x512xf32> to vector<8x128xf32>
    %138 = arith.negf %137 : vector<8x128xf32>
    %139 = math.exp %138 : vector<8x128xf32>
    %cst_43 = arith.constant 1.000000e+00 : f32
    %140 = vector.broadcast %cst_43 : f32 to vector<8x128xf32>
    %141 = arith.addf %140, %139 : vector<8x128xf32>
    %142 = arith.divf %140, %141 : vector<8x128xf32>
    %143 = arith.mulf %134, %74 : vector<8x128xf32>
    %144 = arith.mulf %128, %136 : vector<8x128xf32>
    %145 = arith.addf %143, %144 : vector<8x128xf32>
    %146 = math.tanh %145 : vector<8x128xf32>
    %147 = arith.mulf %142, %146 : vector<8x128xf32>
    %148 = arith.index_cast %116 : i32 to index
    %c128_44 = arith.constant 128 : index
    %149 = vector.load %arg12[%148, %c128_44] : memref<64x256xf32, #tpu.memory_space<vmem>>, vector<8x128xf32>
    tpu.vector_store %arg12[%148, %c128_44], %147 {strides = array<i32>} : memref<64x256xf32, #tpu.memory_space<vmem>>, vector<8x128xf32>,
    %c2_i32 = arith.constant 2 : i32
    %c8_i32_45 = arith.constant 8 : i32
    %150 = arith.muli %c2_i32, %c8_i32_45 : i32
    %151 = tpu.assume_multiple %150, 8 : i32
    %152 = arith.index_cast %151 : i32 to index
    %c0_46 = arith.constant 0 : index
    %153 = vector.load %arg11[%152, %c0_46] : memref<64x1024xf32, #tpu.memory_space<vmem>>, vector<8x512xf32>
    %c0_47 = arith.constant 0 : index
    %c0_48 = arith.constant 0 : index
    %c0_49 = arith.constant 0 : index
    %154 = vector.load %arg3[%c0_47, %c0_48, %c0_49] : memref<2x128x512xf32, #tpu.memory_space<vmem>>, vector<1x128x512xf32>
    %155 = vector.shape_cast %154 : vector<1x128x512xf32> to vector<128x512xf32>
    %cst_50 = arith.constant dense<0.000000e+00> : vector<8x512xf32>
    %156 = tpu.matmul %111, %155, %cst_50 {dimension_numbers = #tpu.dot_dimension_numbers<[1], [0], [0], [1], [0, 0, 1, 1], [], []>} : vector<8x128xf32>, vector<128x512xf32>, vector<8x512xf32> -> vector<8x512xf32>
    %157 = arith.addf %153, %156 : vector<8x512xf32>
    %158 = vector.extract_strided_slice %157 {offsets = [0, 0], sizes = [8, 128], strides = [1, 1]} : vector<8x512xf32> to vector<8x128xf32>
    %159 = arith.negf %158 : vector<8x128xf32>
    %160 = math.exp %159 : vector<8x128xf32>
    %cst_51 = arith.constant 1.000000e+00 : f32
    %161 = vector.broadcast %cst_51 : f32 to vector<8x128xf32>
    %162 = arith.addf %161, %160 : vector<8x128xf32>
    %163 = arith.divf %161, %162 : vector<8x128xf32>
    %164 = vector.extract_strided_slice %157 {offsets = [0, 128], sizes = [8, 128], strides = [1, 1]} : vector<8x512xf32> to vector<8x128xf32>
    %165 = arith.negf %164 : vector<8x128xf32>
    %166 = math.exp %165 : vector<8x128xf32>
    %cst_52 = arith.constant 1.000000e+00 : f32
    %167 = vector.broadcast %cst_52 : f32 to vector<8x128xf32>
    %168 = arith.addf %167, %166 : vector<8x128xf32>
    %169 = arith.divf %167, %168 : vector<8x128xf32>
    %170 = vector.extract_strided_slice %157 {offsets = [0, 256], sizes = [8, 128], strides = [1, 1]} : vector<8x512xf32> to vector<8x128xf32>
    %171 = math.tanh %170 : vector<8x128xf32>
    %172 = vector.extract_strided_slice %157 {offsets = [0, 384], sizes = [8, 128], strides = [1, 1]} : vector<8x512xf32> to vector<8x128xf32>
    %173 = arith.negf %172 : vector<8x128xf32>
    %174 = math.exp %173 : vector<8x128xf32>
    %cst_53 = arith.constant 1.000000e+00 : f32
    %175 = vector.broadcast %cst_53 : f32 to vector<8x128xf32>
    %176 = arith.addf %175, %174 : vector<8x128xf32>
    %177 = arith.divf %175, %176 : vector<8x128xf32>
    %178 = arith.mulf %169, %109 : vector<8x128xf32>
    %179 = arith.mulf %163, %171 : vector<8x128xf32>
    %180 = arith.addf %178, %179 : vector<8x128xf32>
    %181 = math.tanh %180 : vector<8x128xf32>
    %182 = arith.mulf %177, %181 : vector<8x128xf32>
    %183 = arith.index_cast %151 : i32 to index
    %c0_54 = arith.constant 0 : index
    %184 = vector.load %arg12[%183, %c0_54] : memref<64x256xf32, #tpu.memory_space<vmem>>, vector<8x128xf32>
    tpu.vector_store %arg12[%183, %c0_54], %182 {strides = array<i32>} : memref<64x256xf32, #tpu.memory_space<vmem>>, vector<8x128xf32>,
    %c7_i32_55 = arith.constant 7 : i32
    %185 = arith.subi %c7_i32_55, %c2_i32 : i32
    %c8_i32_56 = arith.constant 8 : i32
    %186 = arith.muli %185, %c8_i32_56 : i32
    %187 = tpu.assume_multiple %186, 8 : i32
    %188 = arith.index_cast %187 : i32 to index
    %c512_57 = arith.constant 512 : index
    %189 = vector.load %arg11[%188, %c512_57] : memref<64x1024xf32, #tpu.memory_space<vmem>>, vector<8x512xf32>
    %c1_58 = arith.constant 1 : index
    %c0_59 = arith.constant 0 : index
    %c0_60 = arith.constant 0 : index
    %190 = vector.load %arg3[%c1_58, %c0_59, %c0_60] : memref<2x128x512xf32, #tpu.memory_space<vmem>>, vector<1x128x512xf32>
    %191 = vector.shape_cast %190 : vector<1x128x512xf32> to vector<128x512xf32>
    %cst_61 = arith.constant dense<0.000000e+00> : vector<8x512xf32>
    %192 = tpu.matmul %147, %191, %cst_61 {dimension_numbers = #tpu.dot_dimension_numbers<[1], [0], [0], [1], [0, 0, 1, 1], [], []>} : vector<8x128xf32>, vector<128x512xf32>, vector<8x512xf32> -> vector<8x512xf32>
    %193 = arith.addf %189, %192 : vector<8x512xf32>
    %194 = vector.extract_strided_slice %193 {offsets = [0, 0], sizes = [8, 128], strides = [1, 1]} : vector<8x512xf32> to vector<8x128xf32>
    %195 = arith.negf %194 : vector<8x128xf32>
    %196 = math.exp %195 : vector<8x128xf32>
    %cst_62 = arith.constant 1.000000e+00 : f32
    %197 = vector.broadcast %cst_62 : f32 to vector<8x128xf32>
    %198 = arith.addf %197, %196 : vector<8x128xf32>
    %199 = arith.divf %197, %198 : vector<8x128xf32>
    %200 = vector.extract_strided_slice %193 {offsets = [0, 128], sizes = [8, 128], strides = [1, 1]} : vector<8x512xf32> to vector<8x128xf32>
    %201 = arith.negf %200 : vector<8x128xf32>
    %202 = math.exp %201 : vector<8x128xf32>
    %cst_63 = arith.constant 1.000000e+00 : f32
    %203 = vector.broadcast %cst_63 : f32 to vector<8x128xf32>
    %204 = arith.addf %203, %202 : vector<8x128xf32>
    %205 = arith.divf %203, %204 : vector<8x128xf32>
    %206 = vector.extract_strided_slice %193 {offsets = [0, 256], sizes = [8, 128], strides = [1, 1]} : vector<8x512xf32> to vector<8x128xf32>
    %207 = math.tanh %206 : vector<8x128xf32>
    %208 = vector.extract_strided_slice %193 {offsets = [0, 384], sizes = [8, 128], strides = [1, 1]} : vector<8x512xf32> to vector<8x128xf32>
    %209 = arith.negf %208 : vector<8x128xf32>
    %210 = math.exp %209 : vector<8x128xf32>
    %cst_64 = arith.constant 1.000000e+00 : f32
    %211 = vector.broadcast %cst_64 : f32 to vector<8x128xf32>
    %212 = arith.addf %211, %210 : vector<8x128xf32>
    %213 = arith.divf %211, %212 : vector<8x128xf32>
    %214 = arith.mulf %205, %145 : vector<8x128xf32>
    %215 = arith.mulf %199, %207 : vector<8x128xf32>
    %216 = arith.addf %214, %215 : vector<8x128xf32>
    %217 = math.tanh %216 : vector<8x128xf32>
    %218 = arith.mulf %213, %217 : vector<8x128xf32>
    %219 = arith.index_cast %187 : i32 to index
    %c128_65 = arith.constant 128 : index
    %220 = vector.load %arg12[%219, %c128_65] : memref<64x256xf32, #tpu.memory_space<vmem>>, vector<8x128xf32>
    tpu.vector_store %arg12[%219, %c128_65], %218 {strides = array<i32>} : memref<64x256xf32, #tpu.memory_space<vmem>>, vector<8x128xf32>,
    %c3_i32 = arith.constant 3 : i32
    %c8_i32_66 = arith.constant 8 : i32
    %221 = arith.muli %c3_i32, %c8_i32_66 : i32
    %222 = tpu.assume_multiple %221, 8 : i32
    %223 = arith.index_cast %222 : i32 to index
    %c0_67 = arith.constant 0 : index
    %224 = vector.load %arg11[%223, %c0_67] : memref<64x1024xf32, #tpu.memory_space<vmem>>, vector<8x512xf32>
    %c0_68 = arith.constant 0 : index
    %c0_69 = arith.constant 0 : index
    %c0_70 = arith.constant 0 : index
    %225 = vector.load %arg3[%c0_68, %c0_69, %c0_70] : memref<2x128x512xf32, #tpu.memory_space<vmem>>, vector<1x128x512xf32>
    %226 = vector.shape_cast %225 : vector<1x128x512xf32> to vector<128x512xf32>
    %cst_71 = arith.constant dense<0.000000e+00> : vector<8x512xf32>
    %227 = tpu.matmul %182, %226, %cst_71 {dimension_numbers = #tpu.dot_dimension_numbers<[1], [0], [0], [1], [0, 0, 1, 1], [], []>} : vector<8x128xf32>, vector<128x512xf32>, vector<8x512xf32> -> vector<8x512xf32>
    %228 = arith.addf %224, %227 : vector<8x512xf32>
    %229 = vector.extract_strided_slice %228 {offsets = [0, 0], sizes = [8, 128], strides = [1, 1]} : vector<8x512xf32> to vector<8x128xf32>
    %230 = arith.negf %229 : vector<8x128xf32>
    %231 = math.exp %230 : vector<8x128xf32>
    %cst_72 = arith.constant 1.000000e+00 : f32
    %232 = vector.broadcast %cst_72 : f32 to vector<8x128xf32>
    %233 = arith.addf %232, %231 : vector<8x128xf32>
    %234 = arith.divf %232, %233 : vector<8x128xf32>
    %235 = vector.extract_strided_slice %228 {offsets = [0, 128], sizes = [8, 128], strides = [1, 1]} : vector<8x512xf32> to vector<8x128xf32>
    %236 = arith.negf %235 : vector<8x128xf32>
    %237 = math.exp %236 : vector<8x128xf32>
    %cst_73 = arith.constant 1.000000e+00 : f32
    %238 = vector.broadcast %cst_73 : f32 to vector<8x128xf32>
    %239 = arith.addf %238, %237 : vector<8x128xf32>
    %240 = arith.divf %238, %239 : vector<8x128xf32>
    %241 = vector.extract_strided_slice %228 {offsets = [0, 256], sizes = [8, 128], strides = [1, 1]} : vector<8x512xf32> to vector<8x128xf32>
    %242 = math.tanh %241 : vector<8x128xf32>
    %243 = vector.extract_strided_slice %228 {offsets = [0, 384], sizes = [8, 128], strides = [1, 1]} : vector<8x512xf32> to vector<8x128xf32>
    %244 = arith.negf %243 : vector<8x128xf32>
    %245 = math.exp %244 : vector<8x128xf32>
    %cst_74 = arith.constant 1.000000e+00 : f32
    %246 = vector.broadcast %cst_74 : f32 to vector<8x128xf32>
    %247 = arith.addf %246, %245 : vector<8x128xf32>
    %248 = arith.divf %246, %247 : vector<8x128xf32>
    %249 = arith.mulf %240, %180 : vector<8x128xf32>
    %250 = arith.mulf %234, %242 : vector<8x128xf32>
    %251 = arith.addf %249, %250 : vector<8x128xf32>
    %252 = math.tanh %251 : vector<8x128xf32>
    %253 = arith.mulf %248, %252 : vector<8x128xf32>
    %254 = arith.index_cast %222 : i32 to index
    %c0_75 = arith.constant 0 : index
    %255 = vector.load %arg12[%254, %c0_75] : memref<64x256xf32, #tpu.memory_space<vmem>>, vector<8x128xf32>
    tpu.vector_store %arg12[%254, %c0_75], %253 {strides = array<i32>} : memref<64x256xf32, #tpu.memory_space<vmem>>, vector<8x128xf32>,
    %c7_i32_76 = arith.constant 7 : i32
    %256 = arith.subi %c7_i32_76, %c3_i32 : i32
    %c8_i32_77 = arith.constant 8 : i32
    %257 = arith.muli %256, %c8_i32_77 : i32
    %258 = tpu.assume_multiple %257, 8 : i32
    %259 = arith.index_cast %258 : i32 to index
    %c512_78 = arith.constant 512 : index
    %260 = vector.load %arg11[%259, %c512_78] : memref<64x1024xf32, #tpu.memory_space<vmem>>, vector<8x512xf32>
    %c1_79 = arith.constant 1 : index
    %c0_80 = arith.constant 0 : index
    %c0_81 = arith.constant 0 : index
    %261 = vector.load %arg3[%c1_79, %c0_80, %c0_81] : memref<2x128x512xf32, #tpu.memory_space<vmem>>, vector<1x128x512xf32>
    %262 = vector.shape_cast %261 : vector<1x128x512xf32> to vector<128x512xf32>
    %cst_82 = arith.constant dense<0.000000e+00> : vector<8x512xf32>
    %263 = tpu.matmul %218, %262, %cst_82 {dimension_numbers = #tpu.dot_dimension_numbers<[1], [0], [0], [1], [0, 0, 1, 1], [], []>} : vector<8x128xf32>, vector<128x512xf32>, vector<8x512xf32> -> vector<8x512xf32>
    %264 = arith.addf %260, %263 : vector<8x512xf32>
    %265 = vector.extract_strided_slice %264 {offsets = [0, 0], sizes = [8, 128], strides = [1, 1]} : vector<8x512xf32> to vector<8x128xf32>
    %266 = arith.negf %265 : vector<8x128xf32>
    %267 = math.exp %266 : vector<8x128xf32>
    %cst_83 = arith.constant 1.000000e+00 : f32
    %268 = vector.broadcast %cst_83 : f32 to vector<8x128xf32>
    %269 = arith.addf %268, %267 : vector<8x128xf32>
    %270 = arith.divf %268, %269 : vector<8x128xf32>
    %271 = vector.extract_strided_slice %264 {offsets = [0, 128], sizes = [8, 128], strides = [1, 1]} : vector<8x512xf32> to vector<8x128xf32>
    %272 = arith.negf %271 : vector<8x128xf32>
    %273 = math.exp %272 : vector<8x128xf32>
    %cst_84 = arith.constant 1.000000e+00 : f32
    %274 = vector.broadcast %cst_84 : f32 to vector<8x128xf32>
    %275 = arith.addf %274, %273 : vector<8x128xf32>
    %276 = arith.divf %274, %275 : vector<8x128xf32>
    %277 = vector.extract_strided_slice %264 {offsets = [0, 256], sizes = [8, 128], strides = [1, 1]} : vector<8x512xf32> to vector<8x128xf32>
    %278 = math.tanh %277 : vector<8x128xf32>
    %279 = vector.extract_strided_slice %264 {offsets = [0, 384], sizes = [8, 128], strides = [1, 1]} : vector<8x512xf32> to vector<8x128xf32>
    %280 = arith.negf %279 : vector<8x128xf32>
    %281 = math.exp %280 : vector<8x128xf32>
    %cst_85 = arith.constant 1.000000e+00 : f32
    %282 = vector.broadcast %cst_85 : f32 to vector<8x128xf32>
    %283 = arith.addf %282, %281 : vector<8x128xf32>
    %284 = arith.divf %282, %283 : vector<8x128xf32>
    %285 = arith.mulf %276, %216 : vector<8x128xf32>
    %286 = arith.mulf %270, %278 : vector<8x128xf32>
    %287 = arith.addf %285, %286 : vector<8x128xf32>
    %288 = math.tanh %287 : vector<8x128xf32>
    %289 = arith.mulf %284, %288 : vector<8x128xf32>
    %290 = arith.index_cast %258 : i32 to index
    %c128_86 = arith.constant 128 : index
    %291 = vector.load %arg12[%290, %c128_86] : memref<64x256xf32, #tpu.memory_space<vmem>>, vector<8x128xf32>
    tpu.vector_store %arg12[%290, %c128_86], %289 {strides = array<i32>} : memref<64x256xf32, #tpu.memory_space<vmem>>, vector<8x128xf32>,
    %c4_i32 = arith.constant 4 : i32
    %c8_i32_87 = arith.constant 8 : i32
    %292 = arith.muli %c4_i32, %c8_i32_87 : i32
    %293 = tpu.assume_multiple %292, 8 : i32
    %294 = arith.index_cast %293 : i32 to index
    %c0_88 = arith.constant 0 : index
    %295 = vector.load %arg11[%294, %c0_88] : memref<64x1024xf32, #tpu.memory_space<vmem>>, vector<8x512xf32>
    %c0_89 = arith.constant 0 : index
    %c0_90 = arith.constant 0 : index
    %c0_91 = arith.constant 0 : index
    %296 = vector.load %arg3[%c0_89, %c0_90, %c0_91] : memref<2x128x512xf32, #tpu.memory_space<vmem>>, vector<1x128x512xf32>
    %297 = vector.shape_cast %296 : vector<1x128x512xf32> to vector<128x512xf32>
    %cst_92 = arith.constant dense<0.000000e+00> : vector<8x512xf32>
    %298 = tpu.matmul %253, %297, %cst_92 {dimension_numbers = #tpu.dot_dimension_numbers<[1], [0], [0], [1], [0, 0, 1, 1], [], []>} : vector<8x128xf32>, vector<128x512xf32>, vector<8x512xf32> -> vector<8x512xf32>
    %299 = arith.addf %295, %298 : vector<8x512xf32>
    %300 = vector.extract_strided_slice %299 {offsets = [0, 0], sizes = [8, 128], strides = [1, 1]} : vector<8x512xf32> to vector<8x128xf32>
    %301 = arith.negf %300 : vector<8x128xf32>
    %302 = math.exp %301 : vector<8x128xf32>
    %cst_93 = arith.constant 1.000000e+00 : f32
    %303 = vector.broadcast %cst_93 : f32 to vector<8x128xf32>
    %304 = arith.addf %303, %302 : vector<8x128xf32>
    %305 = arith.divf %303, %304 : vector<8x128xf32>
    %306 = vector.extract_strided_slice %299 {offsets = [0, 128], sizes = [8, 128], strides = [1, 1]} : vector<8x512xf32> to vector<8x128xf32>
    %307 = arith.negf %306 : vector<8x128xf32>
    %308 = math.exp %307 : vector<8x128xf32>
    %cst_94 = arith.constant 1.000000e+00 : f32
    %309 = vector.broadcast %cst_94 : f32 to vector<8x128xf32>
    %310 = arith.addf %309, %308 : vector<8x128xf32>
    %311 = arith.divf %309, %310 : vector<8x128xf32>
    %312 = vector.extract_strided_slice %299 {offsets = [0, 256], sizes = [8, 128], strides = [1, 1]} : vector<8x512xf32> to vector<8x128xf32>
    %313 = math.tanh %312 : vector<8x128xf32>
    %314 = vector.extract_strided_slice %299 {offsets = [0, 384], sizes = [8, 128], strides = [1, 1]} : vector<8x512xf32> to vector<8x128xf32>
    %315 = arith.negf %314 : vector<8x128xf32>
    %316 = math.exp %315 : vector<8x128xf32>
    %cst_95 = arith.constant 1.000000e+00 : f32
    %317 = vector.broadcast %cst_95 : f32 to vector<8x128xf32>
    %318 = arith.addf %317, %316 : vector<8x128xf32>
    %319 = arith.divf %317, %318 : vector<8x128xf32>
    %320 = arith.mulf %311, %251 : vector<8x128xf32>
    %321 = arith.mulf %305, %313 : vector<8x128xf32>
    %322 = arith.addf %320, %321 : vector<8x128xf32>
    %323 = math.tanh %322 : vector<8x128xf32>
    %324 = arith.mulf %319, %323 : vector<8x128xf32>
    %325 = arith.index_cast %293 : i32 to index
    %c0_96 = arith.constant 0 : index
    %326 = vector.load %arg12[%325, %c0_96] : memref<64x256xf32, #tpu.memory_space<vmem>>, vector<8x128xf32>
    tpu.vector_store %arg12[%325, %c0_96], %324 {strides = array<i32>} : memref<64x256xf32, #tpu.memory_space<vmem>>, vector<8x128xf32>,
    %c7_i32_97 = arith.constant 7 : i32
    %327 = arith.subi %c7_i32_97, %c4_i32 : i32
    %c8_i32_98 = arith.constant 8 : i32
    %328 = arith.muli %327, %c8_i32_98 : i32
    %329 = tpu.assume_multiple %328, 8 : i32
    %330 = arith.index_cast %329 : i32 to index
    %c512_99 = arith.constant 512 : index
    %331 = vector.load %arg11[%330, %c512_99] : memref<64x1024xf32, #tpu.memory_space<vmem>>, vector<8x512xf32>
    %c1_100 = arith.constant 1 : index
    %c0_101 = arith.constant 0 : index
    %c0_102 = arith.constant 0 : index
    %332 = vector.load %arg3[%c1_100, %c0_101, %c0_102] : memref<2x128x512xf32, #tpu.memory_space<vmem>>, vector<1x128x512xf32>
    %333 = vector.shape_cast %332 : vector<1x128x512xf32> to vector<128x512xf32>
    %cst_103 = arith.constant dense<0.000000e+00> : vector<8x512xf32>
    %334 = tpu.matmul %289, %333, %cst_103 {dimension_numbers = #tpu.dot_dimension_numbers<[1], [0], [0], [1], [0, 0, 1, 1], [], []>} : vector<8x128xf32>, vector<128x512xf32>, vector<8x512xf32> -> vector<8x512xf32>
    %335 = arith.addf %331, %334 : vector<8x512xf32>
    %336 = vector.extract_strided_slice %335 {offsets = [0, 0], sizes = [8, 128], strides = [1, 1]} : vector<8x512xf32> to vector<8x128xf32>
    %337 = arith.negf %336 : vector<8x128xf32>
    %338 = math.exp %337 : vector<8x128xf32>
    %cst_104 = arith.constant 1.000000e+00 : f32
    %339 = vector.broadcast %cst_104 : f32 to vector<8x128xf32>
    %340 = arith.addf %339, %338 : vector<8x128xf32>
    %341 = arith.divf %339, %340 : vector<8x128xf32>
    %342 = vector.extract_strided_slice %335 {offsets = [0, 128], sizes = [8, 128], strides = [1, 1]} : vector<8x512xf32> to vector<8x128xf32>
    %343 = arith.negf %342 : vector<8x128xf32>
    %344 = math.exp %343 : vector<8x128xf32>
    %cst_105 = arith.constant 1.000000e+00 : f32
    %345 = vector.broadcast %cst_105 : f32 to vector<8x128xf32>
    %346 = arith.addf %345, %344 : vector<8x128xf32>
    %347 = arith.divf %345, %346 : vector<8x128xf32>
    %348 = vector.extract_strided_slice %335 {offsets = [0, 256], sizes = [8, 128], strides = [1, 1]} : vector<8x512xf32> to vector<8x128xf32>
    %349 = math.tanh %348 : vector<8x128xf32>
    %350 = vector.extract_strided_slice %335 {offsets = [0, 384], sizes = [8, 128], strides = [1, 1]} : vector<8x512xf32> to vector<8x128xf32>
    %351 = arith.negf %350 : vector<8x128xf32>
    %352 = math.exp %351 : vector<8x128xf32>
    %cst_106 = arith.constant 1.000000e+00 : f32
    %353 = vector.broadcast %cst_106 : f32 to vector<8x128xf32>
    %354 = arith.addf %353, %352 : vector<8x128xf32>
    %355 = arith.divf %353, %354 : vector<8x128xf32>
    %356 = arith.mulf %347, %287 : vector<8x128xf32>
    %357 = arith.mulf %341, %349 : vector<8x128xf32>
    %358 = arith.addf %356, %357 : vector<8x128xf32>
    %359 = math.tanh %358 : vector<8x128xf32>
    %360 = arith.mulf %355, %359 : vector<8x128xf32>
    %361 = arith.index_cast %329 : i32 to index
    %c128_107 = arith.constant 128 : index
    %362 = vector.load %arg12[%361, %c128_107] : memref<64x256xf32, #tpu.memory_space<vmem>>, vector<8x128xf32>
    tpu.vector_store %arg12[%361, %c128_107], %360 {strides = array<i32>} : memref<64x256xf32, #tpu.memory_space<vmem>>, vector<8x128xf32>,
    %c5_i32 = arith.constant 5 : i32
    %c8_i32_108 = arith.constant 8 : i32
    %363 = arith.muli %c5_i32, %c8_i32_108 : i32
    %364 = tpu.assume_multiple %363, 8 : i32
    %365 = arith.index_cast %364 : i32 to index
    %c0_109 = arith.constant 0 : index
    %366 = vector.load %arg11[%365, %c0_109] : memref<64x1024xf32, #tpu.memory_space<vmem>>, vector<8x512xf32>
    %c0_110 = arith.constant 0 : index
    %c0_111 = arith.constant 0 : index
    %c0_112 = arith.constant 0 : index
    %367 = vector.load %arg3[%c0_110, %c0_111, %c0_112] : memref<2x128x512xf32, #tpu.memory_space<vmem>>, vector<1x128x512xf32>
    %368 = vector.shape_cast %367 : vector<1x128x512xf32> to vector<128x512xf32>
    %cst_113 = arith.constant dense<0.000000e+00> : vector<8x512xf32>
    %369 = tpu.matmul %324, %368, %cst_113 {dimension_numbers = #tpu.dot_dimension_numbers<[1], [0], [0], [1], [0, 0, 1, 1], [], []>} : vector<8x128xf32>, vector<128x512xf32>, vector<8x512xf32> -> vector<8x512xf32>
    %370 = arith.addf %366, %369 : vector<8x512xf32>
    %371 = vector.extract_strided_slice %370 {offsets = [0, 0], sizes = [8, 128], strides = [1, 1]} : vector<8x512xf32> to vector<8x128xf32>
    %372 = arith.negf %371 : vector<8x128xf32>
    %373 = math.exp %372 : vector<8x128xf32>
    %cst_114 = arith.constant 1.000000e+00 : f32
    %374 = vector.broadcast %cst_114 : f32 to vector<8x128xf32>
    %375 = arith.addf %374, %373 : vector<8x128xf32>
    %376 = arith.divf %374, %375 : vector<8x128xf32>
    %377 = vector.extract_strided_slice %370 {offsets = [0, 128], sizes = [8, 128], strides = [1, 1]} : vector<8x512xf32> to vector<8x128xf32>
    %378 = arith.negf %377 : vector<8x128xf32>
    %379 = math.exp %378 : vector<8x128xf32>
    %cst_115 = arith.constant 1.000000e+00 : f32
    %380 = vector.broadcast %cst_115 : f32 to vector<8x128xf32>
    %381 = arith.addf %380, %379 : vector<8x128xf32>
    %382 = arith.divf %380, %381 : vector<8x128xf32>
    %383 = vector.extract_strided_slice %370 {offsets = [0, 256], sizes = [8, 128], strides = [1, 1]} : vector<8x512xf32> to vector<8x128xf32>
    %384 = math.tanh %383 : vector<8x128xf32>
    %385 = vector.extract_strided_slice %370 {offsets = [0, 384], sizes = [8, 128], strides = [1, 1]} : vector<8x512xf32> to vector<8x128xf32>
    %386 = arith.negf %385 : vector<8x128xf32>
    %387 = math.exp %386 : vector<8x128xf32>
    %cst_116 = arith.constant 1.000000e+00 : f32
    %388 = vector.broadcast %cst_116 : f32 to vector<8x128xf32>
    %389 = arith.addf %388, %387 : vector<8x128xf32>
    %390 = arith.divf %388, %389 : vector<8x128xf32>
    %391 = arith.mulf %382, %322 : vector<8x128xf32>
    %392 = arith.mulf %376, %384 : vector<8x128xf32>
    %393 = arith.addf %391, %392 : vector<8x128xf32>
    %394 = math.tanh %393 : vector<8x128xf32>
    %395 = arith.mulf %390, %394 : vector<8x128xf32>
    %396 = arith.index_cast %364 : i32 to index
    %c0_117 = arith.constant 0 : index
    %397 = vector.load %arg12[%396, %c0_117] : memref<64x256xf32, #tpu.memory_space<vmem>>, vector<8x128xf32>
    tpu.vector_store %arg12[%396, %c0_117], %395 {strides = array<i32>} : memref<64x256xf32, #tpu.memory_space<vmem>>, vector<8x128xf32>,
    %c7_i32_118 = arith.constant 7 : i32
    %398 = arith.subi %c7_i32_118, %c5_i32 : i32
    %c8_i32_119 = arith.constant 8 : i32
    %399 = arith.muli %398, %c8_i32_119 : i32
    %400 = tpu.assume_multiple %399, 8 : i32
    %401 = arith.index_cast %400 : i32 to index
    %c512_120 = arith.constant 512 : index
    %402 = vector.load %arg11[%401, %c512_120] : memref<64x1024xf32, #tpu.memory_space<vmem>>, vector<8x512xf32>
    %c1_121 = arith.constant 1 : index
    %c0_122 = arith.constant 0 : index
    %c0_123 = arith.constant 0 : index
    %403 = vector.load %arg3[%c1_121, %c0_122, %c0_123] : memref<2x128x512xf32, #tpu.memory_space<vmem>>, vector<1x128x512xf32>
    %404 = vector.shape_cast %403 : vector<1x128x512xf32> to vector<128x512xf32>
    %cst_124 = arith.constant dense<0.000000e+00> : vector<8x512xf32>
    %405 = tpu.matmul %360, %404, %cst_124 {dimension_numbers = #tpu.dot_dimension_numbers<[1], [0], [0], [1], [0, 0, 1, 1], [], []>} : vector<8x128xf32>, vector<128x512xf32>, vector<8x512xf32> -> vector<8x512xf32>
    %406 = arith.addf %402, %405 : vector<8x512xf32>
    %407 = vector.extract_strided_slice %406 {offsets = [0, 0], sizes = [8, 128], strides = [1, 1]} : vector<8x512xf32> to vector<8x128xf32>
    %408 = arith.negf %407 : vector<8x128xf32>
    %409 = math.exp %408 : vector<8x128xf32>
    %cst_125 = arith.constant 1.000000e+00 : f32
    %410 = vector.broadcast %cst_125 : f32 to vector<8x128xf32>
    %411 = arith.addf %410, %409 : vector<8x128xf32>
    %412 = arith.divf %410, %411 : vector<8x128xf32>
    %413 = vector.extract_strided_slice %406 {offsets = [0, 128], sizes = [8, 128], strides = [1, 1]} : vector<8x512xf32> to vector<8x128xf32>
    %414 = arith.negf %413 : vector<8x128xf32>
    %415 = math.exp %414 : vector<8x128xf32>
    %cst_126 = arith.constant 1.000000e+00 : f32
    %416 = vector.broadcast %cst_126 : f32 to vector<8x128xf32>
    %417 = arith.addf %416, %415 : vector<8x128xf32>
    %418 = arith.divf %416, %417 : vector<8x128xf32>
    %419 = vector.extract_strided_slice %406 {offsets = [0, 256], sizes = [8, 128], strides = [1, 1]} : vector<8x512xf32> to vector<8x128xf32>
    %420 = math.tanh %419 : vector<8x128xf32>
    %421 = vector.extract_strided_slice %406 {offsets = [0, 384], sizes = [8, 128], strides = [1, 1]} : vector<8x512xf32> to vector<8x128xf32>
    %422 = arith.negf %421 : vector<8x128xf32>
    %423 = math.exp %422 : vector<8x128xf32>
    %cst_127 = arith.constant 1.000000e+00 : f32
    %424 = vector.broadcast %cst_127 : f32 to vector<8x128xf32>
    %425 = arith.addf %424, %423 : vector<8x128xf32>
    %426 = arith.divf %424, %425 : vector<8x128xf32>
    %427 = arith.mulf %418, %358 : vector<8x128xf32>
    %428 = arith.mulf %412, %420 : vector<8x128xf32>
    %429 = arith.addf %427, %428 : vector<8x128xf32>
    %430 = math.tanh %429 : vector<8x128xf32>
    %431 = arith.mulf %426, %430 : vector<8x128xf32>
    %432 = arith.index_cast %400 : i32 to index
    %c128_128 = arith.constant 128 : index
    %433 = vector.load %arg12[%432, %c128_128] : memref<64x256xf32, #tpu.memory_space<vmem>>, vector<8x128xf32>
    tpu.vector_store %arg12[%432, %c128_128], %431 {strides = array<i32>} : memref<64x256xf32, #tpu.memory_space<vmem>>, vector<8x128xf32>,
    %c6_i32 = arith.constant 6 : i32
    %c8_i32_129 = arith.constant 8 : i32
    %434 = arith.muli %c6_i32, %c8_i32_129 : i32
    %435 = tpu.assume_multiple %434, 8 : i32
    %436 = arith.index_cast %435 : i32 to index
    %c0_130 = arith.constant 0 : index
    %437 = vector.load %arg11[%436, %c0_130] : memref<64x1024xf32, #tpu.memory_space<vmem>>, vector<8x512xf32>
    %c0_131 = arith.constant 0 : index
    %c0_132 = arith.constant 0 : index
    %c0_133 = arith.constant 0 : index
    %438 = vector.load %arg3[%c0_131, %c0_132, %c0_133] : memref<2x128x512xf32, #tpu.memory_space<vmem>>, vector<1x128x512xf32>
    %439 = vector.shape_cast %438 : vector<1x128x512xf32> to vector<128x512xf32>
    %cst_134 = arith.constant dense<0.000000e+00> : vector<8x512xf32>
    %440 = tpu.matmul %395, %439, %cst_134 {dimension_numbers = #tpu.dot_dimension_numbers<[1], [0], [0], [1], [0, 0, 1, 1], [], []>} : vector<8x128xf32>, vector<128x512xf32>, vector<8x512xf32> -> vector<8x512xf32>
    %441 = arith.addf %437, %440 : vector<8x512xf32>
    %442 = vector.extract_strided_slice %441 {offsets = [0, 0], sizes = [8, 128], strides = [1, 1]} : vector<8x512xf32> to vector<8x128xf32>
    %443 = arith.negf %442 : vector<8x128xf32>
    %444 = math.exp %443 : vector<8x128xf32>
    %cst_135 = arith.constant 1.000000e+00 : f32
    %445 = vector.broadcast %cst_135 : f32 to vector<8x128xf32>
    %446 = arith.addf %445, %444 : vector<8x128xf32>
    %447 = arith.divf %445, %446 : vector<8x128xf32>
    %448 = vector.extract_strided_slice %441 {offsets = [0, 128], sizes = [8, 128], strides = [1, 1]} : vector<8x512xf32> to vector<8x128xf32>
    %449 = arith.negf %448 : vector<8x128xf32>
    %450 = math.exp %449 : vector<8x128xf32>
    %cst_136 = arith.constant 1.000000e+00 : f32
    %451 = vector.broadcast %cst_136 : f32 to vector<8x128xf32>
    %452 = arith.addf %451, %450 : vector<8x128xf32>
    %453 = arith.divf %451, %452 : vector<8x128xf32>
    %454 = vector.extract_strided_slice %441 {offsets = [0, 256], sizes = [8, 128], strides = [1, 1]} : vector<8x512xf32> to vector<8x128xf32>
    %455 = math.tanh %454 : vector<8x128xf32>
    %456 = vector.extract_strided_slice %441 {offsets = [0, 384], sizes = [8, 128], strides = [1, 1]} : vector<8x512xf32> to vector<8x128xf32>
    %457 = arith.negf %456 : vector<8x128xf32>
    %458 = math.exp %457 : vector<8x128xf32>
    %cst_137 = arith.constant 1.000000e+00 : f32
    %459 = vector.broadcast %cst_137 : f32 to vector<8x128xf32>
    %460 = arith.addf %459, %458 : vector<8x128xf32>
    %461 = arith.divf %459, %460 : vector<8x128xf32>
    %462 = arith.mulf %453, %393 : vector<8x128xf32>
    %463 = arith.mulf %447, %455 : vector<8x128xf32>
    %464 = arith.addf %462, %463 : vector<8x128xf32>
    %465 = math.tanh %464 : vector<8x128xf32>
    %466 = arith.mulf %461, %465 : vector<8x128xf32>
    %467 = arith.index_cast %435 : i32 to index
    %c0_138 = arith.constant 0 : index
    %468 = vector.load %arg12[%467, %c0_138] : memref<64x256xf32, #tpu.memory_space<vmem>>, vector<8x128xf32>
    tpu.vector_store %arg12[%467, %c0_138], %466 {strides = array<i32>} : memref<64x256xf32, #tpu.memory_space<vmem>>, vector<8x128xf32>,
    %c7_i32_139 = arith.constant 7 : i32
    %469 = arith.subi %c7_i32_139, %c6_i32 : i32
    %c8_i32_140 = arith.constant 8 : i32
    %470 = arith.muli %469, %c8_i32_140 : i32
    %471 = tpu.assume_multiple %470, 8 : i32
    %472 = arith.index_cast %471 : i32 to index
    %c512_141 = arith.constant 512 : index
    %473 = vector.load %arg11[%472, %c512_141] : memref<64x1024xf32, #tpu.memory_space<vmem>>, vector<8x512xf32>
    %c1_142 = arith.constant 1 : index
    %c0_143 = arith.constant 0 : index
    %c0_144 = arith.constant 0 : index
    %474 = vector.load %arg3[%c1_142, %c0_143, %c0_144] : memref<2x128x512xf32, #tpu.memory_space<vmem>>, vector<1x128x512xf32>
    %475 = vector.shape_cast %474 : vector<1x128x512xf32> to vector<128x512xf32>
    %cst_145 = arith.constant dense<0.000000e+00> : vector<8x512xf32>
    %476 = tpu.matmul %431, %475, %cst_145 {dimension_numbers = #tpu.dot_dimension_numbers<[1], [0], [0], [1], [0, 0, 1, 1], [], []>} : vector<8x128xf32>, vector<128x512xf32>, vector<8x512xf32> -> vector<8x512xf32>
    %477 = arith.addf %473, %476 : vector<8x512xf32>
    %478 = vector.extract_strided_slice %477 {offsets = [0, 0], sizes = [8, 128], strides = [1, 1]} : vector<8x512xf32> to vector<8x128xf32>
    %479 = arith.negf %478 : vector<8x128xf32>
    %480 = math.exp %479 : vector<8x128xf32>
    %cst_146 = arith.constant 1.000000e+00 : f32
    %481 = vector.broadcast %cst_146 : f32 to vector<8x128xf32>
    %482 = arith.addf %481, %480 : vector<8x128xf32>
    %483 = arith.divf %481, %482 : vector<8x128xf32>
    %484 = vector.extract_strided_slice %477 {offsets = [0, 128], sizes = [8, 128], strides = [1, 1]} : vector<8x512xf32> to vector<8x128xf32>
    %485 = arith.negf %484 : vector<8x128xf32>
    %486 = math.exp %485 : vector<8x128xf32>
    %cst_147 = arith.constant 1.000000e+00 : f32
    %487 = vector.broadcast %cst_147 : f32 to vector<8x128xf32>
    %488 = arith.addf %487, %486 : vector<8x128xf32>
    %489 = arith.divf %487, %488 : vector<8x128xf32>
    %490 = vector.extract_strided_slice %477 {offsets = [0, 256], sizes = [8, 128], strides = [1, 1]} : vector<8x512xf32> to vector<8x128xf32>
    %491 = math.tanh %490 : vector<8x128xf32>
    %492 = vector.extract_strided_slice %477 {offsets = [0, 384], sizes = [8, 128], strides = [1, 1]} : vector<8x512xf32> to vector<8x128xf32>
    %493 = arith.negf %492 : vector<8x128xf32>
    %494 = math.exp %493 : vector<8x128xf32>
    %cst_148 = arith.constant 1.000000e+00 : f32
    %495 = vector.broadcast %cst_148 : f32 to vector<8x128xf32>
    %496 = arith.addf %495, %494 : vector<8x128xf32>
    %497 = arith.divf %495, %496 : vector<8x128xf32>
    %498 = arith.mulf %489, %429 : vector<8x128xf32>
    %499 = arith.mulf %483, %491 : vector<8x128xf32>
    %500 = arith.addf %498, %499 : vector<8x128xf32>
    %501 = math.tanh %500 : vector<8x128xf32>
    %502 = arith.mulf %497, %501 : vector<8x128xf32>
    %503 = arith.index_cast %471 : i32 to index
    %c128_149 = arith.constant 128 : index
    %504 = vector.load %arg12[%503, %c128_149] : memref<64x256xf32, #tpu.memory_space<vmem>>, vector<8x128xf32>
    tpu.vector_store %arg12[%503, %c128_149], %502 {strides = array<i32>} : memref<64x256xf32, #tpu.memory_space<vmem>>, vector<8x128xf32>,
    %c7_i32_150 = arith.constant 7 : i32
    %c8_i32_151 = arith.constant 8 : i32
    %505 = arith.muli %c7_i32_150, %c8_i32_151 : i32
    %506 = tpu.assume_multiple %505, 8 : i32
    %507 = arith.index_cast %506 : i32 to index
    %c0_152 = arith.constant 0 : index
    %508 = vector.load %arg11[%507, %c0_152] : memref<64x1024xf32, #tpu.memory_space<vmem>>, vector<8x512xf32>
    %c0_153 = arith.constant 0 : index
    %c0_154 = arith.constant 0 : index
    %c0_155 = arith.constant 0 : index
    %509 = vector.load %arg3[%c0_153, %c0_154, %c0_155] : memref<2x128x512xf32, #tpu.memory_space<vmem>>, vector<1x128x512xf32>
    %510 = vector.shape_cast %509 : vector<1x128x512xf32> to vector<128x512xf32>
    %cst_156 = arith.constant dense<0.000000e+00> : vector<8x512xf32>
    %511 = tpu.matmul %466, %510, %cst_156 {dimension_numbers = #tpu.dot_dimension_numbers<[1], [0], [0], [1], [0, 0, 1, 1], [], []>} : vector<8x128xf32>, vector<128x512xf32>, vector<8x512xf32> -> vector<8x512xf32>
    %512 = arith.addf %508, %511 : vector<8x512xf32>
    %513 = vector.extract_strided_slice %512 {offsets = [0, 0], sizes = [8, 128], strides = [1, 1]} : vector<8x512xf32> to vector<8x128xf32>
    %514 = arith.negf %513 : vector<8x128xf32>
    %515 = math.exp %514 : vector<8x128xf32>
    %cst_157 = arith.constant 1.000000e+00 : f32
    %516 = vector.broadcast %cst_157 : f32 to vector<8x128xf32>
    %517 = arith.addf %516, %515 : vector<8x128xf32>
    %518 = arith.divf %516, %517 : vector<8x128xf32>
    %519 = vector.extract_strided_slice %512 {offsets = [0, 128], sizes = [8, 128], strides = [1, 1]} : vector<8x512xf32> to vector<8x128xf32>
    %520 = arith.negf %519 : vector<8x128xf32>
    %521 = math.exp %520 : vector<8x128xf32>
    %cst_158 = arith.constant 1.000000e+00 : f32
    %522 = vector.broadcast %cst_158 : f32 to vector<8x128xf32>
    %523 = arith.addf %522, %521 : vector<8x128xf32>
    %524 = arith.divf %522, %523 : vector<8x128xf32>
    %525 = vector.extract_strided_slice %512 {offsets = [0, 256], sizes = [8, 128], strides = [1, 1]} : vector<8x512xf32> to vector<8x128xf32>
    %526 = math.tanh %525 : vector<8x128xf32>
    %527 = vector.extract_strided_slice %512 {offsets = [0, 384], sizes = [8, 128], strides = [1, 1]} : vector<8x512xf32> to vector<8x128xf32>
    %528 = arith.negf %527 : vector<8x128xf32>
    %529 = math.exp %528 : vector<8x128xf32>
    %cst_159 = arith.constant 1.000000e+00 : f32
    %530 = vector.broadcast %cst_159 : f32 to vector<8x128xf32>
    %531 = arith.addf %530, %529 : vector<8x128xf32>
    %532 = arith.divf %530, %531 : vector<8x128xf32>
    %533 = arith.mulf %524, %464 : vector<8x128xf32>
    %534 = arith.mulf %518, %526 : vector<8x128xf32>
    %535 = arith.addf %533, %534 : vector<8x128xf32>
    %536 = math.tanh %535 : vector<8x128xf32>
    %537 = arith.mulf %532, %536 : vector<8x128xf32>
    %538 = arith.index_cast %506 : i32 to index
    %c0_160 = arith.constant 0 : index
    %539 = vector.load %arg12[%538, %c0_160] : memref<64x256xf32, #tpu.memory_space<vmem>>, vector<8x128xf32>
    tpu.vector_store %arg12[%538, %c0_160], %537 {strides = array<i32>} : memref<64x256xf32, #tpu.memory_space<vmem>>, vector<8x128xf32>,
    %c7_i32_161 = arith.constant 7 : i32
    %540 = arith.subi %c7_i32_161, %c7_i32_150 : i32
    %c8_i32_162 = arith.constant 8 : i32
    %541 = arith.muli %540, %c8_i32_162 : i32
    %542 = tpu.assume_multiple %541, 8 : i32
    %543 = arith.index_cast %542 : i32 to index
    %c512_163 = arith.constant 512 : index
    %544 = vector.load %arg11[%543, %c512_163] : memref<64x1024xf32, #tpu.memory_space<vmem>>, vector<8x512xf32>
    %c1_164 = arith.constant 1 : index
    %c0_165 = arith.constant 0 : index
    %c0_166 = arith.constant 0 : index
    %545 = vector.load %arg3[%c1_164, %c0_165, %c0_166] : memref<2x128x512xf32, #tpu.memory_space<vmem>>, vector<1x128x512xf32>
    %546 = vector.shape_cast %545 : vector<1x128x512xf32> to vector<128x512xf32>
    %cst_167 = arith.constant dense<0.000000e+00> : vector<8x512xf32>
    %547 = tpu.matmul %502, %546, %cst_167 {dimension_numbers = #tpu.dot_dimension_numbers<[1], [0], [0], [1], [0, 0, 1, 1], [], []>} : vector<8x128xf32>, vector<128x512xf32>, vector<8x512xf32> -> vector<8x512xf32>
    %548 = arith.addf %544, %547 : vector<8x512xf32>
    %549 = vector.extract_strided_slice %548 {offsets = [0, 0], sizes = [8, 128], strides = [1, 1]} : vector<8x512xf32> to vector<8x128xf32>
    %550 = arith.negf %549 : vector<8x128xf32>
    %551 = math.exp %550 : vector<8x128xf32>
    %cst_168 = arith.constant 1.000000e+00 : f32
    %552 = vector.broadcast %cst_168 : f32 to vector<8x128xf32>
    %553 = arith.addf %552, %551 : vector<8x128xf32>
    %554 = arith.divf %552, %553 : vector<8x128xf32>
    %555 = vector.extract_strided_slice %548 {offsets = [0, 128], sizes = [8, 128], strides = [1, 1]} : vector<8x512xf32> to vector<8x128xf32>
    %556 = arith.negf %555 : vector<8x128xf32>
    %557 = math.exp %556 : vector<8x128xf32>
    %cst_169 = arith.constant 1.000000e+00 : f32
    %558 = vector.broadcast %cst_169 : f32 to vector<8x128xf32>
    %559 = arith.addf %558, %557 : vector<8x128xf32>
    %560 = arith.divf %558, %559 : vector<8x128xf32>
    %561 = vector.extract_strided_slice %548 {offsets = [0, 256], sizes = [8, 128], strides = [1, 1]} : vector<8x512xf32> to vector<8x128xf32>
    %562 = math.tanh %561 : vector<8x128xf32>
    %563 = vector.extract_strided_slice %548 {offsets = [0, 384], sizes = [8, 128], strides = [1, 1]} : vector<8x512xf32> to vector<8x128xf32>
    %564 = arith.negf %563 : vector<8x128xf32>
    %565 = math.exp %564 : vector<8x128xf32>
    %cst_170 = arith.constant 1.000000e+00 : f32
    %566 = vector.broadcast %cst_170 : f32 to vector<8x128xf32>
    %567 = arith.addf %566, %565 : vector<8x128xf32>
    %568 = arith.divf %566, %567 : vector<8x128xf32>
    %569 = arith.mulf %560, %500 : vector<8x128xf32>
    %570 = arith.mulf %554, %562 : vector<8x128xf32>
    %571 = arith.addf %569, %570 : vector<8x128xf32>
    %572 = math.tanh %571 : vector<8x128xf32>
    %573 = arith.mulf %568, %572 : vector<8x128xf32>
    %574 = arith.index_cast %542 : i32 to index
    %c128_171 = arith.constant 128 : index
    %575 = vector.load %arg12[%574, %c128_171] : memref<64x256xf32, #tpu.memory_space<vmem>>, vector<8x128xf32>
    tpu.vector_store %arg12[%574, %c128_171], %573 {strides = array<i32>} : memref<64x256xf32, #tpu.memory_space<vmem>>, vector<8x128xf32>,
    %c8_i32_172 = arith.constant 8 : i32
    %c0_173 = arith.constant 0 : index
    %c0_174 = arith.constant 0 : index
    %576 = vector.load %arg12[%c0_173, %c0_174] : memref<64x256xf32, #tpu.memory_space<vmem>>, vector<64x256xf32>
    %c0_175 = arith.constant 0 : index
    %c0_176 = arith.constant 0 : index
    %577 = vector.load %arg5[%c0_175, %c0_176] : memref<256x1024xf32, #tpu.memory_space<vmem>>, vector<256x1024xf32>
    %cst_177 = arith.constant dense<0.000000e+00> : vector<64x1024xf32>
    %578 = tpu.matmul %576, %577, %cst_177 {dimension_numbers = #tpu.dot_dimension_numbers<[1], [0], [0], [1], [0, 0, 1, 1], [], []>} : vector<64x256xf32>, vector<256x1024xf32>, vector<64x1024xf32> -> vector<64x1024xf32>
    %c0_178 = arith.constant 0 : index
    %c0_179 = arith.constant 0 : index
    %579 = vector.load %arg7[%c0_178, %c0_179] : memref<1x1024xf32, #tpu.memory_space<vmem>>, vector<1x1024xf32>
    %580 = vector.broadcast %579 : vector<1x1024xf32> to vector<64x1024xf32>
    %581 = arith.addf %578, %580 : vector<64x1024xf32>
    %c0_180 = arith.constant 0 : index
    %c0_181 = arith.constant 0 : index
    %582 = vector.load %arg11[%c0_180, %c0_181] : memref<64x1024xf32, #tpu.memory_space<vmem>>, vector<64x1024xf32>
    tpu.vector_store %arg11[%c0_180, %c0_181], %581 {strides = array<i32>} : memref<64x1024xf32, #tpu.memory_space<vmem>>, vector<64x1024xf32>,
    %cst_182 = arith.constant 0.000000e+00 : f32
    %583 = vector.broadcast %cst_182 : f32 to vector<8x128xf32>
    %c0_i32_183 = arith.constant 0 : i32
    %c8_i32_184 = arith.constant 8 : i32
    %584 = arith.muli %c0_i32_183, %c8_i32_184 : i32
    %585 = tpu.assume_multiple %584, 8 : i32
    %586 = arith.index_cast %585 : i32 to index
    %c0_185 = arith.constant 0 : index
    %587 = vector.load %arg11[%586, %c0_185] : memref<64x1024xf32, #tpu.memory_space<vmem>>, vector<8x512xf32>
    %c0_186 = arith.constant 0 : index
    %c0_187 = arith.constant 0 : index
    %c0_188 = arith.constant 0 : index
    %588 = vector.load %arg6[%c0_186, %c0_187, %c0_188] : memref<2x128x512xf32, #tpu.memory_space<vmem>>, vector<1x128x512xf32>
    %589 = vector.shape_cast %588 : vector<1x128x512xf32> to vector<128x512xf32>
    %cst_189 = arith.constant dense<0.000000e+00> : vector<8x512xf32>
    %590 = tpu.matmul %583, %589, %cst_189 {dimension_numbers = #tpu.dot_dimension_numbers<[1], [0], [0], [1], [0, 0, 1, 1], [], []>} : vector<8x128xf32>, vector<128x512xf32>, vector<8x512xf32> -> vector<8x512xf32>
    %591 = arith.addf %587, %590 : vector<8x512xf32>
    %592 = vector.extract_strided_slice %591 {offsets = [0, 0], sizes = [8, 128], strides = [1, 1]} : vector<8x512xf32> to vector<8x128xf32>
    %593 = arith.negf %592 : vector<8x128xf32>
    %594 = math.exp %593 : vector<8x128xf32>
    %cst_190 = arith.constant 1.000000e+00 : f32
    %595 = vector.broadcast %cst_190 : f32 to vector<8x128xf32>
    %596 = arith.addf %595, %594 : vector<8x128xf32>
    %597 = arith.divf %595, %596 : vector<8x128xf32>
    %598 = vector.extract_strided_slice %591 {offsets = [0, 128], sizes = [8, 128], strides = [1, 1]} : vector<8x512xf32> to vector<8x128xf32>
    %599 = arith.negf %598 : vector<8x128xf32>
    %600 = math.exp %599 : vector<8x128xf32>
    %cst_191 = arith.constant 1.000000e+00 : f32
    %601 = vector.broadcast %cst_191 : f32 to vector<8x128xf32>
    %602 = arith.addf %601, %600 : vector<8x128xf32>
    %603 = arith.divf %601, %602 : vector<8x128xf32>
    %604 = vector.extract_strided_slice %591 {offsets = [0, 256], sizes = [8, 128], strides = [1, 1]} : vector<8x512xf32> to vector<8x128xf32>
    %605 = math.tanh %604 : vector<8x128xf32>
    %606 = vector.extract_strided_slice %591 {offsets = [0, 384], sizes = [8, 128], strides = [1, 1]} : vector<8x512xf32> to vector<8x128xf32>
    %607 = arith.negf %606 : vector<8x128xf32>
    %608 = math.exp %607 : vector<8x128xf32>
    %cst_192 = arith.constant 1.000000e+00 : f32
    %609 = vector.broadcast %cst_192 : f32 to vector<8x128xf32>
    %610 = arith.addf %609, %608 : vector<8x128xf32>
    %611 = arith.divf %609, %610 : vector<8x128xf32>
    %612 = arith.mulf %603, %583 : vector<8x128xf32>
    %613 = arith.mulf %597, %605 : vector<8x128xf32>
    %614 = arith.addf %612, %613 : vector<8x128xf32>
    %615 = math.tanh %614 : vector<8x128xf32>
    %616 = arith.mulf %611, %615 : vector<8x128xf32>
    %617 = arith.index_cast %585 : i32 to index
    %c0_193 = arith.constant 0 : index
    %618 = vector.load %arg12[%617, %c0_193] : memref<64x256xf32, #tpu.memory_space<vmem>>, vector<8x128xf32>
    tpu.vector_store %arg12[%617, %c0_193], %616 {strides = array<i32>} : memref<64x256xf32, #tpu.memory_space<vmem>>, vector<8x128xf32>,
    %c7_i32_194 = arith.constant 7 : i32
    %619 = arith.subi %c7_i32_194, %c0_i32_183 : i32
    %c8_i32_195 = arith.constant 8 : i32
    %620 = arith.muli %619, %c8_i32_195 : i32
    %621 = tpu.assume_multiple %620, 8 : i32
    %622 = arith.index_cast %621 : i32 to index
    %c512_196 = arith.constant 512 : index
    %623 = vector.load %arg11[%622, %c512_196] : memref<64x1024xf32, #tpu.memory_space<vmem>>, vector<8x512xf32>
    %c1_197 = arith.constant 1 : index
    %c0_198 = arith.constant 0 : index
    %c0_199 = arith.constant 0 : index
    %624 = vector.load %arg6[%c1_197, %c0_198, %c0_199] : memref<2x128x512xf32, #tpu.memory_space<vmem>>, vector<1x128x512xf32>
    %625 = vector.shape_cast %624 : vector<1x128x512xf32> to vector<128x512xf32>
    %cst_200 = arith.constant dense<0.000000e+00> : vector<8x512xf32>
    %626 = tpu.matmul %583, %625, %cst_200 {dimension_numbers = #tpu.dot_dimension_numbers<[1], [0], [0], [1], [0, 0, 1, 1], [], []>} : vector<8x128xf32>, vector<128x512xf32>, vector<8x512xf32> -> vector<8x512xf32>
    %627 = arith.addf %623, %626 : vector<8x512xf32>
    %628 = vector.extract_strided_slice %627 {offsets = [0, 0], sizes = [8, 128], strides = [1, 1]} : vector<8x512xf32> to vector<8x128xf32>
    %629 = arith.negf %628 : vector<8x128xf32>
    %630 = math.exp %629 : vector<8x128xf32>
    %cst_201 = arith.constant 1.000000e+00 : f32
    %631 = vector.broadcast %cst_201 : f32 to vector<8x128xf32>
    %632 = arith.addf %631, %630 : vector<8x128xf32>
    %633 = arith.divf %631, %632 : vector<8x128xf32>
    %634 = vector.extract_strided_slice %627 {offsets = [0, 128], sizes = [8, 128], strides = [1, 1]} : vector<8x512xf32> to vector<8x128xf32>
    %635 = arith.negf %634 : vector<8x128xf32>
    %636 = math.exp %635 : vector<8x128xf32>
    %cst_202 = arith.constant 1.000000e+00 : f32
    %637 = vector.broadcast %cst_202 : f32 to vector<8x128xf32>
    %638 = arith.addf %637, %636 : vector<8x128xf32>
    %639 = arith.divf %637, %638 : vector<8x128xf32>
    %640 = vector.extract_strided_slice %627 {offsets = [0, 256], sizes = [8, 128], strides = [1, 1]} : vector<8x512xf32> to vector<8x128xf32>
    %641 = math.tanh %640 : vector<8x128xf32>
    %642 = vector.extract_strided_slice %627 {offsets = [0, 384], sizes = [8, 128], strides = [1, 1]} : vector<8x512xf32> to vector<8x128xf32>
    %643 = arith.negf %642 : vector<8x128xf32>
    %644 = math.exp %643 : vector<8x128xf32>
    %cst_203 = arith.constant 1.000000e+00 : f32
    %645 = vector.broadcast %cst_203 : f32 to vector<8x128xf32>
    %646 = arith.addf %645, %644 : vector<8x128xf32>
    %647 = arith.divf %645, %646 : vector<8x128xf32>
    %648 = arith.mulf %639, %583 : vector<8x128xf32>
    %649 = arith.mulf %633, %641 : vector<8x128xf32>
    %650 = arith.addf %648, %649 : vector<8x128xf32>
    %651 = math.tanh %650 : vector<8x128xf32>
    %652 = arith.mulf %647, %651 : vector<8x128xf32>
    %653 = arith.index_cast %621 : i32 to index
    %c128_204 = arith.constant 128 : index
    %654 = vector.load %arg12[%653, %c128_204] : memref<64x256xf32, #tpu.memory_space<vmem>>, vector<8x128xf32>
    tpu.vector_store %arg12[%653, %c128_204], %652 {strides = array<i32>} : memref<64x256xf32, #tpu.memory_space<vmem>>, vector<8x128xf32>,
    %c1_i32_205 = arith.constant 1 : i32
    %c8_i32_206 = arith.constant 8 : i32
    %655 = arith.muli %c1_i32_205, %c8_i32_206 : i32
    %656 = tpu.assume_multiple %655, 8 : i32
    %657 = arith.index_cast %656 : i32 to index
    %c0_207 = arith.constant 0 : index
    %658 = vector.load %arg11[%657, %c0_207] : memref<64x1024xf32, #tpu.memory_space<vmem>>, vector<8x512xf32>
    %c0_208 = arith.constant 0 : index
    %c0_209 = arith.constant 0 : index
    %c0_210 = arith.constant 0 : index
    %659 = vector.load %arg6[%c0_208, %c0_209, %c0_210] : memref<2x128x512xf32, #tpu.memory_space<vmem>>, vector<1x128x512xf32>
    %660 = vector.shape_cast %659 : vector<1x128x512xf32> to vector<128x512xf32>
    %cst_211 = arith.constant dense<0.000000e+00> : vector<8x512xf32>
    %661 = tpu.matmul %616, %660, %cst_211 {dimension_numbers = #tpu.dot_dimension_numbers<[1], [0], [0], [1], [0, 0, 1, 1], [], []>} : vector<8x128xf32>, vector<128x512xf32>, vector<8x512xf32> -> vector<8x512xf32>
    %662 = arith.addf %658, %661 : vector<8x512xf32>
    %663 = vector.extract_strided_slice %662 {offsets = [0, 0], sizes = [8, 128], strides = [1, 1]} : vector<8x512xf32> to vector<8x128xf32>
    %664 = arith.negf %663 : vector<8x128xf32>
    %665 = math.exp %664 : vector<8x128xf32>
    %cst_212 = arith.constant 1.000000e+00 : f32
    %666 = vector.broadcast %cst_212 : f32 to vector<8x128xf32>
    %667 = arith.addf %666, %665 : vector<8x128xf32>
    %668 = arith.divf %666, %667 : vector<8x128xf32>
    %669 = vector.extract_strided_slice %662 {offsets = [0, 128], sizes = [8, 128], strides = [1, 1]} : vector<8x512xf32> to vector<8x128xf32>
    %670 = arith.negf %669 : vector<8x128xf32>
    %671 = math.exp %670 : vector<8x128xf32>
    %cst_213 = arith.constant 1.000000e+00 : f32
    %672 = vector.broadcast %cst_213 : f32 to vector<8x128xf32>
    %673 = arith.addf %672, %671 : vector<8x128xf32>
    %674 = arith.divf %672, %673 : vector<8x128xf32>
    %675 = vector.extract_strided_slice %662 {offsets = [0, 256], sizes = [8, 128], strides = [1, 1]} : vector<8x512xf32> to vector<8x128xf32>
    %676 = math.tanh %675 : vector<8x128xf32>
    %677 = vector.extract_strided_slice %662 {offsets = [0, 384], sizes = [8, 128], strides = [1, 1]} : vector<8x512xf32> to vector<8x128xf32>
    %678 = arith.negf %677 : vector<8x128xf32>
    %679 = math.exp %678 : vector<8x128xf32>
    %cst_214 = arith.constant 1.000000e+00 : f32
    %680 = vector.broadcast %cst_214 : f32 to vector<8x128xf32>
    %681 = arith.addf %680, %679 : vector<8x128xf32>
    %682 = arith.divf %680, %681 : vector<8x128xf32>
    %683 = arith.mulf %674, %614 : vector<8x128xf32>
    %684 = arith.mulf %668, %676 : vector<8x128xf32>
    %685 = arith.addf %683, %684 : vector<8x128xf32>
    %686 = math.tanh %685 : vector<8x128xf32>
    %687 = arith.mulf %682, %686 : vector<8x128xf32>
    %688 = arith.index_cast %656 : i32 to index
    %c0_215 = arith.constant 0 : index
    %689 = vector.load %arg12[%688, %c0_215] : memref<64x256xf32, #tpu.memory_space<vmem>>, vector<8x128xf32>
    tpu.vector_store %arg12[%688, %c0_215], %687 {strides = array<i32>} : memref<64x256xf32, #tpu.memory_space<vmem>>, vector<8x128xf32>,
    %c7_i32_216 = arith.constant 7 : i32
    %690 = arith.subi %c7_i32_216, %c1_i32_205 : i32
    %c8_i32_217 = arith.constant 8 : i32
    %691 = arith.muli %690, %c8_i32_217 : i32
    %692 = tpu.assume_multiple %691, 8 : i32
    %693 = arith.index_cast %692 : i32 to index
    %c512_218 = arith.constant 512 : index
    %694 = vector.load %arg11[%693, %c512_218] : memref<64x1024xf32, #tpu.memory_space<vmem>>, vector<8x512xf32>
    %c1_219 = arith.constant 1 : index
    %c0_220 = arith.constant 0 : index
    %c0_221 = arith.constant 0 : index
    %695 = vector.load %arg6[%c1_219, %c0_220, %c0_221] : memref<2x128x512xf32, #tpu.memory_space<vmem>>, vector<1x128x512xf32>
    %696 = vector.shape_cast %695 : vector<1x128x512xf32> to vector<128x512xf32>
    %cst_222 = arith.constant dense<0.000000e+00> : vector<8x512xf32>
    %697 = tpu.matmul %652, %696, %cst_222 {dimension_numbers = #tpu.dot_dimension_numbers<[1], [0], [0], [1], [0, 0, 1, 1], [], []>} : vector<8x128xf32>, vector<128x512xf32>, vector<8x512xf32> -> vector<8x512xf32>
    %698 = arith.addf %694, %697 : vector<8x512xf32>
    %699 = vector.extract_strided_slice %698 {offsets = [0, 0], sizes = [8, 128], strides = [1, 1]} : vector<8x512xf32> to vector<8x128xf32>
    %700 = arith.negf %699 : vector<8x128xf32>
    %701 = math.exp %700 : vector<8x128xf32>
    %cst_223 = arith.constant 1.000000e+00 : f32
    %702 = vector.broadcast %cst_223 : f32 to vector<8x128xf32>
    %703 = arith.addf %702, %701 : vector<8x128xf32>
    %704 = arith.divf %702, %703 : vector<8x128xf32>
    %705 = vector.extract_strided_slice %698 {offsets = [0, 128], sizes = [8, 128], strides = [1, 1]} : vector<8x512xf32> to vector<8x128xf32>
    %706 = arith.negf %705 : vector<8x128xf32>
    %707 = math.exp %706 : vector<8x128xf32>
    %cst_224 = arith.constant 1.000000e+00 : f32
    %708 = vector.broadcast %cst_224 : f32 to vector<8x128xf32>
    %709 = arith.addf %708, %707 : vector<8x128xf32>
    %710 = arith.divf %708, %709 : vector<8x128xf32>
    %711 = vector.extract_strided_slice %698 {offsets = [0, 256], sizes = [8, 128], strides = [1, 1]} : vector<8x512xf32> to vector<8x128xf32>
    %712 = math.tanh %711 : vector<8x128xf32>
    %713 = vector.extract_strided_slice %698 {offsets = [0, 384], sizes = [8, 128], strides = [1, 1]} : vector<8x512xf32> to vector<8x128xf32>
    %714 = arith.negf %713 : vector<8x128xf32>
    %715 = math.exp %714 : vector<8x128xf32>
    %cst_225 = arith.constant 1.000000e+00 : f32
    %716 = vector.broadcast %cst_225 : f32 to vector<8x128xf32>
    %717 = arith.addf %716, %715 : vector<8x128xf32>
    %718 = arith.divf %716, %717 : vector<8x128xf32>
    %719 = arith.mulf %710, %650 : vector<8x128xf32>
    %720 = arith.mulf %704, %712 : vector<8x128xf32>
    %721 = arith.addf %719, %720 : vector<8x128xf32>
    %722 = math.tanh %721 : vector<8x128xf32>
    %723 = arith.mulf %718, %722 : vector<8x128xf32>
    %724 = arith.index_cast %692 : i32 to index
    %c128_226 = arith.constant 128 : index
    %725 = vector.load %arg12[%724, %c128_226] : memref<64x256xf32, #tpu.memory_space<vmem>>, vector<8x128xf32>
    tpu.vector_store %arg12[%724, %c128_226], %723 {strides = array<i32>} : memref<64x256xf32, #tpu.memory_space<vmem>>, vector<8x128xf32>,
    %c2_i32_227 = arith.constant 2 : i32
    %c8_i32_228 = arith.constant 8 : i32
    %726 = arith.muli %c2_i32_227, %c8_i32_228 : i32
    %727 = tpu.assume_multiple %726, 8 : i32
    %728 = arith.index_cast %727 : i32 to index
    %c0_229 = arith.constant 0 : index
    %729 = vector.load %arg11[%728, %c0_229] : memref<64x1024xf32, #tpu.memory_space<vmem>>, vector<8x512xf32>
    %c0_230 = arith.constant 0 : index
    %c0_231 = arith.constant 0 : index
    %c0_232 = arith.constant 0 : index
    %730 = vector.load %arg6[%c0_230, %c0_231, %c0_232] : memref<2x128x512xf32, #tpu.memory_space<vmem>>, vector<1x128x512xf32>
    %731 = vector.shape_cast %730 : vector<1x128x512xf32> to vector<128x512xf32>
    %cst_233 = arith.constant dense<0.000000e+00> : vector<8x512xf32>
    %732 = tpu.matmul %687, %731, %cst_233 {dimension_numbers = #tpu.dot_dimension_numbers<[1], [0], [0], [1], [0, 0, 1, 1], [], []>} : vector<8x128xf32>, vector<128x512xf32>, vector<8x512xf32> -> vector<8x512xf32>
    %733 = arith.addf %729, %732 : vector<8x512xf32>
    %734 = vector.extract_strided_slice %733 {offsets = [0, 0], sizes = [8, 128], strides = [1, 1]} : vector<8x512xf32> to vector<8x128xf32>
    %735 = arith.negf %734 : vector<8x128xf32>
    %736 = math.exp %735 : vector<8x128xf32>
    %cst_234 = arith.constant 1.000000e+00 : f32
    %737 = vector.broadcast %cst_234 : f32 to vector<8x128xf32>
    %738 = arith.addf %737, %736 : vector<8x128xf32>
    %739 = arith.divf %737, %738 : vector<8x128xf32>
    %740 = vector.extract_strided_slice %733 {offsets = [0, 128], sizes = [8, 128], strides = [1, 1]} : vector<8x512xf32> to vector<8x128xf32>
    %741 = arith.negf %740 : vector<8x128xf32>
    %742 = math.exp %741 : vector<8x128xf32>
    %cst_235 = arith.constant 1.000000e+00 : f32
    %743 = vector.broadcast %cst_235 : f32 to vector<8x128xf32>
    %744 = arith.addf %743, %742 : vector<8x128xf32>
    %745 = arith.divf %743, %744 : vector<8x128xf32>
    %746 = vector.extract_strided_slice %733 {offsets = [0, 256], sizes = [8, 128], strides = [1, 1]} : vector<8x512xf32> to vector<8x128xf32>
    %747 = math.tanh %746 : vector<8x128xf32>
    %748 = vector.extract_strided_slice %733 {offsets = [0, 384], sizes = [8, 128], strides = [1, 1]} : vector<8x512xf32> to vector<8x128xf32>
    %749 = arith.negf %748 : vector<8x128xf32>
    %750 = math.exp %749 : vector<8x128xf32>
    %cst_236 = arith.constant 1.000000e+00 : f32
    %751 = vector.broadcast %cst_236 : f32 to vector<8x128xf32>
    %752 = arith.addf %751, %750 : vector<8x128xf32>
    %753 = arith.divf %751, %752 : vector<8x128xf32>
    %754 = arith.mulf %745, %685 : vector<8x128xf32>
    %755 = arith.mulf %739, %747 : vector<8x128xf32>
    %756 = arith.addf %754, %755 : vector<8x128xf32>
    %757 = math.tanh %756 : vector<8x128xf32>
    %758 = arith.mulf %753, %757 : vector<8x128xf32>
    %759 = arith.index_cast %727 : i32 to index
    %c0_237 = arith.constant 0 : index
    %760 = vector.load %arg12[%759, %c0_237] : memref<64x256xf32, #tpu.memory_space<vmem>>, vector<8x128xf32>
    tpu.vector_store %arg12[%759, %c0_237], %758 {strides = array<i32>} : memref<64x256xf32, #tpu.memory_space<vmem>>, vector<8x128xf32>,
    %c7_i32_238 = arith.constant 7 : i32
    %761 = arith.subi %c7_i32_238, %c2_i32_227 : i32
    %c8_i32_239 = arith.constant 8 : i32
    %762 = arith.muli %761, %c8_i32_239 : i32
    %763 = tpu.assume_multiple %762, 8 : i32
    %764 = arith.index_cast %763 : i32 to index
    %c512_240 = arith.constant 512 : index
    %765 = vector.load %arg11[%764, %c512_240] : memref<64x1024xf32, #tpu.memory_space<vmem>>, vector<8x512xf32>
    %c1_241 = arith.constant 1 : index
    %c0_242 = arith.constant 0 : index
    %c0_243 = arith.constant 0 : index
    %766 = vector.load %arg6[%c1_241, %c0_242, %c0_243] : memref<2x128x512xf32, #tpu.memory_space<vmem>>, vector<1x128x512xf32>
    %767 = vector.shape_cast %766 : vector<1x128x512xf32> to vector<128x512xf32>
    %cst_244 = arith.constant dense<0.000000e+00> : vector<8x512xf32>
    %768 = tpu.matmul %723, %767, %cst_244 {dimension_numbers = #tpu.dot_dimension_numbers<[1], [0], [0], [1], [0, 0, 1, 1], [], []>} : vector<8x128xf32>, vector<128x512xf32>, vector<8x512xf32> -> vector<8x512xf32>
    %769 = arith.addf %765, %768 : vector<8x512xf32>
    %770 = vector.extract_strided_slice %769 {offsets = [0, 0], sizes = [8, 128], strides = [1, 1]} : vector<8x512xf32> to vector<8x128xf32>
    %771 = arith.negf %770 : vector<8x128xf32>
    %772 = math.exp %771 : vector<8x128xf32>
    %cst_245 = arith.constant 1.000000e+00 : f32
    %773 = vector.broadcast %cst_245 : f32 to vector<8x128xf32>
    %774 = arith.addf %773, %772 : vector<8x128xf32>
    %775 = arith.divf %773, %774 : vector<8x128xf32>
    %776 = vector.extract_strided_slice %769 {offsets = [0, 128], sizes = [8, 128], strides = [1, 1]} : vector<8x512xf32> to vector<8x128xf32>
    %777 = arith.negf %776 : vector<8x128xf32>
    %778 = math.exp %777 : vector<8x128xf32>
    %cst_246 = arith.constant 1.000000e+00 : f32
    %779 = vector.broadcast %cst_246 : f32 to vector<8x128xf32>
    %780 = arith.addf %779, %778 : vector<8x128xf32>
    %781 = arith.divf %779, %780 : vector<8x128xf32>
    %782 = vector.extract_strided_slice %769 {offsets = [0, 256], sizes = [8, 128], strides = [1, 1]} : vector<8x512xf32> to vector<8x128xf32>
    %783 = math.tanh %782 : vector<8x128xf32>
    %784 = vector.extract_strided_slice %769 {offsets = [0, 384], sizes = [8, 128], strides = [1, 1]} : vector<8x512xf32> to vector<8x128xf32>
    %785 = arith.negf %784 : vector<8x128xf32>
    %786 = math.exp %785 : vector<8x128xf32>
    %cst_247 = arith.constant 1.000000e+00 : f32
    %787 = vector.broadcast %cst_247 : f32 to vector<8x128xf32>
    %788 = arith.addf %787, %786 : vector<8x128xf32>
    %789 = arith.divf %787, %788 : vector<8x128xf32>
    %790 = arith.mulf %781, %721 : vector<8x128xf32>
    %791 = arith.mulf %775, %783 : vector<8x128xf32>
    %792 = arith.addf %790, %791 : vector<8x128xf32>
    %793 = math.tanh %792 : vector<8x128xf32>
    %794 = arith.mulf %789, %793 : vector<8x128xf32>
    %795 = arith.index_cast %763 : i32 to index
    %c128_248 = arith.constant 128 : index
    %796 = vector.load %arg12[%795, %c128_248] : memref<64x256xf32, #tpu.memory_space<vmem>>, vector<8x128xf32>
    tpu.vector_store %arg12[%795, %c128_248], %794 {strides = array<i32>} : memref<64x256xf32, #tpu.memory_space<vmem>>, vector<8x128xf32>,
    %c3_i32_249 = arith.constant 3 : i32
    %c8_i32_250 = arith.constant 8 : i32
    %797 = arith.muli %c3_i32_249, %c8_i32_250 : i32
    %798 = tpu.assume_multiple %797, 8 : i32
    %799 = arith.index_cast %798 : i32 to index
    %c0_251 = arith.constant 0 : index
    %800 = vector.load %arg11[%799, %c0_251] : memref<64x1024xf32, #tpu.memory_space<vmem>>, vector<8x512xf32>
    %c0_252 = arith.constant 0 : index
    %c0_253 = arith.constant 0 : index
    %c0_254 = arith.constant 0 : index
    %801 = vector.load %arg6[%c0_252, %c0_253, %c0_254] : memref<2x128x512xf32, #tpu.memory_space<vmem>>, vector<1x128x512xf32>
    %802 = vector.shape_cast %801 : vector<1x128x512xf32> to vector<128x512xf32>
    %cst_255 = arith.constant dense<0.000000e+00> : vector<8x512xf32>
    %803 = tpu.matmul %758, %802, %cst_255 {dimension_numbers = #tpu.dot_dimension_numbers<[1], [0], [0], [1], [0, 0, 1, 1], [], []>} : vector<8x128xf32>, vector<128x512xf32>, vector<8x512xf32> -> vector<8x512xf32>
    %804 = arith.addf %800, %803 : vector<8x512xf32>
    %805 = vector.extract_strided_slice %804 {offsets = [0, 0], sizes = [8, 128], strides = [1, 1]} : vector<8x512xf32> to vector<8x128xf32>
    %806 = arith.negf %805 : vector<8x128xf32>
    %807 = math.exp %806 : vector<8x128xf32>
    %cst_256 = arith.constant 1.000000e+00 : f32
    %808 = vector.broadcast %cst_256 : f32 to vector<8x128xf32>
    %809 = arith.addf %808, %807 : vector<8x128xf32>
    %810 = arith.divf %808, %809 : vector<8x128xf32>
    %811 = vector.extract_strided_slice %804 {offsets = [0, 128], sizes = [8, 128], strides = [1, 1]} : vector<8x512xf32> to vector<8x128xf32>
    %812 = arith.negf %811 : vector<8x128xf32>
    %813 = math.exp %812 : vector<8x128xf32>
    %cst_257 = arith.constant 1.000000e+00 : f32
    %814 = vector.broadcast %cst_257 : f32 to vector<8x128xf32>
    %815 = arith.addf %814, %813 : vector<8x128xf32>
    %816 = arith.divf %814, %815 : vector<8x128xf32>
    %817 = vector.extract_strided_slice %804 {offsets = [0, 256], sizes = [8, 128], strides = [1, 1]} : vector<8x512xf32> to vector<8x128xf32>
    %818 = math.tanh %817 : vector<8x128xf32>
    %819 = vector.extract_strided_slice %804 {offsets = [0, 384], sizes = [8, 128], strides = [1, 1]} : vector<8x512xf32> to vector<8x128xf32>
    %820 = arith.negf %819 : vector<8x128xf32>
    %821 = math.exp %820 : vector<8x128xf32>
    %cst_258 = arith.constant 1.000000e+00 : f32
    %822 = vector.broadcast %cst_258 : f32 to vector<8x128xf32>
    %823 = arith.addf %822, %821 : vector<8x128xf32>
    %824 = arith.divf %822, %823 : vector<8x128xf32>
    %825 = arith.mulf %816, %756 : vector<8x128xf32>
    %826 = arith.mulf %810, %818 : vector<8x128xf32>
    %827 = arith.addf %825, %826 : vector<8x128xf32>
    %828 = math.tanh %827 : vector<8x128xf32>
    %829 = arith.mulf %824, %828 : vector<8x128xf32>
    %830 = arith.index_cast %798 : i32 to index
    %c0_259 = arith.constant 0 : index
    %831 = vector.load %arg12[%830, %c0_259] : memref<64x256xf32, #tpu.memory_space<vmem>>, vector<8x128xf32>
    tpu.vector_store %arg12[%830, %c0_259], %829 {strides = array<i32>} : memref<64x256xf32, #tpu.memory_space<vmem>>, vector<8x128xf32>,
    %c7_i32_260 = arith.constant 7 : i32
    %832 = arith.subi %c7_i32_260, %c3_i32_249 : i32
    %c8_i32_261 = arith.constant 8 : i32
    %833 = arith.muli %832, %c8_i32_261 : i32
    %834 = tpu.assume_multiple %833, 8 : i32
    %835 = arith.index_cast %834 : i32 to index
    %c512_262 = arith.constant 512 : index
    %836 = vector.load %arg11[%835, %c512_262] : memref<64x1024xf32, #tpu.memory_space<vmem>>, vector<8x512xf32>
    %c1_263 = arith.constant 1 : index
    %c0_264 = arith.constant 0 : index
    %c0_265 = arith.constant 0 : index
    %837 = vector.load %arg6[%c1_263, %c0_264, %c0_265] : memref<2x128x512xf32, #tpu.memory_space<vmem>>, vector<1x128x512xf32>
    %838 = vector.shape_cast %837 : vector<1x128x512xf32> to vector<128x512xf32>
    %cst_266 = arith.constant dense<0.000000e+00> : vector<8x512xf32>
    %839 = tpu.matmul %794, %838, %cst_266 {dimension_numbers = #tpu.dot_dimension_numbers<[1], [0], [0], [1], [0, 0, 1, 1], [], []>} : vector<8x128xf32>, vector<128x512xf32>, vector<8x512xf32> -> vector<8x512xf32>
    %840 = arith.addf %836, %839 : vector<8x512xf32>
    %841 = vector.extract_strided_slice %840 {offsets = [0, 0], sizes = [8, 128], strides = [1, 1]} : vector<8x512xf32> to vector<8x128xf32>
    %842 = arith.negf %841 : vector<8x128xf32>
    %843 = math.exp %842 : vector<8x128xf32>
    %cst_267 = arith.constant 1.000000e+00 : f32
    %844 = vector.broadcast %cst_267 : f32 to vector<8x128xf32>
    %845 = arith.addf %844, %843 : vector<8x128xf32>
    %846 = arith.divf %844, %845 : vector<8x128xf32>
    %847 = vector.extract_strided_slice %840 {offsets = [0, 128], sizes = [8, 128], strides = [1, 1]} : vector<8x512xf32> to vector<8x128xf32>
    %848 = arith.negf %847 : vector<8x128xf32>
    %849 = math.exp %848 : vector<8x128xf32>
    %cst_268 = arith.constant 1.000000e+00 : f32
    %850 = vector.broadcast %cst_268 : f32 to vector<8x128xf32>
    %851 = arith.addf %850, %849 : vector<8x128xf32>
    %852 = arith.divf %850, %851 : vector<8x128xf32>
    %853 = vector.extract_strided_slice %840 {offsets = [0, 256], sizes = [8, 128], strides = [1, 1]} : vector<8x512xf32> to vector<8x128xf32>
    %854 = math.tanh %853 : vector<8x128xf32>
    %855 = vector.extract_strided_slice %840 {offsets = [0, 384], sizes = [8, 128], strides = [1, 1]} : vector<8x512xf32> to vector<8x128xf32>
    %856 = arith.negf %855 : vector<8x128xf32>
    %857 = math.exp %856 : vector<8x128xf32>
    %cst_269 = arith.constant 1.000000e+00 : f32
    %858 = vector.broadcast %cst_269 : f32 to vector<8x128xf32>
    %859 = arith.addf %858, %857 : vector<8x128xf32>
    %860 = arith.divf %858, %859 : vector<8x128xf32>
    %861 = arith.mulf %852, %792 : vector<8x128xf32>
    %862 = arith.mulf %846, %854 : vector<8x128xf32>
    %863 = arith.addf %861, %862 : vector<8x128xf32>
    %864 = math.tanh %863 : vector<8x128xf32>
    %865 = arith.mulf %860, %864 : vector<8x128xf32>
    %866 = arith.index_cast %834 : i32 to index
    %c128_270 = arith.constant 128 : index
    %867 = vector.load %arg12[%866, %c128_270] : memref<64x256xf32, #tpu.memory_space<vmem>>, vector<8x128xf32>
    tpu.vector_store %arg12[%866, %c128_270], %865 {strides = array<i32>} : memref<64x256xf32, #tpu.memory_space<vmem>>, vector<8x128xf32>,
    %c4_i32_271 = arith.constant 4 : i32
    %c8_i32_272 = arith.constant 8 : i32
    %868 = arith.muli %c4_i32_271, %c8_i32_272 : i32
    %869 = tpu.assume_multiple %868, 8 : i32
    %870 = arith.index_cast %869 : i32 to index
    %c0_273 = arith.constant 0 : index
    %871 = vector.load %arg11[%870, %c0_273] : memref<64x1024xf32, #tpu.memory_space<vmem>>, vector<8x512xf32>
    %c0_274 = arith.constant 0 : index
    %c0_275 = arith.constant 0 : index
    %c0_276 = arith.constant 0 : index
    %872 = vector.load %arg6[%c0_274, %c0_275, %c0_276] : memref<2x128x512xf32, #tpu.memory_space<vmem>>, vector<1x128x512xf32>
    %873 = vector.shape_cast %872 : vector<1x128x512xf32> to vector<128x512xf32>
    %cst_277 = arith.constant dense<0.000000e+00> : vector<8x512xf32>
    %874 = tpu.matmul %829, %873, %cst_277 {dimension_numbers = #tpu.dot_dimension_numbers<[1], [0], [0], [1], [0, 0, 1, 1], [], []>} : vector<8x128xf32>, vector<128x512xf32>, vector<8x512xf32> -> vector<8x512xf32>
    %875 = arith.addf %871, %874 : vector<8x512xf32>
    %876 = vector.extract_strided_slice %875 {offsets = [0, 0], sizes = [8, 128], strides = [1, 1]} : vector<8x512xf32> to vector<8x128xf32>
    %877 = arith.negf %876 : vector<8x128xf32>
    %878 = math.exp %877 : vector<8x128xf32>
    %cst_278 = arith.constant 1.000000e+00 : f32
    %879 = vector.broadcast %cst_278 : f32 to vector<8x128xf32>
    %880 = arith.addf %879, %878 : vector<8x128xf32>
    %881 = arith.divf %879, %880 : vector<8x128xf32>
    %882 = vector.extract_strided_slice %875 {offsets = [0, 128], sizes = [8, 128], strides = [1, 1]} : vector<8x512xf32> to vector<8x128xf32>
    %883 = arith.negf %882 : vector<8x128xf32>
    %884 = math.exp %883 : vector<8x128xf32>
    %cst_279 = arith.constant 1.000000e+00 : f32
    %885 = vector.broadcast %cst_279 : f32 to vector<8x128xf32>
    %886 = arith.addf %885, %884 : vector<8x128xf32>
    %887 = arith.divf %885, %886 : vector<8x128xf32>
    %888 = vector.extract_strided_slice %875 {offsets = [0, 256], sizes = [8, 128], strides = [1, 1]} : vector<8x512xf32> to vector<8x128xf32>
    %889 = math.tanh %888 : vector<8x128xf32>
    %890 = vector.extract_strided_slice %875 {offsets = [0, 384], sizes = [8, 128], strides = [1, 1]} : vector<8x512xf32> to vector<8x128xf32>
    %891 = arith.negf %890 : vector<8x128xf32>
    %892 = math.exp %891 : vector<8x128xf32>
    %cst_280 = arith.constant 1.000000e+00 : f32
    %893 = vector.broadcast %cst_280 : f32 to vector<8x128xf32>
    %894 = arith.addf %893, %892 : vector<8x128xf32>
    %895 = arith.divf %893, %894 : vector<8x128xf32>
    %896 = arith.mulf %887, %827 : vector<8x128xf32>
    %897 = arith.mulf %881, %889 : vector<8x128xf32>
    %898 = arith.addf %896, %897 : vector<8x128xf32>
    %899 = math.tanh %898 : vector<8x128xf32>
    %900 = arith.mulf %895, %899 : vector<8x128xf32>
    %901 = arith.index_cast %869 : i32 to index
    %c0_281 = arith.constant 0 : index
    %902 = vector.load %arg12[%901, %c0_281] : memref<64x256xf32, #tpu.memory_space<vmem>>, vector<8x128xf32>
    tpu.vector_store %arg12[%901, %c0_281], %900 {strides = array<i32>} : memref<64x256xf32, #tpu.memory_space<vmem>>, vector<8x128xf32>,
    %c7_i32_282 = arith.constant 7 : i32
    %903 = arith.subi %c7_i32_282, %c4_i32_271 : i32
    %c8_i32_283 = arith.constant 8 : i32
    %904 = arith.muli %903, %c8_i32_283 : i32
    %905 = tpu.assume_multiple %904, 8 : i32
    %906 = arith.index_cast %905 : i32 to index
    %c512_284 = arith.constant 512 : index
    %907 = vector.load %arg11[%906, %c512_284] : memref<64x1024xf32, #tpu.memory_space<vmem>>, vector<8x512xf32>
    %c1_285 = arith.constant 1 : index
    %c0_286 = arith.constant 0 : index
    %c0_287 = arith.constant 0 : index
    %908 = vector.load %arg6[%c1_285, %c0_286, %c0_287] : memref<2x128x512xf32, #tpu.memory_space<vmem>>, vector<1x128x512xf32>
    %909 = vector.shape_cast %908 : vector<1x128x512xf32> to vector<128x512xf32>
    %cst_288 = arith.constant dense<0.000000e+00> : vector<8x512xf32>
    %910 = tpu.matmul %865, %909, %cst_288 {dimension_numbers = #tpu.dot_dimension_numbers<[1], [0], [0], [1], [0, 0, 1, 1], [], []>} : vector<8x128xf32>, vector<128x512xf32>, vector<8x512xf32> -> vector<8x512xf32>
    %911 = arith.addf %907, %910 : vector<8x512xf32>
    %912 = vector.extract_strided_slice %911 {offsets = [0, 0], sizes = [8, 128], strides = [1, 1]} : vector<8x512xf32> to vector<8x128xf32>
    %913 = arith.negf %912 : vector<8x128xf32>
    %914 = math.exp %913 : vector<8x128xf32>
    %cst_289 = arith.constant 1.000000e+00 : f32
    %915 = vector.broadcast %cst_289 : f32 to vector<8x128xf32>
    %916 = arith.addf %915, %914 : vector<8x128xf32>
    %917 = arith.divf %915, %916 : vector<8x128xf32>
    %918 = vector.extract_strided_slice %911 {offsets = [0, 128], sizes = [8, 128], strides = [1, 1]} : vector<8x512xf32> to vector<8x128xf32>
    %919 = arith.negf %918 : vector<8x128xf32>
    %920 = math.exp %919 : vector<8x128xf32>
    %cst_290 = arith.constant 1.000000e+00 : f32
    %921 = vector.broadcast %cst_290 : f32 to vector<8x128xf32>
    %922 = arith.addf %921, %920 : vector<8x128xf32>
    %923 = arith.divf %921, %922 : vector<8x128xf32>
    %924 = vector.extract_strided_slice %911 {offsets = [0, 256], sizes = [8, 128], strides = [1, 1]} : vector<8x512xf32> to vector<8x128xf32>
    %925 = math.tanh %924 : vector<8x128xf32>
    %926 = vector.extract_strided_slice %911 {offsets = [0, 384], sizes = [8, 128], strides = [1, 1]} : vector<8x512xf32> to vector<8x128xf32>
    %927 = arith.negf %926 : vector<8x128xf32>
    %928 = math.exp %927 : vector<8x128xf32>
    %cst_291 = arith.constant 1.000000e+00 : f32
    %929 = vector.broadcast %cst_291 : f32 to vector<8x128xf32>
    %930 = arith.addf %929, %928 : vector<8x128xf32>
    %931 = arith.divf %929, %930 : vector<8x128xf32>
    %932 = arith.mulf %923, %863 : vector<8x128xf32>
    %933 = arith.mulf %917, %925 : vector<8x128xf32>
    %934 = arith.addf %932, %933 : vector<8x128xf32>
    %935 = math.tanh %934 : vector<8x128xf32>
    %936 = arith.mulf %931, %935 : vector<8x128xf32>
    %937 = arith.index_cast %905 : i32 to index
    %c128_292 = arith.constant 128 : index
    %938 = vector.load %arg12[%937, %c128_292] : memref<64x256xf32, #tpu.memory_space<vmem>>, vector<8x128xf32>
    tpu.vector_store %arg12[%937, %c128_292], %936 {strides = array<i32>} : memref<64x256xf32, #tpu.memory_space<vmem>>, vector<8x128xf32>,
    %c5_i32_293 = arith.constant 5 : i32
    %c8_i32_294 = arith.constant 8 : i32
    %939 = arith.muli %c5_i32_293, %c8_i32_294 : i32
    %940 = tpu.assume_multiple %939, 8 : i32
    %941 = arith.index_cast %940 : i32 to index
    %c0_295 = arith.constant 0 : index
    %942 = vector.load %arg11[%941, %c0_295] : memref<64x1024xf32, #tpu.memory_space<vmem>>, vector<8x512xf32>
    %c0_296 = arith.constant 0 : index
    %c0_297 = arith.constant 0 : index
    %c0_298 = arith.constant 0 : index
    %943 = vector.load %arg6[%c0_296, %c0_297, %c0_298] : memref<2x128x512xf32, #tpu.memory_space<vmem>>, vector<1x128x512xf32>
    %944 = vector.shape_cast %943 : vector<1x128x512xf32> to vector<128x512xf32>
    %cst_299 = arith.constant dense<0.000000e+00> : vector<8x512xf32>
    %945 = tpu.matmul %900, %944, %cst_299 {dimension_numbers = #tpu.dot_dimension_numbers<[1], [0], [0], [1], [0, 0, 1, 1], [], []>} : vector<8x128xf32>, vector<128x512xf32>, vector<8x512xf32> -> vector<8x512xf32>
    %946 = arith.addf %942, %945 : vector<8x512xf32>
    %947 = vector.extract_strided_slice %946 {offsets = [0, 0], sizes = [8, 128], strides = [1, 1]} : vector<8x512xf32> to vector<8x128xf32>
    %948 = arith.negf %947 : vector<8x128xf32>
    %949 = math.exp %948 : vector<8x128xf32>
    %cst_300 = arith.constant 1.000000e+00 : f32
    %950 = vector.broadcast %cst_300 : f32 to vector<8x128xf32>
    %951 = arith.addf %950, %949 : vector<8x128xf32>
    %952 = arith.divf %950, %951 : vector<8x128xf32>
    %953 = vector.extract_strided_slice %946 {offsets = [0, 128], sizes = [8, 128], strides = [1, 1]} : vector<8x512xf32> to vector<8x128xf32>
    %954 = arith.negf %953 : vector<8x128xf32>
    %955 = math.exp %954 : vector<8x128xf32>
    %cst_301 = arith.constant 1.000000e+00 : f32
    %956 = vector.broadcast %cst_301 : f32 to vector<8x128xf32>
    %957 = arith.addf %956, %955 : vector<8x128xf32>
    %958 = arith.divf %956, %957 : vector<8x128xf32>
    %959 = vector.extract_strided_slice %946 {offsets = [0, 256], sizes = [8, 128], strides = [1, 1]} : vector<8x512xf32> to vector<8x128xf32>
    %960 = math.tanh %959 : vector<8x128xf32>
    %961 = vector.extract_strided_slice %946 {offsets = [0, 384], sizes = [8, 128], strides = [1, 1]} : vector<8x512xf32> to vector<8x128xf32>
    %962 = arith.negf %961 : vector<8x128xf32>
    %963 = math.exp %962 : vector<8x128xf32>
    %cst_302 = arith.constant 1.000000e+00 : f32
    %964 = vector.broadcast %cst_302 : f32 to vector<8x128xf32>
    %965 = arith.addf %964, %963 : vector<8x128xf32>
    %966 = arith.divf %964, %965 : vector<8x128xf32>
    %967 = arith.mulf %958, %898 : vector<8x128xf32>
    %968 = arith.mulf %952, %960 : vector<8x128xf32>
    %969 = arith.addf %967, %968 : vector<8x128xf32>
    %970 = math.tanh %969 : vector<8x128xf32>
    %971 = arith.mulf %966, %970 : vector<8x128xf32>
    %972 = arith.index_cast %940 : i32 to index
    %c0_303 = arith.constant 0 : index
    %973 = vector.load %arg12[%972, %c0_303] : memref<64x256xf32, #tpu.memory_space<vmem>>, vector<8x128xf32>
    tpu.vector_store %arg12[%972, %c0_303], %971 {strides = array<i32>} : memref<64x256xf32, #tpu.memory_space<vmem>>, vector<8x128xf32>,
    %c7_i32_304 = arith.constant 7 : i32
    %974 = arith.subi %c7_i32_304, %c5_i32_293 : i32
    %c8_i32_305 = arith.constant 8 : i32
    %975 = arith.muli %974, %c8_i32_305 : i32
    %976 = tpu.assume_multiple %975, 8 : i32
    %977 = arith.index_cast %976 : i32 to index
    %c512_306 = arith.constant 512 : index
    %978 = vector.load %arg11[%977, %c512_306] : memref<64x1024xf32, #tpu.memory_space<vmem>>, vector<8x512xf32>
    %c1_307 = arith.constant 1 : index
    %c0_308 = arith.constant 0 : index
    %c0_309 = arith.constant 0 : index
    %979 = vector.load %arg6[%c1_307, %c0_308, %c0_309] : memref<2x128x512xf32, #tpu.memory_space<vmem>>, vector<1x128x512xf32>
    %980 = vector.shape_cast %979 : vector<1x128x512xf32> to vector<128x512xf32>
    %cst_310 = arith.constant dense<0.000000e+00> : vector<8x512xf32>
    %981 = tpu.matmul %936, %980, %cst_310 {dimension_numbers = #tpu.dot_dimension_numbers<[1], [0], [0], [1], [0, 0, 1, 1], [], []>} : vector<8x128xf32>, vector<128x512xf32>, vector<8x512xf32> -> vector<8x512xf32>
    %982 = arith.addf %978, %981 : vector<8x512xf32>
    %983 = vector.extract_strided_slice %982 {offsets = [0, 0], sizes = [8, 128], strides = [1, 1]} : vector<8x512xf32> to vector<8x128xf32>
    %984 = arith.negf %983 : vector<8x128xf32>
    %985 = math.exp %984 : vector<8x128xf32>
    %cst_311 = arith.constant 1.000000e+00 : f32
    %986 = vector.broadcast %cst_311 : f32 to vector<8x128xf32>
    %987 = arith.addf %986, %985 : vector<8x128xf32>
    %988 = arith.divf %986, %987 : vector<8x128xf32>
    %989 = vector.extract_strided_slice %982 {offsets = [0, 128], sizes = [8, 128], strides = [1, 1]} : vector<8x512xf32> to vector<8x128xf32>
    %990 = arith.negf %989 : vector<8x128xf32>
    %991 = math.exp %990 : vector<8x128xf32>
    %cst_312 = arith.constant 1.000000e+00 : f32
    %992 = vector.broadcast %cst_312 : f32 to vector<8x128xf32>
    %993 = arith.addf %992, %991 : vector<8x128xf32>
    %994 = arith.divf %992, %993 : vector<8x128xf32>
    %995 = vector.extract_strided_slice %982 {offsets = [0, 256], sizes = [8, 128], strides = [1, 1]} : vector<8x512xf32> to vector<8x128xf32>
    %996 = math.tanh %995 : vector<8x128xf32>
    %997 = vector.extract_strided_slice %982 {offsets = [0, 384], sizes = [8, 128], strides = [1, 1]} : vector<8x512xf32> to vector<8x128xf32>
    %998 = arith.negf %997 : vector<8x128xf32>
    %999 = math.exp %998 : vector<8x128xf32>
    %cst_313 = arith.constant 1.000000e+00 : f32
    %1000 = vector.broadcast %cst_313 : f32 to vector<8x128xf32>
    %1001 = arith.addf %1000, %999 : vector<8x128xf32>
    %1002 = arith.divf %1000, %1001 : vector<8x128xf32>
    %1003 = arith.mulf %994, %934 : vector<8x128xf32>
    %1004 = arith.mulf %988, %996 : vector<8x128xf32>
    %1005 = arith.addf %1003, %1004 : vector<8x128xf32>
    %1006 = math.tanh %1005 : vector<8x128xf32>
    %1007 = arith.mulf %1002, %1006 : vector<8x128xf32>
    %1008 = arith.index_cast %976 : i32 to index
    %c128_314 = arith.constant 128 : index
    %1009 = vector.load %arg12[%1008, %c128_314] : memref<64x256xf32, #tpu.memory_space<vmem>>, vector<8x128xf32>
    tpu.vector_store %arg12[%1008, %c128_314], %1007 {strides = array<i32>} : memref<64x256xf32, #tpu.memory_space<vmem>>, vector<8x128xf32>,
    %c6_i32_315 = arith.constant 6 : i32
    %c8_i32_316 = arith.constant 8 : i32
    %1010 = arith.muli %c6_i32_315, %c8_i32_316 : i32
    %1011 = tpu.assume_multiple %1010, 8 : i32
    %1012 = arith.index_cast %1011 : i32 to index
    %c0_317 = arith.constant 0 : index
    %1013 = vector.load %arg11[%1012, %c0_317] : memref<64x1024xf32, #tpu.memory_space<vmem>>, vector<8x512xf32>
    %c0_318 = arith.constant 0 : index
    %c0_319 = arith.constant 0 : index
    %c0_320 = arith.constant 0 : index
    %1014 = vector.load %arg6[%c0_318, %c0_319, %c0_320] : memref<2x128x512xf32, #tpu.memory_space<vmem>>, vector<1x128x512xf32>
    %1015 = vector.shape_cast %1014 : vector<1x128x512xf32> to vector<128x512xf32>
    %cst_321 = arith.constant dense<0.000000e+00> : vector<8x512xf32>
    %1016 = tpu.matmul %971, %1015, %cst_321 {dimension_numbers = #tpu.dot_dimension_numbers<[1], [0], [0], [1], [0, 0, 1, 1], [], []>} : vector<8x128xf32>, vector<128x512xf32>, vector<8x512xf32> -> vector<8x512xf32>
    %1017 = arith.addf %1013, %1016 : vector<8x512xf32>
    %1018 = vector.extract_strided_slice %1017 {offsets = [0, 0], sizes = [8, 128], strides = [1, 1]} : vector<8x512xf32> to vector<8x128xf32>
    %1019 = arith.negf %1018 : vector<8x128xf32>
    %1020 = math.exp %1019 : vector<8x128xf32>
    %cst_322 = arith.constant 1.000000e+00 : f32
    %1021 = vector.broadcast %cst_322 : f32 to vector<8x128xf32>
    %1022 = arith.addf %1021, %1020 : vector<8x128xf32>
    %1023 = arith.divf %1021, %1022 : vector<8x128xf32>
    %1024 = vector.extract_strided_slice %1017 {offsets = [0, 128], sizes = [8, 128], strides = [1, 1]} : vector<8x512xf32> to vector<8x128xf32>
    %1025 = arith.negf %1024 : vector<8x128xf32>
    %1026 = math.exp %1025 : vector<8x128xf32>
    %cst_323 = arith.constant 1.000000e+00 : f32
    %1027 = vector.broadcast %cst_323 : f32 to vector<8x128xf32>
    %1028 = arith.addf %1027, %1026 : vector<8x128xf32>
    %1029 = arith.divf %1027, %1028 : vector<8x128xf32>
    %1030 = vector.extract_strided_slice %1017 {offsets = [0, 256], sizes = [8, 128], strides = [1, 1]} : vector<8x512xf32> to vector<8x128xf32>
    %1031 = math.tanh %1030 : vector<8x128xf32>
    %1032 = vector.extract_strided_slice %1017 {offsets = [0, 384], sizes = [8, 128], strides = [1, 1]} : vector<8x512xf32> to vector<8x128xf32>
    %1033 = arith.negf %1032 : vector<8x128xf32>
    %1034 = math.exp %1033 : vector<8x128xf32>
    %cst_324 = arith.constant 1.000000e+00 : f32
    %1035 = vector.broadcast %cst_324 : f32 to vector<8x128xf32>
    %1036 = arith.addf %1035, %1034 : vector<8x128xf32>
    %1037 = arith.divf %1035, %1036 : vector<8x128xf32>
    %1038 = arith.mulf %1029, %969 : vector<8x128xf32>
    %1039 = arith.mulf %1023, %1031 : vector<8x128xf32>
    %1040 = arith.addf %1038, %1039 : vector<8x128xf32>
    %1041 = math.tanh %1040 : vector<8x128xf32>
    %1042 = arith.mulf %1037, %1041 : vector<8x128xf32>
    %1043 = arith.index_cast %1011 : i32 to index
    %c0_325 = arith.constant 0 : index
    %1044 = vector.load %arg12[%1043, %c0_325] : memref<64x256xf32, #tpu.memory_space<vmem>>, vector<8x128xf32>
    tpu.vector_store %arg12[%1043, %c0_325], %1042 {strides = array<i32>} : memref<64x256xf32, #tpu.memory_space<vmem>>, vector<8x128xf32>,
    %c7_i32_326 = arith.constant 7 : i32
    %1045 = arith.subi %c7_i32_326, %c6_i32_315 : i32
    %c8_i32_327 = arith.constant 8 : i32
    %1046 = arith.muli %1045, %c8_i32_327 : i32
    %1047 = tpu.assume_multiple %1046, 8 : i32
    %1048 = arith.index_cast %1047 : i32 to index
    %c512_328 = arith.constant 512 : index
    %1049 = vector.load %arg11[%1048, %c512_328] : memref<64x1024xf32, #tpu.memory_space<vmem>>, vector<8x512xf32>
    %c1_329 = arith.constant 1 : index
    %c0_330 = arith.constant 0 : index
    %c0_331 = arith.constant 0 : index
    %1050 = vector.load %arg6[%c1_329, %c0_330, %c0_331] : memref<2x128x512xf32, #tpu.memory_space<vmem>>, vector<1x128x512xf32>
    %1051 = vector.shape_cast %1050 : vector<1x128x512xf32> to vector<128x512xf32>
    %cst_332 = arith.constant dense<0.000000e+00> : vector<8x512xf32>
    %1052 = tpu.matmul %1007, %1051, %cst_332 {dimension_numbers = #tpu.dot_dimension_numbers<[1], [0], [0], [1], [0, 0, 1, 1], [], []>} : vector<8x128xf32>, vector<128x512xf32>, vector<8x512xf32> -> vector<8x512xf32>
    %1053 = arith.addf %1049, %1052 : vector<8x512xf32>
    %1054 = vector.extract_strided_slice %1053 {offsets = [0, 0], sizes = [8, 128], strides = [1, 1]} : vector<8x512xf32> to vector<8x128xf32>
    %1055 = arith.negf %1054 : vector<8x128xf32>
    %1056 = math.exp %1055 : vector<8x128xf32>
    %cst_333 = arith.constant 1.000000e+00 : f32
    %1057 = vector.broadcast %cst_333 : f32 to vector<8x128xf32>
    %1058 = arith.addf %1057, %1056 : vector<8x128xf32>
    %1059 = arith.divf %1057, %1058 : vector<8x128xf32>
    %1060 = vector.extract_strided_slice %1053 {offsets = [0, 128], sizes = [8, 128], strides = [1, 1]} : vector<8x512xf32> to vector<8x128xf32>
    %1061 = arith.negf %1060 : vector<8x128xf32>
    %1062 = math.exp %1061 : vector<8x128xf32>
    %cst_334 = arith.constant 1.000000e+00 : f32
    %1063 = vector.broadcast %cst_334 : f32 to vector<8x128xf32>
    %1064 = arith.addf %1063, %1062 : vector<8x128xf32>
    %1065 = arith.divf %1063, %1064 : vector<8x128xf32>
    %1066 = vector.extract_strided_slice %1053 {offsets = [0, 256], sizes = [8, 128], strides = [1, 1]} : vector<8x512xf32> to vector<8x128xf32>
    %1067 = math.tanh %1066 : vector<8x128xf32>
    %1068 = vector.extract_strided_slice %1053 {offsets = [0, 384], sizes = [8, 128], strides = [1, 1]} : vector<8x512xf32> to vector<8x128xf32>
    %1069 = arith.negf %1068 : vector<8x128xf32>
    %1070 = math.exp %1069 : vector<8x128xf32>
    %cst_335 = arith.constant 1.000000e+00 : f32
    %1071 = vector.broadcast %cst_335 : f32 to vector<8x128xf32>
    %1072 = arith.addf %1071, %1070 : vector<8x128xf32>
    %1073 = arith.divf %1071, %1072 : vector<8x128xf32>
    %1074 = arith.mulf %1065, %1005 : vector<8x128xf32>
    %1075 = arith.mulf %1059, %1067 : vector<8x128xf32>
    %1076 = arith.addf %1074, %1075 : vector<8x128xf32>
    %1077 = math.tanh %1076 : vector<8x128xf32>
    %1078 = arith.mulf %1073, %1077 : vector<8x128xf32>
    %1079 = arith.index_cast %1047 : i32 to index
    %c128_336 = arith.constant 128 : index
    %1080 = vector.load %arg12[%1079, %c128_336] : memref<64x256xf32, #tpu.memory_space<vmem>>, vector<8x128xf32>
    tpu.vector_store %arg12[%1079, %c128_336], %1078 {strides = array<i32>} : memref<64x256xf32, #tpu.memory_space<vmem>>, vector<8x128xf32>,
    %c7_i32_337 = arith.constant 7 : i32
    %c8_i32_338 = arith.constant 8 : i32
    %1081 = arith.muli %c7_i32_337, %c8_i32_338 : i32
    %1082 = tpu.assume_multiple %1081, 8 : i32
    %1083 = arith.index_cast %1082 : i32 to index
    %c0_339 = arith.constant 0 : index
    %1084 = vector.load %arg11[%1083, %c0_339] : memref<64x1024xf32, #tpu.memory_space<vmem>>, vector<8x512xf32>
    %c0_340 = arith.constant 0 : index
    %c0_341 = arith.constant 0 : index
    %c0_342 = arith.constant 0 : index
    %1085 = vector.load %arg6[%c0_340, %c0_341, %c0_342] : memref<2x128x512xf32, #tpu.memory_space<vmem>>, vector<1x128x512xf32>
    %1086 = vector.shape_cast %1085 : vector<1x128x512xf32> to vector<128x512xf32>
    %cst_343 = arith.constant dense<0.000000e+00> : vector<8x512xf32>
    %1087 = tpu.matmul %1042, %1086, %cst_343 {dimension_numbers = #tpu.dot_dimension_numbers<[1], [0], [0], [1], [0, 0, 1, 1], [], []>} : vector<8x128xf32>, vector<128x512xf32>, vector<8x512xf32> -> vector<8x512xf32>
    %1088 = arith.addf %1084, %1087 : vector<8x512xf32>
    %1089 = vector.extract_strided_slice %1088 {offsets = [0, 0], sizes = [8, 128], strides = [1, 1]} : vector<8x512xf32> to vector<8x128xf32>
    %1090 = arith.negf %1089 : vector<8x128xf32>
    %1091 = math.exp %1090 : vector<8x128xf32>
    %cst_344 = arith.constant 1.000000e+00 : f32
    %1092 = vector.broadcast %cst_344 : f32 to vector<8x128xf32>
    %1093 = arith.addf %1092, %1091 : vector<8x128xf32>
    %1094 = arith.divf %1092, %1093 : vector<8x128xf32>
    %1095 = vector.extract_strided_slice %1088 {offsets = [0, 128], sizes = [8, 128], strides = [1, 1]} : vector<8x512xf32> to vector<8x128xf32>
    %1096 = arith.negf %1095 : vector<8x128xf32>
    %1097 = math.exp %1096 : vector<8x128xf32>
    %cst_345 = arith.constant 1.000000e+00 : f32
    %1098 = vector.broadcast %cst_345 : f32 to vector<8x128xf32>
    %1099 = arith.addf %1098, %1097 : vector<8x128xf32>
    %1100 = arith.divf %1098, %1099 : vector<8x128xf32>
    %1101 = vector.extract_strided_slice %1088 {offsets = [0, 256], sizes = [8, 128], strides = [1, 1]} : vector<8x512xf32> to vector<8x128xf32>
    %1102 = math.tanh %1101 : vector<8x128xf32>
    %1103 = vector.extract_strided_slice %1088 {offsets = [0, 384], sizes = [8, 128], strides = [1, 1]} : vector<8x512xf32> to vector<8x128xf32>
    %1104 = arith.negf %1103 : vector<8x128xf32>
    %1105 = math.exp %1104 : vector<8x128xf32>
    %cst_346 = arith.constant 1.000000e+00 : f32
    %1106 = vector.broadcast %cst_346 : f32 to vector<8x128xf32>
    %1107 = arith.addf %1106, %1105 : vector<8x128xf32>
    %1108 = arith.divf %1106, %1107 : vector<8x128xf32>
    %1109 = arith.mulf %1100, %1040 : vector<8x128xf32>
    %1110 = arith.mulf %1094, %1102 : vector<8x128xf32>
    %1111 = arith.addf %1109, %1110 : vector<8x128xf32>
    %1112 = math.tanh %1111 : vector<8x128xf32>
    %1113 = arith.mulf %1108, %1112 : vector<8x128xf32>
    %1114 = arith.index_cast %1082 : i32 to index
    %c0_347 = arith.constant 0 : index
    %1115 = vector.load %arg12[%1114, %c0_347] : memref<64x256xf32, #tpu.memory_space<vmem>>, vector<8x128xf32>
    tpu.vector_store %arg12[%1114, %c0_347], %1113 {strides = array<i32>} : memref<64x256xf32, #tpu.memory_space<vmem>>, vector<8x128xf32>,
    %c7_i32_348 = arith.constant 7 : i32
    %1116 = arith.subi %c7_i32_348, %c7_i32_337 : i32
    %c8_i32_349 = arith.constant 8 : i32
    %1117 = arith.muli %1116, %c8_i32_349 : i32
    %1118 = tpu.assume_multiple %1117, 8 : i32
    %1119 = arith.index_cast %1118 : i32 to index
    %c512_350 = arith.constant 512 : index
    %1120 = vector.load %arg11[%1119, %c512_350] : memref<64x1024xf32, #tpu.memory_space<vmem>>, vector<8x512xf32>
    %c1_351 = arith.constant 1 : index
    %c0_352 = arith.constant 0 : index
    %c0_353 = arith.constant 0 : index
    %1121 = vector.load %arg6[%c1_351, %c0_352, %c0_353] : memref<2x128x512xf32, #tpu.memory_space<vmem>>, vector<1x128x512xf32>
    %1122 = vector.shape_cast %1121 : vector<1x128x512xf32> to vector<128x512xf32>
    %cst_354 = arith.constant dense<0.000000e+00> : vector<8x512xf32>
    %1123 = tpu.matmul %1078, %1122, %cst_354 {dimension_numbers = #tpu.dot_dimension_numbers<[1], [0], [0], [1], [0, 0, 1, 1], [], []>} : vector<8x128xf32>, vector<128x512xf32>, vector<8x512xf32> -> vector<8x512xf32>
    %1124 = arith.addf %1120, %1123 : vector<8x512xf32>
    %1125 = vector.extract_strided_slice %1124 {offsets = [0, 0], sizes = [8, 128], strides = [1, 1]} : vector<8x512xf32> to vector<8x128xf32>
    %1126 = arith.negf %1125 : vector<8x128xf32>
    %1127 = math.exp %1126 : vector<8x128xf32>
    %cst_355 = arith.constant 1.000000e+00 : f32
    %1128 = vector.broadcast %cst_355 : f32 to vector<8x128xf32>
    %1129 = arith.addf %1128, %1127 : vector<8x128xf32>
    %1130 = arith.divf %1128, %1129 : vector<8x128xf32>
    %1131 = vector.extract_strided_slice %1124 {offsets = [0, 128], sizes = [8, 128], strides = [1, 1]} : vector<8x512xf32> to vector<8x128xf32>
    %1132 = arith.negf %1131 : vector<8x128xf32>
    %1133 = math.exp %1132 : vector<8x128xf32>
    %cst_356 = arith.constant 1.000000e+00 : f32
    %1134 = vector.broadcast %cst_356 : f32 to vector<8x128xf32>
    %1135 = arith.addf %1134, %1133 : vector<8x128xf32>
    %1136 = arith.divf %1134, %1135 : vector<8x128xf32>
    %1137 = vector.extract_strided_slice %1124 {offsets = [0, 256], sizes = [8, 128], strides = [1, 1]} : vector<8x512xf32> to vector<8x128xf32>
    %1138 = math.tanh %1137 : vector<8x128xf32>
    %1139 = vector.extract_strided_slice %1124 {offsets = [0, 384], sizes = [8, 128], strides = [1, 1]} : vector<8x512xf32> to vector<8x128xf32>
    %1140 = arith.negf %1139 : vector<8x128xf32>
    %1141 = math.exp %1140 : vector<8x128xf32>
    %cst_357 = arith.constant 1.000000e+00 : f32
    %1142 = vector.broadcast %cst_357 : f32 to vector<8x128xf32>
    %1143 = arith.addf %1142, %1141 : vector<8x128xf32>
    %1144 = arith.divf %1142, %1143 : vector<8x128xf32>
    %1145 = arith.mulf %1136, %1076 : vector<8x128xf32>
    %1146 = arith.mulf %1130, %1138 : vector<8x128xf32>
    %1147 = arith.addf %1145, %1146 : vector<8x128xf32>
    %1148 = math.tanh %1147 : vector<8x128xf32>
    %1149 = arith.mulf %1144, %1148 : vector<8x128xf32>
    %1150 = arith.index_cast %1118 : i32 to index
    %c128_358 = arith.constant 128 : index
    %1151 = vector.load %arg12[%1150, %c128_358] : memref<64x256xf32, #tpu.memory_space<vmem>>, vector<8x128xf32>
    tpu.vector_store %arg12[%1150, %c128_358], %1149 {strides = array<i32>} : memref<64x256xf32, #tpu.memory_space<vmem>>, vector<8x128xf32>,
    %c8_i32_359 = arith.constant 8 : i32
    %c0_360 = arith.constant 0 : index
    %c0_361 = arith.constant 0 : index
    %1152 = vector.load %arg12[%c0_360, %c0_361] : memref<64x256xf32, #tpu.memory_space<vmem>>, vector<64x256xf32>
    %c0_362 = arith.constant 0 : index
    %c0_363 = arith.constant 0 : index
    %1153 = vector.load %arg8[%c0_362, %c0_363] : memref<256x128xf32, #tpu.memory_space<vmem>>, vector<256x128xf32>
    %cst_364 = arith.constant dense<0.000000e+00> : vector<64x128xf32>
    %1154 = tpu.matmul %1152, %1153, %cst_364 {dimension_numbers = #tpu.dot_dimension_numbers<[1], [0], [0], [1], [0, 0, 1, 1], [], []>} : vector<64x256xf32>, vector<256x128xf32>, vector<64x128xf32> -> vector<64x128xf32>
    %c0_365 = arith.constant 0 : index
    %c0_366 = arith.constant 0 : index
    %1155 = vector.load %arg9[%c0_365, %c0_366] : memref<1x128xf32, #tpu.memory_space<vmem>>, vector<1x128xf32>
    %1156 = vector.broadcast %1155 : vector<1x128xf32> to vector<64x128xf32>
    %1157 = arith.addf %1154, %1156 : vector<64x128xf32>
    %1158 = arith.negf %1157 : vector<64x128xf32>
    %1159 = math.exp %1158 : vector<64x128xf32>
    %cst_367 = arith.constant 1.000000e+00 : f32
    %1160 = vector.broadcast %cst_367 : f32 to vector<64x128xf32>
    %1161 = arith.addf %1160, %1159 : vector<64x128xf32>
    %1162 = arith.divf %1160, %1161 : vector<64x128xf32>
    %c0_368 = arith.constant 0 : index
    %c0_369 = arith.constant 0 : index
    %1163 = vector.load %arg10[%c0_368, %c0_369] : memref<64x128xf32, #tpu.memory_space<vmem>>, vector<64x128xf32>
    tpu.vector_store %arg10[%c0_368, %c0_369], %1162 {strides = array<i32>} : memref<64x128xf32, #tpu.memory_space<vmem>>, vector<64x128xf32>,
    return
  }
  func.func @transform_0(%arg0: i32) -> (i32, i32) {
    %c0_i32 = arith.constant 0 : i32
    %c0_i32_0 = arith.constant 0 : i32
    %c0_i32_1 = arith.constant 0 : i32
    return %c0_i32, %c0_i32_0 : i32, i32
  }
  func.func @transform_1(%arg0: i32) -> (i32, i32) {
    %c0_i32 = arith.constant 0 : i32
    %c0_i32_0 = arith.constant 0 : i32
    %c0_i32_1 = arith.constant 0 : i32
    return %c0_i32, %c0_i32_0 : i32, i32
  }
  func.func @transform_2(%arg0: i32) -> (i32, i32, i32) {
    %c0_i32 = arith.constant 0 : i32
    %c0_i32_0 = arith.constant 0 : i32
    %c0_i32_1 = arith.constant 0 : i32
    %c0_i32_2 = arith.constant 0 : i32
    return %c0_i32, %c0_i32_0, %c0_i32_1 : i32, i32, i32
  }
  func.func @transform_3(%arg0: i32) -> (i32, i32) {
    %c0_i32 = arith.constant 0 : i32
    %c0_i32_0 = arith.constant 0 : i32
    %c0_i32_1 = arith.constant 0 : i32
    return %c0_i32, %c0_i32_0 : i32, i32
  }
  func.func @transform_4(%arg0: i32) -> (i32, i32) {
    %c0_i32 = arith.constant 0 : i32
    %c0_i32_0 = arith.constant 0 : i32
    %c0_i32_1 = arith.constant 0 : i32
    return %c0_i32, %c0_i32_0 : i32, i32
  }
  func.func @transform_5(%arg0: i32) -> (i32, i32, i32) {
    %c0_i32 = arith.constant 0 : i32
    %c0_i32_0 = arith.constant 0 : i32
    %c0_i32_1 = arith.constant 0 : i32
    %c0_i32_2 = arith.constant 0 : i32
    return %c0_i32, %c0_i32_0, %c0_i32_1 : i32, i32, i32
  }
  func.func @transform_6(%arg0: i32) -> (i32, i32) {
    %c0_i32 = arith.constant 0 : i32
    %c0_i32_0 = arith.constant 0 : i32
    %c0_i32_1 = arith.constant 0 : i32
    return %c0_i32, %c0_i32_0 : i32, i32
  }
  func.func @transform_7(%arg0: i32) -> (i32, i32) {
    %c0_i32 = arith.constant 0 : i32
    %c0_i32_0 = arith.constant 0 : i32
    %c0_i32_1 = arith.constant 0 : i32
    return %c0_i32, %c0_i32_0 : i32, i32
  }
  func.func @transform_8(%arg0: i32) -> (i32, i32) {
    %c0_i32 = arith.constant 0 : i32
    %c0_i32_0 = arith.constant 0 : i32
    %c0_i32_1 = arith.constant 0 : i32
    return %c0_i32, %c0_i32_0 : i32, i32
  }
  func.func @transform_9(%arg0: i32) -> (i32, i32) {
    %c0_i32 = arith.constant 0 : i32
    %c0_i32_0 = arith.constant 0 : i32
    %c0_i32_1 = arith.constant 0 : i32
    return %c0_i32, %c0_i32_0 : i32, i32
  }
}

</mosaic_0001>

<bundles_post_ra>
// kernel: bilstm_forward.1
= control target key start
LH: loop header
LB: loop body
LE: loop exit
PB: predicated region body
PF: predicated region fallthrough
CT: control target
= control target key end

     0   :  { %14 = vsyncpa [#allocation5], 0  ;;  %s15896_s0 = inlined_call_operand.vmem [shape: f32[64,16], index: 0, kind: input, shape index: {}]   ;;  %s15897_s1 = inlined_call_operand.hbm [shape: f32[16,1024], index: 1, kind: input, shape index: {}]   ;;  %s15898_s2 = inlined_call_operand.hbm [shape: f32[2,128,512], index: 2, kind: input, shape index: {}]   ;;  %s15899_s3 = inlined_call_operand.vmem [shape: f32[1,1024], index: 3, kind: input, shape index: {}]   ;;  %s15900_s4 = inlined_call_operand.hbm [shape: f32[256,1024], index: 4, kind: input, shape index: {}]   ;;  %s15901_s5 = inlined_call_operand.hbm [shape: f32[2,128,512], index: 5, kind: input, shape index: {}]   ;;  %s15902_s6 = inlined_call_operand.vmem [shape: f32[1,1024], index: 6, kind: input, shape index: {}]   ;;  %s15903_s7 = inlined_call_operand.hbm [shape: f32[256,128], index: 7, kind: input, shape index: {}]   ;;  %s15904_s8 = inlined_call_operand.vmem [shape: f32[1,128], index: 8, kind: input, shape index: {}]   ;;  %s15905_s9 = inlined_call_operand.vmem [shape: f32[64,128], index: 9, kind: output, shape index: {}]  }
   0x1   :  { %15 = vsyncpa [#allocation7], 0 }
   0x2   :  { %16 = vsyncpa [#allocation10], 0  ;;  %s12945_s30 = smov [#allocation6]   ;;  %s12829_s13 = scalar_lea.hbm %s15898_s2, 16384 }
   0x3   :  { %s36_s10 = sshll.u32 %s12945_s30, 4  ;;  %p12830_p0 = scmp.ne.s32.totalorder %s15898_s2, %s12829_s13  ;;  %s37_s10 = int_to_ptr.vmem [resolvable:$true] %s36_s10 }
   0x4   :  { %p12833_p1 = scmp.lt.u32.totalorder %s12829_s13, %s15898_s2 }
   0x6   :  { %p12835_p2 = pnand %p12833_p1, %p12830_p0 }
   0x8   :  { %12838 = shalt.err (!%p12835_p2)
}
   0x9   :  { %s12839_s18 = scalar_lea.vmem %s37_s10, 16384  ;;  %p12844_p4 = scmp.lt.s32.totalorder %s37_s10, %s37_s10 }
   0xa   :  { %p12840_p3 = scmp.ne.s32.totalorder %s37_s10, %s12839_s18  ;;  %p12845_p5 = scmp.lt.s32.totalorder %s12839_s18, %s12839_s18 }
   0xc   :  { %p12846_p6 = por %p12845_p5, %p12844_p4 }
   0xe   :  { %p12847_p7 = pnand %p12846_p6, %p12840_p3 }
  0x10   :  { %12850 = shalt.err (!%p12847_p7)
}
  0x11   :  { %s12946_s19 = smov 512   ;;  %s12947_s20 = smov 32  }
  0x12   :  { %42 = dma.hbm_to_vmem [thread:$0]  %s15898_s2, 16384, %s37_s10, [#allocation7], %s12946_s19, %s12946_s19, %s12947_s20  }
  0x13   :  { %s12948_s23 = smov [#allocation9]   ;;  %s12949_s25 = smov [#allocation4]  }
  0x14   :  { %s62_s24 = sshll.u32 %s12948_s23, 4  ;;  %s24_s26 = sshll.u32 %s12949_s25, 4  ;;  %s63_s24 = int_to_ptr.vmem [resolvable:$true] %s62_s24  ;;  %s25_s26 = int_to_ptr.vmem [resolvable:$true] %s24_s26 }
  0x15   :  { %s12851_s29 = scalar_lea.hbm %s15901_s5, 16384 }
  0x16   :  { %p12852_p8 = scmp.ne.s32.totalorder %s15901_s5, %s12851_s29  ;;  %p12855_p9 = scmp.lt.u32.totalorder %s12851_s29, %s15901_s5 }
  0x18   :  { %p12857_p10 = pnand %p12855_p9, %p12852_p8 }
  0x1a   :  { %12860 = shalt.err (!%p12857_p10)
}
  0x1b   :  { %s12861_s2 = scalar_lea.vmem %s63_s24, 16384  ;;  %p12866_p12 = scmp.lt.s32.totalorder %s63_s24, %s63_s24 }
  0x1c   :  { %p12862_p11 = scmp.ne.s32.totalorder %s63_s24, %s12861_s2  ;;  %p12867_p13 = scmp.lt.s32.totalorder %s12861_s2, %s12861_s2 }
  0x1e   :  { %p12868_p0 = por %p12867_p13, %p12866_p12 }
  0x20   :  { %p12869_p1 = pnand %p12868_p0, %p12862_p11 }
  0x22   :  { %12872 = shalt.err (!%p12869_p1)
}
  0x23   :  { %68 = dma.hbm_to_vmem [thread:$0]  %s15901_s5, 16384, %s63_s24, [#allocation10], %s12946_s19, %s12946_s19, %s12947_s20  }
  0x24   :  { %s12873_s17 = scalar_lea.hbm %s15897_s1, 2048 }
  0x25   :  { %p12874_p2 = scmp.ne.s32.totalorder %s15897_s1, %s12873_s17  ;;  %p12877_p3 = scmp.lt.u32.totalorder %s12873_s17, %s15897_s1 }
  0x27   :  { %p12879_p4 = pnand %p12877_p3, %p12874_p2 }
  0x29   :  { %12882 = shalt.err (!%p12879_p4)
}
  0x2a   :  { %s12883_s25 = scalar_lea.vmem %s25_s26, 2048  ;;  %p12888_p6 = scmp.lt.s32.totalorder %s25_s26, %s25_s26 }
  0x2b   :  { %p12884_p5 = scmp.ne.s32.totalorder %s25_s26, %s12883_s25  ;;  %p12889_p7 = scmp.lt.s32.totalorder %s12883_s25, %s12883_s25 }
  0x2d   :  { %p12890_p8 = por %p12889_p7, %p12888_p6 }
  0x2f   :  { %p12891_p9 = pnand %p12890_p8, %p12884_p5 }
  0x31   :  { %12894 = shalt.err (!%p12891_p9)
}
  0x32   :  { %s12950_s5 = smov 1024   ;;  %s12951_s19 = smov 64  }
  0x33   :  { %30 = dma.hbm_to_vmem [thread:$0]  %s15897_s1, 2048, %s25_s26, [#allocation5], %s12950_s5, %s12950_s5, %s12951_s19  }
  0x34   :  { %s12952_s27 = smov [#allocation8]   ;;  %s12953_s29 = smov [#allocation11]  }
  0x35   :  { %s50_s28 = sshll.u32 %s12952_s27, 4  ;;  %s76_s30 = sshll.u32 %s12953_s29, 4  ;;  %s51_s28 = int_to_ptr.vmem [resolvable:$true] %s50_s28  ;;  %s77_s30 = int_to_ptr.vmem [resolvable:$true] %s76_s30 }
  0x36   :  { %s12895_s13 = scalar_lea.hbm %s15900_s4, 32768 }
  0x37   :  { %p12896_p10 = scmp.ne.s32.totalorder %s15900_s4, %s12895_s13  ;;  %p12899_p11 = scmp.lt.u32.totalorder %s12895_s13, %s15900_s4 }
  0x39   :  { %p12901_p12 = pnand %p12899_p11, %p12896_p10 }
  0x3b   :  { %12904 = shalt.err (!%p12901_p12)
}
  0x3c   :  { %s12905_s1 = scalar_lea.vmem %s51_s28, 32768  ;;  %p12910_p0 = scmp.lt.s32.totalorder %s51_s28, %s51_s28 }
  0x3d   :  { %p12906_p13 = scmp.ne.s32.totalorder %s51_s28, %s12905_s1  ;;  %p12911_p1 = scmp.lt.s32.totalorder %s12905_s1, %s12905_s1 }
  0x3f   :  { %p12912_p2 = por %p12911_p1, %p12910_p0 }
  0x41   :  { %p12913_p3 = pnand %p12912_p2, %p12906_p13 }
  0x43   :  { %12916 = shalt.err (!%p12913_p3)
}
  0x44   :  { %56 = dma.hbm_to_vmem [thread:$0]  %s15900_s4, 32768, %s51_s28, [#allocation7], %s12950_s5, %s12950_s5, %s12951_s19  }
  0x45   :  { %s12917_s21 = scalar_lea.hbm %s15903_s7, 4096 }
  0x46   :  { %p12918_p4 = scmp.ne.s32.totalorder %s15903_s7, %s12917_s21  ;;  %p12921_p5 = scmp.lt.u32.totalorder %s12917_s21, %s15903_s7 }
  0x48   :  { %p12923_p6 = pnand %p12921_p5, %p12918_p4 }
  0x4a   :  { %12926 = shalt.err (!%p12923_p6)
}
  0x4b   :  { %s12927_s24 = scalar_lea.vmem %s77_s30, 4096  ;;  %p12932_p8 = scmp.lt.s32.totalorder %s77_s30, %s77_s30 }
  0x4c   :  { %p12928_p7 = scmp.ne.s32.totalorder %s77_s30, %s12927_s24  ;;  %p12933_p9 = scmp.lt.s32.totalorder %s12927_s24, %s12927_s24 }
  0x4e   :  { %p12934_p10 = por %p12933_p9, %p12932_p8 }
  0x50   :  { %p12935_p11 = pnand %p12934_p10, %p12928_p7 }
  0x52   :  { %12938 = shalt.err (!%p12935_p11)
}
  0x53   :  { %s12954_s4 = smov 128   ;;  %s12955_s5 = smov 8  }
  0x54   :  { %82 = dma.hbm_to_vmem [thread:$0]  %s15903_s7, 4096, %s77_s30, [#allocation10], %s12954_s4, %s12954_s4, %s12955_s5  }
  0x55   :  { %12939 = dma.done.wait [#allocation5], 2048  }
  0x56   :  { %12940 = vsyncadd [#allocation5], 4294965248 }
  0x57   :  { %12941 = dma.done.wait [#allocation7], 49152  }
  0x58   :  { %12942 = vsyncadd [#allocation7], 4294918144 }
  0x59   :  { %12943 = dma.done.wait [#allocation10], 20480  }
  0x5a   :  { %12944 = vsyncadd [#allocation10], 4294946816  ;;  %v15908_v0 = vmov 0.0   ;;  %v109_v1 = vld [vmem:[#allocation4 + $0x8] sm:$0xff]  ;;  %v108_v6 = vld [vmem:[#allocation4] sm:$0xff]  ;;  %vm166_vm0 = vcmask 130048  }
  0x5b   :  { %255 = vmatprep.mubr.f32.mxu1 %v15908_v0  ;;  %481 = vmatprep.mubr.f32.mxu0 %v15908_v0  ;;  %v117_v2 = vld [vmem:[#allocation4 + $0x48] sm:$0xff]  ;;  %v116_v7 = vld [vmem:[#allocation4 + $0x40] sm:$0xff]  ;;  %v111_v14 = vld [vmem:[#allocation4 + $0x18] sm:$0xff] }
  0x5c   :  { %v113_v3 = vld [vmem:[#allocation4 + $0x28] sm:$0xff]  ;;  %v9665_v4 = vpack.c.bf16 %v117_v2, %v109_v1  ;;  %v9667_v9 = vpack.c.bf16 %v116_v7, %v108_v6  ;;  %v112_v10 = vld [vmem:[#allocation4 + $0x20] sm:$0xff]  ;;  %v119_v15 = vld [vmem:[#allocation4 + $0x58] sm:$0xff] }
  0x5d   :  { %v121_v5 = vld [vmem:[#allocation4 + $0x68] sm:$0xff]  ;;  %v120_v11 = vld [vmem:[#allocation4 + $0x60] sm:$0xff]  ;;  %v9669_v17 = vpack.c.bf16 %v119_v15, %v111_v14  ;;  %v110_v19 = vld [vmem:[#allocation4 + $0x10] sm:$0xff] }
  0x5e   :  { %v9673_v8 = vpack.c.bf16 %v121_v5, %v113_v3  ;;  %v13072_v12 = vld [vmem:[%s15896_s0] sm:$0xff]  ;;  %9666 = vmatprep.subr.bf16.mxu1 %v9665_v4  ;;  %v9675_v13 = vpack.c.bf16 %v120_v11, %v112_v10  ;;  %v715_v16 = vld [vmem:[#allocation6 + $0x8] sm:$0xff]  ;;  %v118_v20 = vld [vmem:[#allocation4 + $0x50] sm:$0xff] }
  0x5f   :  { %9668 = vmatpush1.bf16.msra.mxu1 %v9667_v9  ;;  %v719_v18 = vld [vmem:[#allocation6 + $0x28] sm:$0xff]  ;;  %v9671_v22 = vpack.c.bf16 %v118_v20, %v110_v19  ;;  %v714_v23 = vld [vmem:[#allocation6] sm:$0xff]  ;;  %v13106_v40 = vld [vmem:[%s15896_s0 + $0x10] sm:$0xff] }
  0x60   :  { %9674 = vmatprep.subr.bf16.mxu0 %v9673_v8  ;;  %v13074_v21 = vpack.c.bf16 %v719_v18, %v715_v16  ;;  %v718_v24 = vld [vmem:[#allocation6 + $0x20] sm:$0xff]  ;;  %9670 = vmatprep.subr.bf16.mxu1 %v9669_v17  ;;  %v723_v26 = vld [vmem:[#allocation6 + $0x48] sm:$0xff]  ;;  %v13123_v47 = vld [vmem:[%s15896_s0 + $0x18] sm:$0xff] }
  0x61   :  { %9676 = vmatpush1.bf16.msra.mxu0 %v9675_v13  ;;  %v13076_v25 = vpack.c.bf16 %v718_v24, %v714_v23  ;;  %v727_v27 = vld [vmem:[#allocation6 + $0x68] sm:$0xff]  ;;  %v722_v28 = vld [vmem:[#allocation6 + $0x40] sm:$0xff]  ;;  %v115_v49 = vld [vmem:[#allocation4 + $0x38] sm:$0xff] }
  0x62   :  { %9472 = vmatmul.mubr.msk.f32.vlgmr.msra.gmra.mrb[0].mxu1 %vm166_vm0, %v13072_v12  ;;  %9682 = vmatprep.subr.bf16.mxu0 %v13074_v21  ;;  %v13081_v29 = vpack.c.bf16 %v727_v27, %v723_v26  ;;  %v726_v30 = vld [vmem:[#allocation6 + $0x60] sm:$0xff]  ;;  %v731_v31 = vld [vmem:[#allocation6 + $0x88] sm:$0xff]  ;;  %v123_v50 = vld [vmem:[#allocation4 + $0x78] sm:$0xff] }
  0x63   :  { %9672 = vmatpush1.bf16.msra.mxu1 %v9671_v22  ;;  %v13088_v32 = vld [vmem:[%s15896_s0 + $0x8] sm:$0xff]  ;;  %261 = vmatprep.mubr.f32.mxu1 %v15908_v0  ;;  %v13092_v34 = vpack.c.bf16 %v726_v30, %v722_v28  ;;  %v730_v36 = vld [vmem:[#allocation6 + $0x80] sm:$0xff]  ;;  %v9677_v54 = vpack.c.bf16 %v123_v50, %v115_v49  ;;  %v13174_v8 = vld [vmem:[%s15896_s0 + $0x30] sm:$0xff] }
  0x64   :  { %9488 = vmatmul.mubr.msk.f32.vlgmr.msra.gmra.mrb[0].mxu0 %vm166_vm0, %v13072_v12  ;;  %v735_v33 = vld [vmem:[#allocation6 + $0xa8] sm:$0xff]  ;;  %v734_v37 = vld [vmem:[#allocation6 + $0xa0] sm:$0xff]  ;;  %v13191_v16 = vld [vmem:[%s15896_s0 + $0x38] sm:$0xff] }
  0x65   :  { %9684 = vmatpush1.bf16.msra.mxu0 %v13076_v25  ;;  %487 = vmatprep.mubr.f32.mxu0 %v15908_v0  ;;  %v13096_v35 = vpack.c.bf16 %v735_v33, %v731_v31  ;;  %v739_v38 = vld [vmem:[#allocation6 + $0xc8] sm:$0xff]  ;;  %v13110_v41 = vpack.c.bf16 %v734_v37, %v730_v36  ;;  %v738_v43 = vld [vmem:[#allocation6 + $0xc0] sm:$0xff]  ;;  %v114_v18 = vld [vmem:[#allocation4 + $0x30] sm:$0xff] }
  0x66   :  { %9686 = vmatprep.subr.bf16.mxu0 %v13081_v29  ;;  %9473 = vmatmul.mubr.msk.f32.gmra.mrb[2].mxu1 %vm166_vm0, %v13088_v32  ;;  %v743_v39 = vld [vmem:[#allocation6 + $0xe8] sm:$0xff]  ;;  %v742_v44 = vld [vmem:[#allocation6 + $0xe0] sm:$0xff]  ;;  %v122_v19 = vld [vmem:[#allocation4 + $0x70] sm:$0xff] }
  0x67   :  { %267 = vmatprep.mubr.f32.mxu1 %v15908_v0  ;;  %v13113_v42 = vpack.c.bf16 %v743_v39, %v739_v38  ;;  %v747_v45 = vld [vmem:[#allocation6 + $0x108] sm:$0xff]  ;;  %v13127_v48 = vpack.c.bf16 %v742_v44, %v738_v43  ;;  %v746_v52 = vld [vmem:[#allocation6 + $0x100] sm:$0xff]  ;;  %9678 = vmatprep.subr.bf16.mxu1 %v9677_v54  ;;  %v717_v27 = vld [vmem:[#allocation6 + $0x18] sm:$0xff]  ;;  %v9679_v30 = vpack.c.bf16 %v122_v19, %v114_v18 }
  0x68   :  { %9489 = vmatmul.mubr.msk.f32.gmra.mrb[2].mxu0 %vm166_vm0, %v13088_v32  ;;  %v751_v46 = vld [vmem:[#allocation6 + $0x128] sm:$0xff]  ;;  %v750_v53 = vld [vmem:[#allocation6 + $0x120] sm:$0xff]  ;;  %v721_v28 = vld [vmem:[#allocation6 + $0x38] sm:$0xff] }
  0x69   :  { %9688 = vmatpush1.bf16.msra.mxu0 %v13092_v34  ;;  %493 = vmatprep.mubr.f32.mxu0 %v15908_v0  ;;  %v13130_v51 = vpack.c.bf16 %v751_v46, %v747_v45  ;;  %v755_v55 = vld [vmem:[#allocation6 + $0x148] sm:$0xff]  ;;  %v13140_v57 = vld [vmem:[%s15896_s0 + $0x20] sm:$0xff]  ;;  %v13144_v58 = vpack.c.bf16 %v750_v53, %v746_v52  ;;  %v13212_v38 = vpack.c.bf16 %v721_v28, %v717_v27 }
  0x6a   :  { %9690 = vmatprep.subr.bf16.mxu0 %v13096_v35  ;;  %9474 = vmatmul.mubr.msk.f32.gmra.mrb[4].mxu1 %vm166_vm0, %v13106_v40  ;;  %v759_v56 = vld [vmem:[#allocation6 + $0x168] sm:$0xff]  ;;  %v754_v60 = vld [vmem:[#allocation6 + $0x140] sm:$0xff] }
  0x6b   :  { %273 = vmatprep.mubr.f32.mxu1 %v15908_v0  ;;  %v13147_v59 = vpack.c.bf16 %v759_v56, %v755_v55  ;;  %v758_v61 = vld [vmem:[#allocation6 + $0x160] sm:$0xff]  ;;  %v763_v62 = vld [vmem:[#allocation6 + $0x188] sm:$0xff] }
  0x6c   :  { %9490 = vmatmul.mubr.msk.f32.gmra.mrb[4].mxu0 %vm166_vm0, %v13106_v40  ;;  %v767_v63 = vld [vmem:[#allocation6 + $0x1a8] sm:$0xff]  ;;  %v13161_v2 = vpack.c.bf16 %v758_v61, %v754_v60  ;;  %v762_v4 = vld [vmem:[#allocation6 + $0x180] sm:$0xff] }
  0x6d   :  { %9692 = vmatpush1.bf16.msra.mxu0 %v13110_v41  ;;  %499 = vmatprep.mubr.f32.mxu0 %v15908_v0  ;;  %v13157_v1 = vld [vmem:[%s15896_s0 + $0x28] sm:$0xff]  ;;  %v13164_v3 = vpack.c.bf16 %v767_v63, %v763_v62  ;;  %v766_v5 = vld [vmem:[#allocation6 + $0x1a0] sm:$0xff] }
  0x6e   :  { %9694 = vmatprep.subr.bf16.mxu0 %v13113_v42  ;;  %9475 = vmatmul.mubr.msk.f32.gmra.mrb[6].mxu1 %vm166_vm0, %v13123_v47  ;;  %v771_v6 = vld [vmem:[#allocation6 + $0x1c8] sm:$0xff]  ;;  %v13178_v9 = vpack.c.bf16 %v766_v5, %v762_v4  ;;  %v770_v11 = vld [vmem:[#allocation6 + $0x1c0] sm:$0xff] }
  0x6f   :  { %279 = vmatprep.mubr.f32.mxu1 %v15908_v0  ;;  %v775_v7 = vld [vmem:[#allocation6 + $0x1e8] sm:$0xff]  ;;  %v774_v13 = vld [vmem:[#allocation6 + $0x1e0] sm:$0xff] }
  0x70   :  { %9491 = vmatmul.mubr.msk.f32.gmra.mrb[6].mxu0 %vm166_vm0, %v13123_v47  ;;  %v13181_v10 = vpack.c.bf16 %v775_v7, %v771_v6  ;;  %v961_v14 = vld [vmem:[#allocation6 + $0x208] sm:$0xff]  ;;  %v13195_v17 = vpack.c.bf16 %v774_v13, %v770_v11  ;;  %v960_v22 = vld [vmem:[#allocation6 + $0x200] sm:$0xff] }
  0x71   :  { %9696 = vmatpush1.bf16.msra.mxu0 %v13127_v48  ;;  %505 = vmatprep.mubr.f32.mxu0 %v15908_v0  ;;  %v965_v15 = vld [vmem:[#allocation6 + $0x228] sm:$0xff]  ;;  %v964_v23 = vld [vmem:[#allocation6 + $0x220] sm:$0xff] }
  0x72   :  { %9698 = vmatprep.subr.bf16.mxu0 %v13130_v51  ;;  %9476 = vmatmul.mubr.msk.f32.gmra.mrb[8].mxu1 %vm166_vm0, %v13140_v57  ;;  %v13198_v20 = vpack.c.bf16 %v965_v15, %v961_v14  ;;  %v969_v24 = vld [vmem:[#allocation6 + $0x248] sm:$0xff]  ;;  %v13207_v31 = vpack.c.bf16 %v964_v23, %v960_v22  ;;  %v968_v36 = vld [vmem:[#allocation6 + $0x240] sm:$0xff] }
  0x73   :  { %285 = vmatprep.mubr.f32.mxu1 %v15908_v0  ;;  %v973_v26 = vld [vmem:[#allocation6 + $0x268] sm:$0xff]  ;;  %v972_v37 = vld [vmem:[#allocation6 + $0x260] sm:$0xff] }
  0x74   :  { %9492 = vmatmul.mubr.msk.f32.gmra.mrb[8].mxu0 %vm166_vm0, %v13140_v57  ;;  %v13210_v33 = vpack.c.bf16 %v973_v26, %v969_v24  ;;  %v977_v39 = vld [vmem:[#allocation6 + $0x288] sm:$0xff]  ;;  %v13219_v44 = vpack.c.bf16 %v972_v37, %v968_v36  ;;  %v976_v46 = vld [vmem:[#allocation6 + $0x280] sm:$0xff] }
  0x75   :  { %9700 = vmatpush1.bf16.msra.mxu0 %v13144_v58  ;;  %511 = vmatprep.mubr.f32.mxu0 %v15908_v0  ;;  %v981_v43 = vld [vmem:[#allocation6 + $0x2a8] sm:$0xff]  ;;  %v980_v49 = vld [vmem:[#allocation6 + $0x2a0] sm:$0xff] }
  0x76   :  { %9702 = vmatprep.subr.bf16.mxu0 %v13147_v59  ;;  %9477 = vmatmul.mubr.msk.f32.gmra.mrb[10].mxu1 %vm166_vm0, %v13157_v1  ;;  %v13222_v45 = vpack.c.bf16 %v981_v43, %v977_v39  ;;  %v985_v50 = vld [vmem:[#allocation6 + $0x2c8] sm:$0xff]  ;;  %v13230_v53 = vpack.c.bf16 %v980_v49, %v976_v46  ;;  %v984_v55 = vld [vmem:[#allocation6 + $0x2c0] sm:$0xff]  ;;  %v716_v43 = vld [vmem:[#allocation6 + $0x10] sm:$0xff] }
  0x77   :  { %291 = vmatprep.mubr.f32.mxu1 %v15908_v0  ;;  %v989_v52 = vld [vmem:[#allocation6 + $0x2e8] sm:$0xff]  ;;  %v988_v56 = vld [vmem:[#allocation6 + $0x2e0] sm:$0xff]  ;;  %v720_v46 = vld [vmem:[#allocation6 + $0x30] sm:$0xff] }
  0x78   :  { %9493 = vmatmul.mubr.msk.f32.gmra.mrb[10].mxu0 %vm166_vm0, %v13157_v1  ;;  %v13233_v54 = vpack.c.bf16 %v989_v52, %v985_v50  ;;  %v993_v60 = vld [vmem:[#allocation6 + $0x308] sm:$0xff]  ;;  %v13239_v62 = vpack.c.bf16 %v988_v56, %v984_v55  ;;  %v992_v4 = vld [vmem:[#allocation6 + $0x300] sm:$0xff]  ;;  %v725_v50 = vld [vmem:[#allocation6 + $0x58] sm:$0xff]  ;;  %v13281_v55 = vpack.c.bf16 %v720_v46, %v716_v43 }
  0x79   :  { %9704 = vmatpush1.bf16.msra.mxu0 %v13161_v2  ;;  %517 = vmatprep.mubr.f32.mxu0 %v15908_v0  ;;  %v997_v61 = vld [vmem:[#allocation6 + $0x328] sm:$0xff]  ;;  %v996_v5 = vld [vmem:[#allocation6 + $0x320] sm:$0xff]  ;;  %v729_v52 = vld [vmem:[#allocation6 + $0x78] sm:$0xff] }
  0x7a   :  { %9706 = vmatprep.subr.bf16.mxu0 %v13164_v3  ;;  %9478 = vmatmul.mubr.msk.f32.gmra.mrb[12].mxu1 %vm166_vm0, %v13174_v8  ;;  %v13242_v63 = vpack.c.bf16 %v997_v61, %v993_v60  ;;  %v1001_v6 = vld [vmem:[#allocation6 + $0x348] sm:$0xff]  ;;  %v13248_v11 = vpack.c.bf16 %v996_v5, %v992_v4  ;;  %v1000_v14 = vld [vmem:[#allocation6 + $0x340] sm:$0xff]  ;;  %v13283_v56 = vpack.c.bf16 %v729_v52, %v725_v50  ;;  %v724_v60 = vld [vmem:[#allocation6 + $0x50] sm:$0xff] }
  0x7b   :  { %297 = vmatprep.mubr.f32.mxu1 %v15908_v0  ;;  %v1005_v7 = vld [vmem:[#allocation6 + $0x368] sm:$0xff]  ;;  %v1004_v15 = vld [vmem:[#allocation6 + $0x360] sm:$0xff]  ;;  %v728_v61 = vld [vmem:[#allocation6 + $0x70] sm:$0xff] }
  0x7c   :  { %9494 = vmatmul.mubr.msk.f32.gmra.mrb[12].mxu0 %vm166_vm0, %v13174_v8  ;;  %v13251_v13 = vpack.c.bf16 %v1005_v7, %v1001_v6  ;;  %v1009_v18 = vld [vmem:[#allocation6 + $0x388] sm:$0xff]  ;;  %v13257_v22 = vpack.c.bf16 %v1004_v15, %v1000_v14  ;;  %v1008_v24 = vld [vmem:[#allocation6 + $0x380] sm:$0xff]  ;;  %v733_v4 = vld [vmem:[#allocation6 + $0x98] sm:$0xff]  ;;  %v13291_v6 = vpack.c.bf16 %v728_v61, %v724_v60 }
  0x7d   :  { %9708 = vmatpush1.bf16.msra.mxu0 %v13178_v9  ;;  %523 = vmatprep.mubr.f32.mxu0 %v15908_v0  ;;  %v1013_v19 = vld [vmem:[#allocation6 + $0x3a8] sm:$0xff]  ;;  %v1012_v26 = vld [vmem:[#allocation6 + $0x3a0] sm:$0xff]  ;;  %v737_v5 = vld [vmem:[#allocation6 + $0xb8] sm:$0xff] }
  0x7e   :  { %9710 = vmatprep.subr.bf16.mxu0 %v13181_v10  ;;  %9479 = vmatmul.mubr.msk.f32.gmra.mrb[14].mxu1 %vm166_vm0, %v13191_v16  ;;  %v13260_v23 = vpack.c.bf16 %v1013_v19, %v1009_v18  ;;  %v1017_v27 = vld [vmem:[#allocation6 + $0x3c8] sm:$0xff]  ;;  %v1016_v37 = vld [vmem:[#allocation6 + $0x3c0] sm:$0xff]  ;;  %v13294_v7 = vpack.c.bf16 %v737_v5, %v733_v4  ;;  %v732_v14 = vld [vmem:[#allocation6 + $0x90] sm:$0xff] }
  0x7f   :  { %368 = vmatprep.mubr.f32.mxu1 %v15908_v0  ;;  %v1021_v28 = vld [vmem:[#allocation6 + $0x3e8] sm:$0xff]  ;;  %v1020_v39 = vld [vmem:[#allocation6 + $0x3e0] sm:$0xff]  ;;  %v736_v15 = vld [vmem:[#allocation6 + $0xb0] sm:$0xff] }
  0x80   :  { %9495 = vmatmul.mubr.msk.f32.gmra.mrb[14].mxu0 %vm166_vm0, %v13191_v16  ;;  %v13269_v36 = vpack.c.bf16 %v1021_v28, %v1017_v27  ;;  %v13275_v49 = vpack.c.bf16 %v1020_v39, %v1016_v37  ;;  %v741_v18 = vld [vmem:[#allocation6 + $0xd8] sm:$0xff]  ;;  %v748_v28 = vld [vmem:[#allocation6 + $0x110] sm:$0xff] }
  0x81   :  { %9712 = vmatpush1.bf16.msra.mxu0 %v13195_v17  ;;  %842 = vmatprep.mubr.f32.mxu0 %v15908_v0  ;;  %v745_v19 = vld [vmem:[#allocation6 + $0xf8] sm:$0xff]  ;;  %v752_v37 = vld [vmem:[#allocation6 + $0x130] sm:$0xff] }
  0x82   :  { %9746 = vmatprep.subr.bf16.mxu0 %v13198_v20  ;;  %9480 = vmatmul.mubr.msk.f32.vlgmr.msra.gmra.mrb[16].mxu1 %vm166_vm0, %v13072_v12  ;;  %v753_v27 = vld [vmem:[#allocation6 + $0x138] sm:$0xff]  ;;  %v760_v46 = vld [vmem:[#allocation6 + $0x170] sm:$0xff] }
  0x83   :  { %9680 = vmatpush1.bf16.msra.mxu1 %v9679_v30  ;;  %374 = vmatprep.mubr.f32.mxu1 %v15908_v0  ;;  %v13266_v30 = vpack.c.bf16 %v1012_v26, %v1008_v24  ;;  %v740_v24 = vld [vmem:[#allocation6 + $0xd0] sm:$0xff]  ;;  %v757_v39 = vld [vmem:[#allocation6 + $0x158] sm:$0xff] }
  0x84   :  { %843 = vmatmul.mubr.f32.vlgmr.msra.gmra.mrb[16].mxu0 %v15908_v0  ;;  %9714 = vmatprep.subr.bf16.mxu1 %v13212_v38  ;;  %v744_v26 = vld [vmem:[#allocation6 + $0xf0] sm:$0xff]  ;;  %v761_v43 = vld [vmem:[#allocation6 + $0x178] sm:$0xff] }
  0x85   :  { %9748 = vmatpush1.bf16.msra.mxu0 %v13207_v31  ;;  %1088 = vmatprep.mubr.f32.mxu0 %v15908_v0  ;;  %v765_v50 = vld [vmem:[#allocation6 + $0x198] sm:$0xff]  ;;  %v768_v60 = vld [vmem:[#allocation6 + $0x1b0] sm:$0xff] }
  0x86   :  { %9750 = vmatprep.subr.bf16.mxu0 %v13210_v33  ;;  %9481 = vmatmul.mubr.msk.f32.gmra.mrb[18].mxu1 %vm166_vm0, %v13088_v32  ;;  %v769_v52 = vld [vmem:[#allocation6 + $0x1b8] sm:$0xff]  ;;  %v776_v5 = vld [vmem:[#allocation6 + $0x1f0] sm:$0xff] }
  0x87   :  { %380 = vmatprep.mubr.f32.mxu1 %v15908_v0  ;;  %v773_v61 = vld [vmem:[#allocation6 + $0x1d8] sm:$0xff] }
  0x88   :  { %v777_v4 = vld [vmem:[#allocation6 + $0x1f8] sm:$0xff] }
  0x89   :  { %9752 = vmatpush1.bf16.msra.mxu0 %v13219_v44 }
  0x8a   :  { %9754 = vmatprep.subr.bf16.mxu0 %v13222_v45  ;;  %9482 = vmatmul.mubr.msk.f32.gmra.mrb[20].mxu1 %vm166_vm0, %v13106_v40 }
  0x8b   :  { %386 = vmatprep.mubr.f32.mxu1 %v15908_v0 }
  0x8d   :  { %9756 = vmatpush1.bf16.msra.mxu0 %v13230_v53 }
  0x8e   :  { %9758 = vmatprep.subr.bf16.mxu0 %v13233_v54  ;;  %9483 = vmatmul.mubr.msk.f32.gmra.mrb[22].mxu1 %vm166_vm0, %v13123_v47 }
  0x8f   :  { %392 = vmatprep.mubr.f32.mxu1 %v15908_v0 }
  0x91   :  { %9760 = vmatpush1.bf16.msra.mxu0 %v13239_v62 }
  0x92   :  { %9762 = vmatprep.subr.bf16.mxu0 %v13242_v63  ;;  %9484 = vmatmul.mubr.msk.f32.gmra.mrb[24].mxu1 %vm166_vm0, %v13140_v57 }
  0x93   :  { %398 = vmatprep.mubr.f32.mxu1 %v15908_v0 }
  0x95   :  { %9764 = vmatpush1.bf16.msra.mxu0 %v13248_v11 }
  0x96   :  { %9766 = vmatprep.subr.bf16.mxu0 %v13251_v13  ;;  %9485 = vmatmul.mubr.msk.f32.gmra.mrb[26].mxu1 %vm166_vm0, %v13157_v1 }
  0x97   :  { %404 = vmatprep.mubr.f32.mxu1 %v15908_v0 }
  0x99   :  { %9768 = vmatpush1.bf16.msra.mxu0 %v13257_v22 }
  0x9a   :  { %9770 = vmatprep.subr.bf16.mxu0 %v13260_v23  ;;  %9486 = vmatmul.mubr.msk.f32.gmra.mrb[28].mxu1 %vm166_vm0, %v13174_v8 }
  0x9b   :  { %410 = vmatprep.mubr.f32.mxu1 %v15908_v0 }
  0x9d   :  { %9772 = vmatpush1.bf16.msra.mxu0 %v13266_v30 }
  0x9e   :  { %9774 = vmatprep.subr.bf16.mxu0 %v13269_v36  ;;  %9487 = vmatmul.mubr.msk.f32.gmra.mrb[30].mxu1 %vm166_vm0, %v13191_v16 }
  0x9f   :  { %594 = vmatprep.mubr.f32.mxu1 %v15908_v0 }
  0xa1   :  { %9776 = vmatpush1.bf16.msra.mxu0 %v13275_v49 }
  0xa2   :  { %9810 = vmatprep.subr.bf16.mxu0 %v13074_v21  ;;  %9496 = vmatmul.mubr.msk.f32.vlgmr.msra.gmra.mrb[32].mxu1 %vm166_vm0, %v13072_v12  ;;  %v13304_v12 = vpack.c.bf16 %v736_v15, %v732_v14  ;;  %v13307_v21 = vpack.c.bf16 %v745_v19, %v741_v18  ;;  %v963_v14 = vld [vmem:[#allocation6 + $0x218] sm:$0xff]  ;;  %v966_v18 = vld [vmem:[#allocation6 + $0x230] sm:$0xff] }
  0xa3   :  { %9716 = vmatpush1.bf16.msra.mxu1 %v13281_v55  ;;  %600 = vmatprep.mubr.f32.mxu1 %v15908_v0  ;;  %v967_v15 = vld [vmem:[#allocation6 + $0x238] sm:$0xff] }
  0xa4   :  { %9718 = vmatprep.subr.bf16.mxu1 %v13283_v56  ;;  %1089 = vmatmul.mubr.f32.vlgmr.msra.gmra.mrb[14].mxu0 %v15908_v0  ;;  %v971_v19 = vld [vmem:[#allocation6 + $0x258] sm:$0xff] }
  0xa5   :  { %9812 = vmatpush1.bf16.msra.mxu0 %v13076_v25  ;;  %1333 = vmatprep.mubr.f32.mxu0 %v15908_v0  ;;  %v749_v25 = vld [vmem:[#allocation6 + $0x118] sm:$0xff] }
  0xa6   :  { %9497 = vmatmul.mubr.msk.f32.gmra.mrb[34].mxu1 %vm166_vm0, %v13088_v32  ;;  %9814 = vmatprep.subr.bf16.mxu0 %v13081_v29  ;;  %v13315_v29 = vpack.c.bf16 %v744_v26, %v740_v24  ;;  %v13318_v32 = vpack.c.bf16 %v753_v27, %v749_v25  ;;  %v975_v24 = vld [vmem:[#allocation6 + $0x278] sm:$0xff]  ;;  %v974_v26 = vld [vmem:[#allocation6 + $0x270] sm:$0xff] }
  0xa7   :  { %9720 = vmatpush1.bf16.msra.mxu1 %v13291_v6  ;;  %606 = vmatprep.mubr.f32.mxu1 %v15908_v0  ;;  %v979_v25 = vld [vmem:[#allocation6 + $0x298] sm:$0xff] }
  0xa8   :  { %9722 = vmatprep.subr.bf16.mxu1 %v13294_v7  ;;  %v983_v27 = vld [vmem:[#allocation6 + $0x2b8] sm:$0xff] }
  0xa9   :  { %9816 = vmatpush1.bf16.msra.mxu0 %v13092_v34  ;;  %v13326_v34 = vpack.c.bf16 %v752_v37, %v748_v28  ;;  %v982_v28 = vld [vmem:[#allocation6 + $0x2b0] sm:$0xff]  ;;  %v987_v37 = vld [vmem:[#allocation6 + $0x2d8] sm:$0xff] }
  0xaa   :  { %9498 = vmatmul.mubr.msk.f32.gmra.mrb[36].mxu1 %vm166_vm0, %v13106_v40  ;;  %9818 = vmatprep.subr.bf16.mxu0 %v13096_v35  ;;  %v13329_v35 = vpack.c.bf16 %v761_v43, %v757_v39  ;;  %v756_v40 = vld [vmem:[#allocation6 + $0x150] sm:$0xff]  ;;  %v991_v39 = vld [vmem:[#allocation6 + $0x2f8] sm:$0xff] }
  0xab   :  { %9724 = vmatpush1.bf16.msra.mxu1 %v13304_v12  ;;  %612 = vmatprep.mubr.f32.mxu1 %v15908_v0  ;;  %v986_v43 = vld [vmem:[#allocation6 + $0x2d0] sm:$0xff] }
  0xac   :  { %9726 = vmatprep.subr.bf16.mxu1 %v13307_v21 }
  0xad   :  { %9820 = vmatpush1.bf16.msra.mxu0 %v13110_v41  ;;  %v13337_v41 = vpack.c.bf16 %v760_v46, %v756_v40  ;;  %v990_v40 = vld [vmem:[#allocation6 + $0x2f0] sm:$0xff]  ;;  %v995_v46 = vld [vmem:[#allocation6 + $0x318] sm:$0xff] }
  0xae   :  { %9499 = vmatmul.mubr.msk.f32.gmra.mrb[38].mxu1 %vm166_vm0, %v13123_v47  ;;  %9822 = vmatprep.subr.bf16.mxu0 %v13113_v42  ;;  %v13340_v42 = vpack.c.bf16 %v769_v52, %v765_v50  ;;  %v764_v47 = vld [vmem:[#allocation6 + $0x190] sm:$0xff]  ;;  %v999_v50 = vld [vmem:[#allocation6 + $0x338] sm:$0xff]  ;;  %v13392_v52 = vpack.c.bf16 %v990_v40, %v986_v43 }
  0xaf   :  { %9728 = vmatpush1.bf16.msra.mxu1 %v13315_v29  ;;  %618 = vmatprep.mubr.f32.mxu1 %v15908_v0  ;;  %v1022_v43 = vld [vmem:[#allocation6 + $0x3f0] sm:$0xff] }
  0xb0   :  { %9730 = vmatprep.subr.bf16.mxu1 %v13318_v32 }
  0xb1   :  { %9824 = vmatpush1.bf16.msra.mxu0 %v13127_v48  ;;  %v13348_v48 = vpack.c.bf16 %v768_v60, %v764_v47  ;;  %v13395_v47 = vpack.c.bf16 %v999_v50, %v995_v46  ;;  %v994_v60 = vld [vmem:[#allocation6 + $0x310] sm:$0xff] }
  0xb2   :  { %9500 = vmatmul.mubr.msk.f32.gmra.mrb[40].mxu1 %vm166_vm0, %v13140_v57  ;;  %9826 = vmatprep.subr.bf16.mxu0 %v13130_v51  ;;  %v13351_v51 = vpack.c.bf16 %v777_v4, %v773_v61  ;;  %v772_v57 = vld [vmem:[#allocation6 + $0x1d0] sm:$0xff]  ;;  %v1003_v4 = vld [vmem:[#allocation6 + $0x358] sm:$0xff] }
  0xb3   :  { %9732 = vmatpush1.bf16.msra.mxu1 %v13326_v34  ;;  %624 = vmatprep.mubr.f32.mxu1 %v15908_v0  ;;  %v998_v61 = vld [vmem:[#allocation6 + $0x330] sm:$0xff] }
  0xb4   :  { %9734 = vmatprep.subr.bf16.mxu1 %v13329_v35 }
  0xb5   :  { %9828 = vmatpush1.bf16.msra.mxu0 %v13144_v58  ;;  %v13359_v58 = vpack.c.bf16 %v776_v5, %v772_v57  ;;  %v1007_v57 = vld [vmem:[#allocation6 + $0x378] sm:$0xff]  ;;  %v13398_v5 = vpack.c.bf16 %v998_v61, %v994_v60 }
  0xb6   :  { %9501 = vmatmul.mubr.msk.f32.gmra.mrb[42].mxu1 %vm166_vm0, %v13157_v1  ;;  %9830 = vmatprep.subr.bf16.mxu0 %v13147_v59  ;;  %v13362_v59 = vpack.c.bf16 %v967_v15, %v963_v14  ;;  %v962_v1 = vld [vmem:[#allocation6 + $0x210] sm:$0xff]  ;;  %v13401_v14 = vpack.c.bf16 %v1007_v57, %v1003_v4 }
  0xb7   :  { %9736 = vmatpush1.bf16.msra.mxu1 %v13337_v41  ;;  %630 = vmatprep.mubr.f32.mxu1 %v15908_v0  ;;  %v1002_v15 = vld [vmem:[#allocation6 + $0x350] sm:$0xff] }
  0xb8   :  { %9738 = vmatprep.subr.bf16.mxu1 %v13340_v42 }
  0xb9   :  { %9832 = vmatpush1.bf16.msra.mxu0 %v13161_v2  ;;  %v13370_v2 = vpack.c.bf16 %v966_v18, %v962_v1  ;;  %v1006_v1 = vld [vmem:[#allocation6 + $0x370] sm:$0xff]  ;;  %v1011_v18 = vld [vmem:[#allocation6 + $0x398] sm:$0xff] }
  0xba   :  { %9502 = vmatmul.mubr.msk.f32.gmra.mrb[44].mxu1 %vm166_vm0, %v13174_v8  ;;  %9834 = vmatprep.subr.bf16.mxu0 %v13164_v3  ;;  %v13373_v3 = vpack.c.bf16 %v975_v24, %v971_v19  ;;  %v970_v8 = vld [vmem:[#allocation6 + $0x250] sm:$0xff]  ;;  %v1015_v19 = vld [vmem:[#allocation6 + $0x3b8] sm:$0xff]  ;;  %v13404_v24 = vpack.c.bf16 %v1006_v1, %v1002_v15 }
  0xbb   :  { %9740 = vmatpush1.bf16.msra.mxu1 %v13348_v48  ;;  %636 = vmatprep.mubr.f32.mxu1 %v15908_v0 }
  0xbc   :  { %9742 = vmatprep.subr.bf16.mxu1 %v13351_v51 }
  0xbd   :  { %9836 = vmatpush1.bf16.msra.mxu0 %v13178_v9  ;;  %v13379_v9 = vpack.c.bf16 %v974_v26, %v970_v8  ;;  %v13407_v8 = vpack.c.bf16 %v1015_v19, %v1011_v18  ;;  %v1010_v26 = vld [vmem:[#allocation6 + $0x390] sm:$0xff] }
  0xbe   :  { %9503 = vmatmul.mubr.msk.f32.gmra.mrb[46].mxu1 %vm166_vm0, %v13191_v16  ;;  %9838 = vmatprep.subr.bf16.mxu0 %v13181_v10  ;;  %v13383_v10 = vpack.c.bf16 %v983_v27, %v979_v25  ;;  %v978_v16 = vld [vmem:[#allocation6 + $0x290] sm:$0xff]  ;;  %v1019_v27 = vld [vmem:[#allocation6 + $0x3d8] sm:$0xff] }
  0xbf   :  { %9744 = vmatpush1.bf16.msra.mxu1 %v13359_v58  ;;  %913 = vmatprep.mubr.f32.mxu1 %v15908_v0  ;;  %v1014_v25 = vld [vmem:[#allocation6 + $0x3b0] sm:$0xff] }
  0xc0   :  { %9778 = vmatprep.subr.bf16.mxu1 %v13362_v59 }
  0xc1   :  { %9840 = vmatpush1.bf16.msra.mxu0 %v13195_v17  ;;  %v13386_v17 = vpack.c.bf16 %v982_v28, %v978_v16  ;;  %v1023_v16 = vld [vmem:[#allocation6 + $0x3f8] sm:$0xff]  ;;  %v13410_v28 = vpack.c.bf16 %v1014_v25, %v1010_v26 }
  0xc2   :  { %914 = vmatmul.mubr.f32.vlgmr.msra.gmra.mrb[16].mxu1 %v15908_v0  ;;  %9874 = vmatprep.subr.bf16.mxu0 %v13198_v20  ;;  %v13389_v20 = vpack.c.bf16 %v991_v39, %v987_v37  ;;  %v13413_v37 = vpack.c.bf16 %v1023_v16, %v1019_v27  ;;  %v1018_v39 = vld [vmem:[#allocation6 + $0x3d0] sm:$0xff] }
  0xc3   :  { %9780 = vmatpush1.bf16.msra.mxu1 %v13370_v2  ;;  %1159 = vmatprep.mubr.f32.mxu1 %v15908_v0  ;;  %v13416_v40 = vpack.c.bf16 %v1022_v43, %v1018_v39 }
  0xc4   :  { %9782 = vmatprep.subr.bf16.mxu1 %v13373_v3 }
  0xc7   :  { %9784 = vmatpush1.bf16.msra.mxu1 %v13379_v9 }
  0xc8   :  { %9786 = vmatprep.subr.bf16.mxu1 %v13383_v10 }
  0xcb   :  { %9788 = vmatpush1.bf16.msra.mxu1 %v13386_v17 }
  0xcc   :  { %9790 = vmatprep.subr.bf16.mxu1 %v13389_v20 }
  0xcf   :  { %9792 = vmatpush1.bf16.msra.mxu1 %v13392_v52 }
  0xd0   :  { %9794 = vmatprep.subr.bf16.mxu1 %v13395_v47 }
  0xd3   :  { %9796 = vmatpush1.bf16.msra.mxu1 %v13398_v5 }
  0xd4   :  { %9798 = vmatprep.subr.bf16.mxu1 %v13401_v14 }
  0xd7   :  { %9800 = vmatpush1.bf16.msra.mxu1 %v13404_v24 }
  0xd8   :  { %9802 = vmatprep.subr.bf16.mxu1 %v13407_v8 }
  0xdb   :  { %9804 = vmatpush1.bf16.msra.mxu1 %v13410_v28 }
  0xdc   :  { %9806 = vmatprep.subr.bf16.mxu1 %v13413_v37 }
  0xdf   :  { %9808 = vmatpush1.bf16.msra.mxu1 %v13416_v40 }
  0xe0   :  { %9842 = vmatprep.subr.bf16.mxu1 %v13212_v38  ;;  %v126_v38 = vlaneseq }
  0xe2   :  { %1160 = vmatmul.mubr.f32.vlgmr.msra.gmra.mrb[46].mxu1 %v15908_v0 }
  0xe3   :  { %9844 = vmatpush1.bf16.msra.mxu1 %v13281_v55  ;;  %1404 = vmatprep.mubr.f32.mxu1 %v15908_v0  ;;  %v13439_v55 = vshrl.u32 %v126_v38, 7 }
  0xe4   :  { %9846 = vmatprep.subr.bf16.mxu1 %v13283_v56 }
  0xe5   :  { %16094 = vst [vmem:[#allocation15_spill] sm:$0xff] %v13439_v55  ;;  %v15907_v56 = vsub.s32 0, %v13439_v55 }
  0xe7   :  { %9848 = vmatpush1.bf16.msra.mxu1 %v13291_v6  ;;  %v13445_v6 = vld [vmem:[%s15899_s3] sm:$0xff] }
  0xe8   :  { %9850 = vmatprep.subr.bf16.mxu1 %v13294_v7 }
  0xeb   :  { %9852 = vmatpush1.bf16.msra.mxu1 %v13304_v12  ;;  %v15906_v12 = vsub.s32 1, %v13439_v55 }
  0xec   :  { %9854 = vmatprep.subr.bf16.mxu1 %v13307_v21 }
  0xef   :  { %9856 = vmatpush1.bf16.msra.mxu1 %v13315_v29  ;;  %v129_v29 = vrot.slane %v13445_v6, %v15907_v56 }
  0xf0   :  { %9858 = vmatprep.subr.bf16.mxu1 %v13318_v32  ;;  %v133_v32 = vrot.slane %v13445_v6, %v15906_v12 }
  0xf3   :  { %9860 = vmatpush1.bf16.msra.mxu1 %v13326_v34 }
  0xf4   :  { %9862 = vmatprep.subr.bf16.mxu1 %v13329_v35 }
  0xf7   :  { %9864 = vmatpush1.bf16.msra.mxu1 %v13337_v41 }
  0xf8   :  { %9866 = vmatprep.subr.bf16.mxu1 %v13340_v42 }
  0xfb   :  { %9868 = vmatpush1.bf16.msra.mxu1 %v13348_v48 }
  0xfc   :  { %9870 = vmatprep.subr.bf16.mxu1 %v13351_v51 }
  0xff   :  { %9872 = vmatpush1.bf16.msra.mxu1 %v13359_v58 }
 0x100   :  { %9906 = vmatprep.subr.bf16.mxu1 %v13362_v59 }
 0x135   :  { %v257_v7 = vpop.f32.mrb[0].mxu1 }
 0x136   :  { %v259_v21 = vpop.f32.mrb[1].mxu1 }
 0x139   :  { %v263_v34 = vpop.f32.mrb[2].mxu1 }
 0x13a   :  { %v13454_v35 = vadd.f32 %v263_v34, %v129_v29  ;;  %v265_v41 = vpop.f32.mrb[3].mxu1 }
 0x13b   :  { %v13456_v42 = vadd.f32 %v265_v41, %v133_v32 }
 0x13d   :  { %v269_v48 = vpop.f32.mrb[4].mxu1 }
 0x13e   :  { %v13458_v51 = vadd.f32 %v269_v48, %v129_v29  ;;  %v271_v58 = vpop.f32.mrb[5].mxu1 }
 0x13f   :  { %v13460_v59 = vadd.f32 %v271_v58, %v133_v32  ;;  %v258_v58 = vadd.f32 %v257_v7, %v129_v29 }
 0x141   :  { %16095 = vst [vmem:[#allocation16_spill] sm:$0xff] %v13460_v59  ;;  %v275_v46 = vpop.f32.mrb[6].mxu1  ;;  %v1959_v59 = vld [vmem:[#allocation6 + $0x298] sm:$0xff] }
 0x142   :  { %v13462_v50 = vadd.f32 %v275_v46, %v129_v29  ;;  %v277_v60 = vpop.f32.mrb[7].mxu1  ;;  %v260_v46 = vadd.f32 %v259_v21, %v133_v32 }
 0x143   :  { %v13464_v61 = vadd.f32 %v277_v60, %v133_v32 }
 0x144   :  { %16096 = vst [vmem:[#allocation17_spill] sm:$0xff] %v13462_v50 }
 0x145   :  { %16097 = vst [vmem:[#allocation18_spill] sm:$0xff] %v13464_v61  ;;  %v281_v4 = vpop.f32.mrb[8].mxu1 }
 0x146   :  { %v13466_v57 = vadd.f32 %v281_v4, %v129_v29  ;;  %v283_v15 = vpop.f32.mrb[9].mxu1 }
 0x147   :  { %v13468_v1 = vadd.f32 %v283_v15, %v133_v32 }
 0x148   :  { %16098 = vst [vmem:[#allocation19_spill] sm:$0xff] %v13466_v57 }
 0x149   :  { %16099 = vst [vmem:[#allocation20_spill] sm:$0xff] %v13468_v1  ;;  %v287_v18 = vpop.f32.mrb[10].mxu1 }
 0x14a   :  { %v13470_v19 = vadd.f32 %v287_v18, %v129_v29  ;;  %v289_v26 = vpop.f32.mrb[11].mxu1 }
 0x14b   :  { %v13472_v25 = vadd.f32 %v289_v26, %v133_v32 }
 0x14c   :  { %16100 = vst [vmem:[#allocation21_spill] sm:$0xff] %v13470_v19 }
 0x14d   :  { %16101 = vst [vmem:[#allocation22_spill] sm:$0xff] %v13472_v25  ;;  %v293_v27 = vpop.f32.mrb[12].mxu1 }
 0x14e   :  { %v13474_v16 = vadd.f32 %v293_v27, %v129_v29  ;;  %v295_v39 = vpop.f32.mrb[13].mxu1 }
 0x14f   :  { %v13476_v43 = vadd.f32 %v295_v39, %v133_v32  ;;  %v15910_v39 = vsub.s32 2, %v13439_v55 }
 0x150   :  { %16102 = vst [vmem:[#allocation23_spill] sm:$0xff] %v13474_v16 }
 0x151   :  { %16103 = vst [vmem:[#allocation24_spill] sm:$0xff] %v13476_v43  ;;  %v299_v38 = vpop.f32.mrb[14].mxu1  ;;  %v13487_v7 = vrot.slane %v13445_v6, %v15910_v39 }
 0x152   :  { %v13478_v34 = vadd.f32 %v299_v38, %v129_v29  ;;  %v301_v41 = vpop.f32.mrb[15].mxu1  ;;  %v15911_v38 = vsub.s32 3, %v13439_v55 }
 0x153   :  { %v13480_v48 = vadd.f32 %v301_v41, %v133_v32  ;;  %16106 = vst [vmem:[#allocation27_spill] sm:$0xff] %v13487_v7 }
 0x154   :  { %16104 = vst [vmem:[#allocation25_spill] sm:$0xff] %v13478_v34  ;;  %v13492_v29 = vrot.slane %v13445_v6, %v15911_v38 }
 0x155   :  { %16105 = vst [vmem:[#allocation26_spill] sm:$0xff] %v13480_v48 }
 0x156   :  { %16107 = vst [vmem:[#allocation28_spill] sm:$0xff] %v13492_v29 }
 0x157   :  { %v844_v60 = vpop.f32.mrb[16].mxu0 }
 0x158   :  { %v920_v4 = vadd.f32 %v844_v60, %v258_v58  ;;  %v846_v15 = vpop.f32.mrb[17].mxu0  ;;  %v15913_v58 = vsub.s32 4, %v13439_v55 }
 0x159   :  { %v921_v18 = vadd.f32 %v846_v15, %v260_v46 }
 0x15a   :  { %v9504_v27 = vmul.f32 -1.442695, %v920_v4  ;;  %v13506_v15 = vrot.slane %v13445_v6, %v15913_v58 }
 0x15b   :  { %v9505_v56 = vmul.f32 -1.442695, %v921_v18 }
 0x15c   :  { %16109 = vst [vmem:[#allocation30_spill] sm:$0xff] %v13506_v15 }
 0x15d   :  { %12285 = vpow2.f32 %v9505_v56  ;;  %v15912_v56 = vsub.s32 5, %v13439_v55 }
 0x15e   :  { %12287 = vpow2.f32 %v9504_v27 }
 0x167   :  { %v12286_v0 = vpop.eup %12285 }
 0x168   :  { %v12288_v34 = vpop.eup %12287  ;;  %v933_v41 = vadd.f32 1.0, %v12286_v0 }
 0x169   :  { %v927_v21 = vadd.f32 1.0, %v12288_v34  ;;  %v13501_v34 = vrot.slane %v13445_v6, %v15912_v56 }
 0x16a   :  { %12289 = vrcp.f32 %v933_v41 }
 0x16b   :  { %12291 = vrcp.f32 %v927_v21  ;;  %16108 = vst [vmem:[#allocation29_spill] sm:$0xff] %v13501_v34 }
 0x174   :  { %v12290_v41 = vpop.eup %12289 }
 0x175   :  { %v12292_v21 = vpop.eup %12291  ;;  %v943_v39 = vmul.f32 0.0, %v12290_v41 }
 0x177   :  { %v1090_v26 = vpop.f32.mrb[14].mxu0 }
 0x178   :  { %v1092_v12 = vpop.f32.mrb[15].mxu0  ;;  %v12079_v27 = vadd.f32 %v1090_v26, %v13506_v15  ;;  %v15915_v26 = vsub.s32 7, %v13439_v55 }
 0x179   :  { %v12080_v18 = vadd.f32 %v1092_v12, %v13501_v34  ;;  %v15914_v12 = vsub.s32 6, %v13439_v55 }
 0x17b   :  { %v13518_v41 = vrot.slane %v13445_v6, %v15914_v12 }
 0x195   :  { %v915_v32 = vpop.f32.mrb[16].mxu1 }
 0x196   :  { %v12049_v46 = vadd.f32 %v915_v32, %v13487_v7  ;;  %v917_v0 = vpop.f32.mrb[17].mxu1  ;;  %v9508_v32 = vmul.f32 -1.442695, %v12080_v18 }
 0x197   :  { %v12050_v60 = vadd.f32 %v917_v0, %v13492_v29  ;;  %v9507_v0 = vmul.f32 -1.442695, %v12079_v27 }
 0x198   :  { %12293 = vtanh.f32 %v12049_v46 }
 0x199   :  { %v9506_v4 = vmul.f32 -1.442695, %v12050_v60 }
 0x19b   :  { %12295 = vpow2.f32 %v9506_v4 }
 0x19c   :  { %12297 = vpow2.f32 %v9508_v32 }
 0x19d   :  { %12299 = vpow2.f32 %v9507_v0 }
 0x1a2   :  { %v12294_v46 = vpop.eup %12293 }
 0x1a3   :  { %v944_v38 = vmul.f32 %v12294_v46, %v12292_v21 }
 0x1a5   :  { %v12296_v56 = vpop.eup %12295  ;;  %v13510_v60 = vadd.f32 %v944_v38, %v943_v39 }
 0x1a6   :  { %v940_v48 = vadd.f32 1.0, %v12296_v56  ;;  %v12298_v4 = vpop.eup %12297 }
 0x1a7   :  { %12301 = vtanh.f32 %v13510_v60  ;;  %v12300_v58 = vpop.eup %12299  ;;  %v1179_v27 = vadd.f32 1.0, %v12298_v4  ;;  %v1705_v4 = vld [vmem:[#allocation6 + $0x50] sm:$0xff] }
 0x1a8   :  { %12303 = vrcp.f32 %v940_v48  ;;  %v1173_v39 = vadd.f32 1.0, %v12300_v58  ;;  %v13525_v48 = vrot.slane %v13445_v6, %v15915_v26  ;;  %v16112_v6 = vmov 0.0   ;;  %v1941_v26 = vld [vmem:[#allocation6 + $0x208] sm:$0xff] }
 0x1a9   :  { %12305 = vrcp.f32 %v1179_v27 }
 0x1aa   :  { %16111 = vst [vmem:[#allocation32_spill] sm:$0xff] %v13525_v48  ;;  %12307 = vrcp.f32 %v1173_v39  ;;  %v1712_v39 = vld [vmem:[#allocation6 + $0x88] sm:$0xff] }
 0x1b1   :  { %v12302_v18 = vpop.eup %12301 }
 0x1b2   :  { %v12304_v43 = vpop.eup %12303 }
 0x1b3   :  { %v13520_v38 = vmul.f32 %v12304_v43, %v12302_v18  ;;  %v1709_v18 = vld [vmem:[#allocation6 + $0x70] sm:$0xff] }
 0x1b4   :  { %v13591_v27 = vpack.c.bf16 %v1709_v18, %v1705_v4  ;;  %v1727_v4 = vld [vmem:[#allocation6 + $0x100] sm:$0xff] }
 0x1b5   :  { %16110 = vst [vmem:[#allocation31_spill] sm:$0xff] %v13520_v38  ;;  %v1161_v56 = vpop.f32.mrb[46].mxu1  ;;  %1334 = vmatmul.mubr.f32.vlgmr.msra.gmra.mrb[18].mxu0 %v13520_v38  ;;  %1405 = vmatmul.mubr.f32.vlgmr.msra.gmra.mrb[18].mxu1 %v13520_v38  ;;  %v1731_v18 = vld [vmem:[#allocation6 + $0x120] sm:$0xff] }
 0x1b6   :  { %v12095_v21 = vadd.f32 %v1161_v56, %v13518_v41  ;;  %v1163_v32 = vpop.f32.mrb[47].mxu1  ;;  %9876 = vmatpush1.bf16.msra.mxu0 %v13207_v31  ;;  %9908 = vmatpush1.bf16.msra.mxu1 %v13370_v2  ;;  %v12306_v31 = vpop.eup %12305  ;;  %v1716_v56 = vld [vmem:[#allocation6 + $0xa8] sm:$0xff] }
 0x1b7   :  { %v12096_v43 = vadd.f32 %v1163_v32, %v13525_v48  ;;  %9878 = vmatprep.subr.bf16.mxu0 %v13210_v33  ;;  %9910 = vmatprep.subr.bf16.mxu1 %v13373_v3  ;;  %v12308_v33 = vpop.eup %12307  ;;  %v13596_v32 = vpack.c.bf16 %v1716_v56, %v1712_v39  ;;  %v13624_v56 = vpack.c.bf16 %v1731_v18, %v1727_v4  ;;  %v1750_v18 = vld [vmem:[#allocation6 + $0x1b8] sm:$0xff] }
 0x1b8   :  { %12309 = vtanh.f32 %v12095_v21  ;;  %1578 = vmatprep.mubr.f32.mxu0 %v16112_v6  ;;  %1649 = vmatprep.mubr.f32.mxu1 %v16112_v6  ;;  %v1714_v21 = vld [vmem:[#allocation6 + $0x98] sm:$0xff] }
 0x1b9   :  { %v9509_v58 = vmul.f32 -1.442695, %v12096_v43  ;;  %v1718_v43 = vld [vmem:[#allocation6 + $0xb8] sm:$0xff] }
 0x1ba   :  { %9880 = vmatpush1.bf16.msra.mxu0 %v13219_v44  ;;  %9912 = vmatpush1.bf16.msra.mxu1 %v13379_v9  ;;  %v1189_v44 = vmul.f32 0.0, %v12306_v31  ;;  %v1715_v31 = vld [vmem:[#allocation6 + $0xa0] sm:$0xff] }
 0x1bb   :  { %12311 = vpow2.f32 %v9509_v58  ;;  %9882 = vmatprep.subr.bf16.mxu0 %v13222_v45  ;;  %9914 = vmatprep.subr.bf16.mxu1 %v13383_v10  ;;  %v1711_v58 = vld [vmem:[#allocation6 + $0x80] sm:$0xff] }
 0x1be   :  { %9884 = vmatpush1.bf16.msra.mxu0 %v13230_v53  ;;  %9916 = vmatpush1.bf16.msra.mxu1 %v13386_v17 }
 0x1bf   :  { %9886 = vmatprep.subr.bf16.mxu0 %v13233_v54  ;;  %9918 = vmatprep.subr.bf16.mxu1 %v13389_v20  ;;  %v1697_v20 = vld [vmem:[#allocation6 + $0x10] sm:$0xff] }
 0x1c2   :  { %v12310_v2 = vpop.eup %12309  ;;  %9888 = vmatpush1.bf16.msra.mxu0 %v13239_v62  ;;  %9920 = vmatpush1.bf16.msra.mxu1 %v13392_v52  ;;  %v1701_v52 = vld [vmem:[#allocation6 + $0x30] sm:$0xff] }
 0x1c3   :  { %v1190_v3 = vmul.f32 %v12310_v2, %v12308_v33  ;;  %9890 = vmatprep.subr.bf16.mxu0 %v13242_v63  ;;  %9922 = vmatprep.subr.bf16.mxu1 %v13395_v47  ;;  %v13579_v47 = vpack.c.bf16 %v1701_v52, %v1697_v20  ;;  %v13598_v33 = vpack.c.bf16 %v1718_v43, %v1714_v21  ;;  %v1721_v20 = vld [vmem:[#allocation6 + $0xd0] sm:$0xff] }
 0x1c4   :  { %v13600_v2 = vpack.c.bf16 %v1715_v31, %v1711_v58  ;;  %v1725_v52 = vld [vmem:[#allocation6 + $0xf0] sm:$0xff]  ;;  %v1736_v31 = vld [vmem:[#allocation6 + $0x148] sm:$0xff] }
 0x1c5   :  { %v12312_v45 = vpop.eup %12311  ;;  %v13549_v53 = vadd.f32 %v1190_v3, %v1189_v44  ;;  %v1713_v44 = vld [vmem:[#allocation6 + $0x90] sm:$0xff] }
 0x1c6   :  { %v1186_v9 = vadd.f32 1.0, %v12312_v45  ;;  %9892 = vmatpush1.bf16.msra.mxu0 %v13248_v11  ;;  %9924 = vmatpush1.bf16.msra.mxu1 %v13398_v5  ;;  %v1696_v11 = vld [vmem:[#allocation6 + $0x8] sm:$0xff]  ;;  %v1717_v3 = vld [vmem:[#allocation6 + $0xb0] sm:$0xff] }
 0x1c7   :  { %12313 = vtanh.f32 %v13549_v53  ;;  %9894 = vmatprep.subr.bf16.mxu0 %v13251_v13  ;;  %9926 = vmatprep.subr.bf16.mxu1 %v13401_v14  ;;  %v1700_v13 = vld [vmem:[#allocation6 + $0x28] sm:$0xff]  ;;  %v13603_v45 = vpack.c.bf16 %v1717_v3, %v1713_v44  ;;  %v1729_v21 = vld [vmem:[#allocation6 + $0x110] sm:$0xff]  ;;  %v1738_v3 = vld [vmem:[#allocation6 + $0x158] sm:$0xff] }
 0x1c8   :  { %12315 = vrcp.f32 %v1186_v9  ;;  %v1704_v5 = vld [vmem:[#allocation6 + $0x48] sm:$0xff]  ;;  %v1733_v43 = vld [vmem:[#allocation6 + $0x130] sm:$0xff] }
 0x1c9   :  { %v1708_v14 = vld [vmem:[#allocation6 + $0x68] sm:$0xff]  ;;  %v13627_v58 = vpack.c.bf16 %v1733_v43, %v1729_v21  ;;  %v1743_v21 = vld [vmem:[#allocation6 + $0x180] sm:$0xff] }
 0x1ca   :  { %9896 = vmatpush1.bf16.msra.mxu0 %v13257_v22  ;;  %9928 = vmatpush1.bf16.msra.mxu1 %v13404_v24  ;;  %v1698_v22 = vld [vmem:[#allocation6 + $0x18] sm:$0xff]  ;;  %v1720_v9 = vld [vmem:[#allocation6 + $0xc8] sm:$0xff]  ;;  %v1747_v43 = vld [vmem:[#allocation6 + $0x1a0] sm:$0xff] }
 0x1cb   :  { %9898 = vmatprep.subr.bf16.mxu0 %v13260_v23  ;;  %9930 = vmatprep.subr.bf16.mxu1 %v13407_v8  ;;  %v13572_v23 = vpack.c.bf16 %v1700_v13, %v1696_v11  ;;  %v1706_v24 = vld [vmem:[#allocation6 + $0x58] sm:$0xff]  ;;  %v13584_v8 = vpack.c.bf16 %v1708_v14, %v1704_v5  ;;  %v13615_v5 = vpack.c.bf16 %v1725_v52, %v1721_v20  ;;  %v1728_v14 = vld [vmem:[#allocation6 + $0x108] sm:$0xff]  ;;  %v1737_v20 = vld [vmem:[#allocation6 + $0x150] sm:$0xff] }
 0x1cc   :  { %v1726_v13 = vld [vmem:[#allocation6 + $0xf8] sm:$0xff]  ;;  %v1740_v44 = vld [vmem:[#allocation6 + $0x168] sm:$0xff]  ;;  %v1741_v52 = vld [vmem:[#allocation6 + $0x170] sm:$0xff] }
 0x1ce   :  { %9900 = vmatpush1.bf16.msra.mxu0 %v13266_v30  ;;  %9932 = vmatpush1.bf16.msra.mxu1 %v13410_v28  ;;  %v1702_v30 = vld [vmem:[#allocation6 + $0x38] sm:$0xff] }
 0x1cf   :  { %9902 = vmatprep.subr.bf16.mxu0 %v13269_v36  ;;  %9934 = vmatprep.subr.bf16.mxu1 %v13413_v37  ;;  %v1695_v36 = vld [vmem:[#allocation6] sm:$0xff]  ;;  %v13574_v10 = vpack.c.bf16 %v1702_v30, %v1698_v22  ;;  %v1710_v28 = vld [vmem:[#allocation6 + $0x78] sm:$0xff] }
 0x1d0   :  { %v1703_v37 = vld [vmem:[#allocation6 + $0x40] sm:$0xff]  ;;  %v13586_v46 = vpack.c.bf16 %v1710_v28, %v1706_v24  ;;  %v1732_v24 = vld [vmem:[#allocation6 + $0x128] sm:$0xff]  ;;  %v1730_v28 = vld [vmem:[#allocation6 + $0x118] sm:$0xff] }
 0x1d1   :  { %v12314_v54 = vpop.eup %12313  ;;  %v1719_v22 = vld [vmem:[#allocation6 + $0xc0] sm:$0xff] }
 0x1d2   :  { %v12316_v62 = vpop.eup %12315  ;;  %9904 = vmatpush1.bf16.msra.mxu0 %v13275_v49  ;;  %9936 = vmatpush1.bf16.msra.mxu1 %v13416_v40  ;;  %v1699_v49 = vld [vmem:[#allocation6 + $0x20] sm:$0xff] }
 0x1d3   :  { %v13566_v63 = vmul.f32 %v12316_v62, %v12314_v54  ;;  %v13576_v17 = vpack.c.bf16 %v1699_v49, %v1695_v36  ;;  %9938 = vmatprep.subr.bf16.mxu0 %v13572_v23  ;;  %9970 = vmatprep.subr.bf16.mxu1 %v13574_v10  ;;  %v1707_v40 = vld [vmem:[#allocation6 + $0x60] sm:$0xff]  ;;  %v1724_v54 = vld [vmem:[#allocation6 + $0xe8] sm:$0xff]  ;;  %v1722_v62 = vld [vmem:[#allocation6 + $0xd8] sm:$0xff] }
 0x1d4   :  { %v13588_v0 = vpack.c.bf16 %v1707_v40, %v1703_v37  ;;  %v13608_v11 = vpack.c.bf16 %v1724_v54, %v1720_v9  ;;  %v1723_v30 = vld [vmem:[#allocation6 + $0xe0] sm:$0xff]  ;;  %v13610_v36 = vpack.c.bf16 %v1726_v13, %v1722_v62  ;;  %v13620_v37 = vpack.c.bf16 %v1732_v24, %v1728_v14  ;;  %v1734_v40 = vld [vmem:[#allocation6 + $0x138] sm:$0xff]  ;;  %v1744_v24 = vld [vmem:[#allocation6 + $0x188] sm:$0xff] }
 0x1d5   :  { %16113 = vst [vmem:[#allocation33_spill] sm:$0xff] %v13566_v63  ;;  %1579 = vmatmul.mubr.f32.vlgmr.msra.gmra.mrb[12].mxu0 %v13566_v63  ;;  %1650 = vmatmul.mubr.f32.vlgmr.msra.gmra.mrb[44].mxu1 %v13566_v63  ;;  %v13612_v49 = vpack.c.bf16 %v1723_v30, %v1719_v22  ;;  %v13622_v39 = vpack.c.bf16 %v1734_v40, %v1730_v28  ;;  %v1742_v54 = vld [vmem:[#allocation6 + $0x178] sm:$0xff]  ;;  %v1735_v62 = vld [vmem:[#allocation6 + $0x140] sm:$0xff]  ;;  %v1748_v28 = vld [vmem:[#allocation6 + $0x1a8] sm:$0xff] }
 0x1d6   :  { %1823 = vmatprep.mubr.f32.mxu0 %v16112_v6  ;;  %1894 = vmatprep.mubr.f32.mxu1 %v16112_v6  ;;  %v13632_v9 = vpack.c.bf16 %v1740_v44, %v1736_v31  ;;  %v1739_v13 = vld [vmem:[#allocation6 + $0x160] sm:$0xff]  ;;  %v13634_v22 = vpack.c.bf16 %v1742_v54, %v1738_v3  ;;  %v13639_v14 = vpack.c.bf16 %v1741_v52, %v1737_v20  ;;  %v1746_v40 = vld [vmem:[#allocation6 + $0x198] sm:$0xff]  ;;  %v1745_v3 = vld [vmem:[#allocation6 + $0x190] sm:$0xff] }
 0x1d7   :  { %9940 = vmatpush1.bf16.msra.mxu0 %v13576_v17  ;;  %9972 = vmatpush1.bf16.msra.mxu1 %v13579_v47  ;;  %v13636_v30 = vpack.c.bf16 %v1739_v13, %v1735_v62  ;;  %v13644_v4 = vpack.c.bf16 %v1748_v28, %v1744_v24  ;;  %v13646_v31 = vpack.c.bf16 %v1750_v18, %v1746_v40  ;;  %v1749_v54 = vld [vmem:[#allocation6 + $0x1b0] sm:$0xff]  ;;  %v1752_v13 = vld [vmem:[#allocation6 + $0x1c8] sm:$0xff]  ;;  %v1754_v52 = vld [vmem:[#allocation6 + $0x1d8] sm:$0xff] }
 0x1d8   :  { %9942 = vmatprep.subr.bf16.mxu0 %v13584_v8  ;;  %9974 = vmatprep.subr.bf16.mxu1 %v13586_v46  ;;  %v13648_v44 = vpack.c.bf16 %v1747_v43, %v1743_v21  ;;  %v13651_v62 = vpack.c.bf16 %v1749_v54, %v1745_v3  ;;  %v1756_v20 = vld [vmem:[#allocation6 + $0x1e8] sm:$0xff]  ;;  %v1758_v28 = vld [vmem:[#allocation6 + $0x1f8] sm:$0xff]  ;;  %v1751_v40 = vld [vmem:[#allocation6 + $0x1c0] sm:$0xff] }
 0x1d9   :  { %v13656_v24 = vpack.c.bf16 %v1756_v20, %v1752_v13  ;;  %v1755_v18 = vld [vmem:[#allocation6 + $0x1e0] sm:$0xff]  ;;  %v13658_v21 = vpack.c.bf16 %v1758_v28, %v1754_v52  ;;  %v1753_v3 = vld [vmem:[#allocation6 + $0x1d0] sm:$0xff]  ;;  %v1945_v13 = vld [vmem:[#allocation6 + $0x228] sm:$0xff] }
 0x1da   :  { %v13660_v43 = vpack.c.bf16 %v1755_v18, %v1751_v40  ;;  %v1757_v54 = vld [vmem:[#allocation6 + $0x1f0] sm:$0xff]  ;;  %v1943_v20 = vld [vmem:[#allocation6 + $0x218] sm:$0xff]  ;;  %v13668_v55 = vpack.c.bf16 %v1945_v13, %v1941_v26 }
 0x1db   :  { %9944 = vmatpush1.bf16.msra.mxu0 %v13588_v0  ;;  %9976 = vmatpush1.bf16.msra.mxu1 %v13591_v27  ;;  %v13663_v12 = vpack.c.bf16 %v1757_v54, %v1753_v3  ;;  %v1947_v52 = vld [vmem:[#allocation6 + $0x238] sm:$0xff] }
 0x1dc   :  { %9946 = vmatprep.subr.bf16.mxu0 %v13596_v32  ;;  %9978 = vmatprep.subr.bf16.mxu1 %v13598_v33  ;;  %v13670_v28 = vpack.c.bf16 %v1947_v52, %v1943_v20 }
 0x1df   :  { %9948 = vmatpush1.bf16.msra.mxu0 %v13600_v2  ;;  %9980 = vmatpush1.bf16.msra.mxu1 %v13603_v45 }
 0x1e0   :  { %9950 = vmatprep.subr.bf16.mxu0 %v13608_v11  ;;  %9982 = vmatprep.subr.bf16.mxu1 %v13610_v36 }
 0x1e3   :  { %9952 = vmatpush1.bf16.msra.mxu0 %v13612_v49  ;;  %9984 = vmatpush1.bf16.msra.mxu1 %v13615_v5 }
 0x1e4   :  { %9954 = vmatprep.subr.bf16.mxu0 %v13620_v37  ;;  %9986 = vmatprep.subr.bf16.mxu1 %v13622_v39 }
 0x1e7   :  { %9956 = vmatpush1.bf16.msra.mxu0 %v13624_v56  ;;  %9988 = vmatpush1.bf16.msra.mxu1 %v13627_v58 }
 0x1e8   :  { %9958 = vmatprep.subr.bf16.mxu0 %v13632_v9  ;;  %9990 = vmatprep.subr.bf16.mxu1 %v13634_v22 }
 0x1eb   :  { %9960 = vmatpush1.bf16.msra.mxu0 %v13636_v30  ;;  %9992 = vmatpush1.bf16.msra.mxu1 %v13639_v14 }
 0x1ec   :  { %9962 = vmatprep.subr.bf16.mxu0 %v13644_v4  ;;  %9994 = vmatprep.subr.bf16.mxu1 %v13646_v31 }
 0x1ef   :  { %9964 = vmatpush1.bf16.msra.mxu0 %v13648_v44  ;;  %9996 = vmatpush1.bf16.msra.mxu1 %v13651_v62 }
 0x1f0   :  { %9966 = vmatprep.subr.bf16.mxu0 %v13656_v24  ;;  %9998 = vmatprep.subr.bf16.mxu1 %v13658_v21 }
 0x1f3   :  { %9968 = vmatpush1.bf16.msra.mxu0 %v13660_v43  ;;  %10000 = vmatpush1.bf16.msra.mxu1 %v13663_v12 }
 0x1f4   :  { %10002 = vmatprep.subr.bf16.mxu0 %v13668_v55  ;;  %10034 = vmatprep.subr.bf16.mxu1 %v13670_v28 }
 0x288   :  { %v1335_v40 = vpop.f32.mrb[18].mxu0  ;;  %v1406_v18 = vpop.f32.mrb[18].mxu1 }
 0x289   :  { %v1411_v3 = vadd.f32 %v1335_v40, %v13454_v35  ;;  %v1337_v54 = vpop.f32.mrb[19].mxu0  ;;  %v1408_v63 = vpop.f32.mrb[19].mxu1  ;;  %v12051_v20 = vadd.f32 %v1406_v18, %v13487_v7  ;;  %v1957_v7 = vld [vmem:[#allocation6 + $0x288] sm:$0xff] }
 0x28a   :  { %v1412_v38 = vadd.f32 %v1337_v54, %v13456_v42  ;;  %v12052_v26 = vadd.f32 %v1408_v63, %v13492_v29  ;;  %v1961_v29 = vld [vmem:[#allocation6 + $0x2a8] sm:$0xff] }
 0x28b   :  { %v9510_v16 = vmul.f32 -1.442695, %v1411_v3 }
 0x28c   :  { %v9511_v25 = vmul.f32 -1.442695, %v1412_v38  ;;  %v9512_v13 = vmul.f32 -1.442695, %v12052_v26 }
 0x28d   :  { %12317 = vpow2.f32 %v9510_v16 }
 0x28e   :  { %12319 = vpow2.f32 %v9511_v25 }
 0x28f   :  { %12321 = vpow2.f32 %v9512_v13 }
 0x290   :  { %12323 = vtanh.f32 %v12051_v20 }
 0x297   :  { %v12318_v52 = vpop.eup %12317 }
 0x298   :  { %v12320_v19 = vpop.eup %12319  ;;  %v1418_v1 = vadd.f32 1.0, %v12318_v52 }
 0x299   :  { %v1424_v57 = vadd.f32 1.0, %v12320_v19  ;;  %v12322_v35 = vpop.eup %12321 }
 0x29a   :  { %12325 = vrcp.f32 %v1418_v1  ;;  %v12324_v40 = vpop.eup %12323  ;;  %v1431_v16 = vadd.f32 1.0, %v12322_v35  ;;  %v1944_v35 = vld [vmem:[#allocation6 + $0x220] sm:$0xff] }
 0x29b   :  { %12327 = vrcp.f32 %v1424_v57 }
 0x29c   :  { %12329 = vrcp.f32 %v1431_v16  ;;  %v1951_v16 = vld [vmem:[#allocation6 + $0x258] sm:$0xff] }
 0x2a4   :  { %v12326_v42 = vpop.eup %12325 }
 0x2a5   :  { %v12328_v3 = vpop.eup %12327  ;;  %v1435_v38 = vmul.f32 %v12326_v42, %v12324_v40  ;;  %v1942_v40 = vld [vmem:[#allocation6 + $0x210] sm:$0xff] }
 0x2a6   :  { %v1434_v25 = vmul.f32 %v12328_v3, %v13510_v60  ;;  %v1940_v60 = vld [vmem:[#allocation6 + $0x200] sm:$0xff]  ;;  %v1946_v42 = vld [vmem:[#allocation6 + $0x230] sm:$0xff]  ;;  %v1949_v3 = vld [vmem:[#allocation6 + $0x248] sm:$0xff] }
 0x2a8   :  { %v13679_v63 = vadd.f32 %v1435_v38, %v1434_v25  ;;  %v1580_v54 = vpop.f32.mrb[12].mxu0  ;;  %v1651_v18 = vpop.f32.mrb[44].mxu1  ;;  %v1953_v38 = vld [vmem:[#allocation6 + $0x268] sm:$0xff]  ;;  %v1955_v25 = vld [vmem:[#allocation6 + $0x278] sm:$0xff] }
 0x2a9   :  { %v12077_v26 = vadd.f32 %v1580_v54, %v13506_v15  ;;  %v1582_v13 = vpop.f32.mrb[13].mxu0  ;;  %v1653_v20 = vpop.f32.mrb[45].mxu1  ;;  %v13685_v15 = vpack.c.bf16 %v1944_v35, %v1940_v60 }
 0x2aa   :  { %16114 = vst [vmem:[#allocation34_spill] sm:$0xff] %v13679_v63  ;;  %12331 = vtanh.f32 %v13679_v63  ;;  %v12078_v57 = vadd.f32 %v1582_v13, %v13501_v34  ;;  %v12094_v52 = vadd.f32 %v1653_v20, %v13525_v48  ;;  %v12330_v54 = vpop.eup %12329  ;;  %v13687_v13 = vpack.c.bf16 %v1946_v42, %v1942_v40  ;;  %v1950_v34 = vld [vmem:[#allocation6 + $0x250] sm:$0xff]  ;;  %v1956_v42 = vld [vmem:[#allocation6 + $0x280] sm:$0xff] }
 0x2ab   :  { %v9513_v1 = vmul.f32 -1.442695, %v12077_v26  ;;  %16115 = vst [vmem:[#allocation35_spill] sm:$0xff] %v13685_v15  ;;  %v1948_v26 = vld [vmem:[#allocation6 + $0x240] sm:$0xff]  ;;  %v12093_v20 = vadd.f32 %v1651_v18, %v13518_v41  ;;  %v13694_v48 = vpack.c.bf16 %v1955_v25, %v1951_v16  ;;  %v1954_v63 = vld [vmem:[#allocation6 + $0x270] sm:$0xff]  ;;  %v13706_v16 = vpack.c.bf16 %v1961_v29, %v1957_v7 }
 0x2ac   :  { %v9514_v19 = vmul.f32 -1.442695, %v12078_v57  ;;  %v9515_v50 = vmul.f32 -1.442695, %v12094_v52  ;;  %16116 = vst [vmem:[#allocation36_spill] sm:$0xff] %v13687_v13  ;;  %v1952_v57 = vld [vmem:[#allocation6 + $0x260] sm:$0xff]  ;;  %v13702_v40 = vpack.c.bf16 %v1954_v63, %v1950_v34 }
 0x2ad   :  { %12333 = vpow2.f32 %v9513_v1  ;;  %16119 = vst [vmem:[#allocation39_spill] sm:$0xff] %v13694_v48  ;;  %v1963_v52 = vld [vmem:[#allocation6 + $0x2b8] sm:$0xff]  ;;  %v13700_v18 = vpack.c.bf16 %v1952_v57, %v1948_v26  ;;  %16122 = vst [vmem:[#allocation42_spill] sm:$0xff] %v13706_v16  ;;  %v1969_v26 = vld [vmem:[#allocation6 + $0x2e8] sm:$0xff] }
 0x2ae   :  { %12335 = vpow2.f32 %v9514_v19  ;;  %v13692_v19 = vpack.c.bf16 %v1953_v38, %v1949_v3  ;;  %16121 = vst [vmem:[#allocation41_spill] sm:$0xff] %v13702_v40  ;;  %v1960_v3 = vld [vmem:[#allocation6 + $0x2a0] sm:$0xff]  ;;  %v13708_v25 = vpack.c.bf16 %v1963_v52, %v1959_v59  ;;  %v1967_v57 = vld [vmem:[#allocation6 + $0x2d8] sm:$0xff] }
 0x2af   :  { %12337 = vpow2.f32 %v9515_v50  ;;  %16120 = vst [vmem:[#allocation40_spill] sm:$0xff] %v13700_v18  ;;  %v1958_v50 = vld [vmem:[#allocation6 + $0x290] sm:$0xff]  ;;  %v1971_v34 = vld [vmem:[#allocation6 + $0x2f8] sm:$0xff]  ;;  %v13714_v7 = vpack.c.bf16 %v1960_v3, %v1956_v42  ;;  %v1964_v29 = vld [vmem:[#allocation6 + $0x2c0] sm:$0xff] }
 0x2b0   :  { %16118 = vst [vmem:[#allocation38_spill] sm:$0xff] %v13692_v19  ;;  %12339 = vtanh.f32 %v12093_v20  ;;  %16123 = vst [vmem:[#allocation43_spill] sm:$0xff] %v13708_v25  ;;  %v1968_v63 = vld [vmem:[#allocation6 + $0x2e0] sm:$0xff]  ;;  %v13722_v52 = vpack.c.bf16 %v1971_v34, %v1967_v57  ;;  %v1974_v57 = vld [vmem:[#allocation6 + $0x310] sm:$0xff] }
 0x2b1   :  { %16124 = vst [vmem:[#allocation44_spill] sm:$0xff] %v13714_v7  ;;  %v13726_v42 = vpack.c.bf16 %v1968_v63, %v1964_v29  ;;  %v1978_v34 = vld [vmem:[#allocation6 + $0x330] sm:$0xff]  ;;  %v1987_v29 = vld [vmem:[#allocation6 + $0x378] sm:$0xff] }
 0x2b2   :  { %16127 = vst [vmem:[#allocation47_spill] sm:$0xff] %v13722_v52 }
 0x2b3   :  { %16128 = vst [vmem:[#allocation48_spill] sm:$0xff] %v13726_v42 }
 0x2b4   :  { %v12332_v61 = vpop.eup %12331 }
 0x2b5   :  { %v13689_v1 = vmul.f32 %v12332_v61, %v12330_v54  ;;  %v1962_v54 = vld [vmem:[#allocation6 + $0x2b0] sm:$0xff] }
 0x2b6   :  { %v13716_v59 = vpack.c.bf16 %v1962_v54, %v1958_v50  ;;  %v1972_v50 = vld [vmem:[#allocation6 + $0x300] sm:$0xff] }
 0x2b7   :  { %16117 = vst [vmem:[#allocation37_spill] sm:$0xff] %v13689_v1  ;;  %v12334_v60 = vpop.eup %12333  ;;  %1824 = vmatmul.mubr.f32.vlgmr.msra.gmra.mrb[20].mxu0 %v13689_v1  ;;  %1895 = vmatmul.mubr.f32.vlgmr.msra.gmra.mrb[20].mxu1 %v13689_v1  ;;  %v1977_v1 = vld [vmem:[#allocation6 + $0x328] sm:$0xff]  ;;  %v1976_v54 = vld [vmem:[#allocation6 + $0x320] sm:$0xff] }
 0x2b8   :  { %v12336_v35 = vpop.eup %12335  ;;  %v1663_v61 = vadd.f32 1.0, %v12334_v60  ;;  %10004 = vmatpush1.bf16.msra.mxu0 %v13685_v15  ;;  %10036 = vmatpush1.bf16.msra.mxu1 %v13687_v13  ;;  %v1965_v60 = vld [vmem:[#allocation6 + $0x2c8] sm:$0xff]  ;;  %16125 = vst [vmem:[#allocation45_spill] sm:$0xff] %v13716_v59  ;;  %v1986_v13 = vld [vmem:[#allocation6 + $0x370] sm:$0xff] }
 0x2b9   :  { %v1669_v38 = vadd.f32 1.0, %v12336_v35  ;;  %10006 = vmatprep.subr.bf16.mxu0 %v13692_v19  ;;  %10038 = vmatprep.subr.bf16.mxu1 %v13694_v48  ;;  %v13720_v20 = vpack.c.bf16 %v1969_v26, %v1965_v60  ;;  %v1966_v35 = vld [vmem:[#allocation6 + $0x2d0] sm:$0xff] }
 0x2ba   :  { %12341 = vrcp.f32 %v1663_v61  ;;  %2068 = vmatprep.mubr.f32.mxu0 %v16112_v6  ;;  %2139 = vmatprep.mubr.f32.mxu1 %v16112_v6  ;;  %v1970_v61 = vld [vmem:[#allocation6 + $0x2f0] sm:$0xff] }
 0x2bb   :  { %12343 = vrcp.f32 %v1669_v38  ;;  %16126 = vst [vmem:[#allocation46_spill] sm:$0xff] %v13720_v20  ;;  %v1973_v38 = vld [vmem:[#allocation6 + $0x308] sm:$0xff]  ;;  %v13728_v3 = vpack.c.bf16 %v1970_v61, %v1966_v35  ;;  %v13738_v61 = vpack.c.bf16 %v1976_v54, %v1972_v50 }
 0x2bc   :  { %10008 = vmatpush1.bf16.msra.mxu0 %v13700_v18  ;;  %10040 = vmatpush1.bf16.msra.mxu1 %v13702_v40  ;;  %v1975_v18 = vld [vmem:[#allocation6 + $0x318] sm:$0xff]  ;;  %v13732_v60 = vpack.c.bf16 %v1977_v1, %v1973_v38  ;;  %v1980_v1 = vld [vmem:[#allocation6 + $0x340] sm:$0xff]  ;;  %v1993_v54 = vld [vmem:[#allocation6 + $0x3a8] sm:$0xff] }
 0x2bd   :  { %10010 = vmatprep.subr.bf16.mxu0 %v13706_v16  ;;  %10042 = vmatprep.subr.bf16.mxu1 %v13708_v25  ;;  %v1979_v40 = vld [vmem:[#allocation6 + $0x338] sm:$0xff]  ;;  %16129 = vst [vmem:[#allocation49_spill] sm:$0xff] %v13728_v3  ;;  %v1981_v25 = vld [vmem:[#allocation6 + $0x348] sm:$0xff] }
 0x2be   :  { %v13734_v26 = vpack.c.bf16 %v1979_v40, %v1975_v18  ;;  %v1985_v16 = vld [vmem:[#allocation6 + $0x368] sm:$0xff]  ;;  %v1984_v18 = vld [vmem:[#allocation6 + $0x360] sm:$0xff] }
 0x2bf   :  { %v13744_v48 = vpack.c.bf16 %v1985_v16, %v1981_v25  ;;  %v1988_v25 = vld [vmem:[#allocation6 + $0x380] sm:$0xff] }
 0x2c0   :  { %10012 = vmatpush1.bf16.msra.mxu0 %v13714_v7  ;;  %10044 = vmatpush1.bf16.msra.mxu1 %v13716_v59  ;;  %v12338_v7 = vpop.eup %12337  ;;  %v1983_v59 = vld [vmem:[#allocation6 + $0x358] sm:$0xff] }
 0x2c1   :  { %10014 = vmatprep.subr.bf16.mxu0 %v13720_v20  ;;  %10046 = vmatprep.subr.bf16.mxu1 %v13722_v52  ;;  %v12340_v63 = vpop.eup %12339  ;;  %v13740_v52 = vpack.c.bf16 %v1978_v34, %v1974_v57  ;;  %v1676_v20 = vadd.f32 1.0, %v12338_v7  ;;  %v13746_v19 = vpack.c.bf16 %v1987_v29, %v1983_v59  ;;  %v1991_v57 = vld [vmem:[#allocation6 + $0x398] sm:$0xff]  ;;  %v13753_v7 = vpack.c.bf16 %v1984_v18, %v1980_v1  ;;  %v1992_v59 = vld [vmem:[#allocation6 + $0x3a0] sm:$0xff]  ;;  %v2001_v1 = vld [vmem:[#allocation6 + $0x3e8] sm:$0xff] }
 0x2c2   :  { %v1995_v34 = vld [vmem:[#allocation6 + $0x3b8] sm:$0xff] }
 0x2c3   :  { %12345 = vrcp.f32 %v1676_v20  ;;  %v13761_v29 = vpack.c.bf16 %v1995_v34, %v1991_v57  ;;  %v1999_v18 = vld [vmem:[#allocation6 + $0x3d8] sm:$0xff]  ;;  %v13766_v20 = vpack.c.bf16 %v1992_v59, %v1988_v25  ;;  %v1998_v57 = vld [vmem:[#allocation6 + $0x3d0] sm:$0xff] }
 0x2c4   :  { %v12342_v35 = vpop.eup %12341  ;;  %10016 = vmatpush1.bf16.msra.mxu0 %v13726_v42  ;;  %10048 = vmatpush1.bf16.msra.mxu1 %v13728_v3  ;;  %v1982_v42 = vld [vmem:[#allocation6 + $0x350] sm:$0xff]  ;;  %v1989_v3 = vld [vmem:[#allocation6 + $0x388] sm:$0xff] }
 0x2c5   :  { %v12344_v40 = vpop.eup %12343  ;;  %v1680_v38 = vmul.f32 %v12342_v35, %v12340_v63  ;;  %10018 = vmatprep.subr.bf16.mxu0 %v13732_v60  ;;  %10050 = vmatprep.subr.bf16.mxu1 %v13734_v26  ;;  %v13755_v16 = vpack.c.bf16 %v1986_v13, %v1982_v42  ;;  %v1990_v63 = vld [vmem:[#allocation6 + $0x390] sm:$0xff]  ;;  %v2003_v13 = vld [vmem:[#allocation6 + $0x3f8] sm:$0xff] }
 0x2c6   :  { %v1679_v50 = vmul.f32 %v12344_v40, %v13549_v53  ;;  %v13759_v53 = vpack.c.bf16 %v1993_v54, %v1989_v3  ;;  %v1994_v35 = vld [vmem:[#allocation6 + $0x3b0] sm:$0xff]  ;;  %v1997_v40 = vld [vmem:[#allocation6 + $0x3c8] sm:$0xff]  ;;  %v1996_v3 = vld [vmem:[#allocation6 + $0x3c0] sm:$0xff] }
 0x2c7   :  { %v13768_v42 = vpack.c.bf16 %v1994_v35, %v1990_v63  ;;  %v2000_v54 = vld [vmem:[#allocation6 + $0x3e0] sm:$0xff]  ;;  %v2002_v34 = vld [vmem:[#allocation6 + $0x3f0] sm:$0xff] }
 0x2c8   :  { %v13749_v15 = vadd.f32 %v1680_v38, %v1679_v50  ;;  %10020 = vmatpush1.bf16.msra.mxu0 %v13738_v61  ;;  %10052 = vmatpush1.bf16.msra.mxu1 %v13740_v52  ;;  %v13772_v38 = vpack.c.bf16 %v2001_v1, %v1997_v40  ;;  %v13774_v50 = vpack.c.bf16 %v2003_v13, %v1999_v18  ;;  %v16137_v13 = vld [vmem:[#allocation32_spill] sm:$0xff] }
 0x2c9   :  { %10022 = vmatprep.subr.bf16.mxu0 %v13744_v48  ;;  %10054 = vmatprep.subr.bf16.mxu1 %v13746_v19  ;;  %v13778_v25 = vpack.c.bf16 %v2000_v54, %v1996_v3  ;;  %v13780_v59 = vpack.c.bf16 %v2002_v34, %v1998_v57 }
 0x2ca   :  { %12347 = vtanh.f32 %v13749_v15 }
 0x2cc   :  { %10024 = vmatpush1.bf16.msra.mxu0 %v13753_v7  ;;  %10056 = vmatpush1.bf16.msra.mxu1 %v13755_v16 }
 0x2cd   :  { %10026 = vmatprep.subr.bf16.mxu0 %v13759_v53  ;;  %10058 = vmatprep.subr.bf16.mxu1 %v13761_v29  ;;  %v12346_v63 = vpop.eup %12345 }
 0x2d0   :  { %10028 = vmatpush1.bf16.msra.mxu0 %v13766_v20  ;;  %10060 = vmatpush1.bf16.msra.mxu1 %v13768_v42 }
 0x2d1   :  { %10030 = vmatprep.subr.bf16.mxu0 %v13772_v38  ;;  %10062 = vmatprep.subr.bf16.mxu1 %v13774_v50 }
 0x2d4   :  { %v12348_v35 = vpop.eup %12347  ;;  %10032 = vmatpush1.bf16.msra.mxu0 %v13778_v25  ;;  %10064 = vmatpush1.bf16.msra.mxu1 %v13780_v59 }
 0x2d5   :  { %v13786_v40 = vmul.f32 %v12348_v35, %v12346_v63  ;;  %10066 = vmatprep.subr.bf16.mxu0 %v13572_v23  ;;  %10098 = vmatprep.subr.bf16.mxu1 %v13574_v10 }
 0x2d7   :  { %16130 = vst [vmem:[#allocation50_spill] sm:$0xff] %v13786_v40  ;;  %2069 = vmatmul.mubr.f32.vlgmr.msra.gmra.mrb[10].mxu0 %v13786_v40  ;;  %2140 = vmatmul.mubr.f32.vlgmr.msra.gmra.mrb[42].mxu1 %v13786_v40 }
 0x2d8   :  { %10068 = vmatpush1.bf16.msra.mxu0 %v13576_v17  ;;  %10100 = vmatpush1.bf16.msra.mxu1 %v13579_v47 }
 0x2d9   :  { %10070 = vmatprep.subr.bf16.mxu0 %v13584_v8  ;;  %10102 = vmatprep.subr.bf16.mxu1 %v13586_v46  ;;  %v16131_v46 = vld [vmem:[#allocation16_spill] sm:$0xff] }
 0x2da   :  { %2313 = vmatprep.mubr.f32.mxu0 %v16112_v6  ;;  %2384 = vmatprep.mubr.f32.mxu1 %v16112_v6 }
 0x2dc   :  { %10072 = vmatpush1.bf16.msra.mxu0 %v13588_v0  ;;  %10104 = vmatpush1.bf16.msra.mxu1 %v13591_v27 }
 0x2dd   :  { %10074 = vmatprep.subr.bf16.mxu0 %v13596_v32  ;;  %10106 = vmatprep.subr.bf16.mxu1 %v13598_v33  ;;  %v16132_v33 = vld [vmem:[#allocation28_spill] sm:$0xff] }
 0x2e0   :  { %10076 = vmatpush1.bf16.msra.mxu0 %v13600_v2  ;;  %10108 = vmatpush1.bf16.msra.mxu1 %v13603_v45 }
 0x2e1   :  { %10078 = vmatprep.subr.bf16.mxu0 %v13608_v11  ;;  %10110 = vmatprep.subr.bf16.mxu1 %v13610_v36 }
 0x2e4   :  { %10080 = vmatpush1.bf16.msra.mxu0 %v13612_v49  ;;  %10112 = vmatpush1.bf16.msra.mxu1 %v13615_v5 }
 0x2e5   :  { %10082 = vmatprep.subr.bf16.mxu0 %v13620_v37  ;;  %10114 = vmatprep.subr.bf16.mxu1 %v13622_v39 }
 0x2e8   :  { %10084 = vmatpush1.bf16.msra.mxu0 %v13624_v56  ;;  %10116 = vmatpush1.bf16.msra.mxu1 %v13627_v58 }
 0x2e9   :  { %10086 = vmatprep.subr.bf16.mxu0 %v13632_v9  ;;  %10118 = vmatprep.subr.bf16.mxu1 %v13634_v22  ;;  %v16134_v22 = vld [vmem:[#allocation34_spill] sm:$0xff] }
 0x2ec   :  { %10088 = vmatpush1.bf16.msra.mxu0 %v13636_v30  ;;  %10120 = vmatpush1.bf16.msra.mxu1 %v13639_v14 }
 0x2ed   :  { %10090 = vmatprep.subr.bf16.mxu0 %v13644_v4  ;;  %10122 = vmatprep.subr.bf16.mxu1 %v13646_v31 }
 0x2f0   :  { %10092 = vmatpush1.bf16.msra.mxu0 %v13648_v44  ;;  %10124 = vmatpush1.bf16.msra.mxu1 %v13651_v62  ;;  %v16135_v44 = vld [vmem:[#allocation30_spill] sm:$0xff] }
 0x2f1   :  { %10094 = vmatprep.subr.bf16.mxu0 %v13656_v24  ;;  %10126 = vmatprep.subr.bf16.mxu1 %v13658_v21 }
 0x2f4   :  { %10096 = vmatpush1.bf16.msra.mxu0 %v13660_v43  ;;  %10128 = vmatpush1.bf16.msra.mxu1 %v13663_v12  ;;  %v16133_v12 = vld [vmem:[#allocation27_spill] sm:$0xff]  ;;  %v16136_v43 = vld [vmem:[#allocation29_spill] sm:$0xff] }
 0x2f5   :  { %10130 = vmatprep.subr.bf16.mxu0 %v13668_v55  ;;  %10162 = vmatprep.subr.bf16.mxu1 %v13670_v28 }
 0x38a   :  { %v1825_v23 = vpop.f32.mrb[20].mxu0  ;;  %v1896_v10 = vpop.f32.mrb[20].mxu1 }
 0x38b   :  { %v1901_v17 = vadd.f32 %v1825_v23, %v13458_v51  ;;  %v1827_v47 = vpop.f32.mrb[21].mxu0  ;;  %v1898_v8 = vpop.f32.mrb[21].mxu1  ;;  %v12053_v11 = vadd.f32 %v1896_v10, %v16133_v12 }
 0x38c   :  { %v1902_v0 = vadd.f32 %v1827_v47, %v16131_v46  ;;  %v12054_v2 = vadd.f32 %v1898_v8, %v16132_v33  ;;  %v16139_v47 = vld [vmem:[#allocation35_spill] sm:$0xff]  ;;  %v16140_v8 = vld [vmem:[#allocation36_spill] sm:$0xff] }
 0x38d   :  { %v9516_v27 = vmul.f32 -1.442695, %v1901_v17 }
 0x38e   :  { %v9517_v32 = vmul.f32 -1.442695, %v1902_v0  ;;  %v9518_v45 = vmul.f32 -1.442695, %v12054_v2  ;;  %v16141_v0 = vld [vmem:[#allocation38_spill] sm:$0xff]  ;;  %v16144_v2 = vld [vmem:[#allocation41_spill] sm:$0xff] }
 0x38f   :  { %12349 = vpow2.f32 %v9516_v27  ;;  %v16142_v27 = vld [vmem:[#allocation39_spill] sm:$0xff] }
 0x390   :  { %12351 = vpow2.f32 %v9517_v32  ;;  %v16143_v32 = vld [vmem:[#allocation40_spill] sm:$0xff] }
 0x391   :  { %12353 = vpow2.f32 %v9518_v45  ;;  %v16145_v45 = vld [vmem:[#allocation42_spill] sm:$0xff] }
 0x392   :  { %12355 = vtanh.f32 %v12053_v11  ;;  %v16146_v11 = vld [vmem:[#allocation43_spill] sm:$0xff] }
 0x399   :  { %v12350_v55 = vpop.eup %12349 }
 0x39a   :  { %v12352_v36 = vpop.eup %12351  ;;  %v1908_v49 = vadd.f32 1.0, %v12350_v55  ;;  %v16147_v55 = vld [vmem:[#allocation44_spill] sm:$0xff] }
 0x39b   :  { %v1914_v5 = vadd.f32 1.0, %v12352_v36  ;;  %v12354_v51 = vpop.eup %12353  ;;  %v16148_v36 = vld [vmem:[#allocation45_spill] sm:$0xff] }
 0x39c   :  { %12357 = vrcp.f32 %v1908_v49  ;;  %v12356_v37 = vpop.eup %12355  ;;  %v1921_v9 = vadd.f32 1.0, %v12354_v51  ;;  %v16149_v49 = vld [vmem:[#allocation46_spill] sm:$0xff] }
 0x39d   :  { %12359 = vrcp.f32 %v1914_v5  ;;  %v16150_v5 = vld [vmem:[#allocation47_spill] sm:$0xff] }
 0x39e   :  { %12361 = vrcp.f32 %v1921_v9 }
 0x3a6   :  { %v12358_v39 = vpop.eup %12357 }
 0x3a7   :  { %v12360_v56 = vpop.eup %12359  ;;  %v1925_v58 = vmul.f32 %v12358_v39, %v12356_v37 }
 0x3a8   :  { %v1924_v30 = vmul.f32 %v12360_v56, %v16134_v22  ;;  %v12362_v54 = vpop.eup %12361  ;;  %v16151_v56 = vld [vmem:[#allocation48_spill] sm:$0xff] }
 0x3aa   :  { %v13831_v14 = vadd.f32 %v1925_v58, %v1924_v30  ;;  %v2070_v4 = vpop.f32.mrb[10].mxu0  ;;  %v2141_v31 = vpop.f32.mrb[42].mxu1  ;;  %v16152_v58 = vld [vmem:[#allocation49_spill] sm:$0xff] }
 0x3ab   :  { %v12075_v62 = vadd.f32 %v2070_v4, %v16135_v44  ;;  %v2072_v24 = vpop.f32.mrb[11].mxu0  ;;  %v2143_v21 = vpop.f32.mrb[43].mxu1  ;;  %v12091_v35 = vadd.f32 %v2141_v31, %v13518_v41 }
 0x3ac   :  { %12363 = vtanh.f32 %v13831_v14  ;;  %v12076_v28 = vadd.f32 %v2072_v24, %v16136_v43  ;;  %v12092_v3 = vadd.f32 %v2143_v21, %v16137_v13  ;;  %v2687_v21 = vld [vmem:[#allocation6 + $0x78] sm:$0xff] }
 0x3ad   :  { %v9519_v1 = vmul.f32 -1.442695, %v12075_v62  ;;  %v2683_v62 = vld [vmem:[#allocation6 + $0x58] sm:$0xff] }
 0x3ae   :  { %v9520_v18 = vmul.f32 -1.442695, %v12076_v28  ;;  %v9521_v34 = vmul.f32 -1.442695, %v12092_v3  ;;  %v2680_v28 = vld [vmem:[#allocation6 + $0x40] sm:$0xff] }
 0x3af   :  { %12365 = vpow2.f32 %v9519_v1  ;;  %v2684_v1 = vld [vmem:[#allocation6 + $0x60] sm:$0xff] }
 0x3b0   :  { %12367 = vpow2.f32 %v9520_v18  ;;  %v13898_v18 = vpack.c.bf16 %v2687_v21, %v2683_v62  ;;  %v13900_v3 = vpack.c.bf16 %v2684_v1, %v2680_v28  ;;  %v2715_v62 = vld [vmem:[#allocation6 + $0x158] sm:$0xff]  ;;  %v2712_v1 = vld [vmem:[#allocation6 + $0x140] sm:$0xff] }
 0x3b1   :  { %12369 = vpow2.f32 %v9521_v34  ;;  %v2719_v28 = vld [vmem:[#allocation6 + $0x178] sm:$0xff] }
 0x3b2   :  { %12371 = vtanh.f32 %v12091_v35  ;;  %v2689_v35 = vld [vmem:[#allocation6 + $0x88] sm:$0xff] }
 0x3b6   :  { %v12364_v57 = vpop.eup %12363 }
 0x3b7   :  { %v13837_v63 = vmul.f32 %v12364_v57, %v12362_v54  ;;  %v2682_v54 = vld [vmem:[#allocation6 + $0x50] sm:$0xff] }
 0x3b8   :  { %v2686_v57 = vld [vmem:[#allocation6 + $0x70] sm:$0xff] }
 0x3b9   :  { %16138 = vst [vmem:[#allocation16_spill] sm:$0xff] %v13837_v63  ;;  %v12366_v23 = vpop.eup %12365  ;;  %2314 = vmatmul.mubr.f32.vlgmr.msra.gmra.mrb[22].mxu0 %v13837_v63  ;;  %2385 = vmatmul.mubr.f32.vlgmr.msra.gmra.mrb[22].mxu1 %v13837_v63  ;;  %v13903_v34 = vpack.c.bf16 %v2686_v57, %v2682_v54  ;;  %v2716_v54 = vld [vmem:[#allocation6 + $0x160] sm:$0xff]  ;;  %v13946_v57 = vpack.c.bf16 %v2719_v28, %v2715_v62  ;;  %v2734_v62 = vld [vmem:[#allocation6 + $0x1f0] sm:$0xff] }
 0x3ba   :  { %v12368_v10 = vpop.eup %12367  ;;  %v2153_v17 = vadd.f32 1.0, %v12366_v23  ;;  %10132 = vmatpush1.bf16.msra.mxu0 %v16139_v47  ;;  %10164 = vmatpush1.bf16.msra.mxu1 %v16140_v8  ;;  %v2693_v23 = vld [vmem:[#allocation6 + $0xa8] sm:$0xff]  ;;  %v2695_v47 = vld [vmem:[#allocation6 + $0xb8] sm:$0xff]  ;;  %v2688_v8 = vld [vmem:[#allocation6 + $0x80] sm:$0xff] }
 0x3bb   :  { %v2159_v46 = vadd.f32 1.0, %v12368_v10  ;;  %10134 = vmatprep.subr.bf16.mxu0 %v16141_v0  ;;  %10166 = vmatprep.subr.bf16.mxu1 %v16142_v27  ;;  %v12370_v51 = vpop.eup %12369  ;;  %v2691_v10 = vld [vmem:[#allocation6 + $0x98] sm:$0xff] }
 0x3bc   :  { %12373 = vrcp.f32 %v2153_v17  ;;  %2558 = vmatprep.mubr.f32.mxu0 %v16112_v6  ;;  %2629 = vmatprep.mubr.f32.mxu1 %v16112_v6  ;;  %v12372_v37 = vpop.eup %12371  ;;  %v2166_v30 = vadd.f32 1.0, %v12370_v51  ;;  %v13908_v17 = vpack.c.bf16 %v2693_v23, %v2689_v35  ;;  %v13910_v0 = vpack.c.bf16 %v2695_v47, %v2691_v10  ;;  %v2696_v51 = vld [vmem:[#allocation6 + $0xc0] sm:$0xff]  ;;  %v2714_v23 = vld [vmem:[#allocation6 + $0x150] sm:$0xff] }
 0x3bd   :  { %12375 = vrcp.f32 %v2159_v46  ;;  %v2692_v46 = vld [vmem:[#allocation6 + $0xa0] sm:$0xff]  ;;  %v13948_v35 = vpack.c.bf16 %v2716_v54, %v2712_v1  ;;  %v2718_v10 = vld [vmem:[#allocation6 + $0x170] sm:$0xff]  ;;  %v2912_v1 = vld [vmem:[#allocation6 + $0x208] sm:$0xff] }
 0x3be   :  { %10136 = vmatpush1.bf16.msra.mxu0 %v16143_v32  ;;  %10168 = vmatpush1.bf16.msra.mxu1 %v16144_v2  ;;  %12377 = vrcp.f32 %v2166_v30  ;;  %v13912_v27 = vpack.c.bf16 %v2692_v46, %v2688_v8  ;;  %v2690_v32 = vld [vmem:[#allocation6 + $0x90] sm:$0xff]  ;;  %v2705_v30 = vld [vmem:[#allocation6 + $0x108] sm:$0xff]  ;;  %v13951_v47 = vpack.c.bf16 %v2718_v10, %v2714_v23  ;;  %v2914_v23 = vld [vmem:[#allocation6 + $0x218] sm:$0xff] }
 0x3bf   :  { %10138 = vmatprep.subr.bf16.mxu0 %v16145_v45  ;;  %10170 = vmatprep.subr.bf16.mxu1 %v16146_v11  ;;  %v2694_v2 = vld [vmem:[#allocation6 + $0xb0] sm:$0xff]  ;;  %v2697_v11 = vld [vmem:[#allocation6 + $0xc8] sm:$0xff] }
 0x3c0   :  { %v13915_v45 = vpack.c.bf16 %v2694_v2, %v2690_v32  ;;  %v2721_v8 = vld [vmem:[#allocation6 + $0x188] sm:$0xff]  ;;  %v2723_v32 = vld [vmem:[#allocation6 + $0x198] sm:$0xff] }
 0x3c1   :  { %v2725_v46 = vld [vmem:[#allocation6 + $0x1a8] sm:$0xff] }
 0x3c2   :  { %10140 = vmatpush1.bf16.msra.mxu0 %v16147_v55  ;;  %10172 = vmatpush1.bf16.msra.mxu1 %v16148_v36  ;;  %v2701_v55 = vld [vmem:[#allocation6 + $0xe8] sm:$0xff]  ;;  %v2699_v36 = vld [vmem:[#allocation6 + $0xd8] sm:$0xff]  ;;  %v13956_v2 = vpack.c.bf16 %v2725_v46, %v2721_v8 }
 0x3c3   :  { %10142 = vmatprep.subr.bf16.mxu0 %v16149_v49  ;;  %10174 = vmatprep.subr.bf16.mxu1 %v16150_v5  ;;  %v13920_v49 = vpack.c.bf16 %v2701_v55, %v2697_v11  ;;  %v2703_v5 = vld [vmem:[#allocation6 + $0xf8] sm:$0xff]  ;;  %v2720_v55 = vld [vmem:[#allocation6 + $0x180] sm:$0xff]  ;;  %v2916_v54 = vld [vmem:[#allocation6 + $0x228] sm:$0xff] }
 0x3c4   :  { %v2727_v11 = vld [vmem:[#allocation6 + $0x1b8] sm:$0xff]  ;;  %v13980_v10 = vpack.c.bf16 %v2916_v54, %v2912_v1 }
 0x3c5   :  { %v2918_v8 = vld [vmem:[#allocation6 + $0x238] sm:$0xff] }
 0x3c6   :  { %v12374_v39 = vpop.eup %12373  ;;  %10144 = vmatpush1.bf16.msra.mxu0 %v16151_v56  ;;  %10176 = vmatpush1.bf16.msra.mxu1 %v16152_v58  ;;  %v2698_v58 = vld [vmem:[#allocation6 + $0xd0] sm:$0xff]  ;;  %v13982_v46 = vpack.c.bf16 %v2918_v8, %v2914_v23 }
 0x3c7   :  { %v12376_v9 = vpop.eup %12375  ;;  %v2170_v22 = vmul.f32 %v12374_v39, %v12372_v37  ;;  %10146 = vmatprep.subr.bf16.mxu0 %v13732_v60  ;;  %10178 = vmatprep.subr.bf16.mxu1 %v13734_v26  ;;  %v2677_v60 = vld [vmem:[#allocation6 + $0x28] sm:$0xff]  ;;  %v2675_v26 = vld [vmem:[#allocation6 + $0x18] sm:$0xff]  ;;  %v2700_v37 = vld [vmem:[#allocation6 + $0xe0] sm:$0xff]  ;;  %v13922_v39 = vpack.c.bf16 %v2703_v5, %v2699_v36  ;;  %v13958_v5 = vpack.c.bf16 %v2727_v11, %v2723_v32 }
 0x3c8   :  { %v2169_v4 = vmul.f32 %v12376_v9, %v13749_v15  ;;  %v12378_v15 = vpop.eup %12377  ;;  %v13924_v56 = vpack.c.bf16 %v2700_v37, %v2696_v51  ;;  %v2702_v9 = vld [vmem:[#allocation6 + $0xf0] sm:$0xff]  ;;  %v2724_v36 = vld [vmem:[#allocation6 + $0x1a0] sm:$0xff] }
 0x3c9   :  { %v13960_v51 = vpack.c.bf16 %v2724_v36, %v2720_v55  ;;  %v2722_v37 = vld [vmem:[#allocation6 + $0x190] sm:$0xff] }
 0x3ca   :  { %v13861_v31 = vadd.f32 %v2170_v22, %v2169_v4  ;;  %10148 = vmatpush1.bf16.msra.mxu0 %v13738_v61  ;;  %10180 = vmatpush1.bf16.msra.mxu1 %v13740_v52  ;;  %v2673_v52 = vld [vmem:[#allocation6 + $0x8] sm:$0xff]  ;;  %v13927_v22 = vpack.c.bf16 %v2702_v9, %v2698_v58  ;;  %v2726_v58 = vld [vmem:[#allocation6 + $0x1b0] sm:$0xff] }
 0x3cb   :  { %10150 = vmatprep.subr.bf16.mxu0 %v13744_v48  ;;  %10182 = vmatprep.subr.bf16.mxu1 %v13746_v19  ;;  %v13884_v61 = vpack.c.bf16 %v2677_v60, %v2673_v52  ;;  %v2709_v4 = vld [vmem:[#allocation6 + $0x128] sm:$0xff]  ;;  %v2711_v52 = vld [vmem:[#allocation6 + $0x138] sm:$0xff]  ;;  %v2704_v60 = vld [vmem:[#allocation6 + $0x100] sm:$0xff]  ;;  %v13963_v9 = vpack.c.bf16 %v2726_v58, %v2722_v37 }
 0x3cc   :  { %12379 = vtanh.f32 %v13861_v31  ;;  %v16154_v55 = vld [vmem:[#allocation17_spill] sm:$0xff] }
 0x3ce   :  { %10152 = vmatpush1.bf16.msra.mxu0 %v13753_v7  ;;  %10184 = vmatpush1.bf16.msra.mxu1 %v13755_v16  ;;  %v2679_v7 = vld [vmem:[#allocation6 + $0x38] sm:$0xff]  ;;  %v2672_v16 = vld [vmem:[#allocation6] sm:$0xff] }
 0x3cf   :  { %10154 = vmatprep.subr.bf16.mxu0 %v13759_v53  ;;  %10186 = vmatprep.subr.bf16.mxu1 %v13761_v29  ;;  %v2676_v53 = vld [vmem:[#allocation6 + $0x20] sm:$0xff]  ;;  %v13886_v29 = vpack.c.bf16 %v2679_v7, %v2675_v26 }
 0x3d0   :  { %v2708_v26 = vld [vmem:[#allocation6 + $0x120] sm:$0xff] }
 0x3d2   :  { %10156 = vmatpush1.bf16.msra.mxu0 %v13766_v20  ;;  %10188 = vmatpush1.bf16.msra.mxu1 %v13768_v42  ;;  %v13888_v20 = vpack.c.bf16 %v2676_v53, %v2672_v16  ;;  %v2674_v42 = vld [vmem:[#allocation6 + $0x10] sm:$0xff]  ;;  %v13936_v16 = vpack.c.bf16 %v2708_v26, %v2704_v60  ;;  %v2735_v60 = vld [vmem:[#allocation6 + $0x1f8] sm:$0xff]  ;;  %v2728_v26 = vld [vmem:[#allocation6 + $0x1c0] sm:$0xff] }
 0x3d3   :  { %10158 = vmatprep.subr.bf16.mxu0 %v13772_v38  ;;  %10190 = vmatprep.subr.bf16.mxu1 %v13774_v50  ;;  %v2678_v38 = vld [vmem:[#allocation6 + $0x30] sm:$0xff] }
 0x3d4   :  { %v13891_v50 = vpack.c.bf16 %v2678_v38, %v2674_v42  ;;  %v2706_v53 = vld [vmem:[#allocation6 + $0x110] sm:$0xff] }
 0x3d5   :  { %v2710_v42 = vld [vmem:[#allocation6 + $0x130] sm:$0xff] }
 0x3d6   :  { %v12380_v48 = vpop.eup %12379  ;;  %10160 = vmatpush1.bf16.msra.mxu0 %v13778_v25  ;;  %10192 = vmatpush1.bf16.msra.mxu1 %v13780_v59  ;;  %v2681_v25 = vld [vmem:[#allocation6 + $0x48] sm:$0xff]  ;;  %v13939_v38 = vpack.c.bf16 %v2710_v42, %v2706_v53  ;;  %v2732_v53 = vld [vmem:[#allocation6 + $0x1e0] sm:$0xff] }
 0x3d7   :  { %v13878_v19 = vmul.f32 %v12380_v48, %v12378_v15  ;;  %10194 = vmatprep.subr.bf16.mxu0 %v13884_v61  ;;  %10226 = vmatprep.subr.bf16.mxu1 %v13886_v29  ;;  %v2685_v59 = vld [vmem:[#allocation6 + $0x68] sm:$0xff]  ;;  %v2707_v15 = vld [vmem:[#allocation6 + $0x118] sm:$0xff]  ;;  %v13932_v48 = vpack.c.bf16 %v2709_v4, %v2705_v30 }
 0x3d8   :  { %v13896_v24 = vpack.c.bf16 %v2685_v59, %v2681_v25  ;;  %v13934_v7 = vpack.c.bf16 %v2711_v52, %v2707_v15  ;;  %v2713_v25 = vld [vmem:[#allocation6 + $0x148] sm:$0xff]  ;;  %v2731_v15 = vld [vmem:[#allocation6 + $0x1d8] sm:$0xff] }
 0x3d9   :  { %16153 = vst [vmem:[#allocation28_spill] sm:$0xff] %v13878_v19  ;;  %2559 = vmatmul.mubr.f32.vlgmr.msra.gmra.mrb[8].mxu0 %v13878_v19  ;;  %2630 = vmatmul.mubr.f32.vlgmr.msra.gmra.mrb[40].mxu1 %v13878_v19  ;;  %v2717_v59 = vld [vmem:[#allocation6 + $0x168] sm:$0xff]  ;;  %v13970_v42 = vpack.c.bf16 %v2735_v60, %v2731_v15 }
 0x3da   :  { %2800 = vmatprep.mubr.f32.mxu0 %v16112_v6  ;;  %2871 = vmatprep.mubr.f32.mxu1 %v16112_v6  ;;  %v13944_v21 = vpack.c.bf16 %v2717_v59, %v2713_v25  ;;  %v2729_v30 = vld [vmem:[#allocation6 + $0x1c8] sm:$0xff]  ;;  %v13972_v25 = vpack.c.bf16 %v2732_v53, %v2728_v26  ;;  %v2730_v59 = vld [vmem:[#allocation6 + $0x1d0] sm:$0xff] }
 0x3db   :  { %10196 = vmatpush1.bf16.msra.mxu0 %v13888_v20  ;;  %10228 = vmatpush1.bf16.msra.mxu1 %v13891_v50  ;;  %v2733_v4 = vld [vmem:[#allocation6 + $0x1e8] sm:$0xff]  ;;  %v13975_v28 = vpack.c.bf16 %v2734_v62, %v2730_v59 }
 0x3dc   :  { %10198 = vmatprep.subr.bf16.mxu0 %v13896_v24  ;;  %10230 = vmatprep.subr.bf16.mxu1 %v13898_v18  ;;  %v13968_v52 = vpack.c.bf16 %v2733_v4, %v2729_v30  ;;  %v16155_v30 = vld [vmem:[#allocation18_spill] sm:$0xff] }
 0x3df   :  { %10200 = vmatpush1.bf16.msra.mxu0 %v13900_v3  ;;  %10232 = vmatpush1.bf16.msra.mxu1 %v13903_v34 }
 0x3e0   :  { %10202 = vmatprep.subr.bf16.mxu0 %v13908_v17  ;;  %10234 = vmatprep.subr.bf16.mxu1 %v13910_v0 }
 0x3e3   :  { %10204 = vmatpush1.bf16.msra.mxu0 %v13912_v27  ;;  %10236 = vmatpush1.bf16.msra.mxu1 %v13915_v45 }
 0x3e4   :  { %10206 = vmatprep.subr.bf16.mxu0 %v13920_v49  ;;  %10238 = vmatprep.subr.bf16.mxu1 %v13922_v39 }
 0x3e7   :  { %10208 = vmatpush1.bf16.msra.mxu0 %v13924_v56  ;;  %10240 = vmatpush1.bf16.msra.mxu1 %v13927_v22 }
 0x3e8   :  { %10210 = vmatprep.subr.bf16.mxu0 %v13932_v48  ;;  %10242 = vmatprep.subr.bf16.mxu1 %v13934_v7 }
 0x3eb   :  { %10212 = vmatpush1.bf16.msra.mxu0 %v13936_v16  ;;  %10244 = vmatpush1.bf16.msra.mxu1 %v13939_v38 }
 0x3ec   :  { %10214 = vmatprep.subr.bf16.mxu0 %v13944_v21  ;;  %10246 = vmatprep.subr.bf16.mxu1 %v13946_v57 }
 0x3ef   :  { %10216 = vmatpush1.bf16.msra.mxu0 %v13948_v35  ;;  %10248 = vmatpush1.bf16.msra.mxu1 %v13951_v47 }
 0x3f0   :  { %10218 = vmatprep.subr.bf16.mxu0 %v13956_v2  ;;  %10250 = vmatprep.subr.bf16.mxu1 %v13958_v5 }
 0x3f3   :  { %10220 = vmatpush1.bf16.msra.mxu0 %v13960_v51  ;;  %10252 = vmatpush1.bf16.msra.mxu1 %v13963_v9 }
 0x3f4   :  { %10222 = vmatprep.subr.bf16.mxu0 %v13968_v52  ;;  %10254 = vmatprep.subr.bf16.mxu1 %v13970_v42 }
 0x3f7   :  { %10224 = vmatpush1.bf16.msra.mxu0 %v13972_v25  ;;  %10256 = vmatpush1.bf16.msra.mxu1 %v13975_v28 }
 0x3f8   :  { %10258 = vmatprep.subr.bf16.mxu0 %v13980_v10  ;;  %10290 = vmatprep.subr.bf16.mxu1 %v13982_v46 }
 0x48c   :  { %v2315_v32 = vpop.f32.mrb[22].mxu0  ;;  %v2386_v11 = vpop.f32.mrb[22].mxu1 }
 0x48d   :  { %v2391_v36 = vadd.f32 %v2315_v32, %v16154_v55  ;;  %v2317_v37 = vpop.f32.mrb[23].mxu0  ;;  %v2388_v58 = vpop.f32.mrb[23].mxu1  ;;  %v12055_v59 = vadd.f32 %v2386_v11, %v16133_v12  ;;  %v2930_v12 = vld [vmem:[#allocation6 + $0x298] sm:$0xff] }
 0x48e   :  { %v2392_v4 = vadd.f32 %v2317_v37, %v16155_v30  ;;  %v12056_v26 = vadd.f32 %v2388_v58, %v16132_v33 }
 0x48f   :  { %v9522_v15 = vmul.f32 -1.442695, %v2391_v36 }
 0x490   :  { %v9523_v60 = vmul.f32 -1.442695, %v2392_v4  ;;  %v9524_v53 = vmul.f32 -1.442695, %v12056_v26 }
 0x491   :  { %12381 = vpow2.f32 %v9522_v15 }
 0x492   :  { %12383 = vpow2.f32 %v9523_v60 }
 0x493   :  { %12385 = vpow2.f32 %v9524_v53 }
 0x494   :  { %12387 = vtanh.f32 %v12055_v59 }
 0x49b   :  { %v12382_v62 = vpop.eup %12381 }
 0x49c   :  { %v12384_v1 = vpop.eup %12383  ;;  %v2398_v54 = vadd.f32 1.0, %v12382_v62 }
 0x49d   :  { %v2404_v23 = vadd.f32 1.0, %v12384_v1  ;;  %v12386_v8 = vpop.eup %12385 }
 0x49e   :  { %12389 = vrcp.f32 %v2398_v54  ;;  %v12388_v32 = vpop.eup %12387  ;;  %v2411_v30 = vadd.f32 1.0, %v12386_v8  ;;  %v2913_v8 = vld [vmem:[#allocation6 + $0x210] sm:$0xff] }
 0x49f   :  { %12391 = vrcp.f32 %v2404_v23  ;;  %v2915_v23 = vld [vmem:[#allocation6 + $0x220] sm:$0xff] }
 0x4a0   :  { %12393 = vrcp.f32 %v2411_v30  ;;  %v2926_v30 = vld [vmem:[#allocation6 + $0x278] sm:$0xff] }
 0x4a8   :  { %v12390_v55 = vpop.eup %12389 }
 0x4a9   :  { %v12392_v36 = vpop.eup %12391  ;;  %v2415_v37 = vmul.f32 %v12390_v55, %v12388_v32  ;;  %v2917_v32 = vld [vmem:[#allocation6 + $0x230] sm:$0xff]  ;;  %v2920_v55 = vld [vmem:[#allocation6 + $0x248] sm:$0xff] }
 0x4aa   :  { %v2414_v4 = vmul.f32 %v12392_v36, %v13831_v14  ;;  %v2911_v14 = vld [vmem:[#allocation6 + $0x200] sm:$0xff]  ;;  %v2924_v36 = vld [vmem:[#allocation6 + $0x268] sm:$0xff] }
 0x4ab   :  { %v13997_v19 = vpack.c.bf16 %v2915_v23, %v2911_v14 }
 0x4ac   :  { %v13991_v58 = vadd.f32 %v2415_v37, %v2414_v4  ;;  %v2560_v15 = vpop.f32.mrb[8].mxu0  ;;  %v2631_v11 = vpop.f32.mrb[40].mxu1  ;;  %v2922_v37 = vld [vmem:[#allocation6 + $0x258] sm:$0xff] }
 0x4ad   :  { %v12073_v60 = vadd.f32 %v2560_v15, %v16135_v44  ;;  %v2562_v26 = vpop.f32.mrb[9].mxu0  ;;  %v2633_v53 = vpop.f32.mrb[41].mxu1  ;;  %16157 = vst [vmem:[#allocation35_spill] sm:$0xff] %v13997_v19  ;;  %v14006_v63 = vpack.c.bf16 %v2926_v30, %v2922_v37  ;;  %v2928_v44 = vld [vmem:[#allocation6 + $0x288] sm:$0xff] }
 0x4ae   :  { %16156 = vst [vmem:[#allocation34_spill] sm:$0xff] %v13991_v58  ;;  %12395 = vtanh.f32 %v13991_v58  ;;  %v12074_v59 = vadd.f32 %v2562_v26, %v16136_v43  ;;  %v12090_v54 = vadd.f32 %v2633_v53, %v16137_v13  ;;  %v12394_v4 = vpop.eup %12393  ;;  %v13999_v26 = vpack.c.bf16 %v2917_v32, %v2913_v8  ;;  %v2921_v13 = vld [vmem:[#allocation6 + $0x250] sm:$0xff]  ;;  %v2932_v58 = vld [vmem:[#allocation6 + $0x2a8] sm:$0xff] }
 0x4af   :  { %v9525_v62 = vmul.f32 -1.442695, %v12073_v60  ;;  %v2919_v60 = vld [vmem:[#allocation6 + $0x240] sm:$0xff]  ;;  %v12089_v53 = vadd.f32 %v2631_v11, %v13518_v41  ;;  %16161 = vst [vmem:[#allocation40_spill] sm:$0xff] %v14006_v63  ;;  %v2925_v43 = vld [vmem:[#allocation6 + $0x270] sm:$0xff]  ;;  %v14018_v30 = vpack.c.bf16 %v2932_v58, %v2928_v44 }
 0x4b0   :  { %v9526_v1 = vmul.f32 -1.442695, %v12074_v59  ;;  %v9527_v40 = vmul.f32 -1.442695, %v12090_v54  ;;  %16158 = vst [vmem:[#allocation36_spill] sm:$0xff] %v13999_v26  ;;  %v2923_v59 = vld [vmem:[#allocation6 + $0x260] sm:$0xff]  ;;  %v14014_v32 = vpack.c.bf16 %v2925_v43, %v2921_v13 }
 0x4b1   :  { %12397 = vpow2.f32 %v9525_v62  ;;  %v2934_v54 = vld [vmem:[#allocation6 + $0x2b8] sm:$0xff]  ;;  %v14012_v11 = vpack.c.bf16 %v2923_v59, %v2919_v60  ;;  %16164 = vst [vmem:[#allocation43_spill] sm:$0xff] %v14018_v30  ;;  %v2940_v60 = vld [vmem:[#allocation6 + $0x2e8] sm:$0xff]  ;;  %v2935_v13 = vld [vmem:[#allocation6 + $0x2c0] sm:$0xff] }
 0x4b2   :  { %12399 = vpow2.f32 %v9526_v1  ;;  %v14004_v1 = vpack.c.bf16 %v2924_v36, %v2920_v55  ;;  %16163 = vst [vmem:[#allocation42_spill] sm:$0xff] %v14014_v32  ;;  %v2927_v55 = vld [vmem:[#allocation6 + $0x280] sm:$0xff]  ;;  %v2938_v59 = vld [vmem:[#allocation6 + $0x2d8] sm:$0xff] }
 0x4b3   :  { %12401 = vpow2.f32 %v9527_v40  ;;  %16162 = vst [vmem:[#allocation41_spill] sm:$0xff] %v14012_v11  ;;  %v2931_v36 = vld [vmem:[#allocation6 + $0x2a0] sm:$0xff]  ;;  %v2929_v40 = vld [vmem:[#allocation6 + $0x290] sm:$0xff]  ;;  %v2942_v43 = vld [vmem:[#allocation6 + $0x2f8] sm:$0xff] }
 0x4b4   :  { %16160 = vst [vmem:[#allocation39_spill] sm:$0xff] %v14004_v1  ;;  %12403 = vtanh.f32 %v12089_v53  ;;  %v14026_v44 = vpack.c.bf16 %v2931_v36, %v2927_v55  ;;  %v2939_v58 = vld [vmem:[#allocation6 + $0x2e0] sm:$0xff] }
 0x4b5   :  { %v14038_v55 = vpack.c.bf16 %v2939_v58, %v2935_v13  ;;  %v2958_v13 = vld [vmem:[#allocation6 + $0x378] sm:$0xff] }
 0x4b6   :  { %16166 = vst [vmem:[#allocation45_spill] sm:$0xff] %v14026_v44 }
 0x4b7   :  { %16170 = vst [vmem:[#allocation49_spill] sm:$0xff] %v14038_v55 }
 0x4b8   :  { %v12396_v15 = vpop.eup %12395 }
 0x4b9   :  { %v14001_v62 = vmul.f32 %v12396_v15, %v12394_v4  ;;  %v14020_v4 = vpack.c.bf16 %v2934_v54, %v2930_v12  ;;  %v2933_v15 = vld [vmem:[#allocation6 + $0x2b0] sm:$0xff]  ;;  %v14034_v54 = vpack.c.bf16 %v2942_v43, %v2938_v59 }
 0x4ba   :  { %v14028_v12 = vpack.c.bf16 %v2933_v15, %v2929_v40  ;;  %v2943_v40 = vld [vmem:[#allocation6 + $0x300] sm:$0xff]  ;;  %v2945_v59 = vld [vmem:[#allocation6 + $0x310] sm:$0xff] }
 0x4bb   :  { %16159 = vst [vmem:[#allocation38_spill] sm:$0xff] %v14001_v62  ;;  %v12398_v14 = vpop.eup %12397  ;;  %2801 = vmatmul.mubr.f32.vlgmr.msra.gmra.mrb[24].mxu0 %v14001_v62  ;;  %2872 = vmatmul.mubr.f32.vlgmr.msra.gmra.mrb[24].mxu1 %v14001_v62  ;;  %16165 = vst [vmem:[#allocation44_spill] sm:$0xff] %v14020_v4  ;;  %v2948_v62 = vld [vmem:[#allocation6 + $0x328] sm:$0xff]  ;;  %v2947_v15 = vld [vmem:[#allocation6 + $0x320] sm:$0xff] }
 0x4bc   :  { %v12400_v23 = vpop.eup %12399  ;;  %v2643_v8 = vadd.f32 1.0, %v12398_v14  ;;  %10260 = vmatpush1.bf16.msra.mxu0 %v13997_v19  ;;  %10292 = vmatpush1.bf16.msra.mxu1 %v13999_v26  ;;  %v2936_v14 = vld [vmem:[#allocation6 + $0x2c8] sm:$0xff]  ;;  %16167 = vst [vmem:[#allocation46_spill] sm:$0xff] %v14028_v12  ;;  %16169 = vst [vmem:[#allocation48_spill] sm:$0xff] %v14034_v54  ;;  %v2949_v43 = vld [vmem:[#allocation6 + $0x330] sm:$0xff] }
 0x4bd   :  { %v2649_v37 = vadd.f32 1.0, %v12400_v23  ;;  %10262 = vmatprep.subr.bf16.mxu0 %v14004_v1  ;;  %10294 = vmatprep.subr.bf16.mxu1 %v14006_v63  ;;  %v14032_v53 = vpack.c.bf16 %v2940_v60, %v2936_v14  ;;  %v2937_v23 = vld [vmem:[#allocation6 + $0x2d0] sm:$0xff] }
 0x4be   :  { %12405 = vrcp.f32 %v2643_v8  ;;  %3039 = vmatprep.mubr.f32.mxu0 %v16112_v6  ;;  %3110 = vmatprep.mubr.f32.mxu1 %v16112_v6  ;;  %v2941_v8 = vld [vmem:[#allocation6 + $0x2f0] sm:$0xff] }
 0x4bf   :  { %12407 = vrcp.f32 %v2649_v37  ;;  %16168 = vst [vmem:[#allocation47_spill] sm:$0xff] %v14032_v53  ;;  %v2944_v37 = vld [vmem:[#allocation6 + $0x308] sm:$0xff]  ;;  %v14040_v36 = vpack.c.bf16 %v2941_v8, %v2937_v23  ;;  %v14050_v8 = vpack.c.bf16 %v2947_v15, %v2943_v40  ;;  %v2957_v26 = vld [vmem:[#allocation6 + $0x370] sm:$0xff] }
 0x4c0   :  { %10264 = vmatpush1.bf16.msra.mxu0 %v14012_v11  ;;  %10296 = vmatpush1.bf16.msra.mxu1 %v14014_v32  ;;  %v2946_v11 = vld [vmem:[#allocation6 + $0x318] sm:$0xff]  ;;  %v14044_v14 = vpack.c.bf16 %v2948_v62, %v2944_v37  ;;  %v2951_v62 = vld [vmem:[#allocation6 + $0x340] sm:$0xff]  ;;  %v2964_v15 = vld [vmem:[#allocation6 + $0x3a8] sm:$0xff] }
 0x4c1   :  { %10266 = vmatprep.subr.bf16.mxu0 %v14018_v30  ;;  %10298 = vmatprep.subr.bf16.mxu1 %v14020_v4  ;;  %v2950_v32 = vld [vmem:[#allocation6 + $0x338] sm:$0xff]  ;;  %16171 = vst [vmem:[#allocation17_spill] sm:$0xff] %v14040_v36  ;;  %v2952_v4 = vld [vmem:[#allocation6 + $0x348] sm:$0xff] }
 0x4c2   :  { %v14046_v60 = vpack.c.bf16 %v2950_v32, %v2946_v11  ;;  %v2956_v30 = vld [vmem:[#allocation6 + $0x368] sm:$0xff]  ;;  %v2955_v11 = vld [vmem:[#allocation6 + $0x360] sm:$0xff] }
 0x4c3   :  { %v14056_v63 = vpack.c.bf16 %v2956_v30, %v2952_v4  ;;  %v2959_v4 = vld [vmem:[#allocation6 + $0x380] sm:$0xff] }
 0x4c4   :  { %10268 = vmatpush1.bf16.msra.mxu0 %v14026_v44  ;;  %10300 = vmatpush1.bf16.msra.mxu1 %v14028_v12  ;;  %v12402_v44 = vpop.eup %12401  ;;  %v2954_v12 = vld [vmem:[#allocation6 + $0x358] sm:$0xff] }
 0x4c5   :  { %10270 = vmatprep.subr.bf16.mxu0 %v14032_v53  ;;  %10302 = vmatprep.subr.bf16.mxu1 %v14034_v54  ;;  %v12404_v58 = vpop.eup %12403  ;;  %v14052_v54 = vpack.c.bf16 %v2949_v43, %v2945_v59  ;;  %v2656_v53 = vadd.f32 1.0, %v12402_v44  ;;  %v14058_v1 = vpack.c.bf16 %v2958_v13, %v2954_v12  ;;  %v2962_v59 = vld [vmem:[#allocation6 + $0x398] sm:$0xff]  ;;  %v14065_v44 = vpack.c.bf16 %v2955_v11, %v2951_v62  ;;  %v2963_v12 = vld [vmem:[#allocation6 + $0x3a0] sm:$0xff]  ;;  %v2972_v62 = vld [vmem:[#allocation6 + $0x3e8] sm:$0xff] }
 0x4c6   :  { %v2966_v43 = vld [vmem:[#allocation6 + $0x3b8] sm:$0xff] }
 0x4c7   :  { %12409 = vrcp.f32 %v2656_v53  ;;  %v14073_v13 = vpack.c.bf16 %v2966_v43, %v2962_v59  ;;  %v2970_v11 = vld [vmem:[#allocation6 + $0x3d8] sm:$0xff]  ;;  %v14078_v53 = vpack.c.bf16 %v2963_v12, %v2959_v4  ;;  %v2969_v59 = vld [vmem:[#allocation6 + $0x3d0] sm:$0xff] }
 0x4c8   :  { %v12406_v23 = vpop.eup %12405  ;;  %10272 = vmatpush1.bf16.msra.mxu0 %v14038_v55  ;;  %10304 = vmatpush1.bf16.msra.mxu1 %v14040_v36  ;;  %v2953_v55 = vld [vmem:[#allocation6 + $0x350] sm:$0xff]  ;;  %v2960_v36 = vld [vmem:[#allocation6 + $0x388] sm:$0xff] }
 0x4c9   :  { %v12408_v32 = vpop.eup %12407  ;;  %v2660_v37 = vmul.f32 %v12406_v23, %v12404_v58  ;;  %10274 = vmatprep.subr.bf16.mxu0 %v14044_v14  ;;  %10306 = vmatprep.subr.bf16.mxu1 %v14046_v60  ;;  %v14067_v30 = vpack.c.bf16 %v2957_v26, %v2953_v55  ;;  %v2961_v58 = vld [vmem:[#allocation6 + $0x390] sm:$0xff]  ;;  %v2974_v26 = vld [vmem:[#allocation6 + $0x3f8] sm:$0xff] }
 0x4ca   :  { %v2659_v40 = vmul.f32 %v12408_v32, %v13861_v31  ;;  %v14071_v31 = vpack.c.bf16 %v2964_v15, %v2960_v36  ;;  %v2965_v23 = vld [vmem:[#allocation6 + $0x3b0] sm:$0xff]  ;;  %v2968_v32 = vld [vmem:[#allocation6 + $0x3c8] sm:$0xff]  ;;  %v2967_v36 = vld [vmem:[#allocation6 + $0x3c0] sm:$0xff] }
 0x4cb   :  { %v14080_v55 = vpack.c.bf16 %v2965_v23, %v2961_v58  ;;  %v2971_v15 = vld [vmem:[#allocation6 + $0x3e0] sm:$0xff]  ;;  %v2973_v43 = vld [vmem:[#allocation6 + $0x3f0] sm:$0xff] }
 0x4cc   :  { %v14061_v19 = vadd.f32 %v2660_v37, %v2659_v40  ;;  %10276 = vmatpush1.bf16.msra.mxu0 %v14050_v8  ;;  %10308 = vmatpush1.bf16.msra.mxu1 %v14052_v54  ;;  %v14084_v37 = vpack.c.bf16 %v2972_v62, %v2968_v32  ;;  %v14086_v40 = vpack.c.bf16 %v2974_v26, %v2970_v11 }
 0x4cd   :  { %10278 = vmatprep.subr.bf16.mxu0 %v14056_v63  ;;  %10310 = vmatprep.subr.bf16.mxu1 %v14058_v1  ;;  %v14090_v4 = vpack.c.bf16 %v2971_v15, %v2967_v36  ;;  %v14092_v12 = vpack.c.bf16 %v2973_v43, %v2969_v59  ;;  %v16179_v36 = vld [vmem:[#allocation32_spill] sm:$0xff] }
 0x4ce   :  { %12411 = vtanh.f32 %v14061_v19 }
 0x4d0   :  { %10280 = vmatpush1.bf16.msra.mxu0 %v14065_v44  ;;  %10312 = vmatpush1.bf16.msra.mxu1 %v14067_v30 }
 0x4d1   :  { %10282 = vmatprep.subr.bf16.mxu0 %v14071_v31  ;;  %10314 = vmatprep.subr.bf16.mxu1 %v14073_v13  ;;  %v12410_v58 = vpop.eup %12409 }
 0x4d4   :  { %10284 = vmatpush1.bf16.msra.mxu0 %v14078_v53  ;;  %10316 = vmatpush1.bf16.msra.mxu1 %v14080_v55 }
 0x4d5   :  { %10286 = vmatprep.subr.bf16.mxu0 %v14084_v37  ;;  %10318 = vmatprep.subr.bf16.mxu1 %v14086_v40 }
 0x4d8   :  { %v12412_v23 = vpop.eup %12411  ;;  %10288 = vmatpush1.bf16.msra.mxu0 %v14090_v4  ;;  %10320 = vmatpush1.bf16.msra.mxu1 %v14092_v12 }
 0x4d9   :  { %v14098_v32 = vmul.f32 %v12412_v23, %v12410_v58  ;;  %10322 = vmatprep.subr.bf16.mxu0 %v13884_v61  ;;  %10354 = vmatprep.subr.bf16.mxu1 %v13886_v29 }
 0x4db   :  { %16172 = vst [vmem:[#allocation18_spill] sm:$0xff] %v14098_v32  ;;  %3040 = vmatmul.mubr.f32.vlgmr.msra.gmra.mrb[6].mxu0 %v14098_v32  ;;  %3111 = vmatmul.mubr.f32.vlgmr.msra.gmra.mrb[38].mxu1 %v14098_v32 }
 0x4dc   :  { %10324 = vmatpush1.bf16.msra.mxu0 %v13888_v20  ;;  %10356 = vmatpush1.bf16.msra.mxu1 %v13891_v50  ;;  %v16173_v20 = vld [vmem:[#allocation19_spill] sm:$0xff] }
 0x4dd   :  { %10326 = vmatprep.subr.bf16.mxu0 %v13896_v24  ;;  %10358 = vmatprep.subr.bf16.mxu1 %v13898_v18 }
 0x4de   :  { %3278 = vmatprep.mubr.f32.mxu0 %v16112_v6  ;;  %3349 = vmatprep.mubr.f32.mxu1 %v16112_v6 }
 0x4e0   :  { %10328 = vmatpush1.bf16.msra.mxu0 %v13900_v3  ;;  %10360 = vmatpush1.bf16.msra.mxu1 %v13903_v34  ;;  %v16174_v3 = vld [vmem:[#allocation20_spill] sm:$0xff] }
 0x4e1   :  { %10330 = vmatprep.subr.bf16.mxu0 %v13908_v17  ;;  %10362 = vmatprep.subr.bf16.mxu1 %v13910_v0 }
 0x4e4   :  { %10332 = vmatpush1.bf16.msra.mxu0 %v13912_v27  ;;  %10364 = vmatpush1.bf16.msra.mxu1 %v13915_v45 }
 0x4e5   :  { %10334 = vmatprep.subr.bf16.mxu0 %v13920_v49  ;;  %10366 = vmatprep.subr.bf16.mxu1 %v13922_v39  ;;  %v16175_v49 = vld [vmem:[#allocation27_spill] sm:$0xff] }
 0x4e8   :  { %10336 = vmatpush1.bf16.msra.mxu0 %v13924_v56  ;;  %10368 = vmatpush1.bf16.msra.mxu1 %v13927_v22 }
 0x4e9   :  { %10338 = vmatprep.subr.bf16.mxu0 %v13932_v48  ;;  %10370 = vmatprep.subr.bf16.mxu1 %v13934_v7 }
 0x4ec   :  { %10340 = vmatpush1.bf16.msra.mxu0 %v13936_v16  ;;  %10372 = vmatpush1.bf16.msra.mxu1 %v13939_v38 }
 0x4ed   :  { %10342 = vmatprep.subr.bf16.mxu0 %v13944_v21  ;;  %10374 = vmatprep.subr.bf16.mxu1 %v13946_v57 }
 0x4f0   :  { %10344 = vmatpush1.bf16.msra.mxu0 %v13948_v35  ;;  %10376 = vmatpush1.bf16.msra.mxu1 %v13951_v47 }
 0x4f1   :  { %10346 = vmatprep.subr.bf16.mxu0 %v13956_v2  ;;  %10378 = vmatprep.subr.bf16.mxu1 %v13958_v5  ;;  %v16176_v2 = vld [vmem:[#allocation34_spill] sm:$0xff] }
 0x4f4   :  { %10348 = vmatpush1.bf16.msra.mxu0 %v13960_v51  ;;  %10380 = vmatpush1.bf16.msra.mxu1 %v13963_v9 }
 0x4f5   :  { %10350 = vmatprep.subr.bf16.mxu0 %v13968_v52  ;;  %10382 = vmatprep.subr.bf16.mxu1 %v13970_v42  ;;  %v16177_v42 = vld [vmem:[#allocation30_spill] sm:$0xff] }
 0x4f8   :  { %10352 = vmatpush1.bf16.msra.mxu0 %v13972_v25  ;;  %10384 = vmatpush1.bf16.msra.mxu1 %v13975_v28 }
 0x4f9   :  { %10386 = vmatprep.subr.bf16.mxu0 %v13980_v10  ;;  %10418 = vmatprep.subr.bf16.mxu1 %v13982_v46  ;;  %v16178_v46 = vld [vmem:[#allocation29_spill] sm:$0xff] }
 0x58e   :  { %v2802_v61 = vpop.f32.mrb[24].mxu0  ;;  %v2873_v29 = vpop.f32.mrb[24].mxu1 }
 0x58f   :  { %v2878_v50 = vadd.f32 %v2802_v61, %v16173_v20  ;;  %v2804_v24 = vpop.f32.mrb[25].mxu0  ;;  %v2875_v18 = vpop.f32.mrb[25].mxu1  ;;  %v12057_v39 = vadd.f32 %v2873_v29, %v16175_v49 }
 0x590   :  { %v2879_v34 = vadd.f32 %v2804_v24, %v16174_v3  ;;  %v12058_v27 = vadd.f32 %v2875_v18, %v16132_v33  ;;  %v16181_v24 = vld [vmem:[#allocation35_spill] sm:$0xff]  ;;  %v16182_v18 = vld [vmem:[#allocation36_spill] sm:$0xff] }
 0x591   :  { %v9528_v17 = vmul.f32 -1.442695, %v2878_v50 }
 0x592   :  { %v9529_v0 = vmul.f32 -1.442695, %v2879_v34  ;;  %v9530_v45 = vmul.f32 -1.442695, %v12058_v27  ;;  %v16183_v34 = vld [vmem:[#allocation39_spill] sm:$0xff]  ;;  %v16186_v27 = vld [vmem:[#allocation42_spill] sm:$0xff] }
 0x593   :  { %12413 = vpow2.f32 %v9528_v17  ;;  %v16184_v17 = vld [vmem:[#allocation40_spill] sm:$0xff] }
 0x594   :  { %12415 = vpow2.f32 %v9529_v0  ;;  %v16185_v0 = vld [vmem:[#allocation41_spill] sm:$0xff] }
 0x595   :  { %12417 = vpow2.f32 %v9530_v45  ;;  %v16187_v45 = vld [vmem:[#allocation43_spill] sm:$0xff] }
 0x596   :  { %12419 = vtanh.f32 %v12057_v39  ;;  %v16188_v39 = vld [vmem:[#allocation44_spill] sm:$0xff] }
 0x59d   :  { %v12414_v56 = vpop.eup %12413 }
 0x59e   :  { %v12416_v22 = vpop.eup %12415  ;;  %v2885_v48 = vadd.f32 1.0, %v12414_v56  ;;  %v16189_v56 = vld [vmem:[#allocation45_spill] sm:$0xff] }
 0x59f   :  { %v2891_v7 = vadd.f32 1.0, %v12416_v22  ;;  %v12418_v16 = vpop.eup %12417  ;;  %v16190_v22 = vld [vmem:[#allocation46_spill] sm:$0xff] }
 0x5a0   :  { %12421 = vrcp.f32 %v2885_v48  ;;  %v12420_v38 = vpop.eup %12419  ;;  %v2898_v47 = vadd.f32 1.0, %v12418_v16  ;;  %v16191_v48 = vld [vmem:[#allocation47_spill] sm:$0xff] }
 0x5a1   :  { %12423 = vrcp.f32 %v2891_v7  ;;  %v16192_v7 = vld [vmem:[#allocation48_spill] sm:$0xff] }
 0x5a2   :  { %12425 = vrcp.f32 %v2898_v47 }
 0x5aa   :  { %v12422_v21 = vpop.eup %12421 }
 0x5ab   :  { %v12424_v57 = vpop.eup %12423  ;;  %v2902_v35 = vmul.f32 %v12422_v21, %v12420_v38 }
 0x5ac   :  { %v2901_v5 = vmul.f32 %v12424_v57, %v16176_v2  ;;  %v12426_v59 = vpop.eup %12425  ;;  %v16193_v57 = vld [vmem:[#allocation49_spill] sm:$0xff] }
 0x5ae   :  { %v14143_v51 = vadd.f32 %v2902_v35, %v2901_v5  ;;  %v3041_v9 = vpop.f32.mrb[6].mxu0  ;;  %v3112_v52 = vpop.f32.mrb[38].mxu1  ;;  %v16194_v35 = vld [vmem:[#allocation17_spill] sm:$0xff] }
 0x5af   :  { %v12071_v25 = vadd.f32 %v3041_v9, %v16177_v42  ;;  %v3043_v28 = vpop.f32.mrb[7].mxu0  ;;  %v3114_v10 = vpop.f32.mrb[39].mxu1  ;;  %v12087_v61 = vadd.f32 %v3112_v52, %v13518_v41 }
 0x5b0   :  { %12427 = vtanh.f32 %v14143_v51  ;;  %v12072_v62 = vadd.f32 %v3043_v28, %v16178_v46  ;;  %v12088_v15 = vadd.f32 %v3114_v10, %v16179_v36  ;;  %v3643_v10 = vld [vmem:[#allocation6 + $0x78] sm:$0xff] }
 0x5b1   :  { %v9531_v11 = vmul.f32 -1.442695, %v12071_v25  ;;  %v3639_v25 = vld [vmem:[#allocation6 + $0x58] sm:$0xff] }
 0x5b2   :  { %v9532_v26 = vmul.f32 -1.442695, %v12072_v62  ;;  %v9533_v58 = vmul.f32 -1.442695, %v12088_v15  ;;  %v3636_v62 = vld [vmem:[#allocation6 + $0x40] sm:$0xff] }
 0x5b3   :  { %12429 = vpow2.f32 %v9531_v11  ;;  %v3640_v11 = vld [vmem:[#allocation6 + $0x60] sm:$0xff] }
 0x5b4   :  { %12431 = vpow2.f32 %v9532_v26  ;;  %v14210_v26 = vpack.c.bf16 %v3643_v10, %v3639_v25  ;;  %v14212_v15 = vpack.c.bf16 %v3640_v11, %v3636_v62  ;;  %v3671_v25 = vld [vmem:[#allocation6 + $0x158] sm:$0xff]  ;;  %v3668_v11 = vld [vmem:[#allocation6 + $0x140] sm:$0xff] }
 0x5b5   :  { %12433 = vpow2.f32 %v9533_v58  ;;  %v3675_v62 = vld [vmem:[#allocation6 + $0x178] sm:$0xff] }
 0x5b6   :  { %12435 = vtanh.f32 %v12087_v61  ;;  %v3645_v61 = vld [vmem:[#allocation6 + $0x88] sm:$0xff] }
 0x5ba   :  { %v12428_v43 = vpop.eup %12427 }
 0x5bb   :  { %v14149_v23 = vmul.f32 %v12428_v43, %v12426_v59  ;;  %v3638_v59 = vld [vmem:[#allocation6 + $0x50] sm:$0xff] }
 0x5bc   :  { %v3642_v43 = vld [vmem:[#allocation6 + $0x70] sm:$0xff] }
 0x5bd   :  { %16180 = vst [vmem:[#allocation19_spill] sm:$0xff] %v14149_v23  ;;  %v12430_v29 = vpop.eup %12429  ;;  %3279 = vmatmul.mubr.f32.vlgmr.msra.gmra.mrb[26].mxu0 %v14149_v23  ;;  %3350 = vmatmul.mubr.f32.vlgmr.msra.gmra.mrb[26].mxu1 %v14149_v23  ;;  %v14215_v58 = vpack.c.bf16 %v3642_v43, %v3638_v59  ;;  %v3672_v59 = vld [vmem:[#allocation6 + $0x160] sm:$0xff]  ;;  %v14258_v43 = vpack.c.bf16 %v3675_v62, %v3671_v25  ;;  %v3690_v25 = vld [vmem:[#allocation6 + $0x1f0] sm:$0xff] }
 0x5be   :  { %v12432_v20 = vpop.eup %12431  ;;  %v3124_v50 = vadd.f32 1.0, %v12430_v29  ;;  %10388 = vmatpush1.bf16.msra.mxu0 %v16181_v24  ;;  %10420 = vmatpush1.bf16.msra.mxu1 %v16182_v18  ;;  %v3649_v29 = vld [vmem:[#allocation6 + $0xa8] sm:$0xff]  ;;  %v3651_v24 = vld [vmem:[#allocation6 + $0xb8] sm:$0xff]  ;;  %v3644_v18 = vld [vmem:[#allocation6 + $0x80] sm:$0xff] }
 0x5bf   :  { %v3130_v3 = vadd.f32 1.0, %v12432_v20  ;;  %10390 = vmatprep.subr.bf16.mxu0 %v16183_v34  ;;  %10422 = vmatprep.subr.bf16.mxu1 %v16184_v17  ;;  %v12434_v16 = vpop.eup %12433  ;;  %v3647_v20 = vld [vmem:[#allocation6 + $0x98] sm:$0xff] }
 0x5c0   :  { %12437 = vrcp.f32 %v3124_v50  ;;  %3517 = vmatprep.mubr.f32.mxu0 %v16112_v6  ;;  %3588 = vmatprep.mubr.f32.mxu1 %v16112_v6  ;;  %v12436_v38 = vpop.eup %12435  ;;  %v3137_v5 = vadd.f32 1.0, %v12434_v16  ;;  %v14220_v50 = vpack.c.bf16 %v3649_v29, %v3645_v61  ;;  %v14222_v34 = vpack.c.bf16 %v3651_v24, %v3647_v20  ;;  %v3652_v16 = vld [vmem:[#allocation6 + $0xc0] sm:$0xff]  ;;  %v3670_v29 = vld [vmem:[#allocation6 + $0x150] sm:$0xff] }
 0x5c1   :  { %12439 = vrcp.f32 %v3130_v3  ;;  %v3648_v3 = vld [vmem:[#allocation6 + $0xa0] sm:$0xff]  ;;  %v14260_v61 = vpack.c.bf16 %v3672_v59, %v3668_v11  ;;  %v3674_v20 = vld [vmem:[#allocation6 + $0x170] sm:$0xff]  ;;  %v3868_v11 = vld [vmem:[#allocation6 + $0x208] sm:$0xff] }
 0x5c2   :  { %10392 = vmatpush1.bf16.msra.mxu0 %v16185_v0  ;;  %10424 = vmatpush1.bf16.msra.mxu1 %v16186_v27  ;;  %12441 = vrcp.f32 %v3137_v5  ;;  %v14224_v17 = vpack.c.bf16 %v3648_v3, %v3644_v18  ;;  %v3646_v0 = vld [vmem:[#allocation6 + $0x90] sm:$0xff]  ;;  %v3661_v5 = vld [vmem:[#allocation6 + $0x108] sm:$0xff]  ;;  %v14263_v24 = vpack.c.bf16 %v3674_v20, %v3670_v29  ;;  %v3870_v29 = vld [vmem:[#allocation6 + $0x218] sm:$0xff] }
 0x5c3   :  { %10394 = vmatprep.subr.bf16.mxu0 %v16187_v45  ;;  %10426 = vmatprep.subr.bf16.mxu1 %v16188_v39  ;;  %v3650_v27 = vld [vmem:[#allocation6 + $0xb0] sm:$0xff]  ;;  %v3653_v39 = vld [vmem:[#allocation6 + $0xc8] sm:$0xff] }
 0x5c4   :  { %v14227_v45 = vpack.c.bf16 %v3650_v27, %v3646_v0  ;;  %v3677_v18 = vld [vmem:[#allocation6 + $0x188] sm:$0xff]  ;;  %v3679_v0 = vld [vmem:[#allocation6 + $0x198] sm:$0xff] }
 0x5c5   :  { %v3681_v3 = vld [vmem:[#allocation6 + $0x1a8] sm:$0xff] }
 0x5c6   :  { %10396 = vmatpush1.bf16.msra.mxu0 %v16189_v56  ;;  %10428 = vmatpush1.bf16.msra.mxu1 %v16190_v22  ;;  %v3657_v56 = vld [vmem:[#allocation6 + $0xe8] sm:$0xff]  ;;  %v3655_v22 = vld [vmem:[#allocation6 + $0xd8] sm:$0xff]  ;;  %v14268_v27 = vpack.c.bf16 %v3681_v3, %v3677_v18 }
 0x5c7   :  { %10398 = vmatprep.subr.bf16.mxu0 %v16191_v48  ;;  %10430 = vmatprep.subr.bf16.mxu1 %v16192_v7  ;;  %v14232_v48 = vpack.c.bf16 %v3657_v56, %v3653_v39  ;;  %v3659_v7 = vld [vmem:[#allocation6 + $0xf8] sm:$0xff]  ;;  %v3676_v56 = vld [vmem:[#allocation6 + $0x180] sm:$0xff]  ;;  %v3872_v59 = vld [vmem:[#allocation6 + $0x228] sm:$0xff] }
 0x5c8   :  { %v3683_v39 = vld [vmem:[#allocation6 + $0x1b8] sm:$0xff]  ;;  %v14292_v20 = vpack.c.bf16 %v3872_v59, %v3868_v11 }
 0x5c9   :  { %v3874_v18 = vld [vmem:[#allocation6 + $0x238] sm:$0xff] }
 0x5ca   :  { %v12438_v21 = vpop.eup %12437  ;;  %10400 = vmatpush1.bf16.msra.mxu0 %v16193_v57  ;;  %10432 = vmatpush1.bf16.msra.mxu1 %v16194_v35  ;;  %v3654_v35 = vld [vmem:[#allocation6 + $0xd0] sm:$0xff]  ;;  %v14294_v3 = vpack.c.bf16 %v3874_v18, %v3870_v29 }
 0x5cb   :  { %v12440_v47 = vpop.eup %12439  ;;  %v3141_v2 = vmul.f32 %v12438_v21, %v12436_v38  ;;  %10402 = vmatprep.subr.bf16.mxu0 %v14044_v14  ;;  %10434 = vmatprep.subr.bf16.mxu1 %v14046_v60  ;;  %v3633_v14 = vld [vmem:[#allocation6 + $0x28] sm:$0xff]  ;;  %v3631_v60 = vld [vmem:[#allocation6 + $0x18] sm:$0xff]  ;;  %v3656_v38 = vld [vmem:[#allocation6 + $0xe0] sm:$0xff]  ;;  %v14234_v21 = vpack.c.bf16 %v3659_v7, %v3655_v22  ;;  %v14270_v7 = vpack.c.bf16 %v3683_v39, %v3679_v0 }
 0x5cc   :  { %v3140_v9 = vmul.f32 %v12440_v47, %v14061_v19  ;;  %v14236_v57 = vpack.c.bf16 %v3656_v38, %v3652_v16  ;;  %v3658_v47 = vld [vmem:[#allocation6 + $0xf0] sm:$0xff]  ;;  %v3680_v22 = vld [vmem:[#allocation6 + $0x1a0] sm:$0xff] }
 0x5cd   :  { %v14272_v16 = vpack.c.bf16 %v3680_v22, %v3676_v56  ;;  %v3678_v38 = vld [vmem:[#allocation6 + $0x190] sm:$0xff] }
 0x5ce   :  { %v14173_v52 = vadd.f32 %v3141_v2, %v3140_v9  ;;  %10404 = vmatpush1.bf16.msra.mxu0 %v14050_v8  ;;  %10436 = vmatpush1.bf16.msra.mxu1 %v14052_v54  ;;  %v3629_v54 = vld [vmem:[#allocation6 + $0x8] sm:$0xff]  ;;  %v14239_v2 = vpack.c.bf16 %v3658_v47, %v3654_v35  ;;  %v3682_v35 = vld [vmem:[#allocation6 + $0x1b0] sm:$0xff] }
 0x5cf   :  { %10406 = vmatprep.subr.bf16.mxu0 %v14056_v63  ;;  %10438 = vmatprep.subr.bf16.mxu1 %v14058_v1  ;;  %v12442_v63 = vpop.eup %12441  ;;  %v14196_v8 = vpack.c.bf16 %v3633_v14, %v3629_v54  ;;  %v3665_v9 = vld [vmem:[#allocation6 + $0x128] sm:$0xff]  ;;  %v3667_v54 = vld [vmem:[#allocation6 + $0x138] sm:$0xff]  ;;  %v3660_v14 = vld [vmem:[#allocation6 + $0x100] sm:$0xff]  ;;  %v14275_v47 = vpack.c.bf16 %v3682_v35, %v3678_v38 }
 0x5d0   :  { %12443 = vtanh.f32 %v14173_v52  ;;  %v16196_v56 = vld [vmem:[#allocation21_spill] sm:$0xff] }
 0x5d2   :  { %10408 = vmatpush1.bf16.msra.mxu0 %v14065_v44  ;;  %10440 = vmatpush1.bf16.msra.mxu1 %v14067_v30  ;;  %v3635_v44 = vld [vmem:[#allocation6 + $0x38] sm:$0xff]  ;;  %v3628_v30 = vld [vmem:[#allocation6] sm:$0xff] }
 0x5d3   :  { %10410 = vmatprep.subr.bf16.mxu0 %v14071_v31  ;;  %10442 = vmatprep.subr.bf16.mxu1 %v14073_v13  ;;  %v3632_v31 = vld [vmem:[#allocation6 + $0x20] sm:$0xff]  ;;  %v14198_v13 = vpack.c.bf16 %v3635_v44, %v3631_v60 }
 0x5d4   :  { %v3664_v60 = vld [vmem:[#allocation6 + $0x120] sm:$0xff] }
 0x5d6   :  { %10412 = vmatpush1.bf16.msra.mxu0 %v14078_v53  ;;  %10444 = vmatpush1.bf16.msra.mxu1 %v14080_v55  ;;  %v14200_v53 = vpack.c.bf16 %v3632_v31, %v3628_v30  ;;  %v3630_v55 = vld [vmem:[#allocation6 + $0x10] sm:$0xff]  ;;  %v14248_v30 = vpack.c.bf16 %v3664_v60, %v3660_v14  ;;  %v3691_v14 = vld [vmem:[#allocation6 + $0x1f8] sm:$0xff]  ;;  %v3684_v60 = vld [vmem:[#allocation6 + $0x1c0] sm:$0xff] }
 0x5d7   :  { %10414 = vmatprep.subr.bf16.mxu0 %v14084_v37  ;;  %10446 = vmatprep.subr.bf16.mxu1 %v14086_v40  ;;  %v3634_v37 = vld [vmem:[#allocation6 + $0x30] sm:$0xff] }
 0x5d8   :  { %v14203_v40 = vpack.c.bf16 %v3634_v37, %v3630_v55  ;;  %v3662_v31 = vld [vmem:[#allocation6 + $0x110] sm:$0xff] }
 0x5d9   :  { %v3666_v55 = vld [vmem:[#allocation6 + $0x130] sm:$0xff] }
 0x5da   :  { %v12444_v19 = vpop.eup %12443  ;;  %10416 = vmatpush1.bf16.msra.mxu0 %v14090_v4  ;;  %10448 = vmatpush1.bf16.msra.mxu1 %v14092_v12  ;;  %v3637_v4 = vld [vmem:[#allocation6 + $0x48] sm:$0xff]  ;;  %v14251_v37 = vpack.c.bf16 %v3666_v55, %v3662_v31  ;;  %v3688_v31 = vld [vmem:[#allocation6 + $0x1e0] sm:$0xff] }
 0x5db   :  { %v14190_v1 = vmul.f32 %v12444_v19, %v12442_v63  ;;  %10450 = vmatprep.subr.bf16.mxu0 %v14196_v8  ;;  %10482 = vmatprep.subr.bf16.mxu1 %v14198_v13  ;;  %v3641_v12 = vld [vmem:[#allocation6 + $0x68] sm:$0xff]  ;;  %v3663_v63 = vld [vmem:[#allocation6 + $0x118] sm:$0xff]  ;;  %v14244_v19 = vpack.c.bf16 %v3665_v9, %v3661_v5 }
 0x5dc   :  { %v14208_v28 = vpack.c.bf16 %v3641_v12, %v3637_v4  ;;  %v14246_v44 = vpack.c.bf16 %v3667_v54, %v3663_v63  ;;  %v3669_v4 = vld [vmem:[#allocation6 + $0x148] sm:$0xff]  ;;  %v3687_v63 = vld [vmem:[#allocation6 + $0x1d8] sm:$0xff] }
 0x5dd   :  { %16195 = vst [vmem:[#allocation20_spill] sm:$0xff] %v14190_v1  ;;  %3518 = vmatmul.mubr.f32.vlgmr.msra.gmra.mrb[4].mxu0 %v14190_v1  ;;  %3589 = vmatmul.mubr.f32.vlgmr.msra.gmra.mrb[36].mxu1 %v14190_v1  ;;  %v3673_v12 = vld [vmem:[#allocation6 + $0x168] sm:$0xff]  ;;  %v14282_v55 = vpack.c.bf16 %v3691_v14, %v3687_v63 }
 0x5de   :  { %3756 = vmatprep.mubr.f32.mxu0 %v16112_v6  ;;  %3827 = vmatprep.mubr.f32.mxu1 %v16112_v6  ;;  %v14256_v10 = vpack.c.bf16 %v3673_v12, %v3669_v4  ;;  %v3685_v5 = vld [vmem:[#allocation6 + $0x1c8] sm:$0xff]  ;;  %v14284_v4 = vpack.c.bf16 %v3688_v31, %v3684_v60  ;;  %v3686_v12 = vld [vmem:[#allocation6 + $0x1d0] sm:$0xff] }
 0x5df   :  { %10452 = vmatpush1.bf16.msra.mxu0 %v14200_v53  ;;  %10484 = vmatpush1.bf16.msra.mxu1 %v14203_v40  ;;  %v3689_v9 = vld [vmem:[#allocation6 + $0x1e8] sm:$0xff]  ;;  %v14287_v62 = vpack.c.bf16 %v3690_v25, %v3686_v12 }
 0x5e0   :  { %10454 = vmatprep.subr.bf16.mxu0 %v14208_v28  ;;  %10486 = vmatprep.subr.bf16.mxu1 %v14210_v26  ;;  %v14280_v54 = vpack.c.bf16 %v3689_v9, %v3685_v5  ;;  %v16197_v5 = vld [vmem:[#allocation22_spill] sm:$0xff] }
 0x5e3   :  { %10456 = vmatpush1.bf16.msra.mxu0 %v14212_v15  ;;  %10488 = vmatpush1.bf16.msra.mxu1 %v14215_v58 }
 0x5e4   :  { %10458 = vmatprep.subr.bf16.mxu0 %v14220_v50  ;;  %10490 = vmatprep.subr.bf16.mxu1 %v14222_v34 }
 0x5e7   :  { %10460 = vmatpush1.bf16.msra.mxu0 %v14224_v17  ;;  %10492 = vmatpush1.bf16.msra.mxu1 %v14227_v45 }
 0x5e8   :  { %10462 = vmatprep.subr.bf16.mxu0 %v14232_v48  ;;  %10494 = vmatprep.subr.bf16.mxu1 %v14234_v21 }
 0x5eb   :  { %10464 = vmatpush1.bf16.msra.mxu0 %v14236_v57  ;;  %10496 = vmatpush1.bf16.msra.mxu1 %v14239_v2 }
 0x5ec   :  { %10466 = vmatprep.subr.bf16.mxu0 %v14244_v19  ;;  %10498 = vmatprep.subr.bf16.mxu1 %v14246_v44 }
 0x5ef   :  { %10468 = vmatpush1.bf16.msra.mxu0 %v14248_v30  ;;  %10500 = vmatpush1.bf16.msra.mxu1 %v14251_v37 }
 0x5f0   :  { %10470 = vmatprep.subr.bf16.mxu0 %v14256_v10  ;;  %10502 = vmatprep.subr.bf16.mxu1 %v14258_v43 }
 0x5f3   :  { %10472 = vmatpush1.bf16.msra.mxu0 %v14260_v61  ;;  %10504 = vmatpush1.bf16.msra.mxu1 %v14263_v24 }
 0x5f4   :  { %10474 = vmatprep.subr.bf16.mxu0 %v14268_v27  ;;  %10506 = vmatprep.subr.bf16.mxu1 %v14270_v7 }
 0x5f7   :  { %10476 = vmatpush1.bf16.msra.mxu0 %v14272_v16  ;;  %10508 = vmatpush1.bf16.msra.mxu1 %v14275_v47 }
 0x5f8   :  { %10478 = vmatprep.subr.bf16.mxu0 %v14280_v54  ;;  %10510 = vmatprep.subr.bf16.mxu1 %v14282_v55 }
 0x5fb   :  { %10480 = vmatpush1.bf16.msra.mxu0 %v14284_v4  ;;  %10512 = vmatpush1.bf16.msra.mxu1 %v14287_v62 }
 0x5fc   :  { %10514 = vmatprep.subr.bf16.mxu0 %v14292_v20  ;;  %10546 = vmatprep.subr.bf16.mxu1 %v14294_v3 }
 0x690   :  { %v3280_v0 = vpop.f32.mrb[26].mxu0  ;;  %v3351_v39 = vpop.f32.mrb[26].mxu1 }
 0x691   :  { %v3356_v22 = vadd.f32 %v3280_v0, %v16196_v56  ;;  %v3282_v38 = vpop.f32.mrb[27].mxu0  ;;  %v3353_v35 = vpop.f32.mrb[27].mxu1  ;;  %v12059_v12 = vadd.f32 %v3351_v39, %v16175_v49  ;;  %v3886_v49 = vld [vmem:[#allocation6 + $0x298] sm:$0xff] }
 0x692   :  { %v3357_v9 = vadd.f32 %v3282_v38, %v16197_v5  ;;  %v12060_v60 = vadd.f32 %v3353_v35, %v16132_v33 }
 0x693   :  { %v9534_v63 = vmul.f32 -1.442695, %v3356_v22 }
 0x694   :  { %v9535_v14 = vmul.f32 -1.442695, %v3357_v9  ;;  %v9536_v31 = vmul.f32 -1.442695, %v12060_v60 }
 0x695   :  { %12445 = vpow2.f32 %v9534_v63 }
 0x696   :  { %12447 = vpow2.f32 %v9535_v14 }
 0x697   :  { %12449 = vpow2.f32 %v9536_v31 }
 0x698   :  { %12451 = vtanh.f32 %v12059_v12 }
 0x69f   :  { %v12446_v25 = vpop.eup %12445 }
 0x6a0   :  { %v12448_v11 = vpop.eup %12447  ;;  %v3363_v59 = vadd.f32 1.0, %v12446_v25 }
 0x6a1   :  { %v3369_v29 = vadd.f32 1.0, %v12448_v11  ;;  %v12450_v18 = vpop.eup %12449 }
 0x6a2   :  { %12453 = vrcp.f32 %v3363_v59  ;;  %v12452_v0 = vpop.eup %12451  ;;  %v3376_v5 = vadd.f32 1.0, %v12450_v18  ;;  %v3869_v18 = vld [vmem:[#allocation6 + $0x210] sm:$0xff] }
 0x6a3   :  { %12455 = vrcp.f32 %v3369_v29  ;;  %v3871_v29 = vld [vmem:[#allocation6 + $0x220] sm:$0xff] }
 0x6a4   :  { %12457 = vrcp.f32 %v3376_v5  ;;  %v3882_v5 = vld [vmem:[#allocation6 + $0x278] sm:$0xff] }
 0x6ac   :  { %v12454_v56 = vpop.eup %12453 }
 0x6ad   :  { %v12456_v22 = vpop.eup %12455  ;;  %v3380_v38 = vmul.f32 %v12454_v56, %v12452_v0  ;;  %v3873_v0 = vld [vmem:[#allocation6 + $0x230] sm:$0xff]  ;;  %v3876_v56 = vld [vmem:[#allocation6 + $0x248] sm:$0xff] }
 0x6ae   :  { %v3379_v9 = vmul.f32 %v12456_v22, %v14143_v51  ;;  %v3867_v51 = vld [vmem:[#allocation6 + $0x200] sm:$0xff]  ;;  %v3880_v22 = vld [vmem:[#allocation6 + $0x268] sm:$0xff] }
 0x6af   :  { %v14309_v32 = vpack.c.bf16 %v3871_v29, %v3867_v51 }
 0x6b0   :  { %v14303_v35 = vadd.f32 %v3380_v38, %v3379_v9  ;;  %v3519_v63 = vpop.f32.mrb[4].mxu0  ;;  %v3590_v39 = vpop.f32.mrb[36].mxu1  ;;  %v3878_v38 = vld [vmem:[#allocation6 + $0x258] sm:$0xff] }
 0x6b1   :  { %v12069_v14 = vadd.f32 %v3519_v63, %v16177_v42  ;;  %v3521_v60 = vpop.f32.mrb[5].mxu0  ;;  %v3592_v31 = vpop.f32.mrb[37].mxu1  ;;  %16199 = vst [vmem:[#allocation35_spill] sm:$0xff] %v14309_v32  ;;  %v14318_v1 = vpack.c.bf16 %v3882_v5, %v3878_v38  ;;  %v3884_v42 = vld [vmem:[#allocation6 + $0x288] sm:$0xff] }
 0x6b2   :  { %16198 = vst [vmem:[#allocation34_spill] sm:$0xff] %v14303_v35  ;;  %12459 = vtanh.f32 %v14303_v35  ;;  %v12070_v12 = vadd.f32 %v3521_v60, %v16178_v46  ;;  %v12086_v59 = vadd.f32 %v3592_v31, %v16179_v36  ;;  %v12458_v9 = vpop.eup %12457  ;;  %v14311_v60 = vpack.c.bf16 %v3873_v0, %v3869_v18  ;;  %v3877_v36 = vld [vmem:[#allocation6 + $0x250] sm:$0xff]  ;;  %v3888_v35 = vld [vmem:[#allocation6 + $0x2a8] sm:$0xff] }
 0x6b3   :  { %v9537_v25 = vmul.f32 -1.442695, %v12069_v14  ;;  %v3875_v14 = vld [vmem:[#allocation6 + $0x240] sm:$0xff]  ;;  %v12085_v31 = vadd.f32 %v3590_v39, %v13518_v41  ;;  %16203 = vst [vmem:[#allocation41_spill] sm:$0xff] %v14318_v1  ;;  %v3881_v46 = vld [vmem:[#allocation6 + $0x270] sm:$0xff]  ;;  %v14330_v5 = vpack.c.bf16 %v3888_v35, %v3884_v42 }
 0x6b4   :  { %v9538_v11 = vmul.f32 -1.442695, %v12070_v12  ;;  %v9539_v23 = vmul.f32 -1.442695, %v12086_v59  ;;  %16200 = vst [vmem:[#allocation36_spill] sm:$0xff] %v14311_v60  ;;  %v3879_v12 = vld [vmem:[#allocation6 + $0x260] sm:$0xff]  ;;  %v14326_v0 = vpack.c.bf16 %v3881_v46, %v3877_v36 }
 0x6b5   :  { %12461 = vpow2.f32 %v9537_v25  ;;  %v3890_v59 = vld [vmem:[#allocation6 + $0x2b8] sm:$0xff]  ;;  %v14324_v39 = vpack.c.bf16 %v3879_v12, %v3875_v14  ;;  %16206 = vst [vmem:[#allocation44_spill] sm:$0xff] %v14330_v5  ;;  %v3896_v14 = vld [vmem:[#allocation6 + $0x2e8] sm:$0xff]  ;;  %v3891_v36 = vld [vmem:[#allocation6 + $0x2c0] sm:$0xff] }
 0x6b6   :  { %12463 = vpow2.f32 %v9538_v11  ;;  %v14316_v11 = vpack.c.bf16 %v3880_v22, %v3876_v56  ;;  %16205 = vst [vmem:[#allocation43_spill] sm:$0xff] %v14326_v0  ;;  %v3883_v56 = vld [vmem:[#allocation6 + $0x280] sm:$0xff]  ;;  %v3894_v12 = vld [vmem:[#allocation6 + $0x2d8] sm:$0xff] }
 0x6b7   :  { %12465 = vpow2.f32 %v9539_v23  ;;  %16204 = vst [vmem:[#allocation42_spill] sm:$0xff] %v14324_v39  ;;  %v3887_v22 = vld [vmem:[#allocation6 + $0x2a0] sm:$0xff]  ;;  %v3885_v23 = vld [vmem:[#allocation6 + $0x290] sm:$0xff]  ;;  %v3898_v46 = vld [vmem:[#allocation6 + $0x2f8] sm:$0xff] }
 0x6b8   :  { %16202 = vst [vmem:[#allocation40_spill] sm:$0xff] %v14316_v11  ;;  %12467 = vtanh.f32 %v12085_v31  ;;  %v14338_v42 = vpack.c.bf16 %v3887_v22, %v3883_v56  ;;  %v3895_v35 = vld [vmem:[#allocation6 + $0x2e0] sm:$0xff] }
 0x6b9   :  { %v14350_v56 = vpack.c.bf16 %v3895_v35, %v3891_v36  ;;  %v3914_v36 = vld [vmem:[#allocation6 + $0x378] sm:$0xff] }
 0x6ba   :  { %16208 = vst [vmem:[#allocation46_spill] sm:$0xff] %v14338_v42 }
 0x6bb   :  { %16212 = vst [vmem:[#allocation17_spill] sm:$0xff] %v14350_v56 }
 0x6bc   :  { %v12460_v63 = vpop.eup %12459 }
 0x6bd   :  { %v14313_v25 = vmul.f32 %v12460_v63, %v12458_v9  ;;  %v14332_v9 = vpack.c.bf16 %v3890_v59, %v3886_v49  ;;  %v3889_v63 = vld [vmem:[#allocation6 + $0x2b0] sm:$0xff]  ;;  %v14346_v59 = vpack.c.bf16 %v3898_v46, %v3894_v12 }
 0x6be   :  { %v14340_v49 = vpack.c.bf16 %v3889_v63, %v3885_v23  ;;  %v3899_v23 = vld [vmem:[#allocation6 + $0x300] sm:$0xff]  ;;  %v3901_v12 = vld [vmem:[#allocation6 + $0x310] sm:$0xff] }
 0x6bf   :  { %16201 = vst [vmem:[#allocation39_spill] sm:$0xff] %v14313_v25  ;;  %v12462_v51 = vpop.eup %12461  ;;  %3757 = vmatmul.mubr.f32.vlgmr.msra.gmra.mrb[28].mxu0 %v14313_v25  ;;  %3828 = vmatmul.mubr.f32.vlgmr.msra.gmra.mrb[28].mxu1 %v14313_v25  ;;  %16207 = vst [vmem:[#allocation45_spill] sm:$0xff] %v14332_v9  ;;  %v3904_v25 = vld [vmem:[#allocation6 + $0x328] sm:$0xff]  ;;  %v3903_v63 = vld [vmem:[#allocation6 + $0x320] sm:$0xff] }
 0x6c0   :  { %v12464_v29 = vpop.eup %12463  ;;  %v3602_v18 = vadd.f32 1.0, %v12462_v51  ;;  %10516 = vmatpush1.bf16.msra.mxu0 %v14309_v32  ;;  %10548 = vmatpush1.bf16.msra.mxu1 %v14311_v60  ;;  %v3892_v51 = vld [vmem:[#allocation6 + $0x2c8] sm:$0xff]  ;;  %16209 = vst [vmem:[#allocation47_spill] sm:$0xff] %v14340_v49  ;;  %16211 = vst [vmem:[#allocation49_spill] sm:$0xff] %v14346_v59  ;;  %v3905_v46 = vld [vmem:[#allocation6 + $0x330] sm:$0xff] }
 0x6c1   :  { %v3608_v38 = vadd.f32 1.0, %v12464_v29  ;;  %10518 = vmatprep.subr.bf16.mxu0 %v14316_v11  ;;  %10550 = vmatprep.subr.bf16.mxu1 %v14318_v1  ;;  %v14344_v31 = vpack.c.bf16 %v3896_v14, %v3892_v51  ;;  %v3893_v29 = vld [vmem:[#allocation6 + $0x2d0] sm:$0xff] }
 0x6c2   :  { %12469 = vrcp.f32 %v3602_v18  ;;  %3995 = vmatprep.mubr.f32.mxu0 %v16112_v6  ;;  %4066 = vmatprep.mubr.f32.mxu1 %v16112_v6  ;;  %v3897_v18 = vld [vmem:[#allocation6 + $0x2f0] sm:$0xff] }
 0x6c3   :  { %12471 = vrcp.f32 %v3608_v38  ;;  %16210 = vst [vmem:[#allocation48_spill] sm:$0xff] %v14344_v31  ;;  %v3900_v38 = vld [vmem:[#allocation6 + $0x308] sm:$0xff]  ;;  %v14352_v22 = vpack.c.bf16 %v3897_v18, %v3893_v29  ;;  %v14362_v18 = vpack.c.bf16 %v3903_v63, %v3899_v23  ;;  %v3913_v60 = vld [vmem:[#allocation6 + $0x370] sm:$0xff] }
 0x6c4   :  { %10520 = vmatpush1.bf16.msra.mxu0 %v14324_v39  ;;  %10552 = vmatpush1.bf16.msra.mxu1 %v14326_v0  ;;  %v3902_v39 = vld [vmem:[#allocation6 + $0x318] sm:$0xff]  ;;  %v14356_v51 = vpack.c.bf16 %v3904_v25, %v3900_v38  ;;  %v3907_v25 = vld [vmem:[#allocation6 + $0x340] sm:$0xff]  ;;  %v3920_v63 = vld [vmem:[#allocation6 + $0x3a8] sm:$0xff] }
 0x6c5   :  { %10522 = vmatprep.subr.bf16.mxu0 %v14330_v5  ;;  %10554 = vmatprep.subr.bf16.mxu1 %v14332_v9  ;;  %v3906_v0 = vld [vmem:[#allocation6 + $0x338] sm:$0xff]  ;;  %16213 = vst [vmem:[#allocation21_spill] sm:$0xff] %v14352_v22  ;;  %v3908_v9 = vld [vmem:[#allocation6 + $0x348] sm:$0xff] }
 0x6c6   :  { %v14358_v14 = vpack.c.bf16 %v3906_v0, %v3902_v39  ;;  %v3912_v5 = vld [vmem:[#allocation6 + $0x368] sm:$0xff]  ;;  %v3911_v39 = vld [vmem:[#allocation6 + $0x360] sm:$0xff] }
 0x6c7   :  { %v14368_v1 = vpack.c.bf16 %v3912_v5, %v3908_v9  ;;  %v3915_v9 = vld [vmem:[#allocation6 + $0x380] sm:$0xff] }
 0x6c8   :  { %10524 = vmatpush1.bf16.msra.mxu0 %v14338_v42  ;;  %10556 = vmatpush1.bf16.msra.mxu1 %v14340_v49  ;;  %v12466_v42 = vpop.eup %12465  ;;  %v3910_v49 = vld [vmem:[#allocation6 + $0x358] sm:$0xff] }
 0x6c9   :  { %10526 = vmatprep.subr.bf16.mxu0 %v14344_v31  ;;  %10558 = vmatprep.subr.bf16.mxu1 %v14346_v59  ;;  %v12468_v35 = vpop.eup %12467  ;;  %v14364_v59 = vpack.c.bf16 %v3905_v46, %v3901_v12  ;;  %v3615_v31 = vadd.f32 1.0, %v12466_v42  ;;  %v14370_v11 = vpack.c.bf16 %v3914_v36, %v3910_v49  ;;  %v3918_v12 = vld [vmem:[#allocation6 + $0x398] sm:$0xff]  ;;  %v14377_v42 = vpack.c.bf16 %v3911_v39, %v3907_v25  ;;  %v3919_v49 = vld [vmem:[#allocation6 + $0x3a0] sm:$0xff]  ;;  %v3928_v25 = vld [vmem:[#allocation6 + $0x3e8] sm:$0xff] }
 0x6ca   :  { %v3922_v46 = vld [vmem:[#allocation6 + $0x3b8] sm:$0xff] }
 0x6cb   :  { %12473 = vrcp.f32 %v3615_v31  ;;  %v14385_v36 = vpack.c.bf16 %v3922_v46, %v3918_v12  ;;  %v3926_v39 = vld [vmem:[#allocation6 + $0x3d8] sm:$0xff]  ;;  %v14390_v31 = vpack.c.bf16 %v3919_v49, %v3915_v9  ;;  %v3925_v12 = vld [vmem:[#allocation6 + $0x3d0] sm:$0xff] }
 0x6cc   :  { %v12470_v29 = vpop.eup %12469  ;;  %10528 = vmatpush1.bf16.msra.mxu0 %v14350_v56  ;;  %10560 = vmatpush1.bf16.msra.mxu1 %v14352_v22  ;;  %v3909_v56 = vld [vmem:[#allocation6 + $0x350] sm:$0xff]  ;;  %v3916_v22 = vld [vmem:[#allocation6 + $0x388] sm:$0xff] }
 0x6cd   :  { %v12472_v0 = vpop.eup %12471  ;;  %v3619_v38 = vmul.f32 %v12470_v29, %v12468_v35  ;;  %10530 = vmatprep.subr.bf16.mxu0 %v14356_v51  ;;  %10562 = vmatprep.subr.bf16.mxu1 %v14358_v14  ;;  %v14379_v5 = vpack.c.bf16 %v3913_v60, %v3909_v56  ;;  %v3917_v35 = vld [vmem:[#allocation6 + $0x390] sm:$0xff]  ;;  %v3930_v60 = vld [vmem:[#allocation6 + $0x3f8] sm:$0xff] }
 0x6ce   :  { %v3618_v23 = vmul.f32 %v12472_v0, %v14173_v52  ;;  %v14383_v52 = vpack.c.bf16 %v3920_v63, %v3916_v22  ;;  %v3921_v29 = vld [vmem:[#allocation6 + $0x3b0] sm:$0xff]  ;;  %v3924_v0 = vld [vmem:[#allocation6 + $0x3c8] sm:$0xff]  ;;  %v3923_v22 = vld [vmem:[#allocation6 + $0x3c0] sm:$0xff] }
 0x6cf   :  { %v14392_v56 = vpack.c.bf16 %v3921_v29, %v3917_v35  ;;  %v3927_v63 = vld [vmem:[#allocation6 + $0x3e0] sm:$0xff]  ;;  %v3929_v46 = vld [vmem:[#allocation6 + $0x3f0] sm:$0xff] }
 0x6d0   :  { %v14373_v32 = vadd.f32 %v3619_v38, %v3618_v23  ;;  %10532 = vmatpush1.bf16.msra.mxu0 %v14362_v18  ;;  %10564 = vmatpush1.bf16.msra.mxu1 %v14364_v59  ;;  %v14396_v38 = vpack.c.bf16 %v3928_v25, %v3924_v0  ;;  %v14398_v23 = vpack.c.bf16 %v3930_v60, %v3926_v39 }
 0x6d1   :  { %10534 = vmatprep.subr.bf16.mxu0 %v14368_v1  ;;  %10566 = vmatprep.subr.bf16.mxu1 %v14370_v11  ;;  %v14402_v9 = vpack.c.bf16 %v3927_v63, %v3923_v22  ;;  %v14404_v49 = vpack.c.bf16 %v3929_v46, %v3925_v12  ;;  %v16220_v22 = vld [vmem:[#allocation32_spill] sm:$0xff] }
 0x6d2   :  { %12475 = vtanh.f32 %v14373_v32 }
 0x6d4   :  { %10536 = vmatpush1.bf16.msra.mxu0 %v14377_v42  ;;  %10568 = vmatpush1.bf16.msra.mxu1 %v14379_v5 }
 0x6d5   :  { %10538 = vmatprep.subr.bf16.mxu0 %v14383_v52  ;;  %10570 = vmatprep.subr.bf16.mxu1 %v14385_v36  ;;  %v12474_v35 = vpop.eup %12473 }
 0x6d8   :  { %10540 = vmatpush1.bf16.msra.mxu0 %v14390_v31  ;;  %10572 = vmatpush1.bf16.msra.mxu1 %v14392_v56 }
 0x6d9   :  { %10542 = vmatprep.subr.bf16.mxu0 %v14396_v38  ;;  %10574 = vmatprep.subr.bf16.mxu1 %v14398_v23 }
 0x6dc   :  { %v12476_v29 = vpop.eup %12475  ;;  %10544 = vmatpush1.bf16.msra.mxu0 %v14402_v9  ;;  %10576 = vmatpush1.bf16.msra.mxu1 %v14404_v49 }
 0x6dd   :  { %v14410_v0 = vmul.f32 %v12476_v29, %v12474_v35  ;;  %10578 = vmatprep.subr.bf16.mxu0 %v14196_v8  ;;  %10610 = vmatprep.subr.bf16.mxu1 %v14198_v13 }
 0x6df   :  { %3996 = vmatmul.mubr.f32.vlgmr.msra.gmra.mrb[2].mxu0 %v14410_v0  ;;  %4067 = vmatmul.mubr.f32.vlgmr.msra.gmra.mrb[34].mxu1 %v14410_v0 }
 0x6e0   :  { %10580 = vmatpush1.bf16.msra.mxu0 %v14200_v53  ;;  %10612 = vmatpush1.bf16.msra.mxu1 %v14203_v40  ;;  %v16214_v53 = vld [vmem:[#allocation23_spill] sm:$0xff] }
 0x6e1   :  { %10582 = vmatprep.subr.bf16.mxu0 %v14208_v28  ;;  %10614 = vmatprep.subr.bf16.mxu1 %v14210_v26 }
 0x6e2   :  { %4234 = vmatprep.mubr.f32.mxu0 %v16112_v6  ;;  %4305 = vmatprep.mubr.f32.mxu1 %v16112_v6 }
 0x6e4   :  { %10584 = vmatpush1.bf16.msra.mxu0 %v14212_v15  ;;  %10616 = vmatpush1.bf16.msra.mxu1 %v14215_v58  ;;  %v16215_v15 = vld [vmem:[#allocation24_spill] sm:$0xff] }
 0x6e5   :  { %10586 = vmatprep.subr.bf16.mxu0 %v14220_v50  ;;  %10618 = vmatprep.subr.bf16.mxu1 %v14222_v34 }
 0x6e8   :  { %10588 = vmatpush1.bf16.msra.mxu0 %v14224_v17  ;;  %10620 = vmatpush1.bf16.msra.mxu1 %v14227_v45 }
 0x6e9   :  { %10590 = vmatprep.subr.bf16.mxu0 %v14232_v48  ;;  %10622 = vmatprep.subr.bf16.mxu1 %v14234_v21  ;;  %v16216_v48 = vld [vmem:[#allocation27_spill] sm:$0xff] }
 0x6ec   :  { %10592 = vmatpush1.bf16.msra.mxu0 %v14236_v57  ;;  %10624 = vmatpush1.bf16.msra.mxu1 %v14239_v2 }
 0x6ed   :  { %10594 = vmatprep.subr.bf16.mxu0 %v14244_v19  ;;  %10626 = vmatprep.subr.bf16.mxu1 %v14246_v44 }
 0x6f0   :  { %10596 = vmatpush1.bf16.msra.mxu0 %v14248_v30  ;;  %10628 = vmatpush1.bf16.msra.mxu1 %v14251_v37 }
 0x6f1   :  { %10598 = vmatprep.subr.bf16.mxu0 %v14256_v10  ;;  %10630 = vmatprep.subr.bf16.mxu1 %v14258_v43 }
 0x6f4   :  { %10600 = vmatpush1.bf16.msra.mxu0 %v14260_v61  ;;  %10632 = vmatpush1.bf16.msra.mxu1 %v14263_v24 }
 0x6f5   :  { %10602 = vmatprep.subr.bf16.mxu0 %v14268_v27  ;;  %10634 = vmatprep.subr.bf16.mxu1 %v14270_v7  ;;  %v16217_v27 = vld [vmem:[#allocation34_spill] sm:$0xff] }
 0x6f8   :  { %10604 = vmatpush1.bf16.msra.mxu0 %v14272_v16  ;;  %10636 = vmatpush1.bf16.msra.mxu1 %v14275_v47 }
 0x6f9   :  { %10606 = vmatprep.subr.bf16.mxu0 %v14280_v54  ;;  %10638 = vmatprep.subr.bf16.mxu1 %v14282_v55  ;;  %v16218_v55 = vld [vmem:[#allocation30_spill] sm:$0xff] }
 0x6fc   :  { %10608 = vmatpush1.bf16.msra.mxu0 %v14284_v4  ;;  %10640 = vmatpush1.bf16.msra.mxu1 %v14287_v62 }
 0x6fd   :  { %10642 = vmatprep.subr.bf16.mxu0 %v14292_v20  ;;  %10674 = vmatprep.subr.bf16.mxu1 %v14294_v3  ;;  %v16219_v3 = vld [vmem:[#allocation29_spill] sm:$0xff] }
 0x792   :  { %v3758_v8 = vpop.f32.mrb[28].mxu0  ;;  %v3829_v13 = vpop.f32.mrb[28].mxu1 }
 0x793   :  { %v3834_v40 = vadd.f32 %v3758_v8, %v16214_v53  ;;  %v3760_v28 = vpop.f32.mrb[29].mxu0  ;;  %v3831_v26 = vpop.f32.mrb[29].mxu1  ;;  %v12061_v21 = vadd.f32 %v3829_v13, %v16216_v48 }
 0x794   :  { %v3835_v58 = vadd.f32 %v3760_v28, %v16215_v15  ;;  %v12062_v17 = vadd.f32 %v3831_v26, %v16132_v33  ;;  %v16221_v28 = vld [vmem:[#allocation35_spill] sm:$0xff]  ;;  %v16222_v26 = vld [vmem:[#allocation36_spill] sm:$0xff] }
 0x795   :  { %v9540_v50 = vmul.f32 -1.442695, %v3834_v40 }
 0x796   :  { %v9541_v34 = vmul.f32 -1.442695, %v3835_v58  ;;  %v9542_v45 = vmul.f32 -1.442695, %v12062_v17  ;;  %v16223_v58 = vld [vmem:[#allocation40_spill] sm:$0xff]  ;;  %v16226_v17 = vld [vmem:[#allocation43_spill] sm:$0xff] }
 0x797   :  { %12477 = vpow2.f32 %v9540_v50  ;;  %v16224_v50 = vld [vmem:[#allocation41_spill] sm:$0xff] }
 0x798   :  { %12479 = vpow2.f32 %v9541_v34  ;;  %v16225_v34 = vld [vmem:[#allocation42_spill] sm:$0xff] }
 0x799   :  { %12481 = vpow2.f32 %v9542_v45  ;;  %v16227_v45 = vld [vmem:[#allocation44_spill] sm:$0xff] }
 0x79a   :  { %12483 = vtanh.f32 %v12061_v21  ;;  %v16228_v21 = vld [vmem:[#allocation45_spill] sm:$0xff] }
 0x7a1   :  { %v12478_v57 = vpop.eup %12477 }
 0x7a2   :  { %v12480_v2 = vpop.eup %12479  ;;  %v3841_v19 = vadd.f32 1.0, %v12478_v57  ;;  %v16229_v57 = vld [vmem:[#allocation46_spill] sm:$0xff] }
 0x7a3   :  { %v3847_v44 = vadd.f32 1.0, %v12480_v2  ;;  %v12482_v30 = vpop.eup %12481  ;;  %v16230_v2 = vld [vmem:[#allocation47_spill] sm:$0xff] }
 0x7a4   :  { %12485 = vrcp.f32 %v3841_v19  ;;  %v12484_v37 = vpop.eup %12483  ;;  %v3854_v24 = vadd.f32 1.0, %v12482_v30  ;;  %v16231_v19 = vld [vmem:[#allocation48_spill] sm:$0xff] }
 0x7a5   :  { %12487 = vrcp.f32 %v3847_v44  ;;  %v16232_v44 = vld [vmem:[#allocation49_spill] sm:$0xff] }
 0x7a6   :  { %12489 = vrcp.f32 %v3854_v24 }
 0x7ae   :  { %v12486_v10 = vpop.eup %12485 }
 0x7af   :  { %v12488_v43 = vpop.eup %12487  ;;  %v3858_v61 = vmul.f32 %v12486_v10, %v12484_v37 }
 0x7b0   :  { %v3857_v7 = vmul.f32 %v12488_v43, %v16217_v27  ;;  %v12490_v12 = vpop.eup %12489  ;;  %v16233_v43 = vld [vmem:[#allocation17_spill] sm:$0xff] }
 0x7b2   :  { %v14455_v16 = vadd.f32 %v3858_v61, %v3857_v7  ;;  %v3997_v47 = vpop.f32.mrb[2].mxu0  ;;  %v4068_v54 = vpop.f32.mrb[34].mxu1  ;;  %v16234_v61 = vld [vmem:[#allocation21_spill] sm:$0xff] }
 0x7b3   :  { %v12067_v4 = vadd.f32 %v3997_v47, %v16218_v55  ;;  %v3999_v62 = vpop.f32.mrb[3].mxu0  ;;  %v4070_v20 = vpop.f32.mrb[35].mxu1  ;;  %v12083_v8 = vadd.f32 %v4068_v54, %v13518_v41 }
 0x7b4   :  { %12491 = vtanh.f32 %v14455_v16  ;;  %v12068_v25 = vadd.f32 %v3999_v62, %v16219_v3  ;;  %v12084_v63 = vadd.f32 %v4070_v20, %v16220_v22  ;;  %v4623_v20 = vld [vmem:[#allocation8 + $0xd8] sm:$0xff] }
 0x7b5   :  { %v9543_v39 = vmul.f32 -1.442695, %v12067_v4  ;;  %v4615_v4 = vld [vmem:[#allocation8 + $0x98] sm:$0xff] }
 0x7b6   :  { %v9544_v60 = vmul.f32 -1.442695, %v12068_v25  ;;  %v9545_v35 = vmul.f32 -1.442695, %v12084_v63  ;;  %v4612_v25 = vld [vmem:[#allocation8 + $0x80] sm:$0xff] }
 0x7b7   :  { %12493 = vpow2.f32 %v9543_v39  ;;  %v4620_v39 = vld [vmem:[#allocation8 + $0xc0] sm:$0xff] }
 0x7b8   :  { %12495 = vpow2.f32 %v9544_v60  ;;  %v10773_v60 = vpack.c.bf16 %v4623_v20, %v4615_v4  ;;  %v10711_v63 = vpack.c.bf16 %v4620_v39, %v4612_v25  ;;  %v4684_v4 = vld [vmem:[#allocation8 + $0x2c0] sm:$0xff]  ;;  %v4678_v25 = vld [vmem:[#allocation8 + $0x290] sm:$0xff] }
 0x7b9   :  { %12497 = vpow2.f32 %v9545_v35  ;;  %v4686_v39 = vld [vmem:[#allocation8 + $0x2d0] sm:$0xff] }
 0x7ba   :  { %12499 = vtanh.f32 %v12083_v8  ;;  %v4629_v8 = vld [vmem:[#allocation8 + $0x108] sm:$0xff] }
 0x7be   :  { %v12492_v46 = vpop.eup %12491 }
 0x7bf   :  { %v14461_v29 = vmul.f32 %v12492_v46, %v12490_v12  ;;  %v4614_v12 = vld [vmem:[#allocation8 + $0x90] sm:$0xff] }
 0x7c0   :  { %v4622_v46 = vld [vmem:[#allocation8 + $0xd0] sm:$0xff] }
 0x7c1   :  { %v12494_v13 = vpop.eup %12493  ;;  %4235 = vmatmul.mubr.f32.vlgmr.msra.gmra.mrb[30].mxu0 %v14461_v29  ;;  %4306 = vmatmul.mubr.f32.vlgmr.msra.gmra.mrb[30].mxu1 %v14461_v29  ;;  %v10775_v35 = vpack.c.bf16 %v4622_v46, %v4614_v12  ;;  %v4701_v12 = vld [vmem:[#allocation8 + $0x348] sm:$0xff]  ;;  %v4695_v46 = vld [vmem:[#allocation8 + $0x318] sm:$0xff] }
 0x7c2   :  { %v12496_v53 = vpop.eup %12495  ;;  %v4080_v40 = vadd.f32 1.0, %v12494_v13  ;;  %10644 = vmatpush1.bf16.msra.mxu0 %v16221_v28  ;;  %10676 = vmatpush1.bf16.msra.mxu1 %v16222_v26  ;;  %v4637_v13 = vld [vmem:[#allocation8 + $0x148] sm:$0xff]  ;;  %v4639_v28 = vld [vmem:[#allocation8 + $0x158] sm:$0xff]  ;;  %v4628_v26 = vld [vmem:[#allocation8 + $0x100] sm:$0xff] }
 0x7c3   :  { %v4086_v15 = vadd.f32 1.0, %v12496_v53  ;;  %10646 = vmatprep.subr.bf16.mxu0 %v16223_v58  ;;  %10678 = vmatprep.subr.bf16.mxu1 %v16224_v50  ;;  %v12498_v30 = vpop.eup %12497  ;;  %v4631_v53 = vld [vmem:[#allocation8 + $0x118] sm:$0xff] }
 0x7c4   :  { %12501 = vrcp.f32 %v4080_v40  ;;  %4473 = vmatprep.mubr.f32.mxu0 %v16112_v6  ;;  %4544 = vmatprep.mubr.f32.mxu1 %v16112_v6  ;;  %v12500_v37 = vpop.eup %12499  ;;  %v4093_v7 = vadd.f32 1.0, %v12498_v30  ;;  %v10713_v40 = vpack.c.bf16 %v4637_v13, %v4629_v8  ;;  %v10777_v58 = vpack.c.bf16 %v4639_v28, %v4631_v53  ;;  %v4644_v30 = vld [vmem:[#allocation8 + $0x180] sm:$0xff]  ;;  %v4703_v8 = vld [vmem:[#allocation8 + $0x358] sm:$0xff] }
 0x7c5   :  { %12503 = vrcp.f32 %v4086_v15  ;;  %v4636_v15 = vld [vmem:[#allocation8 + $0x140] sm:$0xff] }
 0x7c6   :  { %10648 = vmatpush1.bf16.msra.mxu0 %v16225_v34  ;;  %10680 = vmatpush1.bf16.msra.mxu1 %v16226_v17  ;;  %12505 = vrcp.f32 %v4093_v7  ;;  %v10715_v50 = vpack.c.bf16 %v4636_v15, %v4628_v26  ;;  %v4630_v34 = vld [vmem:[#allocation8 + $0x110] sm:$0xff]  ;;  %v4661_v7 = vld [vmem:[#allocation8 + $0x208] sm:$0xff]  ;;  %v4692_v13 = vld [vmem:[#allocation8 + $0x300] sm:$0xff] }
 0x7c7   :  { %10650 = vmatprep.subr.bf16.mxu0 %v16227_v45  ;;  %10682 = vmatprep.subr.bf16.mxu1 %v16228_v21  ;;  %v4638_v17 = vld [vmem:[#allocation8 + $0x150] sm:$0xff]  ;;  %v4645_v21 = vld [vmem:[#allocation8 + $0x188] sm:$0xff]  ;;  %v4700_v53 = vld [vmem:[#allocation8 + $0x340] sm:$0xff] }
 0x7c8   :  { %v10779_v45 = vpack.c.bf16 %v4638_v17, %v4630_v34  ;;  %v10731_v28 = vpack.c.bf16 %v4700_v53, %v4692_v13  ;;  %v4694_v26 = vld [vmem:[#allocation8 + $0x310] sm:$0xff]  ;;  %v4717_v34 = vld [vmem:[#allocation8 + $0x3c8] sm:$0xff]  ;;  %v4711_v17 = vld [vmem:[#allocation8 + $0x398] sm:$0xff] }
 0x7c9   :  { %v4702_v15 = vld [vmem:[#allocation8 + $0x350] sm:$0xff] }
 0x7ca   :  { %10652 = vmatpush1.bf16.msra.mxu0 %v16229_v57  ;;  %10684 = vmatpush1.bf16.msra.mxu1 %v16230_v2  ;;  %v4653_v57 = vld [vmem:[#allocation8 + $0x1c8] sm:$0xff]  ;;  %v4647_v2 = vld [vmem:[#allocation8 + $0x198] sm:$0xff]  ;;  %v4758_v13 = vld [vmem:[#allocation8 + $0x510] sm:$0xff] }
 0x7cb   :  { %10654 = vmatprep.subr.bf16.mxu0 %v16231_v19  ;;  %10686 = vmatprep.subr.bf16.mxu1 %v16232_v44  ;;  %v10717_v19 = vpack.c.bf16 %v4653_v57, %v4645_v21  ;;  %v4655_v44 = vld [vmem:[#allocation8 + $0x1d8] sm:$0xff]  ;;  %v4708_v57 = vld [vmem:[#allocation8 + $0x380] sm:$0xff]  ;;  %v4766_v53 = vld [vmem:[#allocation8 + $0x550] sm:$0xff] }
 0x7cc   :  { %v4719_v21 = vld [vmem:[#allocation8 + $0x3d8] sm:$0xff] }
 0x7ce   :  { %v12502_v10 = vpop.eup %12501  ;;  %10656 = vmatpush1.bf16.msra.mxu0 %v16233_v43  ;;  %10688 = vmatpush1.bf16.msra.mxu1 %v16234_v61  ;;  %v4646_v61 = vld [vmem:[#allocation8 + $0x190] sm:$0xff] }
 0x7cf   :  { %v12504_v24 = vpop.eup %12503  ;;  %v4097_v27 = vmul.f32 %v12502_v10, %v12500_v37  ;;  %10658 = vmatprep.subr.bf16.mxu0 %v14356_v51  ;;  %10690 = vmatprep.subr.bf16.mxu1 %v14358_v14  ;;  %v4605_v51 = vld [vmem:[#allocation8 + $0x48] sm:$0xff]  ;;  %v4599_v14 = vld [vmem:[#allocation8 + $0x18] sm:$0xff]  ;;  %v4652_v37 = vld [vmem:[#allocation8 + $0x1c0] sm:$0xff]  ;;  %v10781_v10 = vpack.c.bf16 %v4655_v44, %v4647_v2 }
 0x7d0   :  { %v4096_v47 = vmul.f32 %v12504_v24, %v14373_v32  ;;  %v12506_v32 = vpop.eup %12505  ;;  %v10719_v43 = vpack.c.bf16 %v4652_v37, %v4644_v30  ;;  %v4654_v24 = vld [vmem:[#allocation8 + $0x1d0] sm:$0xff]  ;;  %v4716_v2 = vld [vmem:[#allocation8 + $0x3c0] sm:$0xff] }
 0x7d1   :  { %v10735_v44 = vpack.c.bf16 %v4716_v2, %v4708_v57  ;;  %v4710_v30 = vld [vmem:[#allocation8 + $0x390] sm:$0xff] }
 0x7d2   :  { %v14485_v54 = vadd.f32 %v4097_v27, %v4096_v47  ;;  %10660 = vmatpush1.bf16.msra.mxu0 %v14362_v18  ;;  %10692 = vmatpush1.bf16.msra.mxu1 %v14364_v59  ;;  %v4597_v59 = vld [vmem:[#allocation8 + $0x8] sm:$0xff]  ;;  %v10783_v27 = vpack.c.bf16 %v4654_v24, %v4646_v61  ;;  %v4718_v37 = vld [vmem:[#allocation8 + $0x3d0] sm:$0xff]  ;;  %v4727_v24 = vld [vmem:[#allocation8 + $0x418] sm:$0xff] }
 0x7d3   :  { %10662 = vmatprep.subr.bf16.mxu0 %v14368_v1  ;;  %10694 = vmatprep.subr.bf16.mxu1 %v14370_v11  ;;  %v10705_v18 = vpack.c.bf16 %v4605_v51, %v4597_v59  ;;  %v4669_v47 = vld [vmem:[#allocation8 + $0x248] sm:$0xff]  ;;  %v4671_v59 = vld [vmem:[#allocation8 + $0x258] sm:$0xff]  ;;  %v4660_v51 = vld [vmem:[#allocation8 + $0x200] sm:$0xff] }
 0x7d4   :  { %12507 = vtanh.f32 %v14485_v54  ;;  %v4733_v61 = vld [vmem:[#allocation8 + $0x448] sm:$0xff]  ;;  %v4774_v57 = vld [vmem:[#allocation8 + $0x590] sm:$0xff] }
 0x7d5   :  { %v4782_v2 = vld [vmem:[#allocation8 + $0x5d0] sm:$0xff] }
 0x7d6   :  { %10664 = vmatpush1.bf16.msra.mxu0 %v14377_v42  ;;  %10696 = vmatpush1.bf16.msra.mxu1 %v14379_v5  ;;  %v4607_v42 = vld [vmem:[#allocation8 + $0x58] sm:$0xff]  ;;  %v4596_v5 = vld [vmem:[#allocation8] sm:$0xff] }
 0x7d7   :  { %10666 = vmatprep.subr.bf16.mxu0 %v14383_v52  ;;  %10698 = vmatprep.subr.bf16.mxu1 %v14385_v36  ;;  %v4604_v52 = vld [vmem:[#allocation8 + $0x40] sm:$0xff]  ;;  %v10769_v36 = vpack.c.bf16 %v4607_v42, %v4599_v14 }
 0x7d8   :  { %v4668_v14 = vld [vmem:[#allocation8 + $0x240] sm:$0xff] }
 0x7d9   :  { %v10723_v42 = vpack.c.bf16 %v4668_v14, %v4660_v51  ;;  %v4726_v51 = vld [vmem:[#allocation8 + $0x410] sm:$0xff] }
 0x7da   :  { %10668 = vmatpush1.bf16.msra.mxu0 %v14390_v31  ;;  %10700 = vmatpush1.bf16.msra.mxu1 %v14392_v56  ;;  %v10707_v31 = vpack.c.bf16 %v4604_v52, %v4596_v5  ;;  %v4598_v56 = vld [vmem:[#allocation8 + $0x10] sm:$0xff] }
 0x7db   :  { %10670 = vmatprep.subr.bf16.mxu0 %v14396_v38  ;;  %10702 = vmatprep.subr.bf16.mxu1 %v14398_v23  ;;  %v4606_v38 = vld [vmem:[#allocation8 + $0x50] sm:$0xff] }
 0x7dc   :  { %v10771_v23 = vpack.c.bf16 %v4606_v38, %v4598_v56  ;;  %v4662_v5 = vld [vmem:[#allocation8 + $0x210] sm:$0xff]  ;;  %v4685_v56 = vld [vmem:[#allocation8 + $0x2c8] sm:$0xff]  ;;  %v4679_v38 = vld [vmem:[#allocation8 + $0x298] sm:$0xff] }
 0x7dd   :  { %v4670_v52 = vld [vmem:[#allocation8 + $0x250] sm:$0xff] }
 0x7de   :  { %v12508_v1 = vpop.eup %12507  ;;  %10672 = vmatpush1.bf16.msra.mxu0 %v14402_v9  ;;  %10704 = vmatpush1.bf16.msra.mxu1 %v14404_v49  ;;  %v4613_v9 = vld [vmem:[#allocation8 + $0x88] sm:$0xff]  ;;  %v4734_v14 = vld [vmem:[#allocation8 + $0x450] sm:$0xff] }
 0x7df   :  { %v14502_v11 = vmul.f32 %v12508_v1, %v12506_v32  ;;  %10706 = vmatprep.subr.bf16.mxu0 %v10705_v18  ;;  %10770 = vmatprep.subr.bf16.mxu1 %v10769_v36  ;;  %v4621_v49 = vld [vmem:[#allocation8 + $0xc8] sm:$0xff]  ;;  %v4663_v32 = vld [vmem:[#allocation8 + $0x218] sm:$0xff]  ;;  %v10721_v1 = vpack.c.bf16 %v4669_v47, %v4661_v7  ;;  %v10787_v36 = vpack.c.bf16 %v4670_v52, %v4662_v5  ;;  %v4724_v47 = vld [vmem:[#allocation8 + $0x400] sm:$0xff] }
 0x7e0   :  { %v10709_v62 = vpack.c.bf16 %v4621_v49, %v4613_v9  ;;  %v10785_v18 = vpack.c.bf16 %v4671_v59, %v4663_v32  ;;  %v4687_v9 = vld [vmem:[#allocation8 + $0x2d8] sm:$0xff]  ;;  %v4676_v49 = vld [vmem:[#allocation8 + $0x280] sm:$0xff]  ;;  %v4749_v5 = vld [vmem:[#allocation8 + $0x4c8] sm:$0xff] }
 0x7e1   :  { %4474 = vmatmul.mubr.f32.vlgmr.msra.gmra.mrb[0].mxu0 %v14502_v11  ;;  %4545 = vmatmul.mubr.f32.vlgmr.msra.gmra.mrb[32].mxu1 %v14502_v11  ;;  %v10727_v20 = vpack.c.bf16 %v4684_v4, %v4676_v49  ;;  %v4735_v7 = vld [vmem:[#allocation8 + $0x458] sm:$0xff]  ;;  %v4732_v32 = vld [vmem:[#allocation8 + $0x440] sm:$0xff]  ;;  %v4742_v49 = vld [vmem:[#allocation8 + $0x490] sm:$0xff] }
 0x7e2   :  { %10708 = vmatpush1.bf16.msra.mxu0 %v10707_v31  ;;  %10772 = vmatpush1.bf16.msra.mxu1 %v10771_v23  ;;  %v4677_v31 = vld [vmem:[#allocation8 + $0x288] sm:$0xff]  ;;  %v10739_v59 = vpack.c.bf16 %v4732_v32, %v4724_v47  ;;  %v4743_v52 = vld [vmem:[#allocation8 + $0x498] sm:$0xff]  ;;  %v4750_v4 = vld [vmem:[#allocation8 + $0x4d0] sm:$0xff] }
 0x7e3   :  { %10710 = vmatprep.subr.bf16.mxu0 %v10709_v62  ;;  %10774 = vmatprep.subr.bf16.mxu1 %v10773_v60  ;;  %v10725_v23 = vpack.c.bf16 %v4685_v56, %v4677_v31  ;;  %v10789_v62 = vpack.c.bf16 %v4687_v9, %v4679_v38  ;;  %v10791_v60 = vpack.c.bf16 %v4686_v39, %v4678_v25  ;;  %v4751_v31 = vld [vmem:[#allocation8 + $0x4d8] sm:$0xff]  ;;  %v4740_v56 = vld [vmem:[#allocation8 + $0x480] sm:$0xff]  ;;  %v4765_v25 = vld [vmem:[#allocation8 + $0x548] sm:$0xff] }
 0x7e4   :  { %v4748_v38 = vld [vmem:[#allocation8 + $0x4c0] sm:$0xff]  ;;  %v4759_v39 = vld [vmem:[#allocation8 + $0x518] sm:$0xff]  ;;  %v4790_v47 = vld [vmem:[#allocation8 + $0x610] sm:$0xff] }
 0x7e5   :  { %v10743_v9 = vpack.c.bf16 %v4748_v38, %v4740_v56  ;;  %v4798_v32 = vld [vmem:[#allocation8 + $0x650] sm:$0xff] }
 0x7e6   :  { %10712 = vmatpush1.bf16.msra.mxu0 %v10711_v63  ;;  %10776 = vmatpush1.bf16.msra.mxu1 %v10775_v35  ;;  %v4693_v63 = vld [vmem:[#allocation8 + $0x308] sm:$0xff]  ;;  %v4806_v56 = vld [vmem:[#allocation8 + $0x690] sm:$0xff] }
 0x7e7   :  { %10714 = vmatprep.subr.bf16.mxu0 %v10713_v40  ;;  %10778 = vmatprep.subr.bf16.mxu1 %v10777_v58  ;;  %v10729_v35 = vpack.c.bf16 %v4701_v12, %v4693_v63  ;;  %v10793_v40 = vpack.c.bf16 %v4703_v8, %v4695_v46  ;;  %v10795_v58 = vpack.c.bf16 %v4702_v15, %v4694_v26  ;;  %v4767_v63 = vld [vmem:[#allocation8 + $0x558] sm:$0xff]  ;;  %v4756_v12 = vld [vmem:[#allocation8 + $0x500] sm:$0xff]  ;;  %v4781_v26 = vld [vmem:[#allocation8 + $0x5c8] sm:$0xff] }
 0x7e8   :  { %v4764_v46 = vld [vmem:[#allocation8 + $0x540] sm:$0xff]  ;;  %v4775_v15 = vld [vmem:[#allocation8 + $0x598] sm:$0xff]  ;;  %v4814_v38 = vld [vmem:[#allocation8 + $0x6d0] sm:$0xff] }
 0x7e9   :  { %v10747_v8 = vpack.c.bf16 %v4764_v46, %v4756_v12  ;;  %v4830_v46 = vld [vmem:[#allocation8 + $0x750] sm:$0xff] }
 0x7ea   :  { %10716 = vmatpush1.bf16.msra.mxu0 %v10715_v50  ;;  %10780 = vmatpush1.bf16.msra.mxu1 %v10779_v45  ;;  %v4709_v50 = vld [vmem:[#allocation8 + $0x388] sm:$0xff] }
 0x7eb   :  { %10718 = vmatprep.subr.bf16.mxu0 %v10717_v19  ;;  %10782 = vmatprep.subr.bf16.mxu1 %v10781_v10  ;;  %v10733_v45 = vpack.c.bf16 %v4717_v34, %v4709_v50  ;;  %v10797_v19 = vpack.c.bf16 %v4719_v21, %v4711_v17  ;;  %v10799_v10 = vpack.c.bf16 %v4718_v37, %v4710_v30  ;;  %v4783_v50 = vld [vmem:[#allocation8 + $0x5d8] sm:$0xff]  ;;  %v4772_v34 = vld [vmem:[#allocation8 + $0x580] sm:$0xff]  ;;  %v4797_v30 = vld [vmem:[#allocation8 + $0x648] sm:$0xff] }
 0x7ec   :  { %v4780_v17 = vld [vmem:[#allocation8 + $0x5c0] sm:$0xff]  ;;  %v4791_v37 = vld [vmem:[#allocation8 + $0x618] sm:$0xff] }
 0x7ed   :  { %v10751_v21 = vpack.c.bf16 %v4780_v17, %v4772_v34  ;;  %v4846_v34 = vld [vmem:[#allocation8 + $0x7d0] sm:$0xff] }
 0x7ee   :  { %10720 = vmatpush1.bf16.msra.mxu0 %v10719_v43  ;;  %10784 = vmatpush1.bf16.msra.mxu1 %v10783_v27  ;;  %v4725_v43 = vld [vmem:[#allocation8 + $0x408] sm:$0xff] }
 0x7ef   :  { %10722 = vmatprep.subr.bf16.mxu0 %v10721_v1  ;;  %10786 = vmatprep.subr.bf16.mxu1 %v10785_v18  ;;  %v10737_v27 = vpack.c.bf16 %v4733_v61, %v4725_v43  ;;  %v10801_v1 = vpack.c.bf16 %v4735_v7, %v4727_v24  ;;  %v10803_v18 = vpack.c.bf16 %v4734_v14, %v4726_v51  ;;  %v4799_v43 = vld [vmem:[#allocation8 + $0x658] sm:$0xff]  ;;  %v4788_v61 = vld [vmem:[#allocation8 + $0x600] sm:$0xff]  ;;  %v4813_v51 = vld [vmem:[#allocation8 + $0x6c8] sm:$0xff] }
 0x7f0   :  { %v4796_v24 = vld [vmem:[#allocation8 + $0x640] sm:$0xff]  ;;  %v4807_v14 = vld [vmem:[#allocation8 + $0x698] sm:$0xff] }
 0x7f1   :  { %v10755_v7 = vpack.c.bf16 %v4796_v24, %v4788_v61 }
 0x7f2   :  { %10724 = vmatpush1.bf16.msra.mxu0 %v10723_v42  ;;  %10788 = vmatpush1.bf16.msra.mxu1 %v10787_v36  ;;  %v4741_v42 = vld [vmem:[#allocation8 + $0x488] sm:$0xff] }
 0x7f3   :  { %10726 = vmatprep.subr.bf16.mxu0 %v10725_v23  ;;  %10790 = vmatprep.subr.bf16.mxu1 %v10789_v62  ;;  %v10741_v36 = vpack.c.bf16 %v4749_v5, %v4741_v42  ;;  %v10805_v23 = vpack.c.bf16 %v4751_v31, %v4743_v52  ;;  %v10807_v62 = vpack.c.bf16 %v4750_v4, %v4742_v49  ;;  %v4815_v42 = vld [vmem:[#allocation8 + $0x6d8] sm:$0xff]  ;;  %v4804_v5 = vld [vmem:[#allocation8 + $0x680] sm:$0xff]  ;;  %v4829_v49 = vld [vmem:[#allocation8 + $0x748] sm:$0xff] }
 0x7f4   :  { %v4812_v52 = vld [vmem:[#allocation8 + $0x6c0] sm:$0xff]  ;;  %v4823_v4 = vld [vmem:[#allocation8 + $0x718] sm:$0xff] }
 0x7f5   :  { %v10759_v31 = vpack.c.bf16 %v4812_v52, %v4804_v5 }
 0x7f6   :  { %10728 = vmatpush1.bf16.msra.mxu0 %v10727_v20  ;;  %10792 = vmatpush1.bf16.msra.mxu1 %v10791_v60  ;;  %v4757_v20 = vld [vmem:[#allocation8 + $0x508] sm:$0xff] }
 0x7f7   :  { %10730 = vmatprep.subr.bf16.mxu0 %v10729_v35  ;;  %10794 = vmatprep.subr.bf16.mxu1 %v10793_v40  ;;  %v10745_v60 = vpack.c.bf16 %v4765_v25, %v4757_v20  ;;  %v10809_v35 = vpack.c.bf16 %v4767_v63, %v4759_v39  ;;  %v10811_v40 = vpack.c.bf16 %v4766_v53, %v4758_v13  ;;  %v4820_v39 = vld [vmem:[#allocation8 + $0x700] sm:$0xff]  ;;  %v4822_v63 = vld [vmem:[#allocation8 + $0x710] sm:$0xff] }
 0x7f8   :  { %v10827_v13 = vpack.c.bf16 %v4830_v46, %v4822_v63 }
 0x7fa   :  { %10732 = vmatpush1.bf16.msra.mxu0 %v10731_v28  ;;  %10796 = vmatpush1.bf16.msra.mxu1 %v10795_v58  ;;  %v4773_v28 = vld [vmem:[#allocation8 + $0x588] sm:$0xff] }
 0x7fb   :  { %10734 = vmatprep.subr.bf16.mxu0 %v10733_v45  ;;  %10798 = vmatprep.subr.bf16.mxu1 %v10797_v19  ;;  %v10749_v58 = vpack.c.bf16 %v4781_v26, %v4773_v28  ;;  %v10813_v45 = vpack.c.bf16 %v4783_v50, %v4775_v15  ;;  %v10815_v19 = vpack.c.bf16 %v4782_v2, %v4774_v57  ;;  %v4847_v28 = vld [vmem:[#allocation8 + $0x7d8] sm:$0xff]  ;;  %v4836_v26 = vld [vmem:[#allocation8 + $0x780] sm:$0xff]  ;;  %v4838_v50 = vld [vmem:[#allocation8 + $0x790] sm:$0xff] }
 0x7fc   :  { %v4609_v57 = vld [vmem:[#allocation8 + $0x68] sm:$0xff]  ;;  %v4603_v2 = vld [vmem:[#allocation8 + $0x38] sm:$0xff] }
 0x7fe   :  { %10736 = vmatpush1.bf16.msra.mxu0 %v10735_v44  ;;  %10800 = vmatpush1.bf16.msra.mxu1 %v10799_v10  ;;  %v4789_v44 = vld [vmem:[#allocation8 + $0x608] sm:$0xff] }
 0x7ff   :  { %10738 = vmatprep.subr.bf16.mxu0 %v10737_v27  ;;  %10802 = vmatprep.subr.bf16.mxu1 %v10801_v1  ;;  %v10753_v10 = vpack.c.bf16 %v4797_v30, %v4789_v44  ;;  %v10817_v27 = vpack.c.bf16 %v4799_v43, %v4791_v37  ;;  %v10819_v1 = vpack.c.bf16 %v4798_v32, %v4790_v47  ;;  %v4611_v44 = vld [vmem:[#allocation8 + $0x78] sm:$0xff]  ;;  %v16235_v43 = vld [vmem:[#allocation25_spill] sm:$0xff] }
 0x800   :  { %v10897_v30 = vpack.c.bf16 %v4611_v44, %v4603_v2 }
 0x802   :  { %10740 = vmatpush1.bf16.msra.mxu0 %v10739_v59  ;;  %10804 = vmatpush1.bf16.msra.mxu1 %v10803_v18  ;;  %v4805_v59 = vld [vmem:[#allocation8 + $0x688] sm:$0xff] }
 0x803   :  { %10742 = vmatprep.subr.bf16.mxu0 %v10741_v36  ;;  %10806 = vmatprep.subr.bf16.mxu1 %v10805_v23  ;;  %v10757_v18 = vpack.c.bf16 %v4813_v51, %v4805_v59  ;;  %v10821_v36 = vpack.c.bf16 %v4815_v42, %v4807_v14  ;;  %v4821_v23 = vld [vmem:[#allocation8 + $0x708] sm:$0xff] }
 0x804   :  { %v10761_v20 = vpack.c.bf16 %v4829_v49, %v4821_v23 }
 0x806   :  { %10744 = vmatpush1.bf16.msra.mxu0 %v10743_v9  ;;  %10808 = vmatpush1.bf16.msra.mxu1 %v10807_v62  ;;  %v10823_v9 = vpack.c.bf16 %v4814_v38, %v4806_v56  ;;  %v4831_v62 = vld [vmem:[#allocation8 + $0x758] sm:$0xff] }
 0x807   :  { %10746 = vmatprep.subr.bf16.mxu0 %v10745_v60  ;;  %10810 = vmatprep.subr.bf16.mxu1 %v10809_v35  ;;  %v10825_v25 = vpack.c.bf16 %v4831_v62, %v4823_v4  ;;  %v4828_v60 = vld [vmem:[#allocation8 + $0x740] sm:$0xff]  ;;  %v4837_v35 = vld [vmem:[#allocation8 + $0x788] sm:$0xff] }
 0x808   :  { %v10763_v12 = vpack.c.bf16 %v4828_v60, %v4820_v39 }
 0x80a   :  { %10748 = vmatpush1.bf16.msra.mxu0 %v10747_v8  ;;  %10812 = vmatpush1.bf16.msra.mxu1 %v10811_v40  ;;  %v4845_v8 = vld [vmem:[#allocation8 + $0x7c8] sm:$0xff]  ;;  %v4839_v40 = vld [vmem:[#allocation8 + $0x798] sm:$0xff] }
 0x80b   :  { %10750 = vmatprep.subr.bf16.mxu0 %v10749_v58  ;;  %10814 = vmatprep.subr.bf16.mxu1 %v10813_v45  ;;  %v10765_v53 = vpack.c.bf16 %v4845_v8, %v4837_v35  ;;  %v10829_v15 = vpack.c.bf16 %v4847_v28, %v4839_v40  ;;  %v4844_v58 = vld [vmem:[#allocation8 + $0x7c0] sm:$0xff]  ;;  %v10831_v45 = vpack.c.bf16 %v4846_v34, %v4838_v50 }
 0x80c   :  { %v10767_v17 = vpack.c.bf16 %v4844_v58, %v4836_v26 }
 0x80e   :  { %10752 = vmatpush1.bf16.msra.mxu0 %v10751_v21  ;;  %10816 = vmatpush1.bf16.msra.mxu1 %v10815_v19  ;;  %v4601_v21 = vld [vmem:[#allocation8 + $0x28] sm:$0xff] }
 0x80f   :  { %10754 = vmatprep.subr.bf16.mxu0 %v10753_v10  ;;  %10818 = vmatprep.subr.bf16.mxu1 %v10817_v27  ;;  %v10833_v19 = vpack.c.bf16 %v4609_v57, %v4601_v21  ;;  %v4602_v21 = vld [vmem:[#allocation8 + $0x30] sm:$0xff] }
 0x810   :  { %v4610_v57 = vld [vmem:[#allocation8 + $0x70] sm:$0xff] }
 0x812   :  { %10756 = vmatpush1.bf16.msra.mxu0 %v10755_v7  ;;  %10820 = vmatpush1.bf16.msra.mxu1 %v10819_v1  ;;  %v16236_v7 = vld [vmem:[#allocation26_spill] sm:$0xff] }
 0x813   :  { %10758 = vmatprep.subr.bf16.mxu0 %v10757_v18  ;;  %10822 = vmatprep.subr.bf16.mxu1 %v10821_v36 }
 0x816   :  { %10760 = vmatpush1.bf16.msra.mxu0 %v10759_v31  ;;  %10824 = vmatpush1.bf16.msra.mxu1 %v10823_v9 }
 0x817   :  { %10762 = vmatprep.subr.bf16.mxu0 %v10761_v20  ;;  %10826 = vmatprep.subr.bf16.mxu1 %v10825_v25 }
 0x81a   :  { %10764 = vmatpush1.bf16.msra.mxu0 %v10763_v12  ;;  %10828 = vmatpush1.bf16.msra.mxu1 %v10827_v13 }
 0x81b   :  { %10766 = vmatprep.subr.bf16.mxu0 %v10765_v53  ;;  %10830 = vmatprep.subr.bf16.mxu1 %v10829_v15 }
 0x81e   :  { %10768 = vmatpush1.bf16.msra.mxu0 %v10767_v17  ;;  %10832 = vmatpush1.bf16.msra.mxu1 %v10831_v45  ;;  %v4608_v45 = vld [vmem:[#allocation8 + $0x60] sm:$0xff] }
 0x81f   :  { %10834 = vmatprep.subr.bf16.mxu0 %v10833_v19  ;;  %10898 = vmatprep.subr.bf16.mxu1 %v10897_v30  ;;  %v4617_v19 = vld [vmem:[#allocation8 + $0xa8] sm:$0xff] }
 0x820   :  { %v4625_v30 = vld [vmem:[#allocation8 + $0xe8] sm:$0xff] }
 0x894   :  { %v4236_v37 = vpop.f32.mrb[30].mxu0  ;;  %v4307_v10 = vpop.f32.mrb[30].mxu1 }
 0x895   :  { %v4312_v61 = vadd.f32 %v4236_v37, %v16235_v43  ;;  %v4238_v24 = vpop.f32.mrb[31].mxu0  ;;  %v4309_v27 = vpop.f32.mrb[31].mxu1  ;;  %v12063_v14 = vadd.f32 %v4307_v10, %v16216_v48  ;;  %v4619_v37 = vld [vmem:[#allocation8 + $0xb8] sm:$0xff] }
 0x896   :  { %v4313_v47 = vadd.f32 %v4238_v24, %v16236_v7  ;;  %v12064_v59 = vadd.f32 %v4309_v27, %v16132_v33  ;;  %v4627_v10 = vld [vmem:[#allocation8 + $0xf8] sm:$0xff]  ;;  %v10899_v24 = vpack.c.bf16 %v4610_v57, %v4602_v21  ;;  %v4616_v27 = vld [vmem:[#allocation8 + $0xa0] sm:$0xff]  ;;  %v4689_v21 = vld [vmem:[#allocation8 + $0x2e8] sm:$0xff] }
 0x897   :  { %v9546_v32 = vmul.f32 -1.442695, %v4312_v61  ;;  %v4624_v7 = vld [vmem:[#allocation8 + $0xe0] sm:$0xff]  ;;  %v4683_v57 = vld [vmem:[#allocation8 + $0x2b8] sm:$0xff] }
 0x898   :  { %v9547_v1 = vmul.f32 -1.442695, %v4313_v47  ;;  %v9548_v51 = vmul.f32 -1.442695, %v12064_v59  ;;  %v4626_v47 = vld [vmem:[#allocation8 + $0xf0] sm:$0xff]  ;;  %v4633_v59 = vld [vmem:[#allocation8 + $0x128] sm:$0xff] }
 0x899   :  { %12509 = vpow2.f32 %v9546_v32  ;;  %v10837_v32 = vpack.c.bf16 %v4625_v30, %v4617_v19  ;;  %v4680_v30 = vld [vmem:[#allocation8 + $0x2a0] sm:$0xff] }
 0x89a   :  { %12511 = vpow2.f32 %v9547_v1  ;;  %v10901_v1 = vpack.c.bf16 %v4627_v10, %v4619_v37  ;;  %v16242_v37 = vld [vmem:[#allocation18_spill] sm:$0xff]  ;;  %v4688_v10 = vld [vmem:[#allocation8 + $0x2e0] sm:$0xff] }
 0x89b   :  { %12513 = vpow2.f32 %v9548_v51  ;;  %v16237_v51 = vld [vmem:[#allocation31_spill] sm:$0xff] }
 0x89c   :  { %12515 = vtanh.f32 %v12063_v14  ;;  %v4641_v14 = vld [vmem:[#allocation8 + $0x168] sm:$0xff] }
 0x8a3   :  { %v12510_v18 = vpop.eup %12509 }
 0x8a4   :  { %v12512_v42 = vpop.eup %12511  ;;  %v4319_v5 = vadd.f32 1.0, %v12510_v18  ;;  %v4635_v18 = vld [vmem:[#allocation8 + $0x138] sm:$0xff] }
 0x8a5   :  { %v4325_v52 = vadd.f32 1.0, %v12512_v42  ;;  %v12514_v36 = vpop.eup %12513  ;;  %v4643_v42 = vld [vmem:[#allocation8 + $0x178] sm:$0xff] }
 0x8a6   :  { %12517 = vrcp.f32 %v4319_v5  ;;  %v12516_v31 = vpop.eup %12515  ;;  %v4332_v9 = vadd.f32 1.0, %v12514_v36  ;;  %v10839_v5 = vpack.c.bf16 %v4624_v7, %v4616_v27  ;;  %v4632_v36 = vld [vmem:[#allocation8 + $0x120] sm:$0xff] }
 0x8a7   :  { %12519 = vrcp.f32 %v4325_v52 }
 0x8a8   :  { %12521 = vrcp.f32 %v4332_v9  ;;  %v10905_v9 = vpack.c.bf16 %v4643_v42, %v4635_v18  ;;  %v4696_v42 = vld [vmem:[#allocation8 + $0x320] sm:$0xff] }
 0x8b0   :  { %v12518_v56 = vpop.eup %12517 }
 0x8b1   :  { %v12520_v38 = vpop.eup %12519  ;;  %v4336_v23 = vmul.f32 %v12518_v56, %v12516_v31  ;;  %v4640_v31 = vld [vmem:[#allocation8 + $0x160] sm:$0xff]  ;;  %v4634_v56 = vld [vmem:[#allocation8 + $0x130] sm:$0xff] }
 0x8b2   :  { %v4335_v49 = vmul.f32 %v12520_v38, %v14455_v16  ;;  %v12522_v46 = vpop.eup %12521  ;;  %v4642_v38 = vld [vmem:[#allocation8 + $0x170] sm:$0xff] }
 0x8b4   :  { %v4337_v33 = vadd.f32 %v4336_v23, %v4335_v49  ;;  %v4475_v4 = vpop.f32.mrb[0].mxu0  ;;  %v4546_v62 = vpop.f32.mrb[32].mxu1  ;;  %v10841_v23 = vpack.c.bf16 %v4641_v14, %v4633_v59  ;;  %v4649_v49 = vld [vmem:[#allocation8 + $0x1a8] sm:$0xff]  ;;  %v4707_v59 = vld [vmem:[#allocation8 + $0x378] sm:$0xff]  ;;  %v10855_v14 = vpack.c.bf16 %v4688_v10, %v4680_v30  ;;  %v4744_v10 = vld [vmem:[#allocation8 + $0x4a0] sm:$0xff] }
 0x8b5   :  { %v12065_v48 = vadd.f32 %v4475_v4, %v16218_v55  ;;  %v4477_v20 = vpop.f32.mrb[1].mxu0  ;;  %v4548_v25 = vpop.f32.mrb[33].mxu1  ;;  %v12081_v8 = vadd.f32 %v4546_v62, %v13518_v41  ;;  %v4600_v41 = vld [vmem:[#allocation8 + $0x20] sm:$0xff]  ;;  %v4657_v4 = vld [vmem:[#allocation8 + $0x1e8] sm:$0xff]  ;;  %v4651_v62 = vld [vmem:[#allocation8 + $0x1b8] sm:$0xff] }
 0x8b6   :  { %12523 = vtanh.f32 %v4337_v33  ;;  %v12066_v39 = vadd.f32 %v4477_v20, %v16219_v3  ;;  %v12082_v12 = vadd.f32 %v4548_v25, %v16220_v22  ;;  %v10835_v61 = vpack.c.bf16 %v4608_v45, %v4600_v41  ;;  %v16238_v33 = vld [vmem:[#allocation37_spill] sm:$0xff]  ;;  %v4681_v41 = vld [vmem:[#allocation8 + $0x2a8] sm:$0xff]  ;;  %v16241_v45 = vld [vmem:[#allocation38_spill] sm:$0xff] }
 0x8b7   :  { %v9549_v60 = vmul.f32 -1.442695, %v12065_v48  ;;  %v4659_v48 = vld [vmem:[#allocation8 + $0x1f8] sm:$0xff]  ;;  %v10843_v20 = vpack.c.bf16 %v4640_v31, %v4632_v36  ;;  %v10907_v25 = vpack.c.bf16 %v4642_v38, %v4634_v56  ;;  %v10853_v27 = vpack.c.bf16 %v4689_v21, %v4681_v41  ;;  %v4698_v36 = vld [vmem:[#allocation8 + $0x330] sm:$0xff] }
 0x8b8   :  { %v9550_v63 = vmul.f32 -1.442695, %v12066_v39  ;;  %v9551_v16 = vmul.f32 -1.442695, %v12082_v12  ;;  %v4648_v39 = vld [vmem:[#allocation8 + $0x1a0] sm:$0xff]  ;;  %v4658_v12 = vld [vmem:[#allocation8 + $0x1f0] sm:$0xff] }
 0x8b9   :  { %12525 = vpow2.f32 %v9549_v60  ;;  %v4656_v60 = vld [vmem:[#allocation8 + $0x1e0] sm:$0xff]  ;;  %v4706_v31 = vld [vmem:[#allocation8 + $0x370] sm:$0xff] }
 0x8ba   :  { %12527 = vpow2.f32 %v9550_v63  ;;  %v4650_v63 = vld [vmem:[#allocation8 + $0x1b0] sm:$0xff] }
 0x8bb   :  { %12529 = vpow2.f32 %v9551_v16  ;;  %v4665_v16 = vld [vmem:[#allocation8 + $0x228] sm:$0xff] }
 0x8bc   :  { %12531 = vtanh.f32 %v12081_v8  ;;  %v16239_v8 = vld [vmem:[#allocation16_spill] sm:$0xff] }
 0x8c0   :  { %v12524_v35 = vpop.eup %12523 }
 0x8c1   :  { %v14515_v13 = vmul.f32 %v12524_v35, %v12522_v46  ;;  %v10845_v46 = vpack.c.bf16 %v4657_v4, %v4649_v49  ;;  %v10909_v35 = vpack.c.bf16 %v4659_v48, %v4651_v62  ;;  %v4721_v49 = vld [vmem:[#allocation8 + $0x3e8] sm:$0xff]  ;;  %v4715_v4 = vld [vmem:[#allocation8 + $0x3b8] sm:$0xff] }
 0x8c2   :  { %v4723_v62 = vld [vmem:[#allocation8 + $0x3f8] sm:$0xff] }
 0x8c3   :  { %v12526_v53 = vpop.eup %12525 }
 0x8c4   :  { %v12528_v55 = vpop.eup %12527  ;;  %v4558_v40 = vadd.f32 1.0, %v12526_v53  ;;  %v4673_v53 = vld [vmem:[#allocation8 + $0x268] sm:$0xff] }
 0x8c5   :  { %v4564_v28 = vadd.f32 1.0, %v12528_v55  ;;  %v12530_v3 = vpop.eup %12529  ;;  %v4667_v55 = vld [vmem:[#allocation8 + $0x238] sm:$0xff] }
 0x8c6   :  { %12533 = vrcp.f32 %v4558_v40  ;;  %v12532_v26 = vpop.eup %12531  ;;  %v4571_v50 = vadd.f32 1.0, %v12530_v3  ;;  %v4675_v40 = vld [vmem:[#allocation8 + $0x278] sm:$0xff]  ;;  %v10911_v3 = vpack.c.bf16 %v4658_v12, %v4650_v63  ;;  %v4714_v63 = vld [vmem:[#allocation8 + $0x3b0] sm:$0xff] }
 0x8c7   :  { %12535 = vrcp.f32 %v4564_v28  ;;  %v10847_v28 = vpack.c.bf16 %v4656_v60, %v4648_v39  ;;  %v16246_v39 = vld [vmem:[#allocation50_spill] sm:$0xff]  ;;  %v4720_v60 = vld [vmem:[#allocation8 + $0x3e0] sm:$0xff]  ;;  %v4722_v12 = vld [vmem:[#allocation8 + $0x3f0] sm:$0xff] }
 0x8c8   :  { %12537 = vrcp.f32 %v4571_v50  ;;  %v4674_v50 = vld [vmem:[#allocation8 + $0x270] sm:$0xff] }
 0x8d0   :  { %v12534_v15 = vpop.eup %12533 }
 0x8d1   :  { %v12536_v58 = vpop.eup %12535  ;;  %v4575_v22 = vmul.f32 %v12534_v15, %v12532_v26  ;;  %v4664_v26 = vld [vmem:[#allocation8 + $0x220] sm:$0xff]  ;;  %v16240_v15 = vld [vmem:[#allocation20_spill] sm:$0xff] }
 0x8d2   :  { %v4574_v34 = vmul.f32 %v12536_v58, %v14485_v54  ;;  %v12538_v2 = vpop.eup %12537  ;;  %v4618_v54 = vld [vmem:[#allocation8 + $0xb0] sm:$0xff]  ;;  %v4672_v58 = vld [vmem:[#allocation8 + $0x260] sm:$0xff] }
 0x8d3   :  { %v10903_v52 = vpack.c.bf16 %v4626_v47, %v4618_v54  ;;  %v10851_v19 = vpack.c.bf16 %v4672_v58, %v4664_v26  ;;  %v4697_v54 = vld [vmem:[#allocation8 + $0x328] sm:$0xff]  ;;  %v16243_v47 = vld [vmem:[#allocation19_spill] sm:$0xff] }
 0x8d4   :  { %v4576_v17 = vadd.f32 %v4575_v22, %v4574_v34  ;;  %v4666_v22 = vld [vmem:[#allocation8 + $0x230] sm:$0xff]  ;;  %v10849_v34 = vpack.c.bf16 %v4673_v53, %v4665_v16  ;;  %v4729_v16 = vld [vmem:[#allocation8 + $0x428] sm:$0xff]  ;;  %v4728_v26 = vld [vmem:[#allocation8 + $0x420] sm:$0xff] }
 0x8d5   :  { %v4737_v53 = vld [vmem:[#allocation8 + $0x468] sm:$0xff]  ;;  %v4736_v58 = vld [vmem:[#allocation8 + $0x460] sm:$0xff] }
 0x8d6   :  { %12539 = vtanh.f32 %v4576_v17  ;;  %v10913_v17 = vpack.c.bf16 %v4675_v40, %v4667_v55  ;;  %v4731_v55 = vld [vmem:[#allocation8 + $0x438] sm:$0xff]  ;;  %v10865_v41 = vpack.c.bf16 %v4737_v53, %v4729_v16  ;;  %v4793_v16 = vld [vmem:[#allocation8 + $0x628] sm:$0xff] }
 0x8d7   :  { %v4739_v40 = vld [vmem:[#allocation8 + $0x478] sm:$0xff]  ;;  %v4801_v53 = vld [vmem:[#allocation8 + $0x668] sm:$0xff] }
 0x8d8   :  { %v10929_v21 = vpack.c.bf16 %v4739_v40, %v4731_v55  ;;  %v4795_v55 = vld [vmem:[#allocation8 + $0x638] sm:$0xff] }
 0x8d9   :  { %v4803_v40 = vld [vmem:[#allocation8 + $0x678] sm:$0xff] }
 0x8e0   :  { %v12540_v44 = vpop.eup %12539 }
 0x8e1   :  { %v14518_v43 = vmul.f32 %v12540_v44, %v12538_v2  ;;  %v4691_v2 = vld [vmem:[#allocation8 + $0x2f8] sm:$0xff]  ;;  %v10915_v44 = vpack.c.bf16 %v4674_v50, %v4666_v22  ;;  %v16247_v22 = vld [vmem:[#allocation33_spill] sm:$0xff] }
 0x8e2   :  { %v10917_v7 = vpack.c.bf16 %v4691_v2, %v4683_v57  ;;  %v4730_v50 = vld [vmem:[#allocation8 + $0x430] sm:$0xff]  ;;  %v4753_v57 = vld [vmem:[#allocation8 + $0x4e8] sm:$0xff]  ;;  %v4747_v2 = vld [vmem:[#allocation8 + $0x4b8] sm:$0xff] }
 0x8e3   :  { %4958 = vmatprep.mubr.f32.mxu0 %v14518_v43  ;;  %5071 = vmatprep.mubr.f32.mxu1 %v14518_v43 }
 0x8e4   :  { %4959 = vmatmul.mubr.f32.vlgmr.msra.gmra.mrb[32].mxu0 %v16237_v51  ;;  %5072 = vmatmul.mubr.f32.vlgmr.msra.gmra.mrb[48].mxu1 %v16237_v51 }
 0x8e5   :  { %10836 = vmatpush1.bf16.msra.mxu0 %v10835_v61  ;;  %10900 = vmatpush1.bf16.msra.mxu1 %v10899_v24  ;;  %v4682_v61 = vld [vmem:[#allocation8 + $0x2b0] sm:$0xff] }
 0x8e6   :  { %4964 = vmatprep.mubr.f32.mxu0 %v14502_v11  ;;  %5077 = vmatprep.mubr.f32.mxu1 %v14502_v11  ;;  %v4690_v24 = vld [vmem:[#allocation8 + $0x2f0] sm:$0xff] }
 0x8e7   :  { %10838 = vmatprep.subr.bf16.mxu0 %v10837_v32  ;;  %10902 = vmatprep.subr.bf16.mxu1 %v10901_v1  ;;  %v4705_v32 = vld [vmem:[#allocation8 + $0x368] sm:$0xff]  ;;  %v4699_v1 = vld [vmem:[#allocation8 + $0x338] sm:$0xff]  ;;  %v10919_v18 = vpack.c.bf16 %v4690_v24, %v4682_v61  ;;  %v4752_v61 = vld [vmem:[#allocation8 + $0x4e0] sm:$0xff] }
 0x8e8   :  { %4965 = vmatmul.mubr.f32.gmra.mrb[34].mxu0 %v16238_v33  ;;  %5078 = vmatmul.mubr.f32.gmra.mrb[50].mxu1 %v16238_v33  ;;  %v10857_v56 = vpack.c.bf16 %v4705_v32, %v4697_v54  ;;  %v10921_v38 = vpack.c.bf16 %v4707_v59, %v4699_v1  ;;  %v4754_v54 = vld [vmem:[#allocation8 + $0x4f0] sm:$0xff]  ;;  %v4761_v32 = vld [vmem:[#allocation8 + $0x528] sm:$0xff]  ;;  %v4763_v59 = vld [vmem:[#allocation8 + $0x538] sm:$0xff] }
 0x8e9   :  { %10840 = vmatpush1.bf16.msra.mxu0 %v10839_v5  ;;  %10904 = vmatpush1.bf16.msra.mxu1 %v10903_v52  ;;  %v16244_v5 = vld [vmem:[#allocation28_spill] sm:$0xff]  ;;  %v4704_v52 = vld [vmem:[#allocation8 + $0x360] sm:$0xff] }
 0x8ea   :  { %4970 = vmatprep.mubr.f32.mxu0 %v14410_v0  ;;  %5083 = vmatprep.mubr.f32.mxu1 %v14410_v0  ;;  %v10859_v48 = vpack.c.bf16 %v4704_v52, %v4696_v42  ;;  %v4769_v1 = vld [vmem:[#allocation8 + $0x568] sm:$0xff]  ;;  %v4760_v52 = vld [vmem:[#allocation8 + $0x520] sm:$0xff] }
 0x8eb   :  { %10842 = vmatprep.subr.bf16.mxu0 %v10841_v23  ;;  %10906 = vmatprep.subr.bf16.mxu1 %v10905_v9  ;;  %v4713_v23 = vld [vmem:[#allocation8 + $0x3a8] sm:$0xff]  ;;  %v16245_v9 = vld [vmem:[#allocation39_spill] sm:$0xff] }
 0x8ec   :  { %4971 = vmatmul.mubr.f32.gmra.mrb[36].mxu0 %v16239_v8  ;;  %5084 = vmatmul.mubr.f32.gmra.mrb[52].mxu1 %v16239_v8 }
 0x8ed   :  { %10844 = vmatpush1.bf16.msra.mxu0 %v10843_v20  ;;  %10908 = vmatpush1.bf16.msra.mxu1 %v10907_v25  ;;  %v10923_v20 = vpack.c.bf16 %v4706_v31, %v4698_v36  ;;  %v4712_v25 = vld [vmem:[#allocation8 + $0x3a0] sm:$0xff]  ;;  %v10873_v31 = vpack.c.bf16 %v4769_v1, %v4761_v32  ;;  %v4825_v32 = vld [vmem:[#allocation8 + $0x728] sm:$0xff] }
 0x8ee   :  { %4976 = vmatprep.mubr.f32.mxu0 %v16240_v15  ;;  %5089 = vmatprep.mubr.f32.mxu1 %v16240_v15  ;;  %v4768_v36 = vld [vmem:[#allocation8 + $0x560] sm:$0xff]  ;;  %v4833_v1 = vld [vmem:[#allocation8 + $0x768] sm:$0xff] }
 0x8ef   :  { %10846 = vmatprep.subr.bf16.mxu0 %v10845_v46  ;;  %10910 = vmatprep.subr.bf16.mxu1 %v10909_v35  ;;  %v10861_v46 = vpack.c.bf16 %v4721_v49, %v4713_v23  ;;  %v10925_v35 = vpack.c.bf16 %v4723_v62, %v4715_v4  ;;  %v4777_v23 = vld [vmem:[#allocation8 + $0x5a8] sm:$0xff]  ;;  %v4779_v4 = vld [vmem:[#allocation8 + $0x5b8] sm:$0xff] }
 0x8f0   :  { %4977 = vmatmul.mubr.f32.gmra.mrb[38].mxu0 %v16241_v45  ;;  %5090 = vmatmul.mubr.f32.gmra.mrb[54].mxu1 %v16241_v45  ;;  %v4785_v49 = vld [vmem:[#allocation8 + $0x5e8] sm:$0xff]  ;;  %v4787_v62 = vld [vmem:[#allocation8 + $0x5f8] sm:$0xff] }
 0x8f1   :  { %10848 = vmatpush1.bf16.msra.mxu0 %v10847_v28  ;;  %10912 = vmatpush1.bf16.msra.mxu1 %v10911_v3  ;;  %v10863_v28 = vpack.c.bf16 %v4720_v60, %v4712_v25  ;;  %v10927_v3 = vpack.c.bf16 %v4722_v12, %v4714_v63  ;;  %v4776_v25 = vld [vmem:[#allocation8 + $0x5a0] sm:$0xff]  ;;  %v10877_v63 = vpack.c.bf16 %v4785_v49, %v4777_v23  ;;  %v4841_v23 = vld [vmem:[#allocation8 + $0x7a8] sm:$0xff] }
 0x8f2   :  { %4982 = vmatprep.mubr.f32.mxu0 %v16242_v37  ;;  %5095 = vmatprep.mubr.f32.mxu1 %v16242_v37  ;;  %v4784_v60 = vld [vmem:[#allocation8 + $0x5e0] sm:$0xff]  ;;  %v10941_v12 = vpack.c.bf16 %v4787_v62, %v4779_v4  ;;  %v4849_v49 = vld [vmem:[#allocation8 + $0x7e8] sm:$0xff]  ;;  %v4843_v4 = vld [vmem:[#allocation8 + $0x7b8] sm:$0xff] }
 0x8f3   :  { %10850 = vmatprep.subr.bf16.mxu0 %v10849_v34  ;;  %10914 = vmatprep.subr.bf16.mxu1 %v10913_v17  ;;  %v4738_v34 = vld [vmem:[#allocation8 + $0x470] sm:$0xff]  ;;  %v4745_v17 = vld [vmem:[#allocation8 + $0x4a8] sm:$0xff]  ;;  %v4851_v62 = vld [vmem:[#allocation8 + $0x7f8] sm:$0xff] }
 0x8f4   :  { %4983 = vmatmul.mubr.f32.gmra.mrb[40].mxu0 %v16243_v47  ;;  %5096 = vmatmul.mubr.f32.gmra.mrb[56].mxu1 %v16243_v47  ;;  %v10931_v30 = vpack.c.bf16 %v4738_v34, %v4730_v50  ;;  %v10869_v24 = vpack.c.bf16 %v4753_v57, %v4745_v17  ;;  %v10881_v50 = vpack.c.bf16 %v4801_v53, %v4793_v16  ;;  %v4794_v17 = vld [vmem:[#allocation8 + $0x630] sm:$0xff]  ;;  %v4817_v57 = vld [vmem:[#allocation8 + $0x6e8] sm:$0xff] }
 0x8f5   :  { %10852 = vmatpush1.bf16.msra.mxu0 %v10851_v19  ;;  %10916 = vmatpush1.bf16.msra.mxu1 %v10915_v44  ;;  %v4755_v19 = vld [vmem:[#allocation8 + $0x4f8] sm:$0xff]  ;;  %v10867_v44 = vpack.c.bf16 %v4736_v58, %v4728_v26  ;;  %v4792_v26 = vld [vmem:[#allocation8 + $0x620] sm:$0xff]  ;;  %v10945_v34 = vpack.c.bf16 %v4803_v40, %v4795_v55  ;;  %v5415_v16 = vld [vmem:[#allocation9 + $0x8] sm:$0xff] }
 0x8f6   :  { %4988 = vmatprep.mubr.f32.mxu0 %v16244_v5  ;;  %5101 = vmatprep.mubr.f32.mxu1 %v16244_v5  ;;  %v4800_v58 = vld [vmem:[#allocation8 + $0x660] sm:$0xff]  ;;  %v5419_v53 = vld [vmem:[#allocation9 + $0x28] sm:$0xff]  ;;  %v5417_v55 = vld [vmem:[#allocation9 + $0x18] sm:$0xff] }
 0x8f7   :  { %10854 = vmatprep.subr.bf16.mxu0 %v10853_v27  ;;  %10918 = vmatprep.subr.bf16.mxu1 %v10917_v7  ;;  %v10933_v27 = vpack.c.bf16 %v4755_v19, %v4747_v2  ;;  %v4746_v7 = vld [vmem:[#allocation8 + $0x4b0] sm:$0xff]  ;;  %v4811_v2 = vld [vmem:[#allocation8 + $0x6b8] sm:$0xff] }
 0x8f8   :  { %4989 = vmatmul.mubr.f32.gmra.mrb[42].mxu0 %v16245_v9  ;;  %5102 = vmatmul.mubr.f32.gmra.mrb[58].mxu1 %v16245_v9  ;;  %v10935_v42 = vpack.c.bf16 %v4754_v54, %v4746_v7  ;;  %v4819_v19 = vld [vmem:[#allocation8 + $0x6f8] sm:$0xff]  ;;  %v4810_v7 = vld [vmem:[#allocation8 + $0x6b0] sm:$0xff] }
 0x8f9   :  { %10856 = vmatpush1.bf16.msra.mxu0 %v10855_v14  ;;  %10920 = vmatpush1.bf16.msra.mxu1 %v10919_v18  ;;  %v4771_v14 = vld [vmem:[#allocation8 + $0x578] sm:$0xff]  ;;  %v10871_v18 = vpack.c.bf16 %v4752_v61, %v4744_v10  ;;  %v4808_v10 = vld [vmem:[#allocation8 + $0x6a0] sm:$0xff]  ;;  %v4818_v54 = vld [vmem:[#allocation8 + $0x6f0] sm:$0xff] }
 0x8fa   :  { %4994 = vmatprep.mubr.f32.mxu0 %v16246_v39  ;;  %5107 = vmatprep.mubr.f32.mxu1 %v16246_v39  ;;  %v4816_v61 = vld [vmem:[#allocation8 + $0x6e0] sm:$0xff]  ;;  %v5421_v40 = vld [vmem:[#allocation9 + $0x38] sm:$0xff] }
 0x8fb   :  { %10858 = vmatprep.subr.bf16.mxu0 %v10857_v56  ;;  %10922 = vmatprep.subr.bf16.mxu1 %v10921_v38  ;;  %v4762_v56 = vld [vmem:[#allocation8 + $0x530] sm:$0xff] }
 0x8fc   :  { %4995 = vmatmul.mubr.f32.gmra.mrb[44].mxu0 %v14461_v29  ;;  %5108 = vmatmul.mubr.f32.gmra.mrb[60].mxu1 %v14461_v29  ;;  %v4770_v38 = vld [vmem:[#allocation8 + $0x570] sm:$0xff] }
 0x8fd   :  { %10860 = vmatpush1.bf16.msra.mxu0 %v10859_v48  ;;  %10924 = vmatpush1.bf16.msra.mxu1 %v10923_v20  ;;  %v10875_v48 = vpack.c.bf16 %v4768_v36, %v4760_v52  ;;  %v10939_v20 = vpack.c.bf16 %v4770_v38, %v4762_v56  ;;  %v4824_v52 = vld [vmem:[#allocation8 + $0x720] sm:$0xff]  ;;  %v4826_v56 = vld [vmem:[#allocation8 + $0x730] sm:$0xff] }
 0x8fe   :  { %5000 = vmatprep.mubr.f32.mxu0 %v16247_v22  ;;  %5113 = vmatprep.mubr.f32.mxu1 %v16247_v22  ;;  %v4832_v36 = vld [vmem:[#allocation8 + $0x760] sm:$0xff]  ;;  %v4834_v38 = vld [vmem:[#allocation8 + $0x770] sm:$0xff] }
 0x8ff   :  { %10862 = vmatprep.subr.bf16.mxu0 %v10861_v46  ;;  %10926 = vmatprep.subr.bf16.mxu1 %v10925_v35  ;;  %v4778_v46 = vld [vmem:[#allocation8 + $0x5b0] sm:$0xff] }
 0x900   :  { %5001 = vmatmul.mubr.f32.gmra.mrb[46].mxu0 %v14515_v13  ;;  %5114 = vmatmul.mubr.f32.gmra.mrb[62].mxu1 %v14515_v13  ;;  %v4786_v35 = vld [vmem:[#allocation8 + $0x5f0] sm:$0xff] }
 0x901   :  { %10864 = vmatpush1.bf16.msra.mxu0 %v10863_v28  ;;  %10928 = vmatpush1.bf16.msra.mxu1 %v10927_v3  ;;  %v10879_v28 = vpack.c.bf16 %v4784_v60, %v4776_v25  ;;  %v10943_v3 = vpack.c.bf16 %v4786_v35, %v4778_v46  ;;  %v4840_v25 = vld [vmem:[#allocation8 + $0x7a0] sm:$0xff]  ;;  %v4842_v46 = vld [vmem:[#allocation8 + $0x7b0] sm:$0xff] }
 0x902   :  { %5184 = vmatprep.mubr.f32.mxu0 %v14518_v43  ;;  %5297 = vmatprep.mubr.f32.mxu1 %v14518_v43  ;;  %v10937_v43 = vpack.c.bf16 %v4771_v14, %v4763_v59  ;;  %v4827_v59 = vld [vmem:[#allocation8 + $0x738] sm:$0xff]  ;;  %v4848_v60 = vld [vmem:[#allocation8 + $0x7e0] sm:$0xff]  ;;  %v4850_v35 = vld [vmem:[#allocation8 + $0x7f0] sm:$0xff] }
 0x903   :  { %10866 = vmatprep.subr.bf16.mxu0 %v10865_v41  ;;  %10930 = vmatprep.subr.bf16.mxu1 %v10929_v21  ;;  %v4802_v41 = vld [vmem:[#allocation8 + $0x670] sm:$0xff]  ;;  %v4809_v21 = vld [vmem:[#allocation8 + $0x6a8] sm:$0xff]  ;;  %v4835_v14 = vld [vmem:[#allocation8 + $0x778] sm:$0xff] }
 0x905   :  { %10868 = vmatpush1.bf16.msra.mxu0 %v10867_v44  ;;  %10932 = vmatpush1.bf16.msra.mxu1 %v10931_v30  ;;  %v10883_v44 = vpack.c.bf16 %v4800_v58, %v4792_v26  ;;  %v10947_v30 = vpack.c.bf16 %v4802_v41, %v4794_v17  ;;  %v14554_v26 = vpack.c.bf16 %v5419_v53, %v5415_v16  ;;  %v5416_v17 = vld [vmem:[#allocation9 + $0x10] sm:$0xff] }
 0x906   :  { %10870 = vmatprep.subr.bf16.mxu0 %v10869_v24  ;;  %10934 = vmatprep.subr.bf16.mxu1 %v10933_v27  ;;  %v10885_v24 = vpack.c.bf16 %v4817_v57, %v4809_v21  ;;  %v10949_v27 = vpack.c.bf16 %v4819_v19, %v4811_v2  ;;  %v14556_v58 = vpack.c.bf16 %v5421_v40, %v5417_v55  ;;  %v5420_v41 = vld [vmem:[#allocation9 + $0x30] sm:$0xff]  ;;  %v5423_v21 = vld [vmem:[#allocation9 + $0x48] sm:$0xff]  ;;  %v5425_v2 = vld [vmem:[#allocation9 + $0x58] sm:$0xff] }
 0x907   :  { %v5427_v57 = vld [vmem:[#allocation9 + $0x68] sm:$0xff]  ;;  %v5429_v19 = vld [vmem:[#allocation9 + $0x78] sm:$0xff]  ;;  %v5446_v55 = vld [vmem:[#allocation9 + $0x100] sm:$0xff] }
 0x908   :  { %v5450_v40 = vld [vmem:[#allocation9 + $0x120] sm:$0xff] }
 0x909   :  { %10872 = vmatpush1.bf16.msra.mxu0 %v10871_v18  ;;  %10936 = vmatpush1.bf16.msra.mxu1 %v10935_v42  ;;  %v10887_v18 = vpack.c.bf16 %v4816_v61, %v4808_v10  ;;  %v10951_v42 = vpack.c.bf16 %v4818_v54, %v4810_v7  ;;  %v5422_v10 = vld [vmem:[#allocation9 + $0x40] sm:$0xff]  ;;  %v5424_v7 = vld [vmem:[#allocation9 + $0x50] sm:$0xff] }
 0x90a   :  { %10874 = vmatprep.subr.bf16.mxu0 %v10873_v31  ;;  %10938 = vmatprep.subr.bf16.mxu1 %v10937_v43  ;;  %v10889_v31 = vpack.c.bf16 %v4833_v1, %v4825_v32  ;;  %v10953_v43 = vpack.c.bf16 %v4835_v14, %v4827_v59  ;;  %v5426_v61 = vld [vmem:[#allocation9 + $0x60] sm:$0xff]  ;;  %v5428_v54 = vld [vmem:[#allocation9 + $0x70] sm:$0xff]  ;;  %v5431_v32 = vld [vmem:[#allocation9 + $0x88] sm:$0xff] }
 0x90b   :  { %v5435_v1 = vld [vmem:[#allocation9 + $0xa8] sm:$0xff]  ;;  %v5433_v59 = vld [vmem:[#allocation9 + $0x98] sm:$0xff] }
 0x90c   :  { %v5437_v14 = vld [vmem:[#allocation9 + $0xb8] sm:$0xff] }
 0x90d   :  { %10876 = vmatpush1.bf16.msra.mxu0 %v10875_v48  ;;  %10940 = vmatpush1.bf16.msra.mxu1 %v10939_v20  ;;  %v10891_v48 = vpack.c.bf16 %v4832_v36, %v4824_v52  ;;  %v10955_v20 = vpack.c.bf16 %v4834_v38, %v4826_v56  ;;  %v5430_v52 = vld [vmem:[#allocation9 + $0x80] sm:$0xff]  ;;  %v5439_v56 = vld [vmem:[#allocation9 + $0xc8] sm:$0xff] }
 0x90e   :  { %10878 = vmatprep.subr.bf16.mxu0 %v10877_v63  ;;  %10942 = vmatprep.subr.bf16.mxu1 %v10941_v12  ;;  %v10893_v63 = vpack.c.bf16 %v4849_v49, %v4841_v23  ;;  %v10957_v12 = vpack.c.bf16 %v4851_v62, %v4843_v4  ;;  %v5434_v36 = vld [vmem:[#allocation9 + $0xa0] sm:$0xff]  ;;  %v5443_v38 = vld [vmem:[#allocation9 + $0xe8] sm:$0xff]  ;;  %v5441_v23 = vld [vmem:[#allocation9 + $0xd8] sm:$0xff] }
 0x90f   :  { %v5445_v49 = vld [vmem:[#allocation9 + $0xf8] sm:$0xff]  ;;  %v14590_v4 = vpack.c.bf16 %v5434_v36, %v5430_v52  ;;  %v5462_v52 = vld [vmem:[#allocation9 + $0x180] sm:$0xff] }
 0x910   :  { %v5466_v36 = vld [vmem:[#allocation9 + $0x1a0] sm:$0xff] }
 0x911   :  { %10880 = vmatpush1.bf16.msra.mxu0 %v10879_v28  ;;  %10944 = vmatpush1.bf16.msra.mxu1 %v10943_v3  ;;  %v10895_v28 = vpack.c.bf16 %v4848_v60, %v4840_v25  ;;  %v10959_v3 = vpack.c.bf16 %v4850_v35, %v4842_v46  ;;  %v14598_v25 = vpack.c.bf16 %v5445_v49, %v5441_v23  ;;  %v5440_v60 = vld [vmem:[#allocation9 + $0xd0] sm:$0xff]  ;;  %v5449_v46 = vld [vmem:[#allocation9 + $0x118] sm:$0xff] }
 0x912   :  { %10882 = vmatprep.subr.bf16.mxu0 %v10881_v50  ;;  %10946 = vmatprep.subr.bf16.mxu1 %v10945_v34  ;;  %v5414_v50 = vld [vmem:[#allocation9] sm:$0xff]  ;;  %v5453_v35 = vld [vmem:[#allocation9 + $0x138] sm:$0xff] }
 0x913   :  { %v5418_v34 = vld [vmem:[#allocation9 + $0x20] sm:$0xff]  ;;  %v5473_v23 = vld [vmem:[#allocation9 + $0x1d8] sm:$0xff] }
 0x914   :  { %v5477_v49 = vld [vmem:[#allocation9 + $0x1f8] sm:$0xff] }
 0x915   :  { %10884 = vmatpush1.bf16.msra.mxu0 %v10883_v44  ;;  %10948 = vmatpush1.bf16.msra.mxu1 %v10947_v30  ;;  %v14560_v44 = vpack.c.bf16 %v5418_v34, %v5414_v50  ;;  %v14562_v30 = vpack.c.bf16 %v5420_v41, %v5416_v17  ;;  %v5455_v50 = vld [vmem:[#allocation9 + $0x148] sm:$0xff]  ;;  %v5457_v17 = vld [vmem:[#allocation9 + $0x158] sm:$0xff] }
 0x916   :  { %10886 = vmatprep.subr.bf16.mxu0 %v10885_v24  ;;  %10950 = vmatprep.subr.bf16.mxu1 %v10949_v27  ;;  %v14564_v24 = vpack.c.bf16 %v5427_v57, %v5423_v21  ;;  %v14566_v27 = vpack.c.bf16 %v5429_v19, %v5425_v2  ;;  %v5459_v34 = vld [vmem:[#allocation9 + $0x168] sm:$0xff]  ;;  %v5461_v41 = vld [vmem:[#allocation9 + $0x178] sm:$0xff]  ;;  %v14622_v21 = vpack.c.bf16 %v5450_v40, %v5446_v55  ;;  %v5454_v2 = vld [vmem:[#allocation9 + $0x140] sm:$0xff] }
 0x917   :  { %v5458_v19 = vld [vmem:[#allocation9 + $0x160] sm:$0xff]  ;;  %v5657_v55 = vld [vmem:[#allocation9 + $0x218] sm:$0xff] }
 0x918   :  { %v5661_v40 = vld [vmem:[#allocation9 + $0x238] sm:$0xff] }
 0x919   :  { %10888 = vmatpush1.bf16.msra.mxu0 %v10887_v18  ;;  %10952 = vmatpush1.bf16.msra.mxu1 %v10951_v42  ;;  %v14574_v18 = vpack.c.bf16 %v5426_v61, %v5422_v10  ;;  %v14576_v42 = vpack.c.bf16 %v5428_v54, %v5424_v7  ;;  %v14630_v10 = vpack.c.bf16 %v5461_v41, %v5457_v17  ;;  %v5456_v61 = vld [vmem:[#allocation9 + $0x150] sm:$0xff]  ;;  %v5463_v7 = vld [vmem:[#allocation9 + $0x188] sm:$0xff] }
 0x91a   :  { %10890 = vmatprep.subr.bf16.mxu0 %v10889_v31  ;;  %10954 = vmatprep.subr.bf16.mxu1 %v10953_v43  ;;  %v14582_v31 = vpack.c.bf16 %v5437_v14, %v5433_v59  ;;  %v5432_v43 = vld [vmem:[#allocation9 + $0x90] sm:$0xff]  ;;  %v5467_v54 = vld [vmem:[#allocation9 + $0x1a8] sm:$0xff]  ;;  %v14638_v59 = vpack.c.bf16 %v5458_v19, %v5454_v2  ;;  %v14678_v17 = vpack.c.bf16 %v5661_v40, %v5657_v55 }
 0x91b   :  { %v5656_v41 = vld [vmem:[#allocation9 + $0x210] sm:$0xff]  ;;  %v5663_v2 = vld [vmem:[#allocation9 + $0x248] sm:$0xff] }
 0x91c   :  { %v5667_v19 = vld [vmem:[#allocation9 + $0x268] sm:$0xff]  ;;  %v5676_v55 = vld [vmem:[#allocation9 + $0x2b0] sm:$0xff] }
 0x91d   :  { %10892 = vmatpush1.bf16.msra.mxu0 %v10891_v48  ;;  %10956 = vmatpush1.bf16.msra.mxu1 %v10955_v20  ;;  %v5438_v48 = vld [vmem:[#allocation9 + $0xc0] sm:$0xff]  ;;  %v5679_v40 = vld [vmem:[#allocation9 + $0x2c8] sm:$0xff] }
 0x91e   :  { %10894 = vmatprep.subr.bf16.mxu0 %v10893_v63  ;;  %10958 = vmatprep.subr.bf16.mxu1 %v10957_v12  ;;  %v5442_v20 = vld [vmem:[#allocation9 + $0xe0] sm:$0xff]  ;;  %v5447_v63 = vld [vmem:[#allocation9 + $0x108] sm:$0xff] }
 0x91f   :  { %v5451_v12 = vld [vmem:[#allocation9 + $0x128] sm:$0xff]  ;;  %v14606_v16 = vpack.c.bf16 %v5442_v20, %v5438_v48  ;;  %v14654_v48 = vpack.c.bf16 %v5466_v36, %v5462_v52  ;;  %v5664_v36 = vld [vmem:[#allocation9 + $0x250] sm:$0xff] }
 0x921   :  { %10896 = vmatpush1.bf16.msra.mxu0 %v10895_v28  ;;  %10960 = vmatpush1.bf16.msra.mxu1 %v10959_v3  ;;  %v14614_v28 = vpack.c.bf16 %v5453_v35, %v5449_v46  ;;  %v5448_v3 = vld [vmem:[#allocation9 + $0x110] sm:$0xff]  ;;  %v5655_v46 = vld [vmem:[#allocation9 + $0x208] sm:$0xff] }
 0x922   :  { %10962 = vmatprep.subr.bf16.mxu0 %v14554_v26  ;;  %10994 = vmatprep.subr.bf16.mxu1 %v14556_v58  ;;  %v5659_v35 = vld [vmem:[#allocation9 + $0x228] sm:$0xff] }
 0x924   :  { %5185 = vmatmul.mubr.f32.vlgmr.msra.gmra.mrb[48].mxu0 %v16237_v51  ;;  %5298 = vmatmul.mubr.f32.vlgmr.msra.gmra.mrb[64].mxu1 %v16237_v51  ;;  %v14580_v51 = vpack.c.bf16 %v5435_v1, %v5431_v32  ;;  %v5465_v32 = vld [vmem:[#allocation9 + $0x198] sm:$0xff] }
 0x925   :  { %5190 = vmatprep.mubr.f32.mxu0 %v14502_v11  ;;  %5303 = vmatprep.mubr.f32.mxu1 %v14502_v11  ;;  %v5436_v11 = vld [vmem:[#allocation9 + $0xb0] sm:$0xff]  ;;  %v5469_v1 = vld [vmem:[#allocation9 + $0x1b8] sm:$0xff] }
 0x926   :  { %10964 = vmatpush1.bf16.msra.mxu0 %v14560_v44  ;;  %10996 = vmatpush1.bf16.msra.mxu1 %v14562_v30  ;;  %v14592_v62 = vpack.c.bf16 %v5436_v11, %v5432_v43  ;;  %v14646_v43 = vpack.c.bf16 %v5469_v1, %v5465_v32  ;;  %v5464_v11 = vld [vmem:[#allocation9 + $0x190] sm:$0xff]  ;;  %v5662_v32 = vld [vmem:[#allocation9 + $0x240] sm:$0xff] }
 0x927   :  { %10966 = vmatprep.subr.bf16.mxu0 %v14564_v24  ;;  %10998 = vmatprep.subr.bf16.mxu1 %v14566_v27  ;;  %v5666_v1 = vld [vmem:[#allocation9 + $0x260] sm:$0xff] }
 0x928   :  { %5191 = vmatmul.mubr.f32.gmra.mrb[50].mxu0 %v16238_v33  ;;  %5304 = vmatmul.mubr.f32.gmra.mrb[66].mxu1 %v16238_v33  ;;  %v14596_v33 = vpack.c.bf16 %v5443_v38, %v5439_v56  ;;  %v5471_v56 = vld [vmem:[#allocation9 + $0x1c8] sm:$0xff] }
 0x929   :  { %5196 = vmatprep.mubr.f32.mxu0 %v14410_v0  ;;  %5309 = vmatprep.mubr.f32.mxu1 %v14410_v0  ;;  %v5444_v0 = vld [vmem:[#allocation9 + $0xf0] sm:$0xff]  ;;  %v5475_v38 = vld [vmem:[#allocation9 + $0x1e8] sm:$0xff] }
 0x92a   :  { %10968 = vmatpush1.bf16.msra.mxu0 %v14574_v18  ;;  %11000 = vmatpush1.bf16.msra.mxu1 %v14576_v42  ;;  %v14608_v53 = vpack.c.bf16 %v5444_v0, %v5440_v60  ;;  %v5470_v60 = vld [vmem:[#allocation9 + $0x1c0] sm:$0xff] }
 0x92b   :  { %10970 = vmatprep.subr.bf16.mxu0 %v14580_v51  ;;  %11002 = vmatprep.subr.bf16.mxu1 %v14582_v31  ;;  %v5474_v0 = vld [vmem:[#allocation9 + $0x1e0] sm:$0xff] }
 0x92c   :  { %5197 = vmatmul.mubr.f32.gmra.mrb[52].mxu0 %v16239_v8  ;;  %5310 = vmatmul.mubr.f32.gmra.mrb[68].mxu1 %v16239_v8  ;;  %v14612_v8 = vpack.c.bf16 %v5451_v12, %v5447_v63  ;;  %v14662_v63 = vpack.c.bf16 %v5477_v49, %v5473_v23  ;;  %v5472_v12 = vld [vmem:[#allocation9 + $0x1d0] sm:$0xff]  ;;  %v5677_v23 = vld [vmem:[#allocation9 + $0x2b8] sm:$0xff]  ;;  %v14700_v49 = vpack.c.bf16 %v5666_v1, %v5662_v32 }
 0x92d   :  { %5202 = vmatprep.mubr.f32.mxu0 %v16240_v15  ;;  %5315 = vmatprep.mubr.f32.mxu1 %v16240_v15  ;;  %v5452_v15 = vld [vmem:[#allocation9 + $0x130] sm:$0xff] }
 0x92e   :  { %10972 = vmatpush1.bf16.msra.mxu0 %v14590_v4  ;;  %11004 = vmatpush1.bf16.msra.mxu1 %v14592_v62  ;;  %v14624_v57 = vpack.c.bf16 %v5452_v15, %v5448_v3  ;;  %v14670_v3 = vpack.c.bf16 %v5474_v0, %v5470_v60  ;;  %v5670_v0 = vld [vmem:[#allocation9 + $0x280] sm:$0xff]  ;;  %v5680_v1 = vld [vmem:[#allocation9 + $0x2d0] sm:$0xff] }
 0x92f   :  { %10974 = vmatprep.subr.bf16.mxu0 %v14596_v33  ;;  %11006 = vmatprep.subr.bf16.mxu1 %v14598_v25 }
 0x930   :  { %5203 = vmatmul.mubr.f32.gmra.mrb[54].mxu0 %v16241_v45  ;;  %5316 = vmatmul.mubr.f32.gmra.mrb[70].mxu1 %v16241_v45  ;;  %v14628_v45 = vpack.c.bf16 %v5459_v34, %v5455_v50  ;;  %v5654_v50 = vld [vmem:[#allocation9 + $0x200] sm:$0xff] }
 0x931   :  { %5208 = vmatprep.mubr.f32.mxu0 %v16242_v37  ;;  %5321 = vmatprep.mubr.f32.mxu1 %v16242_v37  ;;  %v5460_v37 = vld [vmem:[#allocation9 + $0x170] sm:$0xff]  ;;  %v5658_v34 = vld [vmem:[#allocation9 + $0x220] sm:$0xff] }
 0x932   :  { %10976 = vmatpush1.bf16.msra.mxu0 %v14606_v16  ;;  %11008 = vmatpush1.bf16.msra.mxu1 %v14608_v53  ;;  %v14640_v14 = vpack.c.bf16 %v5460_v37, %v5456_v61  ;;  %v5665_v61 = vld [vmem:[#allocation9 + $0x258] sm:$0xff] }
 0x933   :  { %10978 = vmatprep.subr.bf16.mxu0 %v14612_v8  ;;  %11010 = vmatprep.subr.bf16.mxu1 %v14614_v28  ;;  %v5669_v37 = vld [vmem:[#allocation9 + $0x278] sm:$0xff] }
 0x934   :  { %5209 = vmatmul.mubr.f32.gmra.mrb[56].mxu0 %v16243_v47  ;;  %5322 = vmatmul.mubr.f32.gmra.mrb[72].mxu1 %v16243_v47  ;;  %v14644_v47 = vpack.c.bf16 %v5467_v54, %v5463_v7  ;;  %v14686_v7 = vpack.c.bf16 %v5658_v34, %v5654_v50  ;;  %v14694_v52 = vpack.c.bf16 %v5669_v37, %v5665_v61  ;;  %v5683_v50 = vld [vmem:[#allocation9 + $0x2e8] sm:$0xff]  ;;  %v5681_v34 = vld [vmem:[#allocation9 + $0x2d8] sm:$0xff]  ;;  %v5682_v61 = vld [vmem:[#allocation9 + $0x2e0] sm:$0xff] }
 0x935   :  { %5214 = vmatprep.mubr.f32.mxu0 %v16244_v5  ;;  %5327 = vmatprep.mubr.f32.mxu1 %v16244_v5  ;;  %v5468_v5 = vld [vmem:[#allocation9 + $0x1b0] sm:$0xff]  ;;  %v14720_v37 = vpack.c.bf16 %v5683_v50, %v5679_v40 }
 0x936   :  { %10980 = vmatpush1.bf16.msra.mxu0 %v14622_v21  ;;  %11012 = vmatpush1.bf16.msra.mxu1 %v14624_v57  ;;  %v14656_v20 = vpack.c.bf16 %v5468_v5, %v5464_v11  ;;  %v5668_v11 = vld [vmem:[#allocation9 + $0x270] sm:$0xff]  ;;  %v5671_v5 = vld [vmem:[#allocation9 + $0x288] sm:$0xff] }
 0x937   :  { %10982 = vmatprep.subr.bf16.mxu0 %v14628_v45  ;;  %11014 = vmatprep.subr.bf16.mxu1 %v14630_v10  ;;  %v14702_v60 = vpack.c.bf16 %v5668_v11, %v5664_v36  ;;  %16251 = vst [vmem:[#allocation27_spill] sm:$0xff] %v14720_v37  ;;  %v5684_v36 = vld [vmem:[#allocation9 + $0x2f0] sm:$0xff]  ;;  %v5687_v11 = vld [vmem:[#allocation9 + $0x308] sm:$0xff] }
 0x938   :  { %5215 = vmatmul.mubr.f32.gmra.mrb[58].mxu0 %v16245_v9  ;;  %5328 = vmatmul.mubr.f32.gmra.mrb[74].mxu1 %v16245_v9  ;;  %v14660_v9 = vpack.c.bf16 %v5475_v38, %v5471_v56  ;;  %v5675_v56 = vld [vmem:[#allocation9 + $0x2a8] sm:$0xff]  ;;  %v5673_v38 = vld [vmem:[#allocation9 + $0x298] sm:$0xff]  ;;  %v5688_v50 = vld [vmem:[#allocation9 + $0x310] sm:$0xff] }
 0x939   :  { %5220 = vmatprep.mubr.f32.mxu0 %v16246_v39  ;;  %5333 = vmatprep.mubr.f32.mxu1 %v16246_v39  ;;  %v5476_v39 = vld [vmem:[#allocation9 + $0x1f0] sm:$0xff] }
 0x93a   :  { %10984 = vmatpush1.bf16.msra.mxu0 %v14638_v59  ;;  %11016 = vmatpush1.bf16.msra.mxu1 %v14640_v14  ;;  %v14672_v15 = vpack.c.bf16 %v5476_v39, %v5472_v12  ;;  %v5674_v12 = vld [vmem:[#allocation9 + $0x2a0] sm:$0xff]  ;;  %v14706_v39 = vpack.c.bf16 %v5675_v56, %v5671_v5  ;;  %v5691_v5 = vld [vmem:[#allocation9 + $0x328] sm:$0xff]  ;;  %v5689_v56 = vld [vmem:[#allocation9 + $0x318] sm:$0xff] }
 0x93b   :  { %10986 = vmatprep.subr.bf16.mxu0 %v14644_v47  ;;  %11018 = vmatprep.subr.bf16.mxu1 %v14646_v43 }
 0x93c   :  { %5221 = vmatmul.mubr.f32.gmra.mrb[60].mxu0 %v14461_v29  ;;  %5334 = vmatmul.mubr.f32.gmra.mrb[76].mxu1 %v14461_v29  ;;  %v14676_v29 = vpack.c.bf16 %v5659_v35, %v5655_v46  ;;  %v14708_v46 = vpack.c.bf16 %v5677_v23, %v5673_v38  ;;  %v5672_v35 = vld [vmem:[#allocation9 + $0x290] sm:$0xff]  ;;  %v5693_v38 = vld [vmem:[#allocation9 + $0x338] sm:$0xff] }
 0x93d   :  { %5226 = vmatprep.mubr.f32.mxu0 %v16247_v22  ;;  %5339 = vmatprep.mubr.f32.mxu1 %v16247_v22  ;;  %v5660_v22 = vld [vmem:[#allocation9 + $0x230] sm:$0xff]  ;;  %v14734_v40 = vpack.c.bf16 %v5693_v38, %v5689_v56 }
 0x93e   :  { %10988 = vmatpush1.bf16.msra.mxu0 %v14654_v48  ;;  %11020 = vmatpush1.bf16.msra.mxu1 %v14656_v20  ;;  %v14688_v54 = vpack.c.bf16 %v5660_v22, %v5656_v41  ;;  %16248 = vst [vmem:[#allocation22_spill] sm:$0xff] %v14708_v46  ;;  %v5685_v41 = vld [vmem:[#allocation9 + $0x2f8] sm:$0xff]  ;;  %v14714_v22 = vpack.c.bf16 %v5674_v12, %v5670_v0  ;;  %v5686_v12 = vld [vmem:[#allocation9 + $0x300] sm:$0xff]  ;;  %v5696_v56 = vld [vmem:[#allocation9 + $0x350] sm:$0xff] }
 0x93f   :  { %10990 = vmatprep.subr.bf16.mxu0 %v14660_v9  ;;  %11022 = vmatprep.subr.bf16.mxu1 %v14662_v63  ;;  %v14722_v32 = vpack.c.bf16 %v5685_v41, %v5681_v34  ;;  %v14728_v0 = vpack.c.bf16 %v5684_v36, %v5680_v1  ;;  %16256 = vst [vmem:[#allocation35_spill] sm:$0xff] %v14734_v40  ;;  %v5692_v34 = vld [vmem:[#allocation9 + $0x330] sm:$0xff]  ;;  %v5695_v41 = vld [vmem:[#allocation9 + $0x348] sm:$0xff]  ;;  %v5694_v1 = vld [vmem:[#allocation9 + $0x340] sm:$0xff] }
 0x940   :  { %5227 = vmatmul.mubr.f32.gmra.mrb[62].mxu0 %v14515_v13  ;;  %5340 = vmatmul.mubr.f32.gmra.mrb[78].mxu1 %v14515_v13  ;;  %v14692_v13 = vpack.c.bf16 %v5667_v19, %v5663_v2  ;;  %16249 = vst [vmem:[#allocation23_spill] sm:$0xff] %v14714_v22  ;;  %v14716_v2 = vpack.c.bf16 %v5676_v55, %v5672_v35  ;;  %v5678_v19 = vld [vmem:[#allocation9 + $0x2c0] sm:$0xff]  ;;  %v5700_v38 = vld [vmem:[#allocation9 + $0x370] sm:$0xff] }
 0x941   :  { %5542 = vmatprep.mubr.f32.mxu0 %v16112_v6  ;;  %5613 = vmatprep.mubr.f32.mxu1 %v16112_v6  ;;  %16252 = vst [vmem:[#allocation34_spill] sm:$0xff] %v14722_v32  ;;  %v14726_v23 = vpack.c.bf16 %v5682_v61, %v5678_v19  ;;  %16254 = vst [vmem:[#allocation29_spill] sm:$0xff] %v14728_v0  ;;  %v5690_v35 = vld [vmem:[#allocation9 + $0x320] sm:$0xff]  ;;  %v14732_v55 = vpack.c.bf16 %v5691_v5, %v5687_v11 }
 0x942   :  { %10992 = vmatpush1.bf16.msra.mxu0 %v14670_v3  ;;  %11024 = vmatpush1.bf16.msra.mxu1 %v14672_v15  ;;  %16250 = vst [vmem:[#allocation24_spill] sm:$0xff] %v14716_v2  ;;  %v14738_v19 = vpack.c.bf16 %v5690_v35, %v5686_v12  ;;  %v14740_v61 = vpack.c.bf16 %v5692_v34, %v5688_v50  ;;  %v5698_v36 = vld [vmem:[#allocation9 + $0x360] sm:$0xff] }
 0x943   :  { %11026 = vmatprep.subr.bf16.mxu0 %v14676_v29  ;;  %11058 = vmatprep.subr.bf16.mxu1 %v14678_v17  ;;  %16253 = vst [vmem:[#allocation30_spill] sm:$0xff] %v14726_v23  ;;  %16255 = vst [vmem:[#allocation32_spill] sm:$0xff] %v14732_v55  ;;  %v14750_v12 = vpack.c.bf16 %v5698_v36, %v5694_v1  ;;  %v14752_v35 = vpack.c.bf16 %v5700_v38, %v5696_v56  ;;  %v5702_v50 = vld [vmem:[#allocation9 + $0x380] sm:$0xff]  ;;  %v5716_v38 = vld [vmem:[#allocation9 + $0x3f0] sm:$0xff] }
 0x944   :  { %16257 = vst [vmem:[#allocation36_spill] sm:$0xff] %v14738_v19  ;;  %16258 = vst [vmem:[#allocation40_spill] sm:$0xff] %v14740_v61  ;;  %v5706_v34 = vld [vmem:[#allocation9 + $0x3a0] sm:$0xff] }
 0x945   :  { %5543 = vmatmul.mubr.f32.vlgmr.msra.gmra.mrb[32].mxu0 %v16112_v6  ;;  %5614 = vmatmul.mubr.f32.vlgmr.msra.gmra.mrb[48].mxu1 %v16112_v6  ;;  %v14762_v1 = vpack.c.bf16 %v5706_v34, %v5702_v50  ;;  %v5710_v56 = vld [vmem:[#allocation9 + $0x3c0] sm:$0xff] }
 0x946   :  { %11028 = vmatpush1.bf16.msra.mxu0 %v14686_v7  ;;  %11060 = vmatpush1.bf16.msra.mxu1 %v14688_v54 }
 0x947   :  { %11030 = vmatprep.subr.bf16.mxu0 %v14692_v13  ;;  %11062 = vmatprep.subr.bf16.mxu1 %v14694_v52 }
 0x948   :  { %5782 = vmatprep.mubr.f32.mxu0 %v16112_v6  ;;  %5853 = vmatprep.mubr.f32.mxu1 %v16112_v6 }
 0x94a   :  { %11032 = vmatpush1.bf16.msra.mxu0 %v14700_v49  ;;  %11064 = vmatpush1.bf16.msra.mxu1 %v14702_v60 }
 0x94b   :  { %11034 = vmatprep.subr.bf16.mxu0 %v14706_v39  ;;  %11066 = vmatprep.subr.bf16.mxu1 %v14708_v46  ;;  %v5697_v46 = vld [vmem:[#allocation9 + $0x358] sm:$0xff] }
 0x94e   :  { %11036 = vmatpush1.bf16.msra.mxu0 %v14714_v22  ;;  %11068 = vmatpush1.bf16.msra.mxu1 %v14716_v2  ;;  %v5699_v22 = vld [vmem:[#allocation9 + $0x368] sm:$0xff]  ;;  %v5701_v2 = vld [vmem:[#allocation9 + $0x378] sm:$0xff] }
 0x94f   :  { %11038 = vmatprep.subr.bf16.mxu0 %v14720_v37  ;;  %11070 = vmatprep.subr.bf16.mxu1 %v14722_v32  ;;  %v14744_v11 = vpack.c.bf16 %v5699_v22, %v5695_v41  ;;  %v14746_v5 = vpack.c.bf16 %v5701_v2, %v5697_v46  ;;  %v5703_v32 = vld [vmem:[#allocation9 + $0x388] sm:$0xff]  ;;  %v5705_v37 = vld [vmem:[#allocation9 + $0x398] sm:$0xff]  ;;  %v5704_v2 = vld [vmem:[#allocation9 + $0x390] sm:$0xff] }
 0x950   :  { %v5708_v41 = vld [vmem:[#allocation9 + $0x3b0] sm:$0xff] }
 0x951   :  { %v14764_v36 = vpack.c.bf16 %v5708_v41, %v5704_v2 }
 0x952   :  { %11040 = vmatpush1.bf16.msra.mxu0 %v14726_v23  ;;  %11072 = vmatpush1.bf16.msra.mxu1 %v14728_v0  ;;  %v5707_v23 = vld [vmem:[#allocation9 + $0x3a8] sm:$0xff]  ;;  %v5709_v0 = vld [vmem:[#allocation9 + $0x3b8] sm:$0xff] }
 0x953   :  { %11042 = vmatprep.subr.bf16.mxu0 %v14732_v55  ;;  %11074 = vmatprep.subr.bf16.mxu1 %v14734_v40  ;;  %v14756_v46 = vpack.c.bf16 %v5707_v23, %v5703_v32  ;;  %v14758_v22 = vpack.c.bf16 %v5709_v0, %v5705_v37  ;;  %v5711_v40 = vld [vmem:[#allocation9 + $0x3c8] sm:$0xff]  ;;  %v5713_v55 = vld [vmem:[#allocation9 + $0x3d8] sm:$0xff]  ;;  %v5714_v23 = vld [vmem:[#allocation9 + $0x3e0] sm:$0xff] }
 0x954   :  { %v5712_v0 = vld [vmem:[#allocation9 + $0x3d0] sm:$0xff]  ;;  %v14774_v50 = vpack.c.bf16 %v5714_v23, %v5710_v56 }
 0x955   :  { %v14776_v34 = vpack.c.bf16 %v5716_v38, %v5712_v0 }
 0x956   :  { %11044 = vmatpush1.bf16.msra.mxu0 %v14738_v19  ;;  %11076 = vmatpush1.bf16.msra.mxu1 %v14740_v61  ;;  %v5715_v19 = vld [vmem:[#allocation9 + $0x3e8] sm:$0xff]  ;;  %v5717_v61 = vld [vmem:[#allocation9 + $0x3f8] sm:$0xff] }
 0x957   :  { %11046 = vmatprep.subr.bf16.mxu0 %v14744_v11  ;;  %11078 = vmatprep.subr.bf16.mxu1 %v14746_v5  ;;  %v14768_v37 = vpack.c.bf16 %v5715_v19, %v5711_v40  ;;  %v14770_v32 = vpack.c.bf16 %v5717_v61, %v5713_v55 }
 0x95a   :  { %11048 = vmatpush1.bf16.msra.mxu0 %v14750_v12  ;;  %11080 = vmatpush1.bf16.msra.mxu1 %v14752_v35 }
 0x95b   :  { %11050 = vmatprep.subr.bf16.mxu0 %v14756_v46  ;;  %11082 = vmatprep.subr.bf16.mxu1 %v14758_v22 }
 0x95e   :  { %11052 = vmatpush1.bf16.msra.mxu0 %v14762_v1  ;;  %11084 = vmatpush1.bf16.msra.mxu1 %v14764_v36 }
 0x95f   :  { %11054 = vmatprep.subr.bf16.mxu0 %v14768_v37  ;;  %11086 = vmatprep.subr.bf16.mxu1 %v14770_v32 }
 0x962   :  { %11056 = vmatpush1.bf16.msra.mxu0 %v14774_v50  ;;  %11088 = vmatpush1.bf16.msra.mxu1 %v14776_v34 }
 0x963   :  { %11090 = vmatprep.subr.bf16.mxu0 %v14554_v26  ;;  %11122 = vmatprep.subr.bf16.mxu1 %v14556_v58  ;;  %v4852_v26 = vld [vmem:[%s15902_s6] sm:$0xff] }
 0x964   :  { %v16259_v58 = vld [vmem:[#allocation15_spill] sm:$0xff] }
 0x965   :  { %5783 = vmatmul.mubr.f32.vlgmr.msra.gmra.mrb[62].mxu0 %v16112_v6  ;;  %5854 = vmatmul.mubr.f32.vlgmr.msra.gmra.mrb[78].mxu1 %v16112_v6  ;;  %v16269_v55 = vsub.s32 5, %v16259_v58 }
 0x966   :  { %11092 = vmatpush1.bf16.msra.mxu0 %v14560_v44  ;;  %11124 = vmatpush1.bf16.msra.mxu1 %v14562_v30  ;;  %v16260_v44 = vsub.s32 0, %v16259_v58 }
 0x967   :  { %11094 = vmatprep.subr.bf16.mxu0 %v14564_v24  ;;  %11126 = vmatprep.subr.bf16.mxu1 %v14566_v27  ;;  %v16261_v24 = vsub.s32 1, %v16259_v58  ;;  %v14849_v40 = vrot.slane %v4852_v26, %v16269_v55 }
 0x968   :  { %6021 = vmatprep.mubr.f32.mxu0 %v16112_v6  ;;  %6092 = vmatprep.mubr.f32.mxu1 %v16112_v6  ;;  %v14825_v30 = vrot.slane %v4852_v26, %v16260_v44 }
 0x969   :  { %v14829_v27 = vrot.slane %v4852_v26, %v16261_v24  ;;  %16270 = vst [vmem:[#allocation45_spill] sm:$0xff] %v14849_v40  ;;  %v16271_v24 = vsub.s32 7, %v16259_v58 }
 0x96a   :  { %11096 = vmatpush1.bf16.msra.mxu0 %v14574_v18  ;;  %11128 = vmatpush1.bf16.msra.mxu1 %v14576_v42 }
 0x96b   :  { %11098 = vmatprep.subr.bf16.mxu0 %v14580_v51  ;;  %11130 = vmatprep.subr.bf16.mxu1 %v14582_v31  ;;  %16262 = vst [vmem:[#allocation41_spill] sm:$0xff] %v14829_v27 }
 0x96e   :  { %11100 = vmatpush1.bf16.msra.mxu0 %v14590_v4  ;;  %11132 = vmatpush1.bf16.msra.mxu1 %v14592_v62 }
 0x96f   :  { %11102 = vmatprep.subr.bf16.mxu0 %v14596_v33  ;;  %11134 = vmatprep.subr.bf16.mxu1 %v14598_v25 }
 0x972   :  { %11104 = vmatpush1.bf16.msra.mxu0 %v14606_v16  ;;  %11136 = vmatpush1.bf16.msra.mxu1 %v14608_v53  ;;  %v16263_v16 = vsub.s32 3, %v16259_v58 }
 0x973   :  { %11106 = vmatprep.subr.bf16.mxu0 %v14612_v8  ;;  %11138 = vmatprep.subr.bf16.mxu1 %v14614_v28  ;;  %v16265_v28 = vsub.s32 2, %v16259_v58 }
 0x974   :  { %v14835_v53 = vrot.slane %v4852_v26, %v16263_v16 }
 0x976   :  { %11108 = vmatpush1.bf16.msra.mxu0 %v14622_v21  ;;  %11140 = vmatpush1.bf16.msra.mxu1 %v14624_v57  ;;  %16264 = vst [vmem:[#allocation42_spill] sm:$0xff] %v14835_v53  ;;  %v14840_v21 = vrot.slane %v4852_v26, %v16265_v28 }
 0x977   :  { %11110 = vmatprep.subr.bf16.mxu0 %v14628_v45  ;;  %11142 = vmatprep.subr.bf16.mxu1 %v14630_v10 }
 0x978   :  { %16266 = vst [vmem:[#allocation43_spill] sm:$0xff] %v14840_v21 }
 0x97a   :  { %11112 = vmatpush1.bf16.msra.mxu0 %v14638_v59  ;;  %11144 = vmatpush1.bf16.msra.mxu1 %v14640_v14 }
 0x97b   :  { %11114 = vmatprep.subr.bf16.mxu0 %v14644_v47  ;;  %11146 = vmatprep.subr.bf16.mxu1 %v14646_v43 }
 0x97e   :  { %11116 = vmatpush1.bf16.msra.mxu0 %v14654_v48  ;;  %11148 = vmatpush1.bf16.msra.mxu1 %v14656_v20 }
 0x97f   :  { %11118 = vmatprep.subr.bf16.mxu0 %v14660_v9  ;;  %11150 = vmatprep.subr.bf16.mxu1 %v14662_v63 }
 0x982   :  { %11120 = vmatpush1.bf16.msra.mxu0 %v14670_v3  ;;  %11152 = vmatpush1.bf16.msra.mxu1 %v14672_v15  ;;  %v16267_v15 = vsub.s32 4, %v16259_v58 }
 0x983   :  { %11154 = vmatprep.subr.bf16.mxu0 %v14676_v29  ;;  %11186 = vmatprep.subr.bf16.mxu1 %v14678_v17 }
 0x984   :  { %v14845_v29 = vrot.slane %v4852_v26, %v16267_v15  ;;  %v6373_v15 = vld [vmem:[#allocation9 + $0x10] sm:$0xff] }
 0x986   :  { %16268 = vst [vmem:[#allocation44_spill] sm:$0xff] %v14845_v29 }
 0xa18   :  { %v5544_v18 = vpop.f32.mrb[32].mxu0  ;;  %v5615_v42 = vpop.f32.mrb[48].mxu1 }
 0xa19   :  { %v12097_v51 = vadd.f32 %v5544_v18, %v14825_v30  ;;  %v5546_v31 = vpop.f32.mrb[33].mxu0  ;;  %v5617_v4 = vpop.f32.mrb[49].mxu1  ;;  %v12113_v45 = vadd.f32 %v5615_v42, %v14840_v21  ;;  %v14858_v18 = vrot.slane %v4852_v26, %v16271_v24 }
 0xa1a   :  { %v12098_v62 = vadd.f32 %v5546_v31, %v14829_v27  ;;  %v12114_v8 = vadd.f32 %v5617_v4, %v14835_v53 }
 0xa1b   :  { %v9552_v33 = vmul.f32 -1.442695, %v12097_v51  ;;  %16272 = vst [vmem:[#allocation46_spill] sm:$0xff] %v14858_v18  ;;  %v16273_v51 = vsub.s32 6, %v16259_v58  ;;  %v16277_v58 = vld [vmem:[#allocation24_spill] sm:$0xff] }
 0xa1c   :  { %v9553_v25 = vmul.f32 -1.442695, %v12098_v62  ;;  %v9554_v57 = vmul.f32 -1.442695, %v12114_v8 }
 0xa1d   :  { %12541 = vpow2.f32 %v9552_v33  ;;  %v14863_v31 = vrot.slane %v4852_v26, %v16273_v51  ;;  %v6385_v51 = vld [vmem:[#allocation9 + $0x70] sm:$0xff] }
 0xa1e   :  { %12543 = vpow2.f32 %v9553_v25 }
 0xa1f   :  { %12545 = vpow2.f32 %v9554_v57 }
 0xa20   :  { %12547 = vtanh.f32 %v12113_v45 }
 0xa27   :  { %v12542_v10 = vpop.eup %12541 }
 0xa28   :  { %v12544_v59 = vpop.eup %12543  ;;  %v5627_v14 = vadd.f32 1.0, %v12542_v10 }
 0xa29   :  { %v5633_v47 = vadd.f32 1.0, %v12544_v59  ;;  %v12546_v43 = vpop.eup %12545 }
 0xa2a   :  { %12549 = vrcp.f32 %v5627_v14  ;;  %v12548_v48 = vpop.eup %12547  ;;  %v5640_v3 = vadd.f32 1.0, %v12546_v43  ;;  %v16280_v14 = vld [vmem:[#allocation30_spill] sm:$0xff]  ;;  %v16282_v43 = vld [vmem:[#allocation32_spill] sm:$0xff] }
 0xa2b   :  { %12551 = vrcp.f32 %v5633_v47 }
 0xa2c   :  { %12553 = vrcp.f32 %v5640_v3  ;;  %v16285_v3 = vld [vmem:[#allocation40_spill] sm:$0xff] }
 0xa34   :  { %v12550_v20 = vpop.eup %12549 }
 0xa35   :  { %v12552_v9 = vpop.eup %12551  ;;  %v5644_v63 = vmul.f32 %v12550_v20, %v12548_v48  ;;  %v16283_v48 = vld [vmem:[#allocation35_spill] sm:$0xff] }
 0xa36   :  { %v5643_v17 = vmul.f32 0.0, %v12552_v9  ;;  %v12554_v4 = vpop.eup %12553 }
 0xa38   :  { %v14851_v19 = vadd.f32 %v5644_v63, %v5643_v17  ;;  %v5784_v61 = vpop.f32.mrb[62].mxu0  ;;  %v5855_v2 = vpop.f32.mrb[78].mxu1  ;;  %v16284_v63 = vld [vmem:[#allocation36_spill] sm:$0xff]  ;;  %v6377_v17 = vld [vmem:[#allocation9 + $0x30] sm:$0xff] }
 0xa39   :  { %v12143_v41 = vadd.f32 %v5784_v61, %v14845_v29  ;;  %v5786_v56 = vpop.f32.mrb[63].mxu0  ;;  %v5857_v23 = vpop.f32.mrb[79].mxu1  ;;  %v12159_v25 = vadd.f32 %v5855_v2, %v14863_v31  ;;  %v14918_v55 = vpack.c.bf16 %v6377_v17, %v6373_v15  ;;  %v6380_v61 = vld [vmem:[#allocation9 + $0x48] sm:$0xff]  ;;  %v6405_v15 = vld [vmem:[#allocation9 + $0x110] sm:$0xff] }
 0xa3a   :  { %12555 = vtanh.f32 %v14851_v19  ;;  %v12144_v0 = vadd.f32 %v5786_v56, %v14849_v40  ;;  %v12160_v42 = vadd.f32 %v5857_v23, %v14858_v18  ;;  %v6384_v2 = vld [vmem:[#allocation9 + $0x68] sm:$0xff]  ;;  %v6386_v23 = vld [vmem:[#allocation9 + $0x78] sm:$0xff]  ;;  %v6409_v17 = vld [vmem:[#allocation9 + $0x130] sm:$0xff] }
 0xa3b   :  { %v9555_v38 = vmul.f32 -1.442695, %v12143_v41  ;;  %v6382_v41 = vld [vmem:[#allocation9 + $0x58] sm:$0xff]  ;;  %v14923_v56 = vpack.c.bf16 %v6384_v2, %v6380_v61  ;;  %v14966_v61 = vpack.c.bf16 %v6409_v17, %v6405_v15  ;;  %v6412_v2 = vld [vmem:[#allocation9 + $0x148] sm:$0xff]  ;;  %v6427_v15 = vld [vmem:[#allocation9 + $0x1c0] sm:$0xff] }
 0xa3c   :  { %v9556_v44 = vmul.f32 -1.442695, %v12144_v0  ;;  %v9557_v33 = vmul.f32 -1.442695, %v12160_v42  ;;  %v6379_v0 = vld [vmem:[#allocation9 + $0x40] sm:$0xff]  ;;  %v6381_v42 = vld [vmem:[#allocation9 + $0x50] sm:$0xff] }
 0xa3d   :  { %12557 = vpow2.f32 %v9555_v38  ;;  %v6383_v38 = vld [vmem:[#allocation9 + $0x60] sm:$0xff] }
 0xa3e   :  { %12559 = vpow2.f32 %v9556_v44  ;;  %v14925_v44 = vpack.c.bf16 %v6386_v23, %v6382_v41  ;;  %v14927_v24 = vpack.c.bf16 %v6383_v38, %v6379_v0  ;;  %v6416_v41 = vld [vmem:[#allocation9 + $0x168] sm:$0xff]  ;;  %v6414_v23 = vld [vmem:[#allocation9 + $0x158] sm:$0xff]  ;;  %v6431_v17 = vld [vmem:[#allocation9 + $0x1e0] sm:$0xff] }
 0xa3f   :  { %12561 = vpow2.f32 %v9557_v33  ;;  %v6392_v33 = vld [vmem:[#allocation9 + $0xa8] sm:$0xff]  ;;  %v14971_v0 = vpack.c.bf16 %v6416_v41, %v6412_v2  ;;  %v6418_v38 = vld [vmem:[#allocation9 + $0x178] sm:$0xff]  ;;  %v14999_v41 = vpack.c.bf16 %v6431_v17, %v6427_v15 }
 0xa40   :  { %12563 = vtanh.f32 %v12159_v25  ;;  %v6390_v25 = vld [vmem:[#allocation9 + $0x98] sm:$0xff] }
 0xa44   :  { %v12556_v62 = vpop.eup %12555 }
 0xa45   :  { %v14866_v16 = vmul.f32 %v12556_v62, %v12554_v4  ;;  %v14930_v4 = vpack.c.bf16 %v6385_v51, %v6381_v42  ;;  %v6388_v62 = vld [vmem:[#allocation9 + $0x88] sm:$0xff]  ;;  %v6411_v42 = vld [vmem:[#allocation9 + $0x140] sm:$0xff] }
 0xa46   :  { %v6415_v51 = vld [vmem:[#allocation9 + $0x160] sm:$0xff] }
 0xa47   :  { %16274 = vst [vmem:[#allocation47_spill] sm:$0xff] %v14866_v16  ;;  %v12558_v8 = vpop.eup %12557  ;;  %6022 = vmatmul.mubr.f32.vlgmr.msra.gmra.mrb[34].mxu0 %v14866_v16  ;;  %6093 = vmatmul.mubr.f32.vlgmr.msra.gmra.mrb[50].mxu1 %v14866_v16 }
 0xa48   :  { %v12560_v28 = vpop.eup %12559  ;;  %v5867_v57 = vadd.f32 1.0, %v12558_v8  ;;  %11156 = vmatpush1.bf16.msra.mxu0 %v14686_v7  ;;  %11188 = vmatpush1.bf16.msra.mxu1 %v14688_v54  ;;  %v16275_v7 = vld [vmem:[#allocation22_spill] sm:$0xff]  ;;  %v16276_v54 = vld [vmem:[#allocation23_spill] sm:$0xff]  ;;  %v14935_v8 = vpack.c.bf16 %v6392_v33, %v6388_v62  ;;  %v14973_v62 = vpack.c.bf16 %v6418_v38, %v6414_v23  ;;  %v14975_v33 = vpack.c.bf16 %v6415_v51, %v6411_v42  ;;  %v6429_v23 = vld [vmem:[#allocation9 + $0x1d0] sm:$0xff] }
 0xa49   :  { %v5873_v26 = vadd.f32 1.0, %v12560_v28  ;;  %11158 = vmatprep.subr.bf16.mxu0 %v14692_v13  ;;  %11190 = vmatprep.subr.bf16.mxu1 %v14694_v52  ;;  %v16278_v13 = vld [vmem:[#allocation27_spill] sm:$0xff]  ;;  %v16279_v52 = vld [vmem:[#allocation34_spill] sm:$0xff]  ;;  %v12562_v45 = vpop.eup %12561  ;;  %v6433_v38 = vld [vmem:[#allocation9 + $0x1f0] sm:$0xff] }
 0xa4a   :  { %12565 = vrcp.f32 %v5867_v57  ;;  %6260 = vmatprep.mubr.f32.mxu0 %v16112_v6  ;;  %6331 = vmatprep.mubr.f32.mxu1 %v16112_v6  ;;  %v12564_v10 = vpop.eup %12563  ;;  %v6394_v28 = vld [vmem:[#allocation9 + $0xb8] sm:$0xff]  ;;  %v6387_v57 = vld [vmem:[#allocation9 + $0x80] sm:$0xff]  ;;  %v15002_v42 = vpack.c.bf16 %v6433_v38, %v6429_v23  ;;  %v6611_v51 = vld [vmem:[#allocation9 + $0x208] sm:$0xff] }
 0xa4b   :  { %12567 = vrcp.f32 %v5873_v26  ;;  %v6391_v26 = vld [vmem:[#allocation9 + $0xa0] sm:$0xff] }
 0xa4c   :  { %11160 = vmatpush1.bf16.msra.mxu0 %v14700_v49  ;;  %11192 = vmatpush1.bf16.msra.mxu1 %v14702_v60  ;;  %v16281_v49 = vld [vmem:[#allocation29_spill] sm:$0xff] }
 0xa4d   :  { %11162 = vmatprep.subr.bf16.mxu0 %v14706_v39  ;;  %11194 = vmatprep.subr.bf16.mxu1 %v16275_v7  ;;  %v5880_v39 = vadd.f32 1.0, %v12562_v45  ;;  %v14937_v7 = vpack.c.bf16 %v6394_v28, %v6390_v25  ;;  %v6396_v45 = vld [vmem:[#allocation9 + $0xc8] sm:$0xff]  ;;  %v6413_v25 = vld [vmem:[#allocation9 + $0x150] sm:$0xff] }
 0xa4e   :  { %v6417_v28 = vld [vmem:[#allocation9 + $0x170] sm:$0xff] }
 0xa4f   :  { %12569 = vrcp.f32 %v5880_v39 }
 0xa50   :  { %11164 = vmatpush1.bf16.msra.mxu0 %v16276_v54  ;;  %11196 = vmatpush1.bf16.msra.mxu1 %v16277_v58  ;;  %v14939_v54 = vpack.c.bf16 %v6391_v26, %v6387_v57  ;;  %v6389_v58 = vld [vmem:[#allocation9 + $0x90] sm:$0xff]  ;;  %v14978_v57 = vpack.c.bf16 %v6417_v28, %v6413_v25  ;;  %v6420_v26 = vld [vmem:[#allocation9 + $0x188] sm:$0xff]  ;;  %v6613_v28 = vld [vmem:[#allocation9 + $0x218] sm:$0xff] }
 0xa51   :  { %11166 = vmatprep.subr.bf16.mxu0 %v16278_v13  ;;  %11198 = vmatprep.subr.bf16.mxu1 %v16279_v52  ;;  %v6393_v13 = vld [vmem:[#allocation9 + $0xb0] sm:$0xff]  ;;  %v6615_v25 = vld [vmem:[#allocation9 + $0x228] sm:$0xff] }
 0xa52   :  { %v14942_v52 = vpack.c.bf16 %v6393_v13, %v6389_v58  ;;  %v6424_v58 = vld [vmem:[#allocation9 + $0x1a8] sm:$0xff]  ;;  %v6422_v13 = vld [vmem:[#allocation9 + $0x198] sm:$0xff] }
 0xa54   :  { %v12566_v59 = vpop.eup %12565  ;;  %11168 = vmatpush1.bf16.msra.mxu0 %v16280_v14  ;;  %11200 = vmatpush1.bf16.msra.mxu1 %v16281_v49  ;;  %v6402_v49 = vld [vmem:[#allocation9 + $0xf8] sm:$0xff] }
 0xa55   :  { %v12568_v60 = vpop.eup %12567  ;;  %v5884_v47 = vmul.f32 %v12566_v59, %v12564_v10  ;;  %11170 = vmatprep.subr.bf16.mxu0 %v16282_v43  ;;  %11202 = vmatprep.subr.bf16.mxu1 %v16283_v48  ;;  %v6400_v10 = vld [vmem:[#allocation9 + $0xe8] sm:$0xff]  ;;  %v6398_v59 = vld [vmem:[#allocation9 + $0xd8] sm:$0xff]  ;;  %v6397_v48 = vld [vmem:[#allocation9 + $0xd0] sm:$0xff] }
 0xa56   :  { %v5883_v20 = vmul.f32 0.0, %v12568_v60  ;;  %v14947_v14 = vpack.c.bf16 %v6400_v10, %v6396_v45  ;;  %v6395_v60 = vld [vmem:[#allocation9 + $0xc0] sm:$0xff]  ;;  %v14949_v39 = vpack.c.bf16 %v6402_v49, %v6398_v59  ;;  %v14983_v45 = vpack.c.bf16 %v6424_v58, %v6420_v26  ;;  %v6426_v10 = vld [vmem:[#allocation9 + $0x1b8] sm:$0xff] }
 0xa57   :  { %v6419_v59 = vld [vmem:[#allocation9 + $0x180] sm:$0xff]  ;;  %v15007_v26 = vpack.c.bf16 %v6615_v25, %v6611_v51  ;;  %v6617_v58 = vld [vmem:[#allocation9 + $0x238] sm:$0xff] }
 0xa58   :  { %v14888_v9 = vadd.f32 %v5884_v47, %v5883_v20  ;;  %11172 = vmatpush1.bf16.msra.mxu0 %v16284_v63  ;;  %11204 = vmatpush1.bf16.msra.mxu1 %v16285_v3  ;;  %v6399_v47 = vld [vmem:[#allocation9 + $0xe0] sm:$0xff]  ;;  %v6401_v20 = vld [vmem:[#allocation9 + $0xf0] sm:$0xff]  ;;  %v6404_v3 = vld [vmem:[#allocation9 + $0x108] sm:$0xff] }
 0xa59   :  { %11174 = vmatprep.subr.bf16.mxu0 %v14744_v11  ;;  %11206 = vmatprep.subr.bf16.mxu1 %v14746_v5  ;;  %v12570_v11 = vpop.eup %12569  ;;  %v14951_v43 = vpack.c.bf16 %v6399_v47, %v6395_v60  ;;  %v14954_v63 = vpack.c.bf16 %v6401_v20, %v6397_v48  ;;  %v6423_v49 = vld [vmem:[#allocation9 + $0x1a0] sm:$0xff]  ;;  %v14985_v60 = vpack.c.bf16 %v6426_v10, %v6422_v13  ;;  %v6421_v48 = vld [vmem:[#allocation9 + $0x190] sm:$0xff] }
 0xa5a   :  { %12571 = vtanh.f32 %v14888_v9  ;;  %v14987_v47 = vpack.c.bf16 %v6423_v49, %v6419_v59  ;;  %v6425_v20 = vld [vmem:[#allocation9 + $0x1b0] sm:$0xff]  ;;  %v15009_v13 = vpack.c.bf16 %v6617_v58, %v6613_v28 }
 0xa5c   :  { %11176 = vmatpush1.bf16.msra.mxu0 %v14750_v12  ;;  %11208 = vmatpush1.bf16.msra.mxu1 %v14752_v35  ;;  %v6372_v35 = vld [vmem:[#allocation9 + $0x8] sm:$0xff] }
 0xa5d   :  { %11178 = vmatprep.subr.bf16.mxu0 %v14756_v46  ;;  %11210 = vmatprep.subr.bf16.mxu1 %v14758_v22  ;;  %v6376_v46 = vld [vmem:[#allocation9 + $0x28] sm:$0xff]  ;;  %v6374_v22 = vld [vmem:[#allocation9 + $0x18] sm:$0xff] }
 0xa60   :  { %11180 = vmatpush1.bf16.msra.mxu0 %v14762_v1  ;;  %11212 = vmatpush1.bf16.msra.mxu1 %v14764_v36  ;;  %v14911_v1 = vpack.c.bf16 %v6376_v46, %v6372_v35  ;;  %v6378_v36 = vld [vmem:[#allocation9 + $0x38] sm:$0xff] }
 0xa61   :  { %11182 = vmatprep.subr.bf16.mxu0 %v14768_v37  ;;  %11214 = vmatprep.subr.bf16.mxu1 %v14770_v32  ;;  %v6371_v37 = vld [vmem:[#allocation9] sm:$0xff]  ;;  %v6410_v46 = vld [vmem:[#allocation9 + $0x138] sm:$0xff] }
 0xa62   :  { %v6375_v32 = vld [vmem:[#allocation9 + $0x20] sm:$0xff] }
 0xa64   :  { %v12572_v5 = vpop.eup %12571  ;;  %11184 = vmatpush1.bf16.msra.mxu0 %v14774_v50  ;;  %11216 = vmatpush1.bf16.msra.mxu1 %v14776_v34  ;;  %v14913_v50 = vpack.c.bf16 %v6378_v36, %v6374_v22  ;;  %v14915_v34 = vpack.c.bf16 %v6375_v32, %v6371_v37  ;;  %v6403_v22 = vld [vmem:[#allocation9 + $0x100] sm:$0xff] }
 0xa65   :  { %v14905_v12 = vmul.f32 %v12572_v5, %v12570_v11  ;;  %11218 = vmatprep.subr.bf16.mxu0 %v14911_v1  ;;  %v6408_v11 = vld [vmem:[#allocation9 + $0x128] sm:$0xff]  ;;  %v6406_v5 = vld [vmem:[#allocation9 + $0x118] sm:$0xff]  ;;  %v6407_v36 = vld [vmem:[#allocation9 + $0x120] sm:$0xff] }
 0xa66   :  { %11250 = vmatprep.subr.bf16.mxu1 %v14913_v50  ;;  %v14959_v35 = vpack.c.bf16 %v6408_v11, %v6404_v3  ;;  %v14961_v37 = vpack.c.bf16 %v6410_v46, %v6406_v5  ;;  %v14963_v32 = vpack.c.bf16 %v6407_v36, %v6403_v22  ;;  %v14990_v3 = vpack.c.bf16 %v6425_v20, %v6421_v48  ;;  %v6428_v11 = vld [vmem:[#allocation9 + $0x1c8] sm:$0xff]  ;;  %v6430_v46 = vld [vmem:[#allocation9 + $0x1d8] sm:$0xff] }
 0xa67   :  { %16286 = vst [vmem:[#allocation48_spill] sm:$0xff] %v14905_v12  ;;  %6261 = vmatmul.mubr.f32.vlgmr.msra.gmra.mrb[60].mxu0 %v14905_v12  ;;  %6332 = vmatmul.mubr.f32.vlgmr.msra.gmra.mrb[76].mxu1 %v14905_v12  ;;  %v6432_v5 = vld [vmem:[#allocation9 + $0x1e8] sm:$0xff]  ;;  %v6434_v36 = vld [vmem:[#allocation9 + $0x1f8] sm:$0xff] }
 0xa68   :  { %6499 = vmatprep.mubr.f32.mxu0 %v16112_v6  ;;  %6570 = vmatprep.mubr.f32.mxu1 %v16112_v6  ;;  %v14995_v22 = vpack.c.bf16 %v6432_v5, %v6428_v11  ;;  %v14997_v2 = vpack.c.bf16 %v6434_v36, %v6430_v46 }
 0xa69   :  { %11220 = vmatpush1.bf16.msra.mxu0 %v14915_v34  ;;  %11252 = vmatpush1.bf16.msra.mxu1 %v14918_v55 }
 0xa6a   :  { %11222 = vmatprep.subr.bf16.mxu0 %v14923_v56  ;;  %11254 = vmatprep.subr.bf16.mxu1 %v14925_v44 }
 0xa6d   :  { %11224 = vmatpush1.bf16.msra.mxu0 %v14927_v24  ;;  %11256 = vmatpush1.bf16.msra.mxu1 %v14930_v4 }
 0xa6e   :  { %11226 = vmatprep.subr.bf16.mxu0 %v14935_v8  ;;  %11258 = vmatprep.subr.bf16.mxu1 %v14937_v7 }
 0xa71   :  { %11228 = vmatpush1.bf16.msra.mxu0 %v14939_v54  ;;  %11260 = vmatpush1.bf16.msra.mxu1 %v14942_v52 }
 0xa72   :  { %11230 = vmatprep.subr.bf16.mxu0 %v14947_v14  ;;  %11262 = vmatprep.subr.bf16.mxu1 %v14949_v39 }
 0xa75   :  { %11232 = vmatpush1.bf16.msra.mxu0 %v14951_v43  ;;  %11264 = vmatpush1.bf16.msra.mxu1 %v14954_v63 }
 0xa76   :  { %11234 = vmatprep.subr.bf16.mxu0 %v14959_v35  ;;  %11266 = vmatprep.subr.bf16.mxu1 %v14961_v37 }
 0xa79   :  { %11236 = vmatpush1.bf16.msra.mxu0 %v14963_v32  ;;  %11268 = vmatpush1.bf16.msra.mxu1 %v14966_v61 }
 0xa7a   :  { %11238 = vmatprep.subr.bf16.mxu0 %v14971_v0  ;;  %11270 = vmatprep.subr.bf16.mxu1 %v14973_v62 }
 0xa7d   :  { %11240 = vmatpush1.bf16.msra.mxu0 %v14975_v33  ;;  %11272 = vmatpush1.bf16.msra.mxu1 %v14978_v57 }
 0xa7e   :  { %11242 = vmatprep.subr.bf16.mxu0 %v14983_v45  ;;  %11274 = vmatprep.subr.bf16.mxu1 %v14985_v60 }
 0xa81   :  { %11244 = vmatpush1.bf16.msra.mxu0 %v14987_v47  ;;  %11276 = vmatpush1.bf16.msra.mxu1 %v14990_v3 }
 0xa82   :  { %11246 = vmatprep.subr.bf16.mxu0 %v14995_v22  ;;  %11278 = vmatprep.subr.bf16.mxu1 %v14997_v2 }
 0xa85   :  { %11248 = vmatpush1.bf16.msra.mxu0 %v14999_v41  ;;  %11280 = vmatpush1.bf16.msra.mxu1 %v15002_v42 }
 0xa86   :  { %11282 = vmatprep.subr.bf16.mxu0 %v15007_v26  ;;  %11314 = vmatprep.subr.bf16.mxu1 %v15009_v13 }
 0xb1a   :  { %v6023_v10 = vpop.f32.mrb[34].mxu0  ;;  %v6094_v59 = vpop.f32.mrb[50].mxu1 }
 0xb1b   :  { %v12099_v49 = vadd.f32 %v6023_v10, %v14825_v30  ;;  %v6025_v48 = vpop.f32.mrb[35].mxu0  ;;  %v6096_v20 = vpop.f32.mrb[51].mxu1  ;;  %v12115_v17 = vadd.f32 %v6094_v59, %v14840_v21  ;;  %v6627_v21 = vld [vmem:[#allocation9 + $0x288] sm:$0xff] }
 0xb1c   :  { %v12100_v11 = vadd.f32 %v6025_v48, %v14829_v27  ;;  %v12116_v36 = vadd.f32 %v6096_v20, %v14835_v53  ;;  %v6631_v53 = vld [vmem:[#allocation9 + $0x2a8] sm:$0xff]  ;;  %v6629_v27 = vld [vmem:[#allocation9 + $0x298] sm:$0xff] }
 0xb1d   :  { %v9558_v5 = vmul.f32 -1.442695, %v12099_v49 }
 0xb1e   :  { %v9559_v46 = vmul.f32 -1.442695, %v12100_v11  ;;  %v9560_v15 = vmul.f32 -1.442695, %v12116_v36 }
 0xb1f   :  { %12573 = vpow2.f32 %v9558_v5 }
 0xb20   :  { %12575 = vpow2.f32 %v9559_v46 }
 0xb21   :  { %12577 = vpow2.f32 %v9560_v15 }
 0xb22   :  { %12579 = vtanh.f32 %v12115_v17 }
 0xb29   :  { %v12574_v23 = vpop.eup %12573 }
 0xb2a   :  { %v12576_v38 = vpop.eup %12575  ;;  %v6106_v51 = vadd.f32 1.0, %v12574_v23 }
 0xb2b   :  { %v6112_v25 = vadd.f32 1.0, %v12576_v38  ;;  %v12578_v28 = vpop.eup %12577 }
 0xb2c   :  { %12581 = vrcp.f32 %v6106_v51  ;;  %v12580_v58 = vpop.eup %12579  ;;  %v6119_v11 = vadd.f32 1.0, %v12578_v28  ;;  %v6614_v28 = vld [vmem:[#allocation9 + $0x220] sm:$0xff] }
 0xb2d   :  { %12583 = vrcp.f32 %v6112_v25 }
 0xb2e   :  { %12585 = vrcp.f32 %v6119_v11  ;;  %v6621_v11 = vld [vmem:[#allocation9 + $0x258] sm:$0xff] }
 0xb36   :  { %v12582_v10 = vpop.eup %12581 }
 0xb37   :  { %v12584_v49 = vpop.eup %12583  ;;  %v6123_v48 = vmul.f32 %v12582_v10, %v12580_v58  ;;  %v6612_v58 = vld [vmem:[#allocation9 + $0x210] sm:$0xff] }
 0xb38   :  { %v6122_v5 = vmul.f32 %v12584_v49, %v14851_v19  ;;  %v6610_v19 = vld [vmem:[#allocation9 + $0x200] sm:$0xff]  ;;  %v6616_v10 = vld [vmem:[#allocation9 + $0x230] sm:$0xff]  ;;  %v6619_v49 = vld [vmem:[#allocation9 + $0x248] sm:$0xff] }
 0xb3a   :  { %v15018_v20 = vadd.f32 %v6123_v48, %v6122_v5  ;;  %v6262_v46 = vpop.f32.mrb[60].mxu0  ;;  %v6333_v59 = vpop.f32.mrb[76].mxu1  ;;  %v6623_v48 = vld [vmem:[#allocation9 + $0x268] sm:$0xff]  ;;  %v6625_v5 = vld [vmem:[#allocation9 + $0x278] sm:$0xff] }
 0xb3b   :  { %v12141_v36 = vadd.f32 %v6262_v46, %v14845_v29  ;;  %v6264_v15 = vpop.f32.mrb[61].mxu0  ;;  %v6335_v17 = vpop.f32.mrb[77].mxu1  ;;  %v6620_v29 = vld [vmem:[#allocation9 + $0x250] sm:$0xff] }
 0xb3c   :  { %16287 = vst [vmem:[#allocation49_spill] sm:$0xff] %v15018_v20  ;;  %v12142_v23 = vadd.f32 %v6264_v15, %v14849_v40  ;;  %12587 = vtanh.f32 %v15018_v20  ;;  %v12158_v25 = vadd.f32 %v6335_v17, %v14858_v18  ;;  %v12586_v46 = vpop.eup %12585  ;;  %v15024_v15 = vpack.c.bf16 %v6614_v28, %v6610_v19  ;;  %v6624_v20 = vld [vmem:[#allocation9 + $0x270] sm:$0xff] }
 0xb3d   :  { %v9561_v38 = vmul.f32 -1.442695, %v12141_v36  ;;  %v15026_v40 = vpack.c.bf16 %v6616_v10, %v6612_v58  ;;  %v6618_v36 = vld [vmem:[#allocation9 + $0x240] sm:$0xff]  ;;  %v15033_v18 = vpack.c.bf16 %v6625_v5, %v6621_v11  ;;  %v15045_v11 = vpack.c.bf16 %v6631_v53, %v6627_v21 }
 0xb3e   :  { %v9562_v51 = vmul.f32 -1.442695, %v12142_v23  ;;  %v9563_v16 = vmul.f32 -1.442695, %v12158_v25  ;;  %16288 = vst [vmem:[#allocation17_spill] sm:$0xff] %v15024_v15  ;;  %v6622_v23 = vld [vmem:[#allocation9 + $0x260] sm:$0xff] }
 0xb3f   :  { %12589 = vpow2.f32 %v9561_v38  ;;  %16289 = vst [vmem:[#allocation21_spill] sm:$0xff] %v15026_v40  ;;  %v12157_v38 = vadd.f32 %v6333_v59, %v14863_v31  ;;  %16292 = vst [vmem:[#allocation31_spill] sm:$0xff] %v15033_v18  ;;  %v6633_v25 = vld [vmem:[#allocation9 + $0x2b8] sm:$0xff]  ;;  %v15041_v59 = vpack.c.bf16 %v6624_v20, %v6620_v29  ;;  %v6626_v10 = vld [vmem:[#allocation9 + $0x280] sm:$0xff] }
 0xb40   :  { %12591 = vpow2.f32 %v9562_v51  ;;  %v15031_v51 = vpack.c.bf16 %v6623_v48, %v6619_v49  ;;  %v6630_v49 = vld [vmem:[#allocation9 + $0x2a0] sm:$0xff]  ;;  %16295 = vst [vmem:[#allocation20_spill] sm:$0xff] %v15045_v11  ;;  %v15047_v5 = vpack.c.bf16 %v6633_v25, %v6629_v27  ;;  %v6641_v29 = vld [vmem:[#allocation9 + $0x2f8] sm:$0xff] }
 0xb41   :  { %12593 = vpow2.f32 %v9563_v16  ;;  %16294 = vst [vmem:[#allocation16_spill] sm:$0xff] %v15041_v59  ;;  %v6628_v16 = vld [vmem:[#allocation9 + $0x290] sm:$0xff]  ;;  %v15053_v53 = vpack.c.bf16 %v6630_v49, %v6626_v10  ;;  %v6634_v21 = vld [vmem:[#allocation9 + $0x2c0] sm:$0xff] }
 0xb42   :  { %16291 = vst [vmem:[#allocation26_spill] sm:$0xff] %v15031_v51  ;;  %12595 = vtanh.f32 %v12157_v38  ;;  %16296 = vst [vmem:[#allocation38_spill] sm:$0xff] %v15047_v5  ;;  %v6638_v20 = vld [vmem:[#allocation9 + $0x2e0] sm:$0xff] }
 0xb43   :  { %16297 = vst [vmem:[#allocation18_spill] sm:$0xff] %v15053_v53  ;;  %v15065_v10 = vpack.c.bf16 %v6638_v20, %v6634_v21  ;;  %v6657_v21 = vld [vmem:[#allocation9 + $0x378] sm:$0xff] }
 0xb45   :  { %16301 = vst [vmem:[#allocation50_spill] sm:$0xff] %v15065_v10 }
 0xb46   :  { %v12588_v12 = vpop.eup %12587 }
 0xb47   :  { %v15029_v17 = vmul.f32 %v12588_v12, %v12586_v46  ;;  %v15039_v12 = vpack.c.bf16 %v6622_v23, %v6618_v36  ;;  %v6632_v46 = vld [vmem:[#allocation9 + $0x2b0] sm:$0xff]  ;;  %v6639_v36 = vld [vmem:[#allocation9 + $0x2e8] sm:$0xff]  ;;  %v6637_v23 = vld [vmem:[#allocation9 + $0x2d8] sm:$0xff] }
 0xb48   :  { %v15055_v27 = vpack.c.bf16 %v6632_v46, %v6628_v16  ;;  %v15061_v25 = vpack.c.bf16 %v6641_v29, %v6637_v23  ;;  %v6642_v16 = vld [vmem:[#allocation9 + $0x300] sm:$0xff]  ;;  %v6644_v23 = vld [vmem:[#allocation9 + $0x310] sm:$0xff] }
 0xb49   :  { %16290 = vst [vmem:[#allocation25_spill] sm:$0xff] %v15029_v17  ;;  %v12590_v19 = vpop.eup %12589  ;;  %6500 = vmatmul.mubr.f32.vlgmr.msra.gmra.mrb[36].mxu0 %v15029_v17  ;;  %6571 = vmatmul.mubr.f32.vlgmr.msra.gmra.mrb[52].mxu1 %v15029_v17  ;;  %16293 = vst [vmem:[#allocation37_spill] sm:$0xff] %v15039_v12  ;;  %v6647_v17 = vld [vmem:[#allocation9 + $0x328] sm:$0xff]  ;;  %v6646_v46 = vld [vmem:[#allocation9 + $0x320] sm:$0xff] }
 0xb4a   :  { %v12592_v28 = vpop.eup %12591  ;;  %v6345_v58 = vadd.f32 1.0, %v12590_v19  ;;  %11284 = vmatpush1.bf16.msra.mxu0 %v15024_v15  ;;  %11316 = vmatpush1.bf16.msra.mxu1 %v15026_v40  ;;  %v6635_v19 = vld [vmem:[#allocation9 + $0x2c8] sm:$0xff]  ;;  %16298 = vst [vmem:[#allocation19_spill] sm:$0xff] %v15055_v27  ;;  %16300 = vst [vmem:[#allocation39_spill] sm:$0xff] %v15061_v25  ;;  %v6648_v29 = vld [vmem:[#allocation9 + $0x330] sm:$0xff] }
 0xb4b   :  { %v6351_v48 = vadd.f32 1.0, %v12592_v28  ;;  %11286 = vmatprep.subr.bf16.mxu0 %v15031_v51  ;;  %11318 = vmatprep.subr.bf16.mxu1 %v15033_v18  ;;  %v15059_v38 = vpack.c.bf16 %v6639_v36, %v6635_v19  ;;  %v6636_v28 = vld [vmem:[#allocation9 + $0x2d0] sm:$0xff] }
 0xb4c   :  { %12597 = vrcp.f32 %v6345_v58  ;;  %6738 = vmatprep.mubr.f32.mxu0 %v16112_v6  ;;  %6809 = vmatprep.mubr.f32.mxu1 %v16112_v6  ;;  %v6640_v58 = vld [vmem:[#allocation9 + $0x2f0] sm:$0xff] }
 0xb4d   :  { %12599 = vrcp.f32 %v6351_v48  ;;  %16299 = vst [vmem:[#allocation28_spill] sm:$0xff] %v15059_v38  ;;  %v6643_v48 = vld [vmem:[#allocation9 + $0x308] sm:$0xff]  ;;  %v15067_v49 = vpack.c.bf16 %v6640_v58, %v6636_v28  ;;  %v15077_v58 = vpack.c.bf16 %v6646_v46, %v6642_v16  ;;  %v6656_v40 = vld [vmem:[#allocation9 + $0x370] sm:$0xff] }
 0xb4e   :  { %11288 = vmatpush1.bf16.msra.mxu0 %v15039_v12  ;;  %11320 = vmatpush1.bf16.msra.mxu1 %v15041_v59  ;;  %v6645_v12 = vld [vmem:[#allocation9 + $0x318] sm:$0xff]  ;;  %v15071_v19 = vpack.c.bf16 %v6647_v17, %v6643_v48  ;;  %v6650_v17 = vld [vmem:[#allocation9 + $0x340] sm:$0xff]  ;;  %v6663_v46 = vld [vmem:[#allocation9 + $0x3a8] sm:$0xff] }
 0xb4f   :  { %11290 = vmatprep.subr.bf16.mxu0 %v15045_v11  ;;  %11322 = vmatprep.subr.bf16.mxu1 %v15047_v5  ;;  %v6649_v59 = vld [vmem:[#allocation9 + $0x338] sm:$0xff]  ;;  %16302 = vst [vmem:[#allocation33_spill] sm:$0xff] %v15067_v49  ;;  %v6651_v5 = vld [vmem:[#allocation9 + $0x348] sm:$0xff] }
 0xb50   :  { %v15073_v36 = vpack.c.bf16 %v6649_v59, %v6645_v12  ;;  %v6655_v11 = vld [vmem:[#allocation9 + $0x368] sm:$0xff]  ;;  %v6654_v12 = vld [vmem:[#allocation9 + $0x360] sm:$0xff] }
 0xb51   :  { %v15083_v18 = vpack.c.bf16 %v6655_v11, %v6651_v5  ;;  %v6658_v5 = vld [vmem:[#allocation9 + $0x380] sm:$0xff] }
 0xb52   :  { %11292 = vmatpush1.bf16.msra.mxu0 %v15053_v53  ;;  %11324 = vmatpush1.bf16.msra.mxu1 %v15055_v27  ;;  %v12594_v53 = vpop.eup %12593  ;;  %v6653_v27 = vld [vmem:[#allocation9 + $0x358] sm:$0xff] }
 0xb53   :  { %11294 = vmatprep.subr.bf16.mxu0 %v15059_v38  ;;  %11326 = vmatprep.subr.bf16.mxu1 %v15061_v25  ;;  %v12596_v20 = vpop.eup %12595  ;;  %v15079_v25 = vpack.c.bf16 %v6648_v29, %v6644_v23  ;;  %v6358_v38 = vadd.f32 1.0, %v12594_v53  ;;  %v15085_v51 = vpack.c.bf16 %v6657_v21, %v6653_v27  ;;  %v6661_v23 = vld [vmem:[#allocation9 + $0x398] sm:$0xff]  ;;  %v15092_v53 = vpack.c.bf16 %v6654_v12, %v6650_v17  ;;  %v6662_v27 = vld [vmem:[#allocation9 + $0x3a0] sm:$0xff] }
 0xb54   :  { %v6665_v29 = vld [vmem:[#allocation9 + $0x3b8] sm:$0xff] }
 0xb55   :  { %12601 = vrcp.f32 %v6358_v38  ;;  %v15100_v21 = vpack.c.bf16 %v6665_v29, %v6661_v23  ;;  %v6673_v17 = vld [vmem:[#allocation9 + $0x3f8] sm:$0xff]  ;;  %v6668_v23 = vld [vmem:[#allocation9 + $0x3d0] sm:$0xff] }
 0xb56   :  { %v12598_v28 = vpop.eup %12597  ;;  %11296 = vmatpush1.bf16.msra.mxu0 %v15065_v10  ;;  %11328 = vmatpush1.bf16.msra.mxu1 %v15067_v49  ;;  %v6652_v10 = vld [vmem:[#allocation9 + $0x350] sm:$0xff]  ;;  %v6659_v49 = vld [vmem:[#allocation9 + $0x388] sm:$0xff] }
 0xb57   :  { %v12600_v59 = vpop.eup %12599  ;;  %v6362_v48 = vmul.f32 %v12598_v28, %v12596_v20  ;;  %11298 = vmatprep.subr.bf16.mxu0 %v15071_v19  ;;  %11330 = vmatprep.subr.bf16.mxu1 %v15073_v36  ;;  %v15094_v11 = vpack.c.bf16 %v6656_v40, %v6652_v10  ;;  %v6660_v20 = vld [vmem:[#allocation9 + $0x390] sm:$0xff]  ;;  %v15105_v40 = vpack.c.bf16 %v6662_v27, %v6658_v5  ;;  %v6666_v10 = vld [vmem:[#allocation9 + $0x3c0] sm:$0xff] }
 0xb58   :  { %v6361_v16 = vmul.f32 %v12600_v59, %v14888_v9  ;;  %v15098_v9 = vpack.c.bf16 %v6663_v46, %v6659_v49  ;;  %v6664_v28 = vld [vmem:[#allocation9 + $0x3b0] sm:$0xff]  ;;  %v6667_v59 = vld [vmem:[#allocation9 + $0x3c8] sm:$0xff]  ;;  %v6670_v46 = vld [vmem:[#allocation9 + $0x3e0] sm:$0xff] }
 0xb59   :  { %v15107_v38 = vpack.c.bf16 %v6664_v28, %v6660_v20  ;;  %v6672_v29 = vld [vmem:[#allocation9 + $0x3f0] sm:$0xff]  ;;  %v15117_v5 = vpack.c.bf16 %v6670_v46, %v6666_v10  ;;  %v16310_v10 = vld [vmem:[#allocation46_spill] sm:$0xff] }
 0xb5a   :  { %v15088_v15 = vadd.f32 %v6362_v48, %v6361_v16  ;;  %11300 = vmatpush1.bf16.msra.mxu0 %v15077_v58  ;;  %11332 = vmatpush1.bf16.msra.mxu1 %v15079_v25  ;;  %v6671_v48 = vld [vmem:[#allocation9 + $0x3e8] sm:$0xff]  ;;  %v6669_v16 = vld [vmem:[#allocation9 + $0x3d8] sm:$0xff]  ;;  %v15119_v27 = vpack.c.bf16 %v6672_v29, %v6668_v23 }
 0xb5b   :  { %11302 = vmatprep.subr.bf16.mxu0 %v15083_v18  ;;  %11334 = vmatprep.subr.bf16.mxu1 %v15085_v51  ;;  %v15111_v49 = vpack.c.bf16 %v6671_v48, %v6667_v59  ;;  %v15113_v12 = vpack.c.bf16 %v6673_v17, %v6669_v16 }
 0xb5c   :  { %12603 = vtanh.f32 %v15088_v15 }
 0xb5e   :  { %11304 = vmatpush1.bf16.msra.mxu0 %v15092_v53  ;;  %11336 = vmatpush1.bf16.msra.mxu1 %v15094_v11 }
 0xb5f   :  { %11306 = vmatprep.subr.bf16.mxu0 %v15098_v9  ;;  %11338 = vmatprep.subr.bf16.mxu1 %v15100_v21  ;;  %v12602_v20 = vpop.eup %12601 }
 0xb62   :  { %11308 = vmatpush1.bf16.msra.mxu0 %v15105_v40  ;;  %11340 = vmatpush1.bf16.msra.mxu1 %v15107_v38 }
 0xb63   :  { %11310 = vmatprep.subr.bf16.mxu0 %v15111_v49  ;;  %11342 = vmatprep.subr.bf16.mxu1 %v15113_v12 }
 0xb66   :  { %v12604_v28 = vpop.eup %12603  ;;  %11312 = vmatpush1.bf16.msra.mxu0 %v15117_v5  ;;  %11344 = vmatpush1.bf16.msra.mxu1 %v15119_v27 }
 0xb67   :  { %v15125_v59 = vmul.f32 %v12604_v28, %v12602_v20  ;;  %11346 = vmatprep.subr.bf16.mxu0 %v14911_v1  ;;  %11378 = vmatprep.subr.bf16.mxu1 %v14913_v50 }
 0xb69   :  { %16303 = vst [vmem:[#allocation15_spill] sm:$0xff] %v15125_v59  ;;  %6739 = vmatmul.mubr.f32.vlgmr.msra.gmra.mrb[58].mxu0 %v15125_v59  ;;  %6810 = vmatmul.mubr.f32.vlgmr.msra.gmra.mrb[74].mxu1 %v15125_v59 }
 0xb6a   :  { %11348 = vmatpush1.bf16.msra.mxu0 %v14915_v34  ;;  %11380 = vmatpush1.bf16.msra.mxu1 %v14918_v55 }
 0xb6b   :  { %11350 = vmatprep.subr.bf16.mxu0 %v14923_v56  ;;  %11382 = vmatprep.subr.bf16.mxu1 %v14925_v44  ;;  %v16304_v44 = vld [vmem:[#allocation41_spill] sm:$0xff] }
 0xb6c   :  { %6977 = vmatprep.mubr.f32.mxu0 %v16112_v6  ;;  %7048 = vmatprep.mubr.f32.mxu1 %v16112_v6 }
 0xb6e   :  { %11352 = vmatpush1.bf16.msra.mxu0 %v14927_v24  ;;  %11384 = vmatpush1.bf16.msra.mxu1 %v14930_v4 }
 0xb6f   :  { %11354 = vmatprep.subr.bf16.mxu0 %v14935_v8  ;;  %11386 = vmatprep.subr.bf16.mxu1 %v14937_v7  ;;  %v16305_v7 = vld [vmem:[#allocation42_spill] sm:$0xff] }
 0xb72   :  { %11356 = vmatpush1.bf16.msra.mxu0 %v14939_v54  ;;  %11388 = vmatpush1.bf16.msra.mxu1 %v14942_v52 }
 0xb73   :  { %11358 = vmatprep.subr.bf16.mxu0 %v14947_v14  ;;  %11390 = vmatprep.subr.bf16.mxu1 %v14949_v39  ;;  %v16306_v14 = vld [vmem:[#allocation43_spill] sm:$0xff] }
 0xb76   :  { %11360 = vmatpush1.bf16.msra.mxu0 %v14951_v43  ;;  %11392 = vmatpush1.bf16.msra.mxu1 %v14954_v63 }
 0xb77   :  { %11362 = vmatprep.subr.bf16.mxu0 %v14959_v35  ;;  %11394 = vmatprep.subr.bf16.mxu1 %v14961_v37 }
 0xb7a   :  { %11364 = vmatpush1.bf16.msra.mxu0 %v14963_v32  ;;  %11396 = vmatpush1.bf16.msra.mxu1 %v14966_v61 }
 0xb7b   :  { %11366 = vmatprep.subr.bf16.mxu0 %v14971_v0  ;;  %11398 = vmatprep.subr.bf16.mxu1 %v14973_v62 }
 0xb7e   :  { %11368 = vmatpush1.bf16.msra.mxu0 %v14975_v33  ;;  %11400 = vmatpush1.bf16.msra.mxu1 %v14978_v57 }
 0xb7f   :  { %11370 = vmatprep.subr.bf16.mxu0 %v14983_v45  ;;  %11402 = vmatprep.subr.bf16.mxu1 %v14985_v60  ;;  %v16307_v45 = vld [vmem:[#allocation49_spill] sm:$0xff] }
 0xb82   :  { %11372 = vmatpush1.bf16.msra.mxu0 %v14987_v47  ;;  %11404 = vmatpush1.bf16.msra.mxu1 %v14990_v3 }
 0xb83   :  { %11374 = vmatprep.subr.bf16.mxu0 %v14995_v22  ;;  %11406 = vmatprep.subr.bf16.mxu1 %v14997_v2  ;;  %v16308_v2 = vld [vmem:[#allocation44_spill] sm:$0xff] }
 0xb86   :  { %11376 = vmatpush1.bf16.msra.mxu0 %v14999_v41  ;;  %11408 = vmatpush1.bf16.msra.mxu1 %v15002_v42 }
 0xb87   :  { %11410 = vmatprep.subr.bf16.mxu0 %v15007_v26  ;;  %11442 = vmatprep.subr.bf16.mxu1 %v15009_v13  ;;  %v16309_v13 = vld [vmem:[#allocation45_spill] sm:$0xff] }
 0xc1c   :  { %v6501_v1 = vpop.f32.mrb[36].mxu0  ;;  %v6572_v50 = vpop.f32.mrb[52].mxu1 }
 0xc1d   :  { %v12101_v34 = vadd.f32 %v6501_v1, %v14825_v30  ;;  %v6503_v55 = vpop.f32.mrb[37].mxu0  ;;  %v6574_v56 = vpop.f32.mrb[53].mxu1  ;;  %v12117_v39 = vadd.f32 %v6572_v50, %v16306_v14 }
 0xc1e   :  { %v12102_v24 = vadd.f32 %v6503_v55, %v16304_v44  ;;  %v12118_v54 = vadd.f32 %v6574_v56, %v16305_v7  ;;  %v16312_v56 = vld [vmem:[#allocation17_spill] sm:$0xff] }
 0xc1f   :  { %v9564_v4 = vmul.f32 -1.442695, %v12101_v34 }
 0xc20   :  { %v9565_v8 = vmul.f32 -1.442695, %v12102_v24  ;;  %v9566_v52 = vmul.f32 -1.442695, %v12118_v54  ;;  %v16313_v24 = vld [vmem:[#allocation21_spill] sm:$0xff]  ;;  %v16315_v54 = vld [vmem:[#allocation31_spill] sm:$0xff] }
 0xc21   :  { %12605 = vpow2.f32 %v9564_v4 }
 0xc22   :  { %12607 = vpow2.f32 %v9565_v8  ;;  %v16314_v8 = vld [vmem:[#allocation26_spill] sm:$0xff] }
 0xc23   :  { %12609 = vpow2.f32 %v9566_v52  ;;  %v16316_v52 = vld [vmem:[#allocation37_spill] sm:$0xff] }
 0xc24   :  { %12611 = vtanh.f32 %v12117_v39  ;;  %v16317_v39 = vld [vmem:[#allocation16_spill] sm:$0xff] }
 0xc2b   :  { %v12606_v43 = vpop.eup %12605 }
 0xc2c   :  { %v12608_v63 = vpop.eup %12607  ;;  %v6584_v35 = vadd.f32 1.0, %v12606_v43  ;;  %v16318_v43 = vld [vmem:[#allocation20_spill] sm:$0xff] }
 0xc2d   :  { %v6590_v37 = vadd.f32 1.0, %v12608_v63  ;;  %v12610_v32 = vpop.eup %12609  ;;  %v16319_v63 = vld [vmem:[#allocation38_spill] sm:$0xff] }
 0xc2e   :  { %12613 = vrcp.f32 %v6584_v35  ;;  %v12612_v61 = vpop.eup %12611  ;;  %v6597_v57 = vadd.f32 1.0, %v12610_v32  ;;  %v16320_v35 = vld [vmem:[#allocation18_spill] sm:$0xff]  ;;  %v16322_v32 = vld [vmem:[#allocation28_spill] sm:$0xff] }
 0xc2f   :  { %12615 = vrcp.f32 %v6590_v37  ;;  %v16321_v37 = vld [vmem:[#allocation19_spill] sm:$0xff] }
 0xc30   :  { %12617 = vrcp.f32 %v6597_v57  ;;  %v16324_v57 = vld [vmem:[#allocation50_spill] sm:$0xff] }
 0xc38   :  { %v12614_v0 = vpop.eup %12613 }
 0xc39   :  { %v12616_v62 = vpop.eup %12615  ;;  %v6601_v33 = vmul.f32 %v12614_v0, %v12612_v61  ;;  %v16323_v61 = vld [vmem:[#allocation39_spill] sm:$0xff] }
 0xc3a   :  { %v6600_v60 = vmul.f32 %v12616_v62, %v16307_v45  ;;  %v12618_v23 = vpop.eup %12617  ;;  %v16325_v45 = vld [vmem:[#allocation33_spill] sm:$0xff] }
 0xc3c   :  { %v15170_v47 = vadd.f32 %v6601_v33, %v6600_v60  ;;  %v6740_v3 = vpop.f32.mrb[58].mxu0  ;;  %v6811_v22 = vpop.f32.mrb[74].mxu1 }
 0xc3d   :  { %v12139_v41 = vadd.f32 %v6740_v3, %v16308_v2  ;;  %v6742_v42 = vpop.f32.mrb[59].mxu0  ;;  %v6813_v26 = vpop.f32.mrb[75].mxu1  ;;  %v12155_v28 = vadd.f32 %v6811_v22, %v14863_v31 }
 0xc3e   :  { %v12140_v48 = vadd.f32 %v6742_v42, %v16309_v13  ;;  %12619 = vtanh.f32 %v15170_v47  ;;  %v12156_v46 = vadd.f32 %v6813_v26, %v16310_v10  ;;  %v7338_v26 = vld [vmem:[#allocation9 + $0x58] sm:$0xff] }
 0xc3f   :  { %v9567_v16 = vmul.f32 -1.442695, %v12139_v41 }
 0xc40   :  { %v9568_v17 = vmul.f32 -1.442695, %v12140_v48  ;;  %v9569_v20 = vmul.f32 -1.442695, %v12156_v46  ;;  %v7339_v46 = vld [vmem:[#allocation9 + $0x60] sm:$0xff] }
 0xc41   :  { %12621 = vpow2.f32 %v9567_v16  ;;  %v7342_v16 = vld [vmem:[#allocation9 + $0x78] sm:$0xff] }
 0xc42   :  { %12623 = vpow2.f32 %v9568_v17  ;;  %v7335_v17 = vld [vmem:[#allocation9 + $0x40] sm:$0xff] }
 0xc43   :  { %12625 = vpow2.f32 %v9569_v20  ;;  %v7337_v20 = vld [vmem:[#allocation9 + $0x50] sm:$0xff] }
 0xc44   :  { %12627 = vtanh.f32 %v12155_v28  ;;  %v7341_v28 = vld [vmem:[#allocation9 + $0x70] sm:$0xff] }
 0xc48   :  { %v12620_v29 = vpop.eup %12619 }
 0xc49   :  { %v15177_v1 = vmul.f32 %v12620_v29, %v12618_v23  ;;  %v15237_v23 = vpack.c.bf16 %v7342_v16, %v7338_v26  ;;  %v15239_v29 = vpack.c.bf16 %v7339_v46, %v7335_v17  ;;  %v7368_v26 = vld [vmem:[#allocation9 + $0x148] sm:$0xff]  ;;  %v7370_v17 = vld [vmem:[#allocation9 + $0x158] sm:$0xff] }
 0xc4a   :  { %v7372_v16 = vld [vmem:[#allocation9 + $0x168] sm:$0xff] }
 0xc4b   :  { %16311 = vst [vmem:[#allocation22_spill] sm:$0xff] %v15177_v1  ;;  %v12622_v50 = vpop.eup %12621  ;;  %6978 = vmatmul.mubr.f32.vlgmr.msra.gmra.mrb[38].mxu0 %v15177_v1  ;;  %7049 = vmatmul.mubr.f32.vlgmr.msra.gmra.mrb[54].mxu1 %v15177_v1  ;;  %v15283_v46 = vpack.c.bf16 %v7372_v16, %v7368_v26  ;;  %v7387_v26 = vld [vmem:[#allocation9 + $0x1e0] sm:$0xff] }
 0xc4c   :  { %v12624_v34 = vpop.eup %12623  ;;  %v6823_v55 = vadd.f32 1.0, %v12622_v50  ;;  %11412 = vmatpush1.bf16.msra.mxu0 %v16312_v56  ;;  %11444 = vmatpush1.bf16.msra.mxu1 %v16313_v24  ;;  %v15242_v50 = vpack.c.bf16 %v7341_v28, %v7337_v20  ;;  %v7346_v56 = vld [vmem:[#allocation9 + $0x98] sm:$0xff]  ;;  %v7367_v28 = vld [vmem:[#allocation9 + $0x140] sm:$0xff] }
 0xc4d   :  { %v6829_v4 = vadd.f32 1.0, %v12624_v34  ;;  %11414 = vmatprep.subr.bf16.mxu0 %v16314_v8  ;;  %11446 = vmatprep.subr.bf16.mxu1 %v16315_v54  ;;  %v12626_v0 = vpop.eup %12625  ;;  %v7344_v34 = vld [vmem:[#allocation9 + $0x88] sm:$0xff]  ;;  %v7343_v8 = vld [vmem:[#allocation9 + $0x80] sm:$0xff]  ;;  %v7374_v20 = vld [vmem:[#allocation9 + $0x178] sm:$0xff] }
 0xc4e   :  { %12629 = vrcp.f32 %v6823_v55  ;;  %7216 = vmatprep.mubr.f32.mxu0 %v16112_v6  ;;  %7287 = vmatprep.mubr.f32.mxu1 %v16112_v6  ;;  %v12628_v62 = vpop.eup %12627  ;;  %v6836_v22 = vadd.f32 1.0, %v12626_v0  ;;  %v7348_v55 = vld [vmem:[#allocation9 + $0xa8] sm:$0xff]  ;;  %v7347_v54 = vld [vmem:[#allocation9 + $0xa0] sm:$0xff] }
 0xc4f   :  { %12631 = vrcp.f32 %v6829_v4  ;;  %v15247_v24 = vpack.c.bf16 %v7348_v55, %v7344_v34  ;;  %v7350_v4 = vld [vmem:[#allocation9 + $0xb8] sm:$0xff]  ;;  %v7371_v34 = vld [vmem:[#allocation9 + $0x160] sm:$0xff]  ;;  %v15285_v55 = vpack.c.bf16 %v7374_v20, %v7370_v17  ;;  %v7385_v20 = vld [vmem:[#allocation9 + $0x1d0] sm:$0xff] }
 0xc50   :  { %11416 = vmatpush1.bf16.msra.mxu0 %v16316_v52  ;;  %11448 = vmatpush1.bf16.msra.mxu1 %v16317_v39  ;;  %12633 = vrcp.f32 %v6836_v22  ;;  %v15249_v52 = vpack.c.bf16 %v7350_v4, %v7346_v56  ;;  %v15251_v39 = vpack.c.bf16 %v7347_v54, %v7343_v8  ;;  %v7357_v22 = vld [vmem:[#allocation9 + $0xf0] sm:$0xff]  ;;  %v15287_v56 = vpack.c.bf16 %v7371_v34, %v7367_v28 }
 0xc51   :  { %11418 = vmatprep.subr.bf16.mxu0 %v16318_v43  ;;  %11450 = vmatprep.subr.bf16.mxu1 %v16319_v63  ;;  %v7345_v43 = vld [vmem:[#allocation9 + $0x90] sm:$0xff] }
 0xc52   :  { %v7349_v63 = vld [vmem:[#allocation9 + $0xb0] sm:$0xff] }
 0xc53   :  { %v7369_v4 = vld [vmem:[#allocation9 + $0x150] sm:$0xff] }
 0xc54   :  { %11420 = vmatpush1.bf16.msra.mxu0 %v16320_v35  ;;  %11452 = vmatpush1.bf16.msra.mxu1 %v16321_v37  ;;  %v15254_v35 = vpack.c.bf16 %v7349_v63, %v7345_v43  ;;  %v7352_v37 = vld [vmem:[#allocation9 + $0xc8] sm:$0xff]  ;;  %v7373_v8 = vld [vmem:[#allocation9 + $0x170] sm:$0xff] }
 0xc55   :  { %11422 = vmatprep.subr.bf16.mxu0 %v16322_v32  ;;  %11454 = vmatprep.subr.bf16.mxu1 %v16323_v61  ;;  %v7356_v32 = vld [vmem:[#allocation9 + $0xe8] sm:$0xff]  ;;  %v7354_v61 = vld [vmem:[#allocation9 + $0xd8] sm:$0xff]  ;;  %v15290_v54 = vpack.c.bf16 %v7373_v8, %v7369_v4  ;;  %v7389_v28 = vld [vmem:[#allocation9 + $0x1f0] sm:$0xff] }
 0xc56   :  { %v15259_v0 = vpack.c.bf16 %v7356_v32, %v7352_v37  ;;  %v7376_v43 = vld [vmem:[#allocation9 + $0x188] sm:$0xff]  ;;  %v7378_v37 = vld [vmem:[#allocation9 + $0x198] sm:$0xff]  ;;  %v15314_v34 = vpack.c.bf16 %v7389_v28, %v7385_v20 }
 0xc57   :  { %v7380_v63 = vld [vmem:[#allocation9 + $0x1a8] sm:$0xff] }
 0xc58   :  { %v12630_v33 = vpop.eup %12629  ;;  %11424 = vmatpush1.bf16.msra.mxu0 %v16324_v57  ;;  %11456 = vmatpush1.bf16.msra.mxu1 %v16325_v45  ;;  %v7355_v57 = vld [vmem:[#allocation9 + $0xe0] sm:$0xff]  ;;  %v15295_v32 = vpack.c.bf16 %v7380_v63, %v7376_v43  ;;  %v7567_v4 = vld [vmem:[#allocation9 + $0x208] sm:$0xff]  ;;  %v7569_v43 = vld [vmem:[#allocation9 + $0x218] sm:$0xff] }
 0xc59   :  { %v12632_v60 = vpop.eup %12631  ;;  %v6840_v3 = vmul.f32 %v12630_v33, %v12628_v62  ;;  %11426 = vmatprep.subr.bf16.mxu0 %v15071_v19  ;;  %11458 = vmatprep.subr.bf16.mxu1 %v15073_v36  ;;  %v7332_v19 = vld [vmem:[#allocation9 + $0x28] sm:$0xff]  ;;  %v7330_v36 = vld [vmem:[#allocation9 + $0x18] sm:$0xff]  ;;  %v7351_v33 = vld [vmem:[#allocation9 + $0xc0] sm:$0xff] }
 0xc5a   :  { %v6839_v41 = vmul.f32 %v12632_v60, %v15088_v15  ;;  %v7358_v62 = vld [vmem:[#allocation9 + $0xf8] sm:$0xff]  ;;  %v15263_v60 = vpack.c.bf16 %v7355_v57, %v7351_v33  ;;  %v7379_v33 = vld [vmem:[#allocation9 + $0x1a0] sm:$0xff]  ;;  %v7571_v8 = vld [vmem:[#allocation9 + $0x228] sm:$0xff] }
 0xc5b   :  { %v15261_v45 = vpack.c.bf16 %v7358_v62, %v7354_v61  ;;  %v7382_v61 = vld [vmem:[#allocation9 + $0x1b8] sm:$0xff]  ;;  %v7375_v62 = vld [vmem:[#allocation9 + $0x180] sm:$0xff]  ;;  %v15319_v63 = vpack.c.bf16 %v7571_v8, %v7567_v4 }
 0xc5c   :  { %v15200_v42 = vadd.f32 %v6840_v3, %v6839_v41  ;;  %11428 = vmatpush1.bf16.msra.mxu0 %v15077_v58  ;;  %11460 = vmatpush1.bf16.msra.mxu1 %v15079_v25  ;;  %v7328_v25 = vld [vmem:[#allocation9 + $0x8] sm:$0xff]  ;;  %v7353_v3 = vld [vmem:[#allocation9 + $0xd0] sm:$0xff]  ;;  %v15297_v57 = vpack.c.bf16 %v7382_v61, %v7378_v37  ;;  %v7573_v37 = vld [vmem:[#allocation9 + $0x238] sm:$0xff] }
 0xc5d   :  { %11430 = vmatprep.subr.bf16.mxu0 %v15083_v18  ;;  %11462 = vmatprep.subr.bf16.mxu1 %v15085_v51  ;;  %v12634_v18 = vpop.eup %12633  ;;  %v15223_v58 = vpack.c.bf16 %v7332_v19, %v7328_v25  ;;  %v15266_v41 = vpack.c.bf16 %v7357_v22, %v7353_v3  ;;  %v7362_v25 = vld [vmem:[#allocation9 + $0x118] sm:$0xff]  ;;  %v15299_v3 = vpack.c.bf16 %v7379_v33, %v7375_v62  ;;  %v7377_v22 = vld [vmem:[#allocation9 + $0x190] sm:$0xff] }
 0xc5e   :  { %12635 = vtanh.f32 %v15200_v42  ;;  %v15321_v61 = vpack.c.bf16 %v7573_v37, %v7569_v43 }
 0xc60   :  { %11432 = vmatpush1.bf16.msra.mxu0 %v15092_v53  ;;  %11464 = vmatpush1.bf16.msra.mxu1 %v15094_v11  ;;  %v7334_v53 = vld [vmem:[#allocation9 + $0x38] sm:$0xff]  ;;  %v7327_v11 = vld [vmem:[#allocation9] sm:$0xff] }
 0xc61   :  { %11434 = vmatprep.subr.bf16.mxu0 %v15098_v9  ;;  %11466 = vmatprep.subr.bf16.mxu1 %v15100_v21  ;;  %v7331_v9 = vld [vmem:[#allocation9 + $0x20] sm:$0xff]  ;;  %v15225_v21 = vpack.c.bf16 %v7334_v53, %v7330_v36  ;;  %v7366_v36 = vld [vmem:[#allocation9 + $0x138] sm:$0xff] }
 0xc62   :  { %v7359_v53 = vld [vmem:[#allocation9 + $0x100] sm:$0xff] }
 0xc64   :  { %11436 = vmatpush1.bf16.msra.mxu0 %v15105_v40  ;;  %11468 = vmatpush1.bf16.msra.mxu1 %v15107_v38  ;;  %v15227_v40 = vpack.c.bf16 %v7331_v9, %v7327_v11  ;;  %v7329_v38 = vld [vmem:[#allocation9 + $0x10] sm:$0xff]  ;;  %v7363_v11 = vld [vmem:[#allocation9 + $0x120] sm:$0xff]  ;;  %v15273_v9 = vpack.c.bf16 %v7366_v36, %v7362_v25  ;;  %v7384_v25 = vld [vmem:[#allocation9 + $0x1c8] sm:$0xff] }
 0xc65   :  { %11438 = vmatprep.subr.bf16.mxu0 %v15111_v49  ;;  %11470 = vmatprep.subr.bf16.mxu1 %v15113_v12  ;;  %v7333_v49 = vld [vmem:[#allocation9 + $0x30] sm:$0xff]  ;;  %v7388_v36 = vld [vmem:[#allocation9 + $0x1e8] sm:$0xff] }
 0xc66   :  { %v15230_v12 = vpack.c.bf16 %v7333_v49, %v7329_v38  ;;  %v15275_v38 = vpack.c.bf16 %v7363_v11, %v7359_v53  ;;  %v7361_v49 = vld [vmem:[#allocation9 + $0x110] sm:$0xff]  ;;  %v7386_v53 = vld [vmem:[#allocation9 + $0x1d8] sm:$0xff]  ;;  %v15307_v11 = vpack.c.bf16 %v7388_v36, %v7384_v25 }
 0xc68   :  { %v12636_v15 = vpop.eup %12635  ;;  %11440 = vmatpush1.bf16.msra.mxu0 %v15117_v5  ;;  %11472 = vmatpush1.bf16.msra.mxu1 %v15119_v27  ;;  %v7336_v5 = vld [vmem:[#allocation9 + $0x48] sm:$0xff] }
 0xc69   :  { %v15217_v51 = vmul.f32 %v12636_v15, %v12634_v18  ;;  %11474 = vmatprep.subr.bf16.mxu0 %v15223_v58  ;;  %11506 = vmatprep.subr.bf16.mxu1 %v15225_v21  ;;  %v7340_v27 = vld [vmem:[#allocation9 + $0x68] sm:$0xff] }
 0xc6a   :  { %v15235_v48 = vpack.c.bf16 %v7340_v27, %v7336_v5  ;;  %v7360_v18 = vld [vmem:[#allocation9 + $0x108] sm:$0xff]  ;;  %v7365_v5 = vld [vmem:[#allocation9 + $0x130] sm:$0xff] }
 0xc6b   :  { %16326 = vst [vmem:[#allocation23_spill] sm:$0xff] %v15217_v51  ;;  %7217 = vmatmul.mubr.f32.vlgmr.msra.gmra.mrb[56].mxu0 %v15217_v51  ;;  %7288 = vmatmul.mubr.f32.vlgmr.msra.gmra.mrb[72].mxu1 %v15217_v51  ;;  %v7364_v15 = vld [vmem:[#allocation9 + $0x128] sm:$0xff]  ;;  %v15278_v27 = vpack.c.bf16 %v7365_v5, %v7361_v49  ;;  %v7390_v49 = vld [vmem:[#allocation9 + $0x1f8] sm:$0xff]  ;;  %v7383_v5 = vld [vmem:[#allocation9 + $0x1c0] sm:$0xff] }
 0xc6c   :  { %7455 = vmatprep.mubr.f32.mxu0 %v16112_v6  ;;  %7526 = vmatprep.mubr.f32.mxu1 %v16112_v6  ;;  %v15271_v19 = vpack.c.bf16 %v7364_v15, %v7360_v18  ;;  %v7381_v18 = vld [vmem:[#allocation9 + $0x1b0] sm:$0xff]  ;;  %v15309_v16 = vpack.c.bf16 %v7390_v49, %v7386_v53  ;;  %v15311_v17 = vpack.c.bf16 %v7387_v26, %v7383_v5 }
 0xc6d   :  { %11476 = vmatpush1.bf16.msra.mxu0 %v15227_v40  ;;  %11508 = vmatpush1.bf16.msra.mxu1 %v15230_v12  ;;  %v15302_v15 = vpack.c.bf16 %v7381_v18, %v7377_v22 }
 0xc6e   :  { %11478 = vmatprep.subr.bf16.mxu0 %v15235_v48  ;;  %11510 = vmatprep.subr.bf16.mxu1 %v15237_v23 }
 0xc71   :  { %11480 = vmatpush1.bf16.msra.mxu0 %v15239_v29  ;;  %11512 = vmatpush1.bf16.msra.mxu1 %v15242_v50 }
 0xc72   :  { %11482 = vmatprep.subr.bf16.mxu0 %v15247_v24  ;;  %11514 = vmatprep.subr.bf16.mxu1 %v15249_v52 }
 0xc75   :  { %11484 = vmatpush1.bf16.msra.mxu0 %v15251_v39  ;;  %11516 = vmatpush1.bf16.msra.mxu1 %v15254_v35 }
 0xc76   :  { %11486 = vmatprep.subr.bf16.mxu0 %v15259_v0  ;;  %11518 = vmatprep.subr.bf16.mxu1 %v15261_v45 }
 0xc79   :  { %11488 = vmatpush1.bf16.msra.mxu0 %v15263_v60  ;;  %11520 = vmatpush1.bf16.msra.mxu1 %v15266_v41 }
 0xc7a   :  { %11490 = vmatprep.subr.bf16.mxu0 %v15271_v19  ;;  %11522 = vmatprep.subr.bf16.mxu1 %v15273_v9 }
 0xc7d   :  { %11492 = vmatpush1.bf16.msra.mxu0 %v15275_v38  ;;  %11524 = vmatpush1.bf16.msra.mxu1 %v15278_v27 }
 0xc7e   :  { %11494 = vmatprep.subr.bf16.mxu0 %v15283_v46  ;;  %11526 = vmatprep.subr.bf16.mxu1 %v15285_v55 }
 0xc81   :  { %11496 = vmatpush1.bf16.msra.mxu0 %v15287_v56  ;;  %11528 = vmatpush1.bf16.msra.mxu1 %v15290_v54 }
 0xc82   :  { %11498 = vmatprep.subr.bf16.mxu0 %v15295_v32  ;;  %11530 = vmatprep.subr.bf16.mxu1 %v15297_v57 }
 0xc85   :  { %11500 = vmatpush1.bf16.msra.mxu0 %v15299_v3  ;;  %11532 = vmatpush1.bf16.msra.mxu1 %v15302_v15 }
 0xc86   :  { %11502 = vmatprep.subr.bf16.mxu0 %v15307_v11  ;;  %11534 = vmatprep.subr.bf16.mxu1 %v15309_v16 }
 0xc89   :  { %11504 = vmatpush1.bf16.msra.mxu0 %v15311_v17  ;;  %11536 = vmatpush1.bf16.msra.mxu1 %v15314_v34 }
 0xc8a   :  { %11538 = vmatprep.subr.bf16.mxu0 %v15319_v63  ;;  %11570 = vmatprep.subr.bf16.mxu1 %v15321_v61 }
 0xd1e   :  { %v6979_v62 = vpop.f32.mrb[38].mxu0  ;;  %v7050_v33 = vpop.f32.mrb[54].mxu1 }
 0xd1f   :  { %v12103_v22 = vadd.f32 %v6979_v62, %v14825_v30  ;;  %v6981_v18 = vpop.f32.mrb[39].mxu0  ;;  %v7052_v25 = vpop.f32.mrb[55].mxu1  ;;  %v12119_v20 = vadd.f32 %v7050_v33, %v16306_v14  ;;  %v7583_v14 = vld [vmem:[#allocation9 + $0x288] sm:$0xff] }
 0xd20   :  { %v12104_v36 = vadd.f32 %v6981_v18, %v16304_v44  ;;  %v12120_v5 = vadd.f32 %v7052_v25, %v16305_v7  ;;  %v7587_v7 = vld [vmem:[#allocation9 + $0x2a8] sm:$0xff]  ;;  %v7585_v44 = vld [vmem:[#allocation9 + $0x298] sm:$0xff] }
 0xd21   :  { %v9570_v53 = vmul.f32 -1.442695, %v12103_v22 }
 0xd22   :  { %v9571_v49 = vmul.f32 -1.442695, %v12104_v36  ;;  %v9572_v26 = vmul.f32 -1.442695, %v12120_v5 }
 0xd23   :  { %12637 = vpow2.f32 %v9570_v53 }
 0xd24   :  { %12639 = vpow2.f32 %v9571_v49 }
 0xd25   :  { %12641 = vpow2.f32 %v9572_v26 }
 0xd26   :  { %12643 = vtanh.f32 %v12119_v20 }
 0xd2d   :  { %v12638_v28 = vpop.eup %12637 }
 0xd2e   :  { %v12640_v4 = vpop.eup %12639  ;;  %v7062_v8 = vadd.f32 1.0, %v12638_v28 }
 0xd2f   :  { %v7068_v43 = vadd.f32 1.0, %v12640_v4  ;;  %v12642_v37 = vpop.eup %12641 }
 0xd30   :  { %12645 = vrcp.f32 %v7062_v8  ;;  %v12644_v62 = vpop.eup %12643  ;;  %v7075_v53 = vadd.f32 1.0, %v12642_v37 }
 0xd31   :  { %12647 = vrcp.f32 %v7068_v43 }
 0xd32   :  { %12649 = vrcp.f32 %v7075_v53  ;;  %v7579_v53 = vld [vmem:[#allocation9 + $0x268] sm:$0xff] }
 0xd3a   :  { %v12646_v18 = vpop.eup %12645 }
 0xd3b   :  { %v12648_v22 = vpop.eup %12647  ;;  %v7079_v36 = vmul.f32 %v12646_v18, %v12644_v62  ;;  %v7570_v62 = vld [vmem:[#allocation9 + $0x220] sm:$0xff]  ;;  %v7568_v18 = vld [vmem:[#allocation9 + $0x210] sm:$0xff] }
 0xd3c   :  { %v7078_v49 = vmul.f32 %v12648_v22, %v15170_v47  ;;  %v7566_v47 = vld [vmem:[#allocation9 + $0x200] sm:$0xff]  ;;  %v7572_v22 = vld [vmem:[#allocation9 + $0x230] sm:$0xff]  ;;  %v12650_v59 = vpop.eup %12649 }
 0xd3e   :  { %v15330_v25 = vadd.f32 %v7079_v36, %v7078_v49  ;;  %v7218_v5 = vpop.f32.mrb[56].mxu0  ;;  %v7289_v33 = vpop.f32.mrb[72].mxu1  ;;  %v7575_v36 = vld [vmem:[#allocation9 + $0x248] sm:$0xff]  ;;  %v7577_v49 = vld [vmem:[#allocation9 + $0x258] sm:$0xff] }
 0xd3f   :  { %v12137_v28 = vadd.f32 %v7218_v5, %v16308_v2  ;;  %v7220_v26 = vpop.f32.mrb[57].mxu0  ;;  %v7291_v20 = vpop.f32.mrb[73].mxu1  ;;  %v7581_v5 = vld [vmem:[#allocation9 + $0x278] sm:$0xff]  ;;  %v7576_v2 = vld [vmem:[#allocation9 + $0x250] sm:$0xff] }
 0xd40   :  { %16327 = vst [vmem:[#allocation24_spill] sm:$0xff] %v15330_v25  ;;  %v12138_v4 = vadd.f32 %v7220_v26, %v16309_v13  ;;  %12651 = vtanh.f32 %v15330_v25  ;;  %v12154_v37 = vadd.f32 %v7291_v20, %v16310_v10  ;;  %v15336_v26 = vpack.c.bf16 %v7570_v62, %v7566_v47  ;;  %v7580_v25 = vld [vmem:[#allocation9 + $0x270] sm:$0xff] }
 0xd41   :  { %v9573_v8 = vmul.f32 -1.442695, %v12137_v28  ;;  %v15338_v13 = vpack.c.bf16 %v7572_v22, %v7568_v18  ;;  %v7574_v28 = vld [vmem:[#allocation9 + $0x240] sm:$0xff]  ;;  %v15345_v10 = vpack.c.bf16 %v7581_v5, %v7577_v49  ;;  %v7588_v5 = vld [vmem:[#allocation9 + $0x2b0] sm:$0xff] }
 0xd42   :  { %v9574_v43 = vmul.f32 -1.442695, %v12138_v4  ;;  %v9575_v1 = vmul.f32 -1.442695, %v12154_v37  ;;  %16328 = vst [vmem:[#allocation27_spill] sm:$0xff] %v15336_v26  ;;  %v7578_v4 = vld [vmem:[#allocation9 + $0x260] sm:$0xff] }
 0xd43   :  { %12653 = vpow2.f32 %v9573_v8  ;;  %16329 = vst [vmem:[#allocation34_spill] sm:$0xff] %v15338_v13  ;;  %v12153_v8 = vadd.f32 %v7289_v33, %v14863_v31  ;;  %16332 = vst [vmem:[#allocation32_spill] sm:$0xff] %v15345_v10  ;;  %v7589_v37 = vld [vmem:[#allocation9 + $0x2b8] sm:$0xff]  ;;  %v7582_v33 = vld [vmem:[#allocation9 + $0x280] sm:$0xff] }
 0xd44   :  { %12655 = vpow2.f32 %v9574_v43  ;;  %v15343_v43 = vpack.c.bf16 %v7579_v53, %v7575_v36  ;;  %v7586_v22 = vld [vmem:[#allocation9 + $0x2a0] sm:$0xff]  ;;  %v15357_v53 = vpack.c.bf16 %v7587_v7, %v7583_v14  ;;  %v15359_v49 = vpack.c.bf16 %v7589_v37, %v7585_v44 }
 0xd45   :  { %12657 = vpow2.f32 %v9575_v1  ;;  %v7584_v1 = vld [vmem:[#allocation9 + $0x290] sm:$0xff]  ;;  %v15365_v7 = vpack.c.bf16 %v7586_v22, %v7582_v33  ;;  %v7590_v14 = vld [vmem:[#allocation9 + $0x2c0] sm:$0xff] }
 0xd46   :  { %16331 = vst [vmem:[#allocation29_spill] sm:$0xff] %v15343_v43  ;;  %12659 = vtanh.f32 %v12153_v8  ;;  %16335 = vst [vmem:[#allocation40_spill] sm:$0xff] %v15357_v53  ;;  %v15367_v44 = vpack.c.bf16 %v7588_v5, %v7584_v1  ;;  %v7598_v1 = vld [vmem:[#allocation9 + $0x300] sm:$0xff] }
 0xd47   :  { %16336 = vst [vmem:[#allocation49_spill] sm:$0xff] %v15359_v49  ;;  %16337 = vst [vmem:[#allocation17_spill] sm:$0xff] %v15365_v7  ;;  %v7602_v5 = vld [vmem:[#allocation9 + $0x320] sm:$0xff] }
 0xd48   :  { %16338 = vst [vmem:[#allocation21_spill] sm:$0xff] %v15367_v44 }
 0xd4a   :  { %v12652_v51 = vpop.eup %12651 }
 0xd4b   :  { %v15341_v20 = vmul.f32 %v12652_v51, %v12650_v59  ;;  %v15351_v59 = vpack.c.bf16 %v7578_v4, %v7574_v28  ;;  %v15353_v51 = vpack.c.bf16 %v7580_v25, %v7576_v2  ;;  %v7595_v28 = vld [vmem:[#allocation9 + $0x2e8] sm:$0xff]  ;;  %v7593_v4 = vld [vmem:[#allocation9 + $0x2d8] sm:$0xff]  ;;  %v7594_v25 = vld [vmem:[#allocation9 + $0x2e0] sm:$0xff] }
 0xd4c   :  { %v7597_v2 = vld [vmem:[#allocation9 + $0x2f8] sm:$0xff]  ;;  %v15377_v33 = vpack.c.bf16 %v7594_v25, %v7590_v14 }
 0xd4d   :  { %16330 = vst [vmem:[#allocation30_spill] sm:$0xff] %v15341_v20  ;;  %v12654_v47 = vpop.eup %12653  ;;  %7456 = vmatmul.mubr.f32.vlgmr.msra.gmra.mrb[40].mxu0 %v15341_v20  ;;  %7527 = vmatmul.mubr.f32.vlgmr.msra.gmra.mrb[56].mxu1 %v15341_v20  ;;  %16333 = vst [vmem:[#allocation35_spill] sm:$0xff] %v15351_v59  ;;  %v15373_v37 = vpack.c.bf16 %v7597_v2, %v7593_v4  ;;  %v7603_v20 = vld [vmem:[#allocation9 + $0x328] sm:$0xff]  ;;  %v7600_v4 = vld [vmem:[#allocation9 + $0x310] sm:$0xff] }
 0xd4e   :  { %v12656_v62 = vpop.eup %12655  ;;  %v7301_v18 = vadd.f32 1.0, %v12654_v47  ;;  %11540 = vmatpush1.bf16.msra.mxu0 %v15336_v26  ;;  %11572 = vmatpush1.bf16.msra.mxu1 %v15338_v13  ;;  %16334 = vst [vmem:[#allocation36_spill] sm:$0xff] %v15353_v51  ;;  %v7591_v47 = vld [vmem:[#allocation9 + $0x2c8] sm:$0xff]  ;;  %16341 = vst [vmem:[#allocation37_spill] sm:$0xff] %v15377_v33  ;;  %v7604_v2 = vld [vmem:[#allocation9 + $0x330] sm:$0xff] }
 0xd4f   :  { %v7307_v36 = vadd.f32 1.0, %v12656_v62  ;;  %11542 = vmatprep.subr.bf16.mxu0 %v15343_v43  ;;  %11574 = vmatprep.subr.bf16.mxu1 %v15345_v10  ;;  %v15371_v8 = vpack.c.bf16 %v7595_v28, %v7591_v47  ;;  %16340 = vst [vmem:[#allocation31_spill] sm:$0xff] %v15373_v37  ;;  %v7592_v62 = vld [vmem:[#allocation9 + $0x2d0] sm:$0xff]  ;;  %v7613_v14 = vld [vmem:[#allocation9 + $0x378] sm:$0xff] }
 0xd50   :  { %12661 = vrcp.f32 %v7301_v18  ;;  %7694 = vmatprep.mubr.f32.mxu0 %v16112_v6  ;;  %7765 = vmatprep.mubr.f32.mxu1 %v16112_v6  ;;  %v7596_v18 = vld [vmem:[#allocation9 + $0x2f0] sm:$0xff] }
 0xd51   :  { %12663 = vrcp.f32 %v7307_v36  ;;  %16339 = vst [vmem:[#allocation26_spill] sm:$0xff] %v15371_v8  ;;  %v7599_v36 = vld [vmem:[#allocation9 + $0x308] sm:$0xff]  ;;  %v15379_v22 = vpack.c.bf16 %v7596_v18, %v7592_v62  ;;  %v15389_v18 = vpack.c.bf16 %v7602_v5, %v7598_v1  ;;  %v7612_v13 = vld [vmem:[#allocation9 + $0x370] sm:$0xff] }
 0xd52   :  { %11544 = vmatpush1.bf16.msra.mxu0 %v15351_v59  ;;  %11576 = vmatpush1.bf16.msra.mxu1 %v15353_v51  ;;  %v7601_v59 = vld [vmem:[#allocation9 + $0x318] sm:$0xff]  ;;  %v15383_v47 = vpack.c.bf16 %v7603_v20, %v7599_v36  ;;  %v7606_v20 = vld [vmem:[#allocation9 + $0x340] sm:$0xff]  ;;  %v7619_v5 = vld [vmem:[#allocation9 + $0x3a8] sm:$0xff] }
 0xd53   :  { %11546 = vmatprep.subr.bf16.mxu0 %v15357_v53  ;;  %11578 = vmatprep.subr.bf16.mxu1 %v15359_v49  ;;  %v7605_v51 = vld [vmem:[#allocation9 + $0x338] sm:$0xff]  ;;  %16342 = vst [vmem:[#allocation16_spill] sm:$0xff] %v15379_v22  ;;  %v7607_v49 = vld [vmem:[#allocation9 + $0x348] sm:$0xff] }
 0xd54   :  { %v15385_v28 = vpack.c.bf16 %v7605_v51, %v7601_v59  ;;  %v7611_v53 = vld [vmem:[#allocation9 + $0x368] sm:$0xff]  ;;  %v7610_v59 = vld [vmem:[#allocation9 + $0x360] sm:$0xff] }
 0xd55   :  { %v15395_v10 = vpack.c.bf16 %v7611_v53, %v7607_v49  ;;  %v7614_v49 = vld [vmem:[#allocation9 + $0x380] sm:$0xff] }
 0xd56   :  { %11548 = vmatpush1.bf16.msra.mxu0 %v15365_v7  ;;  %11580 = vmatpush1.bf16.msra.mxu1 %v15367_v44  ;;  %v12658_v7 = vpop.eup %12657  ;;  %v7609_v44 = vld [vmem:[#allocation9 + $0x358] sm:$0xff] }
 0xd57   :  { %11550 = vmatprep.subr.bf16.mxu0 %v15371_v8  ;;  %11582 = vmatprep.subr.bf16.mxu1 %v15373_v37  ;;  %v12660_v25 = vpop.eup %12659  ;;  %v15391_v37 = vpack.c.bf16 %v7604_v2, %v7600_v4  ;;  %v7314_v8 = vadd.f32 1.0, %v12658_v7  ;;  %v15397_v43 = vpack.c.bf16 %v7613_v14, %v7609_v44  ;;  %v7617_v4 = vld [vmem:[#allocation9 + $0x398] sm:$0xff]  ;;  %v15404_v7 = vpack.c.bf16 %v7610_v59, %v7606_v20  ;;  %v7618_v44 = vld [vmem:[#allocation9 + $0x3a0] sm:$0xff] }
 0xd58   :  { %v7621_v2 = vld [vmem:[#allocation9 + $0x3b8] sm:$0xff] }
 0xd59   :  { %12665 = vrcp.f32 %v7314_v8  ;;  %v15412_v14 = vpack.c.bf16 %v7621_v2, %v7617_v4  ;;  %v7629_v20 = vld [vmem:[#allocation9 + $0x3f8] sm:$0xff]  ;;  %v7624_v4 = vld [vmem:[#allocation9 + $0x3d0] sm:$0xff] }
 0xd5a   :  { %v12662_v62 = vpop.eup %12661  ;;  %11552 = vmatpush1.bf16.msra.mxu0 %v15377_v33  ;;  %11584 = vmatpush1.bf16.msra.mxu1 %v15379_v22  ;;  %v7608_v33 = vld [vmem:[#allocation9 + $0x350] sm:$0xff]  ;;  %v7615_v22 = vld [vmem:[#allocation9 + $0x388] sm:$0xff] }
 0xd5b   :  { %v12664_v51 = vpop.eup %12663  ;;  %v7318_v36 = vmul.f32 %v12662_v62, %v12660_v25  ;;  %11554 = vmatprep.subr.bf16.mxu0 %v15383_v47  ;;  %11586 = vmatprep.subr.bf16.mxu1 %v15385_v28  ;;  %v15406_v53 = vpack.c.bf16 %v7612_v13, %v7608_v33  ;;  %v7616_v25 = vld [vmem:[#allocation9 + $0x390] sm:$0xff]  ;;  %v15417_v13 = vpack.c.bf16 %v7618_v44, %v7614_v49  ;;  %v7622_v33 = vld [vmem:[#allocation9 + $0x3c0] sm:$0xff] }
 0xd5c   :  { %v7317_v1 = vmul.f32 %v12664_v51, %v15200_v42  ;;  %v15410_v42 = vpack.c.bf16 %v7619_v5, %v7615_v22  ;;  %v7620_v62 = vld [vmem:[#allocation9 + $0x3b0] sm:$0xff]  ;;  %v7623_v51 = vld [vmem:[#allocation9 + $0x3c8] sm:$0xff]  ;;  %v7626_v5 = vld [vmem:[#allocation9 + $0x3e0] sm:$0xff] }
 0xd5d   :  { %v15419_v8 = vpack.c.bf16 %v7620_v62, %v7616_v25  ;;  %v7628_v2 = vld [vmem:[#allocation9 + $0x3f0] sm:$0xff]  ;;  %v15429_v49 = vpack.c.bf16 %v7626_v5, %v7622_v33  ;;  %v16350_v33 = vld [vmem:[#allocation46_spill] sm:$0xff] }
 0xd5e   :  { %v15400_v26 = vadd.f32 %v7318_v36, %v7317_v1  ;;  %11556 = vmatpush1.bf16.msra.mxu0 %v15389_v18  ;;  %11588 = vmatpush1.bf16.msra.mxu1 %v15391_v37  ;;  %v7627_v36 = vld [vmem:[#allocation9 + $0x3e8] sm:$0xff]  ;;  %v7625_v1 = vld [vmem:[#allocation9 + $0x3d8] sm:$0xff]  ;;  %v15431_v44 = vpack.c.bf16 %v7628_v2, %v7624_v4 }
 0xd5f   :  { %11558 = vmatprep.subr.bf16.mxu0 %v15395_v10  ;;  %11590 = vmatprep.subr.bf16.mxu1 %v15397_v43  ;;  %v15423_v22 = vpack.c.bf16 %v7627_v36, %v7623_v51  ;;  %v15425_v59 = vpack.c.bf16 %v7629_v20, %v7625_v1 }
 0xd60   :  { %12667 = vtanh.f32 %v15400_v26 }
 0xd62   :  { %11560 = vmatpush1.bf16.msra.mxu0 %v15404_v7  ;;  %11592 = vmatpush1.bf16.msra.mxu1 %v15406_v53 }
 0xd63   :  { %11562 = vmatprep.subr.bf16.mxu0 %v15410_v42  ;;  %11594 = vmatprep.subr.bf16.mxu1 %v15412_v14  ;;  %v12666_v25 = vpop.eup %12665 }
 0xd66   :  { %11564 = vmatpush1.bf16.msra.mxu0 %v15417_v13  ;;  %11596 = vmatpush1.bf16.msra.mxu1 %v15419_v8 }
 0xd67   :  { %11566 = vmatprep.subr.bf16.mxu0 %v15423_v22  ;;  %11598 = vmatprep.subr.bf16.mxu1 %v15425_v59 }
 0xd6a   :  { %v12668_v62 = vpop.eup %12667  ;;  %11568 = vmatpush1.bf16.msra.mxu0 %v15429_v49  ;;  %11600 = vmatpush1.bf16.msra.mxu1 %v15431_v44 }
 0xd6b   :  { %v15437_v51 = vmul.f32 %v12668_v62, %v12666_v25  ;;  %11602 = vmatprep.subr.bf16.mxu0 %v15223_v58  ;;  %11634 = vmatprep.subr.bf16.mxu1 %v15225_v21 }
 0xd6d   :  { %16343 = vst [vmem:[#allocation20_spill] sm:$0xff] %v15437_v51  ;;  %7695 = vmatmul.mubr.f32.vlgmr.msra.gmra.mrb[54].mxu0 %v15437_v51  ;;  %7766 = vmatmul.mubr.f32.vlgmr.msra.gmra.mrb[70].mxu1 %v15437_v51 }
 0xd6e   :  { %11604 = vmatpush1.bf16.msra.mxu0 %v15227_v40  ;;  %11636 = vmatpush1.bf16.msra.mxu1 %v15230_v12 }
 0xd6f   :  { %11606 = vmatprep.subr.bf16.mxu0 %v15235_v48  ;;  %11638 = vmatprep.subr.bf16.mxu1 %v15237_v23  ;;  %v16344_v23 = vld [vmem:[#allocation41_spill] sm:$0xff] }
 0xd70   :  { %7933 = vmatprep.mubr.f32.mxu0 %v16112_v6  ;;  %8004 = vmatprep.mubr.f32.mxu1 %v16112_v6 }
 0xd72   :  { %11608 = vmatpush1.bf16.msra.mxu0 %v15239_v29  ;;  %11640 = vmatpush1.bf16.msra.mxu1 %v15242_v50 }
 0xd73   :  { %11610 = vmatprep.subr.bf16.mxu0 %v15247_v24  ;;  %11642 = vmatprep.subr.bf16.mxu1 %v15249_v52  ;;  %v16345_v52 = vld [vmem:[#allocation42_spill] sm:$0xff] }
 0xd76   :  { %11612 = vmatpush1.bf16.msra.mxu0 %v15251_v39  ;;  %11644 = vmatpush1.bf16.msra.mxu1 %v15254_v35 }
 0xd77   :  { %11614 = vmatprep.subr.bf16.mxu0 %v15259_v0  ;;  %11646 = vmatprep.subr.bf16.mxu1 %v15261_v45  ;;  %v16346_v0 = vld [vmem:[#allocation43_spill] sm:$0xff] }
 0xd7a   :  { %11616 = vmatpush1.bf16.msra.mxu0 %v15263_v60  ;;  %11648 = vmatpush1.bf16.msra.mxu1 %v15266_v41 }
 0xd7b   :  { %11618 = vmatprep.subr.bf16.mxu0 %v15271_v19  ;;  %11650 = vmatprep.subr.bf16.mxu1 %v15273_v9 }
 0xd7e   :  { %11620 = vmatpush1.bf16.msra.mxu0 %v15275_v38  ;;  %11652 = vmatpush1.bf16.msra.mxu1 %v15278_v27 }
 0xd7f   :  { %11622 = vmatprep.subr.bf16.mxu0 %v15283_v46  ;;  %11654 = vmatprep.subr.bf16.mxu1 %v15285_v55 }
 0xd82   :  { %11624 = vmatpush1.bf16.msra.mxu0 %v15287_v56  ;;  %11656 = vmatpush1.bf16.msra.mxu1 %v15290_v54 }
 0xd83   :  { %11626 = vmatprep.subr.bf16.mxu0 %v15295_v32  ;;  %11658 = vmatprep.subr.bf16.mxu1 %v15297_v57  ;;  %v16347_v32 = vld [vmem:[#allocation24_spill] sm:$0xff] }
 0xd86   :  { %11628 = vmatpush1.bf16.msra.mxu0 %v15299_v3  ;;  %11660 = vmatpush1.bf16.msra.mxu1 %v15302_v15 }
 0xd87   :  { %11630 = vmatprep.subr.bf16.mxu0 %v15307_v11  ;;  %11662 = vmatprep.subr.bf16.mxu1 %v15309_v16  ;;  %v16348_v16 = vld [vmem:[#allocation44_spill] sm:$0xff] }
 0xd8a   :  { %11632 = vmatpush1.bf16.msra.mxu0 %v15311_v17  ;;  %11664 = vmatpush1.bf16.msra.mxu1 %v15314_v34 }
 0xd8b   :  { %11666 = vmatprep.subr.bf16.mxu0 %v15319_v63  ;;  %11698 = vmatprep.subr.bf16.mxu1 %v15321_v61  ;;  %v16349_v61 = vld [vmem:[#allocation45_spill] sm:$0xff] }
 0xe20   :  { %v7457_v58 = vpop.f32.mrb[40].mxu0  ;;  %v7528_v21 = vpop.f32.mrb[56].mxu1 }
 0xe21   :  { %v12105_v40 = vadd.f32 %v7457_v58, %v14825_v30  ;;  %v7459_v12 = vpop.f32.mrb[41].mxu0  ;;  %v7530_v48 = vpop.f32.mrb[57].mxu1  ;;  %v12121_v45 = vadd.f32 %v7528_v21, %v16346_v0 }
 0xe22   :  { %v12106_v29 = vadd.f32 %v7459_v12, %v16344_v23  ;;  %v12122_v39 = vadd.f32 %v7530_v48, %v16345_v52  ;;  %v16352_v48 = vld [vmem:[#allocation27_spill] sm:$0xff] }
 0xe23   :  { %v9576_v50 = vmul.f32 -1.442695, %v12105_v40 }
 0xe24   :  { %v9577_v24 = vmul.f32 -1.442695, %v12106_v29  ;;  %v9578_v35 = vmul.f32 -1.442695, %v12122_v39  ;;  %v16353_v29 = vld [vmem:[#allocation34_spill] sm:$0xff]  ;;  %v16355_v39 = vld [vmem:[#allocation32_spill] sm:$0xff] }
 0xe25   :  { %12669 = vpow2.f32 %v9576_v50 }
 0xe26   :  { %12671 = vpow2.f32 %v9577_v24  ;;  %v16354_v24 = vld [vmem:[#allocation29_spill] sm:$0xff] }
 0xe27   :  { %12673 = vpow2.f32 %v9578_v35  ;;  %v16356_v35 = vld [vmem:[#allocation35_spill] sm:$0xff] }
 0xe28   :  { %12675 = vtanh.f32 %v12121_v45  ;;  %v16357_v45 = vld [vmem:[#allocation36_spill] sm:$0xff] }
 0xe2f   :  { %v12670_v60 = vpop.eup %12669 }
 0xe30   :  { %v12672_v41 = vpop.eup %12671  ;;  %v7540_v19 = vadd.f32 1.0, %v12670_v60  ;;  %v16358_v60 = vld [vmem:[#allocation40_spill] sm:$0xff] }
 0xe31   :  { %v7546_v9 = vadd.f32 1.0, %v12672_v41  ;;  %v12674_v38 = vpop.eup %12673  ;;  %v16359_v41 = vld [vmem:[#allocation49_spill] sm:$0xff] }
 0xe32   :  { %12677 = vrcp.f32 %v7540_v19  ;;  %v12676_v27 = vpop.eup %12675  ;;  %v7553_v54 = vadd.f32 1.0, %v12674_v38  ;;  %v16360_v19 = vld [vmem:[#allocation17_spill] sm:$0xff]  ;;  %v16362_v38 = vld [vmem:[#allocation26_spill] sm:$0xff] }
 0xe33   :  { %12679 = vrcp.f32 %v7546_v9  ;;  %v16361_v9 = vld [vmem:[#allocation21_spill] sm:$0xff] }
 0xe34   :  { %12681 = vrcp.f32 %v7553_v54  ;;  %v16364_v54 = vld [vmem:[#allocation37_spill] sm:$0xff] }
 0xe3c   :  { %v12678_v46 = vpop.eup %12677 }
 0xe3d   :  { %v12680_v55 = vpop.eup %12679  ;;  %v7557_v56 = vmul.f32 %v12678_v46, %v12676_v27  ;;  %v16363_v27 = vld [vmem:[#allocation31_spill] sm:$0xff] }
 0xe3e   :  { %v7556_v57 = vmul.f32 %v12680_v55, %v16347_v32  ;;  %v12682_v4 = vpop.eup %12681  ;;  %v16365_v32 = vld [vmem:[#allocation16_spill] sm:$0xff] }
 0xe40   :  { %v15482_v3 = vadd.f32 %v7557_v56, %v7556_v57  ;;  %v7696_v15 = vpop.f32.mrb[54].mxu0  ;;  %v7767_v11 = vpop.f32.mrb[70].mxu1 }
 0xe41   :  { %v12135_v17 = vadd.f32 %v7696_v15, %v16348_v16  ;;  %v7698_v34 = vpop.f32.mrb[55].mxu0  ;;  %v7769_v63 = vpop.f32.mrb[71].mxu1  ;;  %v12151_v62 = vadd.f32 %v7767_v11, %v14863_v31 }
 0xe42   :  { %v12136_v36 = vadd.f32 %v7698_v34, %v16349_v61  ;;  %12683 = vtanh.f32 %v15482_v3  ;;  %v12152_v5 = vadd.f32 %v7769_v63, %v16350_v33  ;;  %v8294_v63 = vld [vmem:[#allocation9 + $0x58] sm:$0xff] }
 0xe43   :  { %v9579_v1 = vmul.f32 -1.442695, %v12135_v17 }
 0xe44   :  { %v9580_v20 = vmul.f32 -1.442695, %v12136_v36  ;;  %v9581_v25 = vmul.f32 -1.442695, %v12152_v5  ;;  %v8295_v5 = vld [vmem:[#allocation9 + $0x60] sm:$0xff] }
 0xe45   :  { %12685 = vpow2.f32 %v9579_v1  ;;  %v8298_v1 = vld [vmem:[#allocation9 + $0x78] sm:$0xff] }
 0xe46   :  { %12687 = vpow2.f32 %v9580_v20  ;;  %v8291_v20 = vld [vmem:[#allocation9 + $0x40] sm:$0xff] }
 0xe47   :  { %12689 = vpow2.f32 %v9581_v25  ;;  %v8293_v25 = vld [vmem:[#allocation9 + $0x50] sm:$0xff] }
 0xe48   :  { %12691 = vtanh.f32 %v12151_v62  ;;  %v8297_v62 = vld [vmem:[#allocation9 + $0x70] sm:$0xff] }
 0xe4c   :  { %v12684_v2 = vpop.eup %12683 }
 0xe4d   :  { %v15489_v58 = vmul.f32 %v12684_v2, %v12682_v4  ;;  %v15549_v4 = vpack.c.bf16 %v8298_v1, %v8294_v63  ;;  %v15551_v2 = vpack.c.bf16 %v8295_v5, %v8291_v20  ;;  %v8324_v63 = vld [vmem:[#allocation9 + $0x148] sm:$0xff]  ;;  %v8326_v20 = vld [vmem:[#allocation9 + $0x158] sm:$0xff] }
 0xe4e   :  { %v8328_v1 = vld [vmem:[#allocation9 + $0x168] sm:$0xff] }
 0xe4f   :  { %16351 = vst [vmem:[#allocation38_spill] sm:$0xff] %v15489_v58  ;;  %v12686_v21 = vpop.eup %12685  ;;  %7934 = vmatmul.mubr.f32.vlgmr.msra.gmra.mrb[42].mxu0 %v15489_v58  ;;  %8005 = vmatmul.mubr.f32.vlgmr.msra.gmra.mrb[58].mxu1 %v15489_v58  ;;  %v15595_v5 = vpack.c.bf16 %v8328_v1, %v8324_v63  ;;  %v8343_v63 = vld [vmem:[#allocation9 + $0x1e0] sm:$0xff] }
 0xe50   :  { %v12688_v40 = vpop.eup %12687  ;;  %v7779_v12 = vadd.f32 1.0, %v12686_v21  ;;  %11668 = vmatpush1.bf16.msra.mxu0 %v16352_v48  ;;  %11700 = vmatpush1.bf16.msra.mxu1 %v16353_v29  ;;  %v15554_v21 = vpack.c.bf16 %v8297_v62, %v8293_v25  ;;  %v8302_v48 = vld [vmem:[#allocation9 + $0x98] sm:$0xff]  ;;  %v8323_v62 = vld [vmem:[#allocation9 + $0x140] sm:$0xff] }
 0xe51   :  { %v7785_v50 = vadd.f32 1.0, %v12688_v40  ;;  %11670 = vmatprep.subr.bf16.mxu0 %v16354_v24  ;;  %11702 = vmatprep.subr.bf16.mxu1 %v16355_v39  ;;  %v12690_v46 = vpop.eup %12689  ;;  %v8300_v40 = vld [vmem:[#allocation9 + $0x88] sm:$0xff]  ;;  %v8299_v24 = vld [vmem:[#allocation9 + $0x80] sm:$0xff]  ;;  %v8330_v25 = vld [vmem:[#allocation9 + $0x178] sm:$0xff] }
 0xe52   :  { %12693 = vrcp.f32 %v7779_v12  ;;  %8172 = vmatprep.mubr.f32.mxu0 %v16112_v6  ;;  %8243 = vmatprep.mubr.f32.mxu1 %v16112_v6  ;;  %v12692_v55 = vpop.eup %12691  ;;  %v7792_v11 = vadd.f32 1.0, %v12690_v46  ;;  %v8304_v12 = vld [vmem:[#allocation9 + $0xa8] sm:$0xff]  ;;  %v8303_v39 = vld [vmem:[#allocation9 + $0xa0] sm:$0xff] }
 0xe53   :  { %12695 = vrcp.f32 %v7785_v50  ;;  %v15559_v29 = vpack.c.bf16 %v8304_v12, %v8300_v40  ;;  %v8306_v50 = vld [vmem:[#allocation9 + $0xb8] sm:$0xff]  ;;  %v8327_v40 = vld [vmem:[#allocation9 + $0x160] sm:$0xff]  ;;  %v15597_v12 = vpack.c.bf16 %v8330_v25, %v8326_v20  ;;  %v8341_v25 = vld [vmem:[#allocation9 + $0x1d0] sm:$0xff] }
 0xe54   :  { %11672 = vmatpush1.bf16.msra.mxu0 %v16356_v35  ;;  %11704 = vmatpush1.bf16.msra.mxu1 %v16357_v45  ;;  %12697 = vrcp.f32 %v7792_v11  ;;  %v15561_v35 = vpack.c.bf16 %v8306_v50, %v8302_v48  ;;  %v15563_v45 = vpack.c.bf16 %v8303_v39, %v8299_v24  ;;  %v8313_v11 = vld [vmem:[#allocation9 + $0xf0] sm:$0xff]  ;;  %v15599_v48 = vpack.c.bf16 %v8327_v40, %v8323_v62 }
 0xe55   :  { %11674 = vmatprep.subr.bf16.mxu0 %v16358_v60  ;;  %11706 = vmatprep.subr.bf16.mxu1 %v16359_v41  ;;  %v8301_v60 = vld [vmem:[#allocation9 + $0x90] sm:$0xff] }
 0xe56   :  { %v8305_v41 = vld [vmem:[#allocation9 + $0xb0] sm:$0xff] }
 0xe57   :  { %v8325_v50 = vld [vmem:[#allocation9 + $0x150] sm:$0xff] }
 0xe58   :  { %11676 = vmatpush1.bf16.msra.mxu0 %v16360_v19  ;;  %11708 = vmatpush1.bf16.msra.mxu1 %v16361_v9  ;;  %v15566_v19 = vpack.c.bf16 %v8305_v41, %v8301_v60  ;;  %v8308_v9 = vld [vmem:[#allocation9 + $0xc8] sm:$0xff]  ;;  %v8329_v24 = vld [vmem:[#allocation9 + $0x170] sm:$0xff] }
 0xe59   :  { %11678 = vmatprep.subr.bf16.mxu0 %v16362_v38  ;;  %11710 = vmatprep.subr.bf16.mxu1 %v16363_v27  ;;  %v8312_v38 = vld [vmem:[#allocation9 + $0xe8] sm:$0xff]  ;;  %v8310_v27 = vld [vmem:[#allocation9 + $0xd8] sm:$0xff]  ;;  %v15602_v39 = vpack.c.bf16 %v8329_v24, %v8325_v50  ;;  %v8345_v62 = vld [vmem:[#allocation9 + $0x1f0] sm:$0xff] }
 0xe5a   :  { %v15571_v46 = vpack.c.bf16 %v8312_v38, %v8308_v9  ;;  %v8332_v60 = vld [vmem:[#allocation9 + $0x188] sm:$0xff]  ;;  %v8334_v9 = vld [vmem:[#allocation9 + $0x198] sm:$0xff]  ;;  %v15626_v40 = vpack.c.bf16 %v8345_v62, %v8341_v25 }
 0xe5b   :  { %v8336_v41 = vld [vmem:[#allocation9 + $0x1a8] sm:$0xff] }
 0xe5c   :  { %v12694_v56 = vpop.eup %12693  ;;  %11680 = vmatpush1.bf16.msra.mxu0 %v16364_v54  ;;  %11712 = vmatpush1.bf16.msra.mxu1 %v16365_v32  ;;  %v8311_v54 = vld [vmem:[#allocation9 + $0xe0] sm:$0xff]  ;;  %v15607_v38 = vpack.c.bf16 %v8336_v41, %v8332_v60  ;;  %v8523_v50 = vld [vmem:[#allocation9 + $0x208] sm:$0xff]  ;;  %v8525_v60 = vld [vmem:[#allocation9 + $0x218] sm:$0xff] }
 0xe5d   :  { %v12696_v57 = vpop.eup %12695  ;;  %v7796_v15 = vmul.f32 %v12694_v56, %v12692_v55  ;;  %11682 = vmatprep.subr.bf16.mxu0 %v15383_v47  ;;  %11714 = vmatprep.subr.bf16.mxu1 %v15385_v28  ;;  %v8288_v47 = vld [vmem:[#allocation9 + $0x28] sm:$0xff]  ;;  %v8286_v28 = vld [vmem:[#allocation9 + $0x18] sm:$0xff]  ;;  %v8307_v56 = vld [vmem:[#allocation9 + $0xc0] sm:$0xff] }
 0xe5e   :  { %v7795_v17 = vmul.f32 %v12696_v57, %v15400_v26  ;;  %v8314_v55 = vld [vmem:[#allocation9 + $0xf8] sm:$0xff]  ;;  %v15575_v57 = vpack.c.bf16 %v8311_v54, %v8307_v56  ;;  %v8335_v56 = vld [vmem:[#allocation9 + $0x1a0] sm:$0xff]  ;;  %v8527_v24 = vld [vmem:[#allocation9 + $0x228] sm:$0xff] }
 0xe5f   :  { %v15573_v32 = vpack.c.bf16 %v8314_v55, %v8310_v27  ;;  %v8338_v27 = vld [vmem:[#allocation9 + $0x1b8] sm:$0xff]  ;;  %v8331_v55 = vld [vmem:[#allocation9 + $0x180] sm:$0xff]  ;;  %v15631_v41 = vpack.c.bf16 %v8527_v24, %v8523_v50 }
 0xe60   :  { %v15512_v34 = vadd.f32 %v7796_v15, %v7795_v17  ;;  %11684 = vmatpush1.bf16.msra.mxu0 %v15389_v18  ;;  %11716 = vmatpush1.bf16.msra.mxu1 %v15391_v37  ;;  %v8284_v37 = vld [vmem:[#allocation9 + $0x8] sm:$0xff]  ;;  %v8309_v15 = vld [vmem:[#allocation9 + $0xd0] sm:$0xff]  ;;  %v15609_v54 = vpack.c.bf16 %v8338_v27, %v8334_v9  ;;  %v8529_v9 = vld [vmem:[#allocation9 + $0x238] sm:$0xff] }
 0xe61   :  { %11686 = vmatprep.subr.bf16.mxu0 %v15395_v10  ;;  %11718 = vmatprep.subr.bf16.mxu1 %v15397_v43  ;;  %v12698_v10 = vpop.eup %12697  ;;  %v15535_v18 = vpack.c.bf16 %v8288_v47, %v8284_v37  ;;  %v15578_v17 = vpack.c.bf16 %v8313_v11, %v8309_v15  ;;  %v8318_v37 = vld [vmem:[#allocation9 + $0x118] sm:$0xff]  ;;  %v15611_v15 = vpack.c.bf16 %v8335_v56, %v8331_v55  ;;  %v8333_v11 = vld [vmem:[#allocation9 + $0x190] sm:$0xff] }
 0xe62   :  { %12699 = vtanh.f32 %v15512_v34  ;;  %v15633_v27 = vpack.c.bf16 %v8529_v9, %v8525_v60 }
 0xe64   :  { %11688 = vmatpush1.bf16.msra.mxu0 %v15404_v7  ;;  %11720 = vmatpush1.bf16.msra.mxu1 %v15406_v53  ;;  %v8290_v7 = vld [vmem:[#allocation9 + $0x38] sm:$0xff]  ;;  %v8283_v53 = vld [vmem:[#allocation9] sm:$0xff] }
 0xe65   :  { %11690 = vmatprep.subr.bf16.mxu0 %v15410_v42  ;;  %11722 = vmatprep.subr.bf16.mxu1 %v15412_v14  ;;  %v8287_v42 = vld [vmem:[#allocation9 + $0x20] sm:$0xff]  ;;  %v15537_v14 = vpack.c.bf16 %v8290_v7, %v8286_v28  ;;  %v8322_v28 = vld [vmem:[#allocation9 + $0x138] sm:$0xff] }
 0xe66   :  { %v8315_v7 = vld [vmem:[#allocation9 + $0x100] sm:$0xff] }
 0xe68   :  { %11692 = vmatpush1.bf16.msra.mxu0 %v15417_v13  ;;  %11724 = vmatpush1.bf16.msra.mxu1 %v15419_v8  ;;  %v15539_v13 = vpack.c.bf16 %v8287_v42, %v8283_v53  ;;  %v8285_v8 = vld [vmem:[#allocation9 + $0x10] sm:$0xff]  ;;  %v8319_v53 = vld [vmem:[#allocation9 + $0x120] sm:$0xff]  ;;  %v15585_v42 = vpack.c.bf16 %v8322_v28, %v8318_v37  ;;  %v8340_v37 = vld [vmem:[#allocation9 + $0x1c8] sm:$0xff] }
 0xe69   :  { %11694 = vmatprep.subr.bf16.mxu0 %v15423_v22  ;;  %11726 = vmatprep.subr.bf16.mxu1 %v15425_v59  ;;  %v8289_v22 = vld [vmem:[#allocation9 + $0x30] sm:$0xff]  ;;  %v8344_v28 = vld [vmem:[#allocation9 + $0x1e8] sm:$0xff] }
 0xe6a   :  { %v15542_v59 = vpack.c.bf16 %v8289_v22, %v8285_v8  ;;  %v15587_v8 = vpack.c.bf16 %v8319_v53, %v8315_v7  ;;  %v8317_v22 = vld [vmem:[#allocation9 + $0x110] sm:$0xff]  ;;  %v8342_v7 = vld [vmem:[#allocation9 + $0x1d8] sm:$0xff]  ;;  %v15619_v53 = vpack.c.bf16 %v8344_v28, %v8340_v37 }
 0xe6c   :  { %v12700_v26 = vpop.eup %12699  ;;  %11696 = vmatpush1.bf16.msra.mxu0 %v15429_v49  ;;  %11728 = vmatpush1.bf16.msra.mxu1 %v15431_v44  ;;  %v8292_v49 = vld [vmem:[#allocation9 + $0x48] sm:$0xff] }
 0xe6d   :  { %v15529_v43 = vmul.f32 %v12700_v26, %v12698_v10  ;;  %11730 = vmatprep.subr.bf16.mxu0 %v15535_v18  ;;  %11762 = vmatprep.subr.bf16.mxu1 %v15537_v14  ;;  %v8296_v44 = vld [vmem:[#allocation9 + $0x68] sm:$0xff] }
 0xe6e   :  { %v15547_v36 = vpack.c.bf16 %v8296_v44, %v8292_v49  ;;  %v8316_v10 = vld [vmem:[#allocation9 + $0x108] sm:$0xff]  ;;  %v8321_v49 = vld [vmem:[#allocation9 + $0x130] sm:$0xff] }
 0xe6f   :  { %16366 = vst [vmem:[#allocation18_spill] sm:$0xff] %v15529_v43  ;;  %8173 = vmatmul.mubr.f32.vlgmr.msra.gmra.mrb[52].mxu0 %v15529_v43  ;;  %8244 = vmatmul.mubr.f32.vlgmr.msra.gmra.mrb[68].mxu1 %v15529_v43  ;;  %v8320_v26 = vld [vmem:[#allocation9 + $0x128] sm:$0xff]  ;;  %v15590_v44 = vpack.c.bf16 %v8321_v49, %v8317_v22  ;;  %v8346_v22 = vld [vmem:[#allocation9 + $0x1f8] sm:$0xff]  ;;  %v8339_v49 = vld [vmem:[#allocation9 + $0x1c0] sm:$0xff] }
 0xe70   :  { %8411 = vmatprep.mubr.f32.mxu0 %v16112_v6  ;;  %8482 = vmatprep.mubr.f32.mxu1 %v16112_v6  ;;  %v15583_v47 = vpack.c.bf16 %v8320_v26, %v8316_v10  ;;  %v8337_v10 = vld [vmem:[#allocation9 + $0x1b0] sm:$0xff]  ;;  %v15621_v1 = vpack.c.bf16 %v8346_v22, %v8342_v7  ;;  %v15623_v20 = vpack.c.bf16 %v8343_v63, %v8339_v49 }
 0xe71   :  { %11732 = vmatpush1.bf16.msra.mxu0 %v15539_v13  ;;  %11764 = vmatpush1.bf16.msra.mxu1 %v15542_v59  ;;  %v15614_v26 = vpack.c.bf16 %v8337_v10, %v8333_v11 }
 0xe72   :  { %11734 = vmatprep.subr.bf16.mxu0 %v15547_v36  ;;  %11766 = vmatprep.subr.bf16.mxu1 %v15549_v4 }
 0xe75   :  { %11736 = vmatpush1.bf16.msra.mxu0 %v15551_v2  ;;  %11768 = vmatpush1.bf16.msra.mxu1 %v15554_v21 }
 0xe76   :  { %11738 = vmatprep.subr.bf16.mxu0 %v15559_v29  ;;  %11770 = vmatprep.subr.bf16.mxu1 %v15561_v35 }
 0xe79   :  { %11740 = vmatpush1.bf16.msra.mxu0 %v15563_v45  ;;  %11772 = vmatpush1.bf16.msra.mxu1 %v15566_v19 }
 0xe7a   :  { %11742 = vmatprep.subr.bf16.mxu0 %v15571_v46  ;;  %11774 = vmatprep.subr.bf16.mxu1 %v15573_v32 }
 0xe7d   :  { %11744 = vmatpush1.bf16.msra.mxu0 %v15575_v57  ;;  %11776 = vmatpush1.bf16.msra.mxu1 %v15578_v17 }
 0xe7e   :  { %11746 = vmatprep.subr.bf16.mxu0 %v15583_v47  ;;  %11778 = vmatprep.subr.bf16.mxu1 %v15585_v42 }
 0xe81   :  { %11748 = vmatpush1.bf16.msra.mxu0 %v15587_v8  ;;  %11780 = vmatpush1.bf16.msra.mxu1 %v15590_v44 }
 0xe82   :  { %11750 = vmatprep.subr.bf16.mxu0 %v15595_v5  ;;  %11782 = vmatprep.subr.bf16.mxu1 %v15597_v12 }
 0xe85   :  { %11752 = vmatpush1.bf16.msra.mxu0 %v15599_v48  ;;  %11784 = vmatpush1.bf16.msra.mxu1 %v15602_v39 }
 0xe86   :  { %11754 = vmatprep.subr.bf16.mxu0 %v15607_v38  ;;  %11786 = vmatprep.subr.bf16.mxu1 %v15609_v54 }
 0xe89   :  { %11756 = vmatpush1.bf16.msra.mxu0 %v15611_v15  ;;  %11788 = vmatpush1.bf16.msra.mxu1 %v15614_v26 }
 0xe8a   :  { %11758 = vmatprep.subr.bf16.mxu0 %v15619_v53  ;;  %11790 = vmatprep.subr.bf16.mxu1 %v15621_v1 }
 0xe8d   :  { %11760 = vmatpush1.bf16.msra.mxu0 %v15623_v20  ;;  %11792 = vmatpush1.bf16.msra.mxu1 %v15626_v40 }
 0xe8e   :  { %11794 = vmatprep.subr.bf16.mxu0 %v15631_v41  ;;  %11826 = vmatprep.subr.bf16.mxu1 %v15633_v27 }
 0xf22   :  { %v7935_v55 = vpop.f32.mrb[42].mxu0  ;;  %v8006_v56 = vpop.f32.mrb[58].mxu1 }
 0xf23   :  { %v12107_v11 = vadd.f32 %v7935_v55, %v14825_v30  ;;  %v7937_v10 = vpop.f32.mrb[43].mxu0  ;;  %v8008_v37 = vpop.f32.mrb[59].mxu1  ;;  %v12123_v25 = vadd.f32 %v8006_v56, %v16346_v0  ;;  %v8539_v0 = vld [vmem:[#allocation9 + $0x288] sm:$0xff] }
 0xf24   :  { %v12108_v28 = vadd.f32 %v7937_v10, %v16344_v23  ;;  %v12124_v49 = vadd.f32 %v8008_v37, %v16345_v52  ;;  %v8543_v52 = vld [vmem:[#allocation9 + $0x2a8] sm:$0xff]  ;;  %v8541_v23 = vld [vmem:[#allocation9 + $0x298] sm:$0xff] }
 0xf25   :  { %v9582_v7 = vmul.f32 -1.442695, %v12107_v11 }
 0xf26   :  { %v9583_v22 = vmul.f32 -1.442695, %v12108_v28  ;;  %v9584_v63 = vmul.f32 -1.442695, %v12124_v49 }
 0xf27   :  { %12701 = vpow2.f32 %v9582_v7 }
 0xf28   :  { %12703 = vpow2.f32 %v9583_v22 }
 0xf29   :  { %12705 = vpow2.f32 %v9584_v63 }
 0xf2a   :  { %12707 = vtanh.f32 %v12123_v25 }
 0xf31   :  { %v12702_v62 = vpop.eup %12701 }
 0xf32   :  { %v12704_v50 = vpop.eup %12703  ;;  %v8018_v24 = vadd.f32 1.0, %v12702_v62 }
 0xf33   :  { %v8024_v60 = vadd.f32 1.0, %v12704_v50  ;;  %v12706_v9 = vpop.eup %12705 }
 0xf34   :  { %12709 = vrcp.f32 %v8018_v24  ;;  %v12708_v55 = vpop.eup %12707  ;;  %v8031_v7 = vadd.f32 1.0, %v12706_v9 }
 0xf35   :  { %12711 = vrcp.f32 %v8024_v60 }
 0xf36   :  { %12713 = vrcp.f32 %v8031_v7  ;;  %v8535_v7 = vld [vmem:[#allocation9 + $0x268] sm:$0xff] }
 0xf3e   :  { %v12710_v10 = vpop.eup %12709 }
 0xf3f   :  { %v12712_v11 = vpop.eup %12711  ;;  %v8035_v28 = vmul.f32 %v12710_v10, %v12708_v55  ;;  %v8526_v55 = vld [vmem:[#allocation9 + $0x220] sm:$0xff]  ;;  %v8524_v10 = vld [vmem:[#allocation9 + $0x210] sm:$0xff] }
 0xf40   :  { %v8034_v22 = vmul.f32 %v12712_v11, %v15482_v3  ;;  %v8522_v3 = vld [vmem:[#allocation9 + $0x200] sm:$0xff]  ;;  %v8528_v11 = vld [vmem:[#allocation9 + $0x230] sm:$0xff]  ;;  %v12714_v58 = vpop.eup %12713 }
 0xf42   :  { %v15642_v37 = vadd.f32 %v8035_v28, %v8034_v22  ;;  %v8174_v49 = vpop.f32.mrb[52].mxu0  ;;  %v8245_v56 = vpop.f32.mrb[68].mxu1  ;;  %v8531_v28 = vld [vmem:[#allocation9 + $0x248] sm:$0xff]  ;;  %v8533_v22 = vld [vmem:[#allocation9 + $0x258] sm:$0xff] }
 0xf43   :  { %v12133_v62 = vadd.f32 %v8174_v49, %v16348_v16  ;;  %v8176_v63 = vpop.f32.mrb[53].mxu0  ;;  %v8247_v25 = vpop.f32.mrb[69].mxu1  ;;  %v8537_v49 = vld [vmem:[#allocation9 + $0x278] sm:$0xff]  ;;  %v8532_v16 = vld [vmem:[#allocation9 + $0x250] sm:$0xff] }
 0xf44   :  { %16367 = vst [vmem:[#allocation19_spill] sm:$0xff] %v15642_v37  ;;  %v12134_v50 = vadd.f32 %v8176_v63, %v16349_v61  ;;  %12715 = vtanh.f32 %v15642_v37  ;;  %v12150_v9 = vadd.f32 %v8247_v25, %v16350_v33  ;;  %v15648_v63 = vpack.c.bf16 %v8526_v55, %v8522_v3  ;;  %v8536_v37 = vld [vmem:[#allocation9 + $0x270] sm:$0xff] }
 0xf45   :  { %v9585_v24 = vmul.f32 -1.442695, %v12133_v62  ;;  %v15650_v61 = vpack.c.bf16 %v8528_v11, %v8524_v10  ;;  %v8530_v62 = vld [vmem:[#allocation9 + $0x240] sm:$0xff]  ;;  %v15657_v33 = vpack.c.bf16 %v8537_v49, %v8533_v22  ;;  %v8544_v49 = vld [vmem:[#allocation9 + $0x2b0] sm:$0xff] }
 0xf46   :  { %v9586_v60 = vmul.f32 -1.442695, %v12134_v50  ;;  %v9587_v43 = vmul.f32 -1.442695, %v12150_v9  ;;  %16368 = vst [vmem:[#allocation28_spill] sm:$0xff] %v15648_v63  ;;  %v8534_v50 = vld [vmem:[#allocation9 + $0x260] sm:$0xff] }
 0xf47   :  { %12717 = vpow2.f32 %v9585_v24  ;;  %16369 = vst [vmem:[#allocation39_spill] sm:$0xff] %v15650_v61  ;;  %v12149_v24 = vadd.f32 %v8245_v56, %v14863_v31  ;;  %16372 = vst [vmem:[#allocation24_spill] sm:$0xff] %v15657_v33  ;;  %v8545_v9 = vld [vmem:[#allocation9 + $0x2b8] sm:$0xff]  ;;  %v8538_v56 = vld [vmem:[#allocation9 + $0x280] sm:$0xff] }
 0xf48   :  { %12719 = vpow2.f32 %v9586_v60  ;;  %v15655_v60 = vpack.c.bf16 %v8535_v7, %v8531_v28  ;;  %v8542_v11 = vld [vmem:[#allocation9 + $0x2a0] sm:$0xff]  ;;  %v15669_v7 = vpack.c.bf16 %v8543_v52, %v8539_v0  ;;  %v15671_v22 = vpack.c.bf16 %v8545_v9, %v8541_v23 }
 0xf49   :  { %12721 = vpow2.f32 %v9587_v43  ;;  %v8540_v43 = vld [vmem:[#allocation9 + $0x290] sm:$0xff]  ;;  %v15677_v52 = vpack.c.bf16 %v8542_v11, %v8538_v56  ;;  %v8546_v0 = vld [vmem:[#allocation9 + $0x2c0] sm:$0xff] }
 0xf4a   :  { %16371 = vst [vmem:[#allocation33_spill] sm:$0xff] %v15655_v60  ;;  %12723 = vtanh.f32 %v12149_v24  ;;  %16375 = vst [vmem:[#allocation29_spill] sm:$0xff] %v15669_v7  ;;  %v15679_v23 = vpack.c.bf16 %v8544_v49, %v8540_v43  ;;  %v8554_v43 = vld [vmem:[#allocation9 + $0x300] sm:$0xff] }
 0xf4b   :  { %16376 = vst [vmem:[#allocation32_spill] sm:$0xff] %v15671_v22  ;;  %16377 = vst [vmem:[#allocation35_spill] sm:$0xff] %v15677_v52  ;;  %v8558_v49 = vld [vmem:[#allocation9 + $0x320] sm:$0xff] }
 0xf4c   :  { %16378 = vst [vmem:[#allocation36_spill] sm:$0xff] %v15679_v23 }
 0xf4e   :  { %v12716_v51 = vpop.eup %12715 }
 0xf4f   :  { %v15653_v25 = vmul.f32 %v12716_v51, %v12714_v58  ;;  %v15663_v51 = vpack.c.bf16 %v8534_v50, %v8530_v62  ;;  %v15665_v58 = vpack.c.bf16 %v8536_v37, %v8532_v16  ;;  %v8551_v62 = vld [vmem:[#allocation9 + $0x2e8] sm:$0xff]  ;;  %v8549_v50 = vld [vmem:[#allocation9 + $0x2d8] sm:$0xff]  ;;  %v8550_v37 = vld [vmem:[#allocation9 + $0x2e0] sm:$0xff] }
 0xf50   :  { %v8553_v16 = vld [vmem:[#allocation9 + $0x2f8] sm:$0xff]  ;;  %v15689_v56 = vpack.c.bf16 %v8550_v37, %v8546_v0 }
 0xf51   :  { %16370 = vst [vmem:[#allocation50_spill] sm:$0xff] %v15653_v25  ;;  %v12718_v3 = vpop.eup %12717  ;;  %8412 = vmatmul.mubr.f32.vlgmr.msra.gmra.mrb[44].mxu0 %v15653_v25  ;;  %8483 = vmatmul.mubr.f32.vlgmr.msra.gmra.mrb[60].mxu1 %v15653_v25  ;;  %16373 = vst [vmem:[#allocation27_spill] sm:$0xff] %v15663_v51  ;;  %v15685_v9 = vpack.c.bf16 %v8553_v16, %v8549_v50  ;;  %v8559_v25 = vld [vmem:[#allocation9 + $0x328] sm:$0xff]  ;;  %v8556_v50 = vld [vmem:[#allocation9 + $0x310] sm:$0xff] }
 0xf52   :  { %v12720_v55 = vpop.eup %12719  ;;  %v8257_v10 = vadd.f32 1.0, %v12718_v3  ;;  %11796 = vmatpush1.bf16.msra.mxu0 %v15648_v63  ;;  %11828 = vmatpush1.bf16.msra.mxu1 %v15650_v61  ;;  %16374 = vst [vmem:[#allocation34_spill] sm:$0xff] %v15665_v58  ;;  %v8547_v3 = vld [vmem:[#allocation9 + $0x2c8] sm:$0xff]  ;;  %16381 = vst [vmem:[#allocation17_spill] sm:$0xff] %v15689_v56  ;;  %v8560_v16 = vld [vmem:[#allocation9 + $0x330] sm:$0xff] }
 0xf53   :  { %v8263_v28 = vadd.f32 1.0, %v12720_v55  ;;  %11798 = vmatprep.subr.bf16.mxu0 %v15655_v60  ;;  %11830 = vmatprep.subr.bf16.mxu1 %v15657_v33  ;;  %v15683_v24 = vpack.c.bf16 %v8551_v62, %v8547_v3  ;;  %16380 = vst [vmem:[#allocation49_spill] sm:$0xff] %v15685_v9  ;;  %v8548_v55 = vld [vmem:[#allocation9 + $0x2d0] sm:$0xff]  ;;  %v8569_v0 = vld [vmem:[#allocation9 + $0x378] sm:$0xff] }
 0xf54   :  { %12725 = vrcp.f32 %v8257_v10  ;;  %8650 = vmatprep.mubr.f32.mxu0 %v16112_v6  ;;  %8721 = vmatprep.mubr.f32.mxu1 %v16112_v6  ;;  %v8552_v10 = vld [vmem:[#allocation9 + $0x2f0] sm:$0xff] }
 0xf55   :  { %12727 = vrcp.f32 %v8263_v28  ;;  %16379 = vst [vmem:[#allocation40_spill] sm:$0xff] %v15683_v24  ;;  %v8555_v28 = vld [vmem:[#allocation9 + $0x308] sm:$0xff]  ;;  %v15691_v11 = vpack.c.bf16 %v8552_v10, %v8548_v55  ;;  %v15701_v10 = vpack.c.bf16 %v8558_v49, %v8554_v43  ;;  %v8568_v61 = vld [vmem:[#allocation9 + $0x370] sm:$0xff] }
 0xf56   :  { %11800 = vmatpush1.bf16.msra.mxu0 %v15663_v51  ;;  %11832 = vmatpush1.bf16.msra.mxu1 %v15665_v58  ;;  %v8557_v51 = vld [vmem:[#allocation9 + $0x318] sm:$0xff]  ;;  %v15695_v3 = vpack.c.bf16 %v8559_v25, %v8555_v28  ;;  %v8562_v25 = vld [vmem:[#allocation9 + $0x340] sm:$0xff]  ;;  %v8575_v49 = vld [vmem:[#allocation9 + $0x3a8] sm:$0xff] }
 0xf57   :  { %11802 = vmatprep.subr.bf16.mxu0 %v15669_v7  ;;  %11834 = vmatprep.subr.bf16.mxu1 %v15671_v22  ;;  %v8561_v58 = vld [vmem:[#allocation9 + $0x338] sm:$0xff]  ;;  %16382 = vst [vmem:[#allocation21_spill] sm:$0xff] %v15691_v11  ;;  %v8563_v22 = vld [vmem:[#allocation9 + $0x348] sm:$0xff] }
 0xf58   :  { %v15697_v62 = vpack.c.bf16 %v8561_v58, %v8557_v51  ;;  %v8567_v7 = vld [vmem:[#allocation9 + $0x368] sm:$0xff]  ;;  %v8566_v51 = vld [vmem:[#allocation9 + $0x360] sm:$0xff] }
 0xf59   :  { %v15707_v33 = vpack.c.bf16 %v8567_v7, %v8563_v22  ;;  %v8570_v22 = vld [vmem:[#allocation9 + $0x380] sm:$0xff] }
 0xf5a   :  { %11804 = vmatpush1.bf16.msra.mxu0 %v15677_v52  ;;  %11836 = vmatpush1.bf16.msra.mxu1 %v15679_v23  ;;  %v12722_v52 = vpop.eup %12721  ;;  %v8565_v23 = vld [vmem:[#allocation9 + $0x358] sm:$0xff] }
 0xf5b   :  { %11806 = vmatprep.subr.bf16.mxu0 %v15683_v24  ;;  %11838 = vmatprep.subr.bf16.mxu1 %v15685_v9  ;;  %v12724_v37 = vpop.eup %12723  ;;  %v15703_v9 = vpack.c.bf16 %v8560_v16, %v8556_v50  ;;  %v8270_v24 = vadd.f32 1.0, %v12722_v52  ;;  %v15709_v60 = vpack.c.bf16 %v8569_v0, %v8565_v23  ;;  %v8573_v50 = vld [vmem:[#allocation9 + $0x398] sm:$0xff]  ;;  %v15716_v52 = vpack.c.bf16 %v8566_v51, %v8562_v25  ;;  %v8574_v23 = vld [vmem:[#allocation9 + $0x3a0] sm:$0xff] }
 0xf5c   :  { %v8577_v16 = vld [vmem:[#allocation9 + $0x3b8] sm:$0xff] }
 0xf5d   :  { %12729 = vrcp.f32 %v8270_v24  ;;  %v15724_v0 = vpack.c.bf16 %v8577_v16, %v8573_v50  ;;  %v8585_v25 = vld [vmem:[#allocation9 + $0x3f8] sm:$0xff]  ;;  %v8580_v50 = vld [vmem:[#allocation9 + $0x3d0] sm:$0xff] }
 0xf5e   :  { %v12726_v55 = vpop.eup %12725  ;;  %11808 = vmatpush1.bf16.msra.mxu0 %v15689_v56  ;;  %11840 = vmatpush1.bf16.msra.mxu1 %v15691_v11  ;;  %v8564_v56 = vld [vmem:[#allocation9 + $0x350] sm:$0xff]  ;;  %v8571_v11 = vld [vmem:[#allocation9 + $0x388] sm:$0xff] }
 0xf5f   :  { %v12728_v58 = vpop.eup %12727  ;;  %v8274_v28 = vmul.f32 %v12726_v55, %v12724_v37  ;;  %11810 = vmatprep.subr.bf16.mxu0 %v15695_v3  ;;  %11842 = vmatprep.subr.bf16.mxu1 %v15697_v62  ;;  %v15718_v7 = vpack.c.bf16 %v8568_v61, %v8564_v56  ;;  %v8572_v37 = vld [vmem:[#allocation9 + $0x390] sm:$0xff]  ;;  %v15729_v61 = vpack.c.bf16 %v8574_v23, %v8570_v22  ;;  %v8578_v56 = vld [vmem:[#allocation9 + $0x3c0] sm:$0xff] }
 0xf60   :  { %v8273_v43 = vmul.f32 %v12728_v58, %v15512_v34  ;;  %v15722_v34 = vpack.c.bf16 %v8575_v49, %v8571_v11  ;;  %v8576_v55 = vld [vmem:[#allocation9 + $0x3b0] sm:$0xff]  ;;  %v8579_v58 = vld [vmem:[#allocation9 + $0x3c8] sm:$0xff]  ;;  %v8582_v49 = vld [vmem:[#allocation9 + $0x3e0] sm:$0xff] }
 0xf61   :  { %v15731_v24 = vpack.c.bf16 %v8576_v55, %v8572_v37  ;;  %v8584_v16 = vld [vmem:[#allocation9 + $0x3f0] sm:$0xff]  ;;  %v15741_v22 = vpack.c.bf16 %v8582_v49, %v8578_v56  ;;  %v16389_v56 = vld [vmem:[#allocation46_spill] sm:$0xff] }
 0xf62   :  { %v15712_v63 = vadd.f32 %v8274_v28, %v8273_v43  ;;  %11812 = vmatpush1.bf16.msra.mxu0 %v15701_v10  ;;  %11844 = vmatpush1.bf16.msra.mxu1 %v15703_v9  ;;  %v8583_v28 = vld [vmem:[#allocation9 + $0x3e8] sm:$0xff]  ;;  %v8581_v43 = vld [vmem:[#allocation9 + $0x3d8] sm:$0xff]  ;;  %v15743_v23 = vpack.c.bf16 %v8584_v16, %v8580_v50 }
 0xf63   :  { %11814 = vmatprep.subr.bf16.mxu0 %v15707_v33  ;;  %11846 = vmatprep.subr.bf16.mxu1 %v15709_v60  ;;  %v15735_v11 = vpack.c.bf16 %v8583_v28, %v8579_v58  ;;  %v15737_v51 = vpack.c.bf16 %v8585_v25, %v8581_v43 }
 0xf64   :  { %12731 = vtanh.f32 %v15712_v63 }
 0xf66   :  { %11816 = vmatpush1.bf16.msra.mxu0 %v15716_v52  ;;  %11848 = vmatpush1.bf16.msra.mxu1 %v15718_v7 }
 0xf67   :  { %11818 = vmatprep.subr.bf16.mxu0 %v15722_v34  ;;  %11850 = vmatprep.subr.bf16.mxu1 %v15724_v0  ;;  %v12730_v37 = vpop.eup %12729 }
 0xf6a   :  { %11820 = vmatpush1.bf16.msra.mxu0 %v15729_v61  ;;  %11852 = vmatpush1.bf16.msra.mxu1 %v15731_v24 }
 0xf6b   :  { %11822 = vmatprep.subr.bf16.mxu0 %v15735_v11  ;;  %11854 = vmatprep.subr.bf16.mxu1 %v15737_v51 }
 0xf6e   :  { %v12732_v55 = vpop.eup %12731  ;;  %11824 = vmatpush1.bf16.msra.mxu0 %v15741_v22  ;;  %11856 = vmatpush1.bf16.msra.mxu1 %v15743_v23 }
 0xf6f   :  { %v15749_v58 = vmul.f32 %v12732_v55, %v12730_v37  ;;  %11858 = vmatprep.subr.bf16.mxu0 %v15535_v18  ;;  %11890 = vmatprep.subr.bf16.mxu1 %v15537_v14 }
 0xf71   :  { %8651 = vmatmul.mubr.f32.vlgmr.msra.gmra.mrb[50].mxu0 %v15749_v58  ;;  %8722 = vmatmul.mubr.f32.vlgmr.msra.gmra.mrb[66].mxu1 %v15749_v58 }
 0xf72   :  { %11860 = vmatpush1.bf16.msra.mxu0 %v15539_v13  ;;  %11892 = vmatpush1.bf16.msra.mxu1 %v15542_v59 }
 0xf73   :  { %11862 = vmatprep.subr.bf16.mxu0 %v15547_v36  ;;  %11894 = vmatprep.subr.bf16.mxu1 %v15549_v4  ;;  %v16383_v4 = vld [vmem:[#allocation41_spill] sm:$0xff] }
 0xf74   :  { %8889 = vmatprep.mubr.f32.mxu0 %v16112_v6  ;;  %8960 = vmatprep.mubr.f32.mxu1 %v16112_v6 }
 0xf76   :  { %11864 = vmatpush1.bf16.msra.mxu0 %v15551_v2  ;;  %11896 = vmatpush1.bf16.msra.mxu1 %v15554_v21 }
 0xf77   :  { %11866 = vmatprep.subr.bf16.mxu0 %v15559_v29  ;;  %11898 = vmatprep.subr.bf16.mxu1 %v15561_v35  ;;  %v16384_v35 = vld [vmem:[#allocation42_spill] sm:$0xff] }
 0xf7a   :  { %11868 = vmatpush1.bf16.msra.mxu0 %v15563_v45  ;;  %11900 = vmatpush1.bf16.msra.mxu1 %v15566_v19 }
 0xf7b   :  { %11870 = vmatprep.subr.bf16.mxu0 %v15571_v46  ;;  %11902 = vmatprep.subr.bf16.mxu1 %v15573_v32  ;;  %v16385_v46 = vld [vmem:[#allocation43_spill] sm:$0xff] }
 0xf7e   :  { %11872 = vmatpush1.bf16.msra.mxu0 %v15575_v57  ;;  %11904 = vmatpush1.bf16.msra.mxu1 %v15578_v17 }
 0xf7f   :  { %11874 = vmatprep.subr.bf16.mxu0 %v15583_v47  ;;  %11906 = vmatprep.subr.bf16.mxu1 %v15585_v42 }
 0xf82   :  { %11876 = vmatpush1.bf16.msra.mxu0 %v15587_v8  ;;  %11908 = vmatpush1.bf16.msra.mxu1 %v15590_v44 }
 0xf83   :  { %11878 = vmatprep.subr.bf16.mxu0 %v15595_v5  ;;  %11910 = vmatprep.subr.bf16.mxu1 %v15597_v12 }
 0xf86   :  { %11880 = vmatpush1.bf16.msra.mxu0 %v15599_v48  ;;  %11912 = vmatpush1.bf16.msra.mxu1 %v15602_v39 }
 0xf87   :  { %11882 = vmatprep.subr.bf16.mxu0 %v15607_v38  ;;  %11914 = vmatprep.subr.bf16.mxu1 %v15609_v54  ;;  %v16386_v38 = vld [vmem:[#allocation19_spill] sm:$0xff] }
 0xf8a   :  { %11884 = vmatpush1.bf16.msra.mxu0 %v15611_v15  ;;  %11916 = vmatpush1.bf16.msra.mxu1 %v15614_v26 }
 0xf8b   :  { %11886 = vmatprep.subr.bf16.mxu0 %v15619_v53  ;;  %11918 = vmatprep.subr.bf16.mxu1 %v15621_v1  ;;  %v16387_v1 = vld [vmem:[#allocation44_spill] sm:$0xff] }
 0xf8e   :  { %11888 = vmatpush1.bf16.msra.mxu0 %v15623_v20  ;;  %11920 = vmatpush1.bf16.msra.mxu1 %v15626_v40 }
 0xf8f   :  { %11922 = vmatprep.subr.bf16.mxu0 %v15631_v41  ;;  %11954 = vmatprep.subr.bf16.mxu1 %v15633_v27  ;;  %v16388_v27 = vld [vmem:[#allocation45_spill] sm:$0xff] }
0x1024   :  { %v8413_v18 = vpop.f32.mrb[44].mxu0  ;;  %v8484_v14 = vpop.f32.mrb[60].mxu1 }
0x1025   :  { %v12109_v13 = vadd.f32 %v8413_v18, %v14825_v30  ;;  %v8415_v59 = vpop.f32.mrb[45].mxu0  ;;  %v8486_v36 = vpop.f32.mrb[61].mxu1  ;;  %v12125_v32 = vadd.f32 %v8484_v14, %v16385_v46 }
0x1026   :  { %v12110_v2 = vadd.f32 %v8415_v59, %v16383_v4  ;;  %v12126_v45 = vadd.f32 %v8486_v36, %v16384_v35  ;;  %v16390_v36 = vld [vmem:[#allocation28_spill] sm:$0xff] }
0x1027   :  { %v9588_v21 = vmul.f32 -1.442695, %v12109_v13 }
0x1028   :  { %v9589_v29 = vmul.f32 -1.442695, %v12110_v2  ;;  %v9590_v19 = vmul.f32 -1.442695, %v12126_v45  ;;  %v16391_v2 = vld [vmem:[#allocation39_spill] sm:$0xff]  ;;  %v16393_v45 = vld [vmem:[#allocation24_spill] sm:$0xff] }
0x1029   :  { %12733 = vpow2.f32 %v9588_v21 }
0x102a   :  { %12735 = vpow2.f32 %v9589_v29  ;;  %v16392_v29 = vld [vmem:[#allocation33_spill] sm:$0xff] }
0x102b   :  { %12737 = vpow2.f32 %v9590_v19  ;;  %v16394_v19 = vld [vmem:[#allocation27_spill] sm:$0xff] }
0x102c   :  { %12739 = vtanh.f32 %v12125_v32  ;;  %v16395_v32 = vld [vmem:[#allocation34_spill] sm:$0xff] }
0x1033   :  { %v12734_v57 = vpop.eup %12733 }
0x1034   :  { %v12736_v17 = vpop.eup %12735  ;;  %v8496_v47 = vadd.f32 1.0, %v12734_v57  ;;  %v16396_v57 = vld [vmem:[#allocation29_spill] sm:$0xff] }
0x1035   :  { %v8502_v42 = vadd.f32 1.0, %v12736_v17  ;;  %v12738_v8 = vpop.eup %12737  ;;  %v16397_v17 = vld [vmem:[#allocation32_spill] sm:$0xff] }
0x1036   :  { %12741 = vrcp.f32 %v8496_v47  ;;  %v12740_v44 = vpop.eup %12739  ;;  %v8509_v39 = vadd.f32 1.0, %v12738_v8  ;;  %v16398_v47 = vld [vmem:[#allocation35_spill] sm:$0xff]  ;;  %v16400_v8 = vld [vmem:[#allocation40_spill] sm:$0xff] }
0x1037   :  { %12743 = vrcp.f32 %v8502_v42  ;;  %v16399_v42 = vld [vmem:[#allocation36_spill] sm:$0xff] }
0x1038   :  { %12745 = vrcp.f32 %v8509_v39  ;;  %v16403_v39 = vld [vmem:[#allocation21_spill] sm:$0xff] }
0x1040   :  { %v12742_v5 = vpop.eup %12741 }
0x1041   :  { %v12744_v12 = vpop.eup %12743  ;;  %v8513_v48 = vmul.f32 %v12742_v5, %v12740_v44  ;;  %v16401_v44 = vld [vmem:[#allocation49_spill] sm:$0xff] }
0x1042   :  { %v8512_v54 = vmul.f32 %v12744_v12, %v16386_v38  ;;  %v12746_v50 = vpop.eup %12745 }
0x1044   :  { %v15794_v15 = vadd.f32 %v8513_v48, %v8512_v54  ;;  %v8652_v26 = vpop.f32.mrb[50].mxu0  ;;  %v8723_v53 = vpop.f32.mrb[66].mxu1  ;;  %v16402_v48 = vld [vmem:[#allocation17_spill] sm:$0xff] }
0x1045   :  { %v12131_v20 = vadd.f32 %v8652_v26, %v16387_v1  ;;  %v8654_v40 = vpop.f32.mrb[51].mxu0  ;;  %v8725_v41 = vpop.f32.mrb[67].mxu1  ;;  %v12147_v55 = vadd.f32 %v8723_v53, %v14863_v31 }
0x1046   :  { %v12132_v28 = vadd.f32 %v8654_v40, %v16388_v27  ;;  %12747 = vtanh.f32 %v15794_v15  ;;  %v12148_v49 = vadd.f32 %v8725_v41, %v16389_v56  ;;  %v9255_v41 = vld [vmem:[#allocation11 + $0x20] sm:$0xff] }
0x1047   :  { %v9591_v43 = vmul.f32 -1.442695, %v12131_v20 }
0x1048   :  { %v9592_v25 = vmul.f32 -1.442695, %v12132_v28  ;;  %v9593_v37 = vmul.f32 -1.442695, %v12148_v49  ;;  %v9256_v28 = vld [vmem:[#allocation11 + $0x28] sm:$0xff]  ;;  %v9274_v49 = vld [vmem:[#allocation11 + $0xb8] sm:$0xff] }
0x1049   :  { %12749 = vpow2.f32 %v9591_v43  ;;  %v11995_v43 = vpack.c.bf16 %v9256_v28, %v9255_v41 }
0x104a   :  { %12751 = vpow2.f32 %v9592_v25  ;;  %v9273_v25 = vld [vmem:[#allocation11 + $0xb0] sm:$0xff] }
0x104b   :  { %12753 = vpow2.f32 %v9593_v37  ;;  %v9258_v37 = vld [vmem:[#allocation11 + $0x38] sm:$0xff] }
0x104c   :  { %12755 = vtanh.f32 %v12147_v55 }
0x1050   :  { %v12748_v16 = vpop.eup %12747 }
0x1051   :  { %v15801_v18 = vmul.f32 %v12748_v16, %v12746_v50  ;;  %v11997_v50 = vpack.c.bf16 %v9274_v49, %v9273_v25  ;;  %v9257_v16 = vld [vmem:[#allocation11 + $0x30] sm:$0xff] }
0x1052   :  { %v11999_v55 = vpack.c.bf16 %v9258_v37, %v9257_v16 }
0x1053   :  { %v12750_v14 = vpop.eup %12749  ;;  %8890 = vmatmul.mubr.f32.vlgmr.msra.gmra.mrb[46].mxu0 %v15801_v18  ;;  %8961 = vmatmul.mubr.f32.vlgmr.msra.gmra.mrb[62].mxu1 %v15801_v18 }
0x1054   :  { %v12752_v13 = vpop.eup %12751  ;;  %v8735_v59 = vadd.f32 1.0, %v12750_v14  ;;  %11924 = vmatpush1.bf16.msra.mxu0 %v16390_v36  ;;  %11956 = vmatpush1.bf16.msra.mxu1 %v16391_v2  ;;  %v9275_v14 = vld [vmem:[#allocation11 + $0xc0] sm:$0xff]  ;;  %v9260_v2 = vld [vmem:[#allocation11 + $0x48] sm:$0xff] }
0x1055   :  { %v8741_v21 = vadd.f32 1.0, %v12752_v13  ;;  %11926 = vmatprep.subr.bf16.mxu0 %v16392_v29  ;;  %11958 = vmatprep.subr.bf16.mxu1 %v16393_v45  ;;  %v12754_v5 = vpop.eup %12753  ;;  %v9276_v13 = vld [vmem:[#allocation11 + $0xc8] sm:$0xff]  ;;  %v9278_v29 = vld [vmem:[#allocation11 + $0xd8] sm:$0xff] }
0x1056   :  { %12757 = vrcp.f32 %v8735_v59  ;;  %9128 = vmatprep.mubr.f32.mxu0 %v16112_v6  ;;  %9199 = vmatprep.mubr.f32.mxu1 %v16112_v6  ;;  %v12756_v12 = vpop.eup %12755  ;;  %v8748_v26 = vadd.f32 1.0, %v12754_v5  ;;  %v9259_v59 = vld [vmem:[#allocation11 + $0x40] sm:$0xff]  ;;  %v12001_v36 = vpack.c.bf16 %v9276_v13, %v9275_v14  ;;  %v9264_v5 = vld [vmem:[#allocation11 + $0x68] sm:$0xff] }
0x1057   :  { %12759 = vrcp.f32 %v8741_v21  ;;  %v9277_v21 = vld [vmem:[#allocation11 + $0xd0] sm:$0xff]  ;;  %v12003_v45 = vpack.c.bf16 %v9260_v2, %v9259_v59 }
0x1058   :  { %11928 = vmatpush1.bf16.msra.mxu0 %v16394_v19  ;;  %11960 = vmatpush1.bf16.msra.mxu1 %v16395_v32  ;;  %12761 = vrcp.f32 %v8748_v26  ;;  %v12005_v19 = vpack.c.bf16 %v9278_v29, %v9277_v21  ;;  %v9261_v32 = vld [vmem:[#allocation11 + $0x50] sm:$0xff] }
0x1059   :  { %11930 = vmatprep.subr.bf16.mxu0 %v16396_v57  ;;  %11962 = vmatprep.subr.bf16.mxu1 %v16397_v17  ;;  %v9262_v57 = vld [vmem:[#allocation11 + $0x58] sm:$0xff]  ;;  %v9279_v17 = vld [vmem:[#allocation11 + $0xe0] sm:$0xff] }
0x105c   :  { %11932 = vmatpush1.bf16.msra.mxu0 %v16398_v47  ;;  %11964 = vmatpush1.bf16.msra.mxu1 %v16399_v42  ;;  %v9280_v47 = vld [vmem:[#allocation11 + $0xe8] sm:$0xff]  ;;  %v12007_v42 = vpack.c.bf16 %v9262_v57, %v9261_v32 }
0x105d   :  { %11934 = vmatprep.subr.bf16.mxu0 %v16400_v8  ;;  %11966 = vmatprep.subr.bf16.mxu1 %v16401_v44  ;;  %v12009_v8 = vpack.c.bf16 %v9280_v47, %v9279_v17  ;;  %v9263_v44 = vld [vmem:[#allocation11 + $0x60] sm:$0xff] }
0x1060   :  { %v12758_v6 = vpop.eup %12757  ;;  %11936 = vmatpush1.bf16.msra.mxu0 %v16402_v48  ;;  %11968 = vmatpush1.bf16.msra.mxu1 %v16403_v39  ;;  %v12011_v48 = vpack.c.bf16 %v9264_v5, %v9263_v44  ;;  %v16404_v5 = vld [vmem:[#allocation47_spill] sm:$0xff] }
0x1061   :  { %v12760_v38 = vpop.eup %12759  ;;  %v8752_v54 = vmul.f32 %v12758_v6, %v12756_v12  ;;  %11938 = vmatprep.subr.bf16.mxu0 %v15695_v3  ;;  %11970 = vmatprep.subr.bf16.mxu1 %v15697_v62  ;;  %v9268_v3 = vld [vmem:[#allocation11 + $0x88] sm:$0xff]  ;;  %v9281_v12 = vld [vmem:[#allocation11 + $0xf0] sm:$0xff]  ;;  %v9282_v6 = vld [vmem:[#allocation11 + $0xf8] sm:$0xff] }
0x1062   :  { %v8751_v53 = vmul.f32 %v12760_v38, %v15712_v63  ;;  %v12013_v39 = vpack.c.bf16 %v9282_v6, %v9281_v12  ;;  %v9265_v38 = vld [vmem:[#allocation11 + $0x70] sm:$0xff]  ;;  %v16406_v6 = vld [vmem:[#allocation22_spill] sm:$0xff] }
0x1063   :  { %v16405_v12 = vld [vmem:[#allocation25_spill] sm:$0xff] }
0x1064   :  { %v15824_v20 = vadd.f32 %v8752_v54, %v8751_v53  ;;  %11940 = vmatpush1.bf16.msra.mxu0 %v15701_v10  ;;  %11972 = vmatpush1.bf16.msra.mxu1 %v15703_v9  ;;  %v9267_v9 = vld [vmem:[#allocation11 + $0x80] sm:$0xff]  ;;  %v9266_v54 = vld [vmem:[#allocation11 + $0x78] sm:$0xff] }
0x1065   :  { %11942 = vmatprep.subr.bf16.mxu0 %v15707_v33  ;;  %11974 = vmatprep.subr.bf16.mxu1 %v15709_v60  ;;  %v12762_v33 = vpop.eup %12761  ;;  %v11985_v62 = vpack.c.bf16 %v9268_v3, %v9267_v9  ;;  %v9251_v10 = vld [vmem:[#allocation11] sm:$0xff]  ;;  %v12015_v26 = vpack.c.bf16 %v9266_v54, %v9265_v38  ;;  %v16410_v38 = vld [vmem:[#allocation38_spill] sm:$0xff] }
0x1066   :  { %12763 = vtanh.f32 %v15824_v20  ;;  %v16411_v54 = vld [vmem:[#allocation23_spill] sm:$0xff] }
0x1068   :  { %11944 = vmatpush1.bf16.msra.mxu0 %v15716_v52  ;;  %11976 = vmatpush1.bf16.msra.mxu1 %v15718_v7  ;;  %v9252_v52 = vld [vmem:[#allocation11 + $0x8] sm:$0xff] }
0x1069   :  { %11946 = vmatprep.subr.bf16.mxu0 %v15722_v34  ;;  %11978 = vmatprep.subr.bf16.mxu1 %v15724_v0  ;;  %v11987_v7 = vpack.c.bf16 %v9252_v52, %v9251_v10  ;;  %v9269_v34 = vld [vmem:[#allocation11 + $0x90] sm:$0xff]  ;;  %v9270_v0 = vld [vmem:[#allocation11 + $0x98] sm:$0xff] }
0x106c   :  { %11948 = vmatpush1.bf16.msra.mxu0 %v15729_v61  ;;  %11980 = vmatpush1.bf16.msra.mxu1 %v15731_v24  ;;  %v11989_v61 = vpack.c.bf16 %v9270_v0, %v9269_v34  ;;  %v9253_v24 = vld [vmem:[#allocation11 + $0x10] sm:$0xff] }
0x106d   :  { %11950 = vmatprep.subr.bf16.mxu0 %v15735_v11  ;;  %11982 = vmatprep.subr.bf16.mxu1 %v15737_v51  ;;  %v9254_v11 = vld [vmem:[#allocation11 + $0x18] sm:$0xff] }
0x106e   :  { %v11991_v51 = vpack.c.bf16 %v9254_v11, %v9253_v24 }
0x1070   :  { %v12764_v63 = vpop.eup %12763  ;;  %11952 = vmatpush1.bf16.msra.mxu0 %v15741_v22  ;;  %11984 = vmatpush1.bf16.msra.mxu1 %v15743_v23  ;;  %v9271_v22 = vld [vmem:[#allocation11 + $0xa0] sm:$0xff]  ;;  %v9272_v23 = vld [vmem:[#allocation11 + $0xa8] sm:$0xff] }
0x1071   :  { %v15841_v60 = vmul.f32 %v12764_v63, %v12762_v33  ;;  %11986 = vmatprep.subr.bf16.mxu0 %v11985_v62  ;;  %v11993_v40 = vpack.c.bf16 %v9272_v23, %v9271_v22 }
0x1073   :  { %9129 = vmatmul.mubr.f32.vlgmr.msra.gmra.mrb[48].mxu0 %v15841_v60  ;;  %9200 = vmatmul.mubr.f32.vlgmr.msra.gmra.mrb[64].mxu1 %v15841_v60 }
0x1074   :  { %11988 = vmatpush3.bf16.msra.mxu0 %v11987_v7 }
0x1075   :  { %11990 = vmatprep.subr.bf16.mxu0 %v11989_v61 }
0x1078   :  { %11992 = vmatpush3.bf16.msra.mxu0 %v11991_v51 }
0x1079   :  { %11994 = vmatprep.subr.bf16.mxu0 %v11993_v40 }
0x107c   :  { %11996 = vmatpush3.bf16.msra.mxu0 %v11995_v43 }
0x107d   :  { %11998 = vmatprep.subr.bf16.mxu0 %v11997_v50 }
0x1080   :  { %12000 = vmatpush3.bf16.msra.mxu0 %v11999_v55 }
0x1081   :  { %12002 = vmatprep.subr.bf16.mxu0 %v12001_v36 }
0x1084   :  { %12004 = vmatpush3.bf16.msra.mxu0 %v12003_v45 }
0x1085   :  { %12006 = vmatprep.subr.bf16.mxu0 %v12005_v19 }
0x1088   :  { %12008 = vmatpush3.bf16.msra.mxu0 %v12007_v42 }
0x1089   :  { %12010 = vmatprep.subr.bf16.mxu0 %v12009_v8 }
0x108c   :  { %12012 = vmatpush3.bf16.msra.mxu0 %v12011_v48  ;;  %v16407_v48 = vld [vmem:[#allocation18_spill] sm:$0xff] }
0x108d   :  { %12014 = vmatprep.subr.bf16.mxu0 %v12013_v39  ;;  %v16409_v39 = vld [vmem:[#allocation20_spill] sm:$0xff] }
0x1090   :  { %12016 = vmatpush3.bf16.msra.mxu0 %v12015_v26  ;;  %v16412_v26 = vld [vmem:[#allocation50_spill] sm:$0xff] }
0x1126   :  { %v8891_v53 = vpop.f32.mrb[46].mxu0  ;;  %v8962_v33 = vpop.f32.mrb[62].mxu1 }
0x1127   :  { %v12111_v63 = vadd.f32 %v8891_v53, %v14825_v30  ;;  %v8893_v9 = vpop.f32.mrb[47].mxu0  ;;  %v8964_v3 = vpop.f32.mrb[63].mxu1  ;;  %v12127_v0 = vadd.f32 %v8962_v33, %v16385_v46  ;;  %v16413_v53 = vld [vmem:[#allocation15_spill] sm:$0xff] }
0x1128   :  { %v12112_v62 = vadd.f32 %v8893_v9, %v16383_v4  ;;  %v12128_v7 = vadd.f32 %v8964_v3, %v16384_v35  ;;  %v9600_v33 = vld [vmem:[%s15904_s8] ss:$0 sm:$0xff] }
0x1129   :  { %v9594_v10 = vmul.f32 -1.442695, %v12111_v63 }
0x112a   :  { %v9595_v52 = vmul.f32 -1.442695, %v12112_v62  ;;  %v9596_v34 = vmul.f32 -1.442695, %v12128_v7 }
0x112b   :  { %12765 = vpow2.f32 %v9594_v10 }
0x112c   :  { %12767 = vpow2.f32 %v9595_v52 }
0x112d   :  { %12769 = vpow2.f32 %v9596_v34 }
0x112e   :  { %12771 = vtanh.f32 %v12127_v0 }
0x1135   :  { %v12766_v61 = vpop.eup %12765 }
0x1136   :  { %v12768_v24 = vpop.eup %12767  ;;  %v8974_v11 = vadd.f32 1.0, %v12766_v61 }
0x1137   :  { %v8980_v51 = vadd.f32 1.0, %v12768_v24  ;;  %v12770_v30 = vpop.eup %12769 }
0x1138   :  { %12773 = vrcp.f32 %v8974_v11  ;;  %v12772_v22 = vpop.eup %12771  ;;  %v8987_v41 = vadd.f32 1.0, %v12770_v30 }
0x1139   :  { %12775 = vrcp.f32 %v8980_v51 }
0x113a   :  { %12777 = vrcp.f32 %v8987_v41 }
0x1142   :  { %v12774_v4 = vpop.eup %12773 }
0x1143   :  { %v12776_v23 = vpop.eup %12775  ;;  %v8991_v40 = vmul.f32 %v12774_v4, %v12772_v22 }
0x1144   :  { %v8990_v28 = vmul.f32 %v12776_v23, %v15794_v15  ;;  %v12778_v13 = vpop.eup %12777 }
0x1146   :  { %v9130_v35 = vpop.f32.mrb[48].mxu0  ;;  %v9201_v43 = vpop.f32.mrb[64].mxu1  ;;  %v8992_v25 = vadd.f32 %v8991_v40, %v8990_v28 }
0x1147   :  { %v12129_v46 = vadd.f32 %v9130_v35, %v16387_v1  ;;  %v9132_v49 = vpop.f32.mrb[49].mxu0  ;;  %v9203_v50 = vpop.f32.mrb[65].mxu1  ;;  %v12145_v36 = vadd.f32 %v9201_v43, %v14863_v31 }
0x1148   :  { %v12130_v16 = vadd.f32 %v9132_v49, %v16388_v27  ;;  %12779 = vtanh.f32 %v8992_v25  ;;  %v12146_v14 = vadd.f32 %v9203_v50, %v16389_v56 }
0x1149   :  { %v9597_v37 = vmul.f32 -1.442695, %v12129_v46 }
0x114a   :  { %v9598_v55 = vmul.f32 -1.442695, %v12130_v16  ;;  %v9599_v15 = vmul.f32 -1.442695, %v12146_v14 }
0x114b   :  { %12781 = vpow2.f32 %v9597_v37 }
0x114c   :  { %12783 = vpow2.f32 %v9598_v55 }
0x114d   :  { %12785 = vpow2.f32 %v9599_v15 }
0x114e   :  { %12787 = vtanh.f32 %v12145_v36 }
0x1152   :  { %v12780_v59 = vpop.eup %12779 }
0x1153   :  { %v8994_v2 = vmul.f32 %v12780_v59, %v12778_v13 }
0x1155   :  { %v12782_v21 = vpop.eup %12781 }
0x1156   :  { %v12784_v29 = vpop.eup %12783  ;;  %v9213_v1 = vadd.f32 1.0, %v12782_v21 }
0x1157   :  { %v9219_v45 = vadd.f32 1.0, %v12784_v29  ;;  %v12786_v27 = vpop.eup %12785 }
0x1158   :  { %12789 = vrcp.f32 %v9213_v1  ;;  %v12788_v19 = vpop.eup %12787  ;;  %v9226_v56 = vadd.f32 1.0, %v12786_v27 }
0x1159   :  { %12791 = vrcp.f32 %v9219_v45 }
0x115a   :  { %12793 = vrcp.f32 %v9226_v56 }
0x1162   :  { %v12790_v32 = vpop.eup %12789 }
0x1163   :  { %v12792_v57 = vpop.eup %12791  ;;  %v9230_v17 = vmul.f32 %v12790_v32, %v12788_v19 }
0x1164   :  { %v9229_v47 = vmul.f32 %v12792_v57, %v15824_v20  ;;  %v12794_v31 = vpop.eup %12793  ;;  %v16408_v20 = vld [vmem:[#allocation30_spill] sm:$0xff] }
0x1166   :  { %v9231_v42 = vadd.f32 %v9230_v17, %v9229_v47 }
0x1168   :  { %12795 = vtanh.f32 %v9231_v42 }
0x1172   :  { %v12796_v8 = vpop.eup %12795 }
0x1173   :  { %v9233_v44 = vmul.f32 %v12796_v8, %v12794_v31 }
0x1175   :  { %9354 = vmatprep.mubr.f32.mxu0 %v9233_v44 }
0x1176   :  { %9355 = vmatmul.mubr.f32.vlgmr.msra.gmra.mrb[64].mxu0 %v16404_v5 }
0x1177   :  { %9359 = vmatprep.mubr.f32.mxu0 %v15841_v60  ;;  %v16414_v60 = vld [vmem:[#allocation48_spill] sm:$0xff] }
0x117a   :  { %9360 = vmatmul.mubr.f32.gmra.mrb[66].mxu0 %v16405_v12 }
0x117b   :  { %9364 = vmatprep.mubr.f32.mxu0 %v15749_v58 }
0x117e   :  { %9365 = vmatmul.mubr.f32.gmra.mrb[68].mxu0 %v16406_v6 }
0x117f   :  { %9369 = vmatprep.mubr.f32.mxu0 %v16407_v48 }
0x1182   :  { %9370 = vmatmul.mubr.f32.gmra.mrb[70].mxu0 %v16408_v20 }
0x1183   :  { %9374 = vmatprep.mubr.f32.mxu0 %v16409_v39 }
0x1186   :  { %9375 = vmatmul.mubr.f32.gmra.mrb[72].mxu0 %v16410_v38 }
0x1187   :  { %9379 = vmatprep.mubr.f32.mxu0 %v16411_v54 }
0x118a   :  { %9380 = vmatmul.mubr.f32.gmra.mrb[74].mxu0 %v16412_v26 }
0x118b   :  { %9384 = vmatprep.mubr.f32.mxu0 %v16413_v53 }
0x118e   :  { %9385 = vmatmul.mubr.f32.gmra.mrb[76].mxu0 %v15801_v18 }
0x118f   :  { %9389 = vmatprep.mubr.f32.mxu0 %v16414_v60 }
0x1192   :  { %9390 = vmatmul.mubr.f32.gmra.mrb[78].mxu0 %v8994_v2 }
0x1249   :  { %v9641_v58 = vpop.f32.mrb[64].mxu0 }
0x124a   :  { %v9642_v63 = vpop.f32.mrb[65].mxu0 }
0x124b   :  { %v9643_v9 = vadd.f32 %v9642_v63, %v9641_v58 }
0x124d   :  { %v9357_v3 = vadd.f32 %v9643_v9, %v9600_v33  ;;  %v9644_v62 = vpop.f32.mrb[66].mxu0 }
0x124e   :  { %v9645_v10 = vpop.f32.mrb[67].mxu0 }
0x124f   :  { %v9601_v52 = vmul.f32 -1.442695, %v9357_v3  ;;  %v9646_v7 = vadd.f32 %v9645_v10, %v9644_v62 }
0x1251   :  { %12797 = vpow2.f32 %v9601_v52  ;;  %v9362_v34 = vadd.f32 %v9646_v7, %v9600_v33  ;;  %v9647_v0 = vpop.f32.mrb[68].mxu0 }
0x1252   :  { %v9648_v61 = vpop.f32.mrb[69].mxu0 }
0x1253   :  { %v9602_v18 = vmul.f32 -1.442695, %v9362_v34  ;;  %v9649_v24 = vadd.f32 %v9648_v61, %v9647_v0 }
0x1255   :  { %12799 = vpow2.f32 %v9602_v18  ;;  %v9367_v11 = vadd.f32 %v9649_v24, %v9600_v33  ;;  %v9650_v51 = vpop.f32.mrb[70].mxu0 }
0x1256   :  { %v9651_v30 = vpop.f32.mrb[71].mxu0 }
0x1257   :  { %v9603_v22 = vmul.f32 -1.442695, %v9367_v11  ;;  %v9652_v4 = vadd.f32 %v9651_v30, %v9650_v51 }
0x1259   :  { %12801 = vpow2.f32 %v9603_v22  ;;  %v9372_v23 = vadd.f32 %v9652_v4, %v9600_v33  ;;  %v9653_v40 = vpop.f32.mrb[72].mxu0 }
0x125a   :  { %v9654_v41 = vpop.f32.mrb[73].mxu0 }
0x125b   :  { %v12798_v28 = vpop.eup %12797  ;;  %v9604_v35 = vmul.f32 -1.442695, %v9372_v23  ;;  %v9655_v43 = vadd.f32 %v9654_v41, %v9653_v40 }
0x125c   :  { %v9419_v25 = vadd.f32 1.0, %v12798_v28 }
0x125d   :  { %12803 = vpow2.f32 %v9604_v35  ;;  %v9377_v46 = vadd.f32 %v9655_v43, %v9600_v33  ;;  %v9656_v49 = vpop.f32.mrb[74].mxu0 }
0x125e   :  { %12805 = vrcp.f32 %v9419_v25  ;;  %v9657_v50 = vpop.f32.mrb[75].mxu0 }
0x125f   :  { %v12800_v16 = vpop.eup %12799  ;;  %v9605_v37 = vmul.f32 -1.442695, %v9377_v46  ;;  %v9658_v55 = vadd.f32 %v9657_v50, %v9656_v49 }
0x1260   :  { %v9420_v14 = vadd.f32 1.0, %v12800_v16 }
0x1261   :  { %12807 = vpow2.f32 %v9605_v37  ;;  %v9382_v13 = vadd.f32 %v9658_v55, %v9600_v33  ;;  %v9659_v59 = vpop.f32.mrb[76].mxu0 }
0x1262   :  { %12809 = vrcp.f32 %v9420_v14  ;;  %v9660_v15 = vpop.f32.mrb[77].mxu0 }
0x1263   :  { %v12802_v36 = vpop.eup %12801  ;;  %v9606_v2 = vmul.f32 -1.442695, %v9382_v13  ;;  %v9661_v21 = vadd.f32 %v9660_v15, %v9659_v59 }
0x1264   :  { %v9421_v29 = vadd.f32 1.0, %v12802_v36 }
0x1265   :  { %12811 = vpow2.f32 %v9606_v2  ;;  %v9387_v1 = vadd.f32 %v9661_v21, %v9600_v33  ;;  %v9662_v45 = vpop.f32.mrb[78].mxu0 }
0x1266   :  { %12813 = vrcp.f32 %v9421_v29  ;;  %v9663_v27 = vpop.f32.mrb[79].mxu0 }
0x1267   :  { %v12804_v19 = vpop.eup %12803  ;;  %v9607_v32 = vmul.f32 -1.442695, %v9387_v1  ;;  %v9664_v57 = vadd.f32 %v9663_v27, %v9662_v45 }
0x1268   :  { %v12806_v17 = vpop.eup %12805  ;;  %v9422_v56 = vadd.f32 1.0, %v12804_v19 }
0x1269   :  { %9443 = vst [vmem:[%s15905_s9] sm:$0xff] %v12806_v17  ;;  %12815 = vpow2.f32 %v9607_v32  ;;  %v9392_v47 = vadd.f32 %v9664_v57, %v9600_v33 }
0x126a   :  { %12817 = vrcp.f32 %v9422_v56 }
0x126b   :  { %v12808_v42 = vpop.eup %12807  ;;  %v9608_v31 = vmul.f32 -1.442695, %v9392_v47 }
0x126c   :  { %v12810_v8 = vpop.eup %12809  ;;  %v9423_v44 = vadd.f32 1.0, %v12808_v42 }
0x126d   :  { %9444 = vst [vmem:[%s15905_s9 + $0x8] sm:$0xff] %v12810_v8  ;;  %12819 = vpow2.f32 %v9608_v31 }
0x126e   :  { %12821 = vrcp.f32 %v9423_v44 }
0x126f   :  { %v12812_v5 = vpop.eup %12811 }
0x1270   :  { %v12814_v12 = vpop.eup %12813  ;;  %v9424_v6 = vadd.f32 1.0, %v12812_v5 }
0x1271   :  { %9445 = vst [vmem:[%s15905_s9 + $0x10] sm:$0xff] %v12814_v12 }
0x1272   :  { %12823 = vrcp.f32 %v9424_v6 }
0x1273   :  { %v12816_v48 = vpop.eup %12815 }
0x1274   :  { %v12818_v20 = vpop.eup %12817  ;;  %v9425_v39 = vadd.f32 1.0, %v12816_v48 }
0x1275   :  { %9446 = vst [vmem:[%s15905_s9 + $0x18] sm:$0xff] %v12818_v20 }
0x1276   :  { %12825 = vrcp.f32 %v9425_v39 }
0x1277   :  { %v12820_v38 = vpop.eup %12819 }
0x1278   :  { %v12822_v54 = vpop.eup %12821  ;;  %v9426_v26 = vadd.f32 1.0, %v12820_v38 }
0x1279   :  { %9447 = vst [vmem:[%s15905_s9 + $0x20] sm:$0xff] %v12822_v54 }
0x127a   :  { %12827 = vrcp.f32 %v9426_v26 }
0x127c   :  { %v12824_v53 = vpop.eup %12823 }
0x127d   :  { %9448 = vst [vmem:[%s15905_s9 + $0x28] sm:$0xff] %v12824_v53 }
0x1280   :  { %v12826_v60 = vpop.eup %12825 }
0x1281   :  { %9449 = vst [vmem:[%s15905_s9 + $0x30] sm:$0xff] %v12826_v60 }
0x1284   :  { %v12828_v58 = vpop.eup %12827 }
0x1285   :  { %9450 = vst [vmem:[%s15905_s9 + $0x38] sm:$0xff] %v12828_v58 }
0x1286   :  { %9455 = vsyncpa [#allocation5], 1 }
0x1287   :  { %9456 = vsyncpa [#allocation7], 1 }
0x1288   :  { %9457 = vsyncpa [#allocation10], 1 }

</bundles_post_ra>
